<compile_context>
chip_gen: v7x
topology: tpu7x:2x2x1
jax: 0.10.0
libtpu: 0.0.40
codegen_flags: <defaults>
</compile_context>

<pallas_src>
import jax
import jax.numpy as jnp
from jax.experimental import pallas as pl
from jax.experimental.pallas import tpu as pltpu

# ---------------- synthetic scaled-down configuration ----------------
VOCAB = 128
B, S = 2, 8                 # batch, sequence length
D = 128                     # BERT hidden size (stands in for 768)
N_HEADS = 4
HEAD = D // N_HEADS
FF = 512                    # BERT intermediate size
N_BERT_LAYERS = 2
H = 32                      # LSTM hidden_dim
N_LSTM_LAYERS = 2           # n_layers, bidirectional=True
EPS = 1e-12
NEG_INF = -1e9


# ---------------- shared in-kernel math helpers ----------------
def _ln(x, g, b):
    mu = jnp.mean(x, axis=-1, keepdims=True)
    xc = x - mu
    var = jnp.mean(xc * xc, axis=-1, keepdims=True)
    return xc * jax.lax.rsqrt(var + EPS) * g + b


def _gelu(y):
    # TODO(synk): reference BERT uses erf-GELU; tanh approximation used here.
    c = 0.7978845608028654  # sqrt(2/pi)
    return 0.5 * y * (1.0 + jnp.tanh(c * (y + 0.044715 * y * y * y)))


def _dot(a, b):
    """bf16-operand matmul with f32 accumulation (MXU-native on v5e/v6e/v7x)."""
    return jnp.dot(a.astype(jnp.bfloat16), b.astype(jnp.bfloat16),
                   preferred_element_type=jnp.float32)


def _dot_t(a, b):
    """a @ b.T with bf16 operands, f32 accumulation."""
    return jax.lax.dot_general(a.astype(jnp.bfloat16), b.astype(jnp.bfloat16),
                               (((1,), (1,)), ((), ())),
                               preferred_element_type=jnp.float32)


# ---------------- BERT encoder kernel ----------------
def _bert_layer_kernel(x_ref, bias_ref, embg_ref, embb_ref,
                       wqkv_ref, bqkv_ref, wo_ref, bo_ref,
                       ln1g_ref, ln1b_ref, wf1_ref, bf1_ref, wf2_ref, bf2_ref,
                       ln2g_ref, ln2b_ref, o_ref):
    """One full BERT encoder layer per grid step; activation resident in o_ref."""
    layer = pl.program_id(0)

    @pl.when(layer == 0)
    def _():
        # embedding LayerNorm folded into the first grid step
        o_ref[...] = _ln(x_ref[...], embg_ref[...], embb_ref[...])

    x = o_ref[...]                                                 # (B*S, D)
    # fused QKV projection: one (B*S, D) x (D, 3D) matmul
    qkv = _dot(x, wqkv_ref[0]) + bqkv_ref[0]                       # (B*S, 3D)
    bias = bias_ref[...]                                           # (B*S, B*S)
    scale = 1.0 / (HEAD ** 0.5)

    # attention batched over B via block-diagonal bias: one QK^T + one PV per head
    ctx_heads = []
    for h in range(N_HEADS):
        c0 = h * HEAD
        qh = qkv[:, c0:c0 + HEAD]                                  # (B*S, HEAD)
        kh = qkv[:, D + c0:D + c0 + HEAD]
        vh = qkv[:, 2 * D + c0:2 * D + c0 + HEAD]
        s = _dot_t(qh, kh) * scale + bias                          # (B*S, B*S)
        m = jnp.max(s, axis=-1, keepdims=True)
        p = jnp.exp(s - m)
        p = p / jnp.sum(p, axis=-1, keepdims=True)                 # exact divide
        ctx_heads.append(_dot(p, vh))                              # (B*S, HEAD)
    # fold heads into one (B*S, D) tile -> single K=128 output-projection push
    ctx = jnp.concatenate(ctx_heads, axis=-1)                      # (B*S, D)

    # everything below runs once on the full (B*S, D) slab (hoisted)
    ao = _dot(ctx, wo_ref[0]) + bo_ref[0]
    x1 = _ln(ao + x, ln1g_ref[0], ln1b_ref[0])
    ff = _gelu(_dot(x1, wf1_ref[0]) + bf1_ref[0])                  # (B*S, FF)
    y = _dot(ff, wf2_ref[0]) + bf2_ref[0]
    o_ref[...] = _ln(y + x1, ln2g_ref[0], ln2b_ref[0])


def bert_layers(x_emb, attn_bias, emb_g, emb_b, st):
    """All BERT layers in one pallas_call; per-layer weights block-indexed."""
    return pl.pallas_call(
        _bert_layer_kernel,
        out_shape=jax.ShapeDtypeStruct((B * S, D), jnp.float32),
        grid=(N_BERT_LAYERS,),
        in_specs=[
            pl.BlockSpec((B * S, D), lambda l: (0, 0)),            # embeddings (pre-LN)
            pl.BlockSpec((B * S, B * S), lambda l: (0, 0)),        # block-diag attn bias
            pl.BlockSpec((1, D), lambda l: (0, 0)),                # emb LN gamma
            pl.BlockSpec((1, D), lambda l: (0, 0)),                # emb LN beta
            pl.BlockSpec((1, D, 3 * D), lambda l: (l, 0, 0)),      # wqkv
            pl.BlockSpec((1, 1, 3 * D), lambda l: (l, 0, 0)),      # bqkv
            pl.BlockSpec((1, D, D), lambda l: (l, 0, 0)),          # wo
            pl.BlockSpec((1, 1, D), lambda l: (l, 0, 0)),          # bo
            pl.BlockSpec((1, 1, D), lambda l: (l, 0, 0)),          # ln1_g
            pl.BlockSpec((1, 1, D), lambda l: (l, 0, 0)),          # ln1_b
            pl.BlockSpec((1, D, FF), lambda l: (l, 0, 0)),         # wf1
            pl.BlockSpec((1, 1, FF), lambda l: (l, 0, 0)),         # bf1
            pl.BlockSpec((1, FF, D), lambda l: (l, 0, 0)),         # wf2
            pl.BlockSpec((1, 1, D), lambda l: (l, 0, 0)),          # bf2
            pl.BlockSpec((1, 1, D), lambda l: (l, 0, 0)),          # ln2_g
            pl.BlockSpec((1, 1, D), lambda l: (l, 0, 0)),          # ln2_b
        ],
        out_specs=pl.BlockSpec((B * S, D), lambda l: (0, 0)),
        compiler_params=pltpu.CompilerParams(
            dimension_semantics=("arbitrary",)),
    )(x_emb, attn_bias, emb_g, emb_b,
      st["wqkv"], st["bqkv"], st["wo"], st["bo"],
      st["ln1_g"], st["ln1_b"], st["wf1"], st["bf1"], st["wf2"], st["bf2"],
      st["ln2_g"], st["ln2_b"])


# ---------------- bidirectional LSTM + FC kernel ----------------
def _bilstm_fc_kernel(x_ref, lens_ref, wih0_ref, b0_ref, whh0f_ref, whh0b_ref,
                      wih1_ref, b1_ref, whh1f_ref, whh1b_ref,
                      fcw_ref, fcb_ref, o_ref, xp_ref, of0_ref, ob0_ref):
    """Entire packed 2-layer bidirectional LSTM + final FC in one kernel.

    x_ref: (S*B, D) time-major rows (row = t*B + b); lens_ref: (B, 1) int32
    lengths (packed-sequence semantics); biases b_ih+b_hh pre-folded into b*_ref.
    xp_ref: (S*B, 8H) scratch for the fused input projections (both directions),
    of0_ref/ob0_ref: (S*B, H) scratch for layer-0 outputs.
    """
    G = 4 * H
    lens = lens_ref[...]                                           # (B, 1) int32

    def cell(gates, h, c, m):
        # one EUP pass over the full (B, 4H) gate vreg, then static gate slices
        sg = jax.nn.sigmoid(gates)
        th = jnp.tanh(gates)
        i = sg[:, 0:H]                    # PyTorch gate order i, f, g, o
        f = sg[:, H:2 * H]
        g = th[:, 2 * H:3 * H]
        o = sg[:, 3 * H:4 * H]
        c_new = f * c + i * g
        h_new = o * jnp.tanh(c_new)
        return m * h_new + (1.0 - m) * h, m * c_new + (1.0 - m) * c

    # -------- layer 0: single slab input projection (S*B, D) x (D, 8H) --------
    xp_ref[...] = _dot(x_ref[...], wih0_ref[...]) + b0_ref[...]

    whh0f = whh0f_ref[...]
    whh0b = whh0b_ref[...]
    z = jnp.zeros((B, H), jnp.float32)

    def step0(t, carry):
        hf, cf, hb, cb = carry
        tr = S - 1 - t
        mf = (lens > t).astype(jnp.float32)                        # (B, 1)
        mb = (lens > tr).astype(jnp.float32)
        xpt = xp_ref[pl.ds(t * B, B), :]                           # (B, 8H)
        xptr = xp_ref[pl.ds(tr * B, B), :]
        gf = xpt[:, :G] + _dot(hf, whh0f)
        gb = xptr[:, G:] + _dot(hb, whh0b)
        hf, cf = cell(gf, hf, cf, mf)
        hb, cb = cell(gb, hb, cb, mb)
        of0_ref[pl.ds(t * B, B), :] = hf
        ob0_ref[pl.ds(tr * B, B), :] = hb
        return hf, cf, hb, cb

    jax.lax.fori_loop(0, S, step0, (z, z, z, z), unroll=True)

    # -------- layer 1: slab input projection from stacked layer-0 outputs -----
    xp_ref[...] = (_dot(of0_ref[...], wih1_ref[0:H, :])
                   + _dot(ob0_ref[...], wih1_ref[H:2 * H, :]) + b1_ref[...])

    whh1f = whh1f_ref[...]
    whh1b = whh1b_ref[...]

    def step1(t, carry):
        hf, cf, hb, cb = carry
        tr = S - 1 - t
        mf = (lens > t).astype(jnp.float32)
        mb = (lens > tr).astype(jnp.float32)
        xpt = xp_ref[pl.ds(t * B, B), :]
        xptr = xp_ref[pl.ds(tr * B, B), :]
        gf = xpt[:, :G] + _dot(hf, whh1f)
        gb = xptr[:, G:] + _dot(hb, whh1b)
        hf, cf = cell(gf, hf, cf, mf)
        hb, cb = cell(gb, hb, cb, mb)
        return hf, cf, hb, cb

    hf, cf, hb, cb = jax.lax.fori_loop(0, S, step1, (z, z, z, z), unroll=True)

    # -------- final FC on cat(hidden[-2], hidden[-1]): VPU mul + lane reduce ---
    fcw = fcw_ref[...]                                             # (1, 2H)
    o_ref[...] = (jnp.sum(hf * fcw[:, 0:H], axis=-1, keepdims=True)
                  + jnp.sum(hb * fcw[:, H:2 * H], axis=-1, keepdims=True)
                  + fcb_ref[...])


def bilstm_fc(enc, text_lengths, p):
    """Packed-sequence bi-LSTM stack + FC head, single pallas_call -> (B, 1)."""
    x_flat = jnp.transpose(enc, (1, 0, 2)).reshape(S * B, D)       # row = t*B + b
    lens = text_lengths.astype(jnp.int32).reshape(B, 1)

    lp = p["lstm_packed"]
    return pl.pallas_call(
        _bilstm_fc_kernel,
        out_shape=jax.ShapeDtypeStruct((B, 1), jnp.float32),
        grid=(1,),
        in_specs=[
            pl.BlockSpec((S * B, D), lambda i: (0, 0)),            # activations (time-major)
            pl.BlockSpec((B, 1), lambda i: (0, 0)),                # lengths (int32)
            pl.BlockSpec((D, 8 * H), lambda i: (0, 0)),            # wih0 (both dirs)
            pl.BlockSpec((1, 8 * H), lambda i: (0, 0)),            # b0 (folded)
            pl.BlockSpec((H, 4 * H), lambda i: (0, 0)),            # whh0 fwd
            pl.BlockSpec((H, 4 * H), lambda i: (0, 0)),            # whh0 bwd
            pl.BlockSpec((2 * H, 8 * H), lambda i: (0, 0)),        # wih1 (both dirs)
            pl.BlockSpec((1, 8 * H), lambda i: (0, 0)),            # b1 (folded)
            pl.BlockSpec((H, 4 * H), lambda i: (0, 0)),            # whh1 fwd
            pl.BlockSpec((H, 4 * H), lambda i: (0, 0)),            # whh1 bwd
            pl.BlockSpec((1, 2 * H), lambda i: (0, 0)),            # fc weight row
            pl.BlockSpec((1, 1), lambda i: (0, 0)),                # fc bias
        ],
        out_specs=pl.BlockSpec((B, 1), lambda i: (0, 0)),
        scratch_shapes=[
            pltpu.VMEM((S * B, 8 * H), jnp.float32),               # xp slab (both layers)
            pltpu.VMEM((S * B, H), jnp.float32),                   # layer-0 fwd outputs
            pltpu.VMEM((S * B, H), jnp.float32),                   # layer-0 bwd outputs
        ],
    )(x_flat, lens, lp["wih0"], lp["b0"], lp["whh0f"], lp["whh0b"],
      lp["wih1"], lp["b1"], lp["whh1f"], lp["whh1b"],
      lp["fc_w_row"], lp["fc_b"])


# ---------------- model wrappers (glue in plain JAX) ----------------
def bert_encode(tokenids, attention_masks, p):
    """Synthetic frozen BERT encoder -> encoded_layers[-1], shape (B, S, D)."""
    pos_ids = jnp.arange(S)
    x = (p["word_emb"][tokenids]
         + p["pos_emb"][pos_ids][None, :, :]
         + p["type_emb"][0][None, None, :])
    x = x.reshape(B * S, D)

    # block-diagonal additive attention bias (layer-invariant, built once)
    key_valid = attention_masks.astype(jnp.float32).reshape(1, B * S) > 0.5
    idx = jnp.arange(B * S)
    same_batch = (idx[:, None] // S) == (idx[None, :] // S)
    attn_bias = jnp.where(same_batch & key_valid, 0.0, NEG_INF).astype(jnp.float32)

    out = bert_layers(x, attn_bias,
                      p["emb_ln_g"].reshape(1, D), p["emb_ln_b"].reshape(1, D),
                      p["bert_stacked"])
    return out.reshape(B, S, D)


def bert_bilstm_forward(tokenids, text_lengths, attention_masks, params):
    enc = bert_encode(tokenids, attention_masks, params)      # encoded_layers[-1]
    # self.dropout(...) is identity at inference; FC fused into the LSTM kernel
    return bilstm_fc(enc, text_lengths, params)                # (B, 1)


# ---------------- deterministic parameter init + packing ----------------
def init_params(key):
    def normal(k, shape, scale=0.02):
        return scale * jax.random.normal(k, shape, jnp.float32)

    keys = iter(jax.random.split(key, 512))
    p = {
        "word_emb": normal(next(keys), (VOCAB, D)),
        "pos_emb": normal(next(keys), (S, D)),
        "type_emb": normal(next(keys), (2, D)),
        "emb_ln_g": jnp.ones((D,), jnp.float32),
        "emb_ln_b": jnp.zeros((D,), jnp.float32),
    }
    layers = []
    for _ in range(N_BERT_LAYERS):
        lp = {
            "wq": normal(next(keys), (D, D)), "bq": jnp.zeros((D,), jnp.float32),
            "wk": normal(next(keys), (D, D)), "bk": jnp.zeros((D,), jnp.float32),
            "wv": normal(next(keys), (D, D)), "bv": jnp.zeros((D,), jnp.float32),
            "wo": normal(next(keys), (D, D)), "bo": jnp.zeros((D,), jnp.float32),
            "ln1_g": jnp.ones((D,), jnp.float32), "ln1_b": jnp.zeros((D,), jnp.float32),
            "wf1": normal(next(keys), (D, FF)), "bf1": jnp.zeros((FF,), jnp.float32),
            "wf2": normal(next(keys), (FF, D)), "bf2": jnp.zeros((D,), jnp.float32),
            "ln2_g": jnp.ones((D,), jnp.float32), "ln2_b": jnp.zeros((D,), jnp.float32),
        }
        layers.append(lp)
    p["bert_layers"] = layers

    lstm = {}
    for l in range(N_LSTM_LAYERS):
        in_dim = D if l == 0 else 2 * H
        for d in range(2):
            lstm[(l, d)] = {
                "w_ih": normal(next(keys), (in_dim, 4 * H), 0.1),
                "b_ih": normal(next(keys), (4 * H,), 0.1),
                "w_hh": normal(next(keys), (H, 4 * H), 0.1),
                "b_hh": normal(next(keys), (4 * H,), 0.1),
            }
    p["lstm"] = lstm
    p["fc_w"] = normal(next(keys), (2 * H, 1), 0.1)
    p["fc_b"] = jnp.zeros((1,), jnp.float32)

    # ---- pack per-layer BERT weights into stacked arrays (fused QKV) ----
    p["bert_stacked"] = {
        "wqkv": jnp.stack([jnp.concatenate([lp["wq"], lp["wk"], lp["wv"]], axis=1)
                           for lp in layers]),
        "bqkv": jnp.stack([jnp.concatenate([lp["bq"], lp["bk"], lp["bv"]])[None, :]
                           for lp in layers]),
        "wo": jnp.stack([lp["wo"] for lp in layers]),
        "bo": jnp.stack([lp["bo"][None, :] for lp in layers]),
        "ln1_g": jnp.stack([lp["ln1_g"][None, :] for lp in layers]),
        "ln1_b": jnp.stack([lp["ln1_b"][None, :] for lp in layers]),
        "wf1": jnp.stack([lp["wf1"] for lp in layers]),
        "bf1": jnp.stack([lp["bf1"][None, :] for lp in layers]),
        "wf2": jnp.stack([lp["wf2"] for lp in layers]),
        "bf2": jnp.stack([lp["bf2"][None, :] for lp in layers]),
        "ln2_g": jnp.stack([lp["ln2_g"][None, :] for lp in layers]),
        "ln2_b": jnp.stack([lp["ln2_b"][None, :] for lp in layers]),
    }

    # ---- pack LSTM: concat both directions' w_ih, fold b_ih + b_hh ----
    packed = {}
    for l in range(N_LSTM_LAYERS):
        fwd, bwd = lstm[(l, 0)], lstm[(l, 1)]
        packed[f"wih{l}"] = jnp.concatenate([fwd["w_ih"], bwd["w_ih"]], axis=1)
        packed[f"b{l}"] = jnp.concatenate([fwd["b_ih"] + fwd["b_hh"],
                                           bwd["b_ih"] + bwd["b_hh"]])[None, :]
        packed[f"whh{l}f"] = fwd["w_hh"]
        packed[f"whh{l}b"] = bwd["w_hh"]
    packed["fc_w_row"] = p["fc_w"].reshape(1, 2 * H)
    packed["fc_b"] = p["fc_b"].reshape(1, 1)
    p["lstm_packed"] = packed
    return p


if __name__ == "__main__":
    root = jax.random.PRNGKey(0)
    pkey, tkey = jax.random.split(root)
    params = init_params(pkey)

    tokenids = jax.random.randint(tkey, (B, S), 0, VOCAB, dtype=jnp.int32)
    text_lengths = jnp.array([8, 5], dtype=jnp.int32)       # sorted desc (pack_padded)
    attention_masks = (jnp.arange(S)[None, :] < text_lengths[:, None]).astype(jnp.int32)

    predict = jax.jit(bert_bilstm_forward)(tokenids, text_lengths,
                                           attention_masks, params)
    predict = jax.block_until_ready(predict)

    assert predict.shape == (B, 1) and predict.dtype == jnp.float32
    assert bool(jnp.all(jnp.isfinite(predict)))
    print("KERNEL_OK")
</pallas_src>

<mosaic_0001>
module attributes {stable_mosaic.version = 11 : i64} {
  func.func @_bert_layer_kernel(%arg0: i32, %arg1: memref<16x128xf32, #tpu.memory_space<vmem>>, %arg2: memref<16x16xf32, #tpu.memory_space<vmem>>, %arg3: memref<1x128xf32, #tpu.memory_space<vmem>>, %arg4: memref<1x128xf32, #tpu.memory_space<vmem>>, %arg5: memref<1x128x384xf32, #tpu.memory_space<vmem>>, %arg6: memref<1x1x384xf32, #tpu.memory_space<vmem>>, %arg7: memref<1x128x128xf32, #tpu.memory_space<vmem>>, %arg8: memref<1x1x128xf32, #tpu.memory_space<vmem>>, %arg9: memref<1x1x128xf32, #tpu.memory_space<vmem>>, %arg10: memref<1x1x128xf32, #tpu.memory_space<vmem>>, %arg11: memref<1x128x512xf32, #tpu.memory_space<vmem>>, %arg12: memref<1x1x512xf32, #tpu.memory_space<vmem>>, %arg13: memref<1x512x128xf32, #tpu.memory_space<vmem>>, %arg14: memref<1x1x128xf32, #tpu.memory_space<vmem>>, %arg15: memref<1x1x128xf32, #tpu.memory_space<vmem>>, %arg16: memref<1x1x128xf32, #tpu.memory_space<vmem>>, %arg17: memref<16x128xf32, #tpu.memory_space<vmem>>) attributes {dimension_semantics = [#tpu.dimension_semantics<arbitrary>], iteration_bounds = array<i64: 2>, scalar_prefetch = 0 : i64, scratch_operands = 0 : i64, tpu.core_type = #tpu.core_type<tc>, window_params = [{pipeline_mode = #tpu.pipeline_mode<synchronous>, transform_indices = @transform_0, window_bounds = array<i64: 16, 128>}, {pipeline_mode = #tpu.pipeline_mode<synchronous>, transform_indices = @transform_1, window_bounds = array<i64: 16, 16>}, {pipeline_mode = #tpu.pipeline_mode<synchronous>, transform_indices = @transform_2, window_bounds = array<i64: 1, 128>}, {pipeline_mode = #tpu.pipeline_mode<synchronous>, transform_indices = @transform_3, window_bounds = array<i64: 1, 128>}, {transform_indices = @transform_4, window_bounds = array<i64: 1, 128, 384>}, {transform_indices = @transform_5, window_bounds = array<i64: 1, 1, 384>}, {transform_indices = @transform_6, window_bounds = array<i64: 1, 128, 128>}, {transform_indices = @transform_7, window_bounds = array<i64: 1, 1, 128>}, {transform_indices = @transform_8, window_bounds = array<i64: 1, 1, 128>}, {transform_indices = @transform_9, window_bounds = array<i64: 1, 1, 128>}, {transform_indices = @transform_10, window_bounds = array<i64: 1, 128, 512>}, {transform_indices = @transform_11, window_bounds = array<i64: 1, 1, 512>}, {transform_indices = @transform_12, window_bounds = array<i64: 1, 512, 128>}, {transform_indices = @transform_13, window_bounds = array<i64: 1, 1, 128>}, {transform_indices = @transform_14, window_bounds = array<i64: 1, 1, 128>}, {transform_indices = @transform_15, window_bounds = array<i64: 1, 1, 128>}, {pipeline_mode = #tpu.pipeline_mode<synchronous>, transform_indices = @transform_16, window_bounds = array<i64: 16, 128>}]} {
    %c0_i32 = arith.constant 0 : i32
    %0 = arith.cmpi eq, %arg0, %c0_i32 : i32
    %1 = arith.extui %0 : i1 to i32
    %c0_i32_0 = arith.constant 0 : i32
    %2 = arith.cmpi ne, %1, %c0_i32_0 : i32
    scf.if %2 {
      %c0_79 = arith.constant 0 : index
      %c0_80 = arith.constant 0 : index
      %190 = vector.load %arg1[%c0_79, %c0_80] : memref<16x128xf32, #tpu.memory_space<vmem>>, vector<16x128xf32>
      %c0_81 = arith.constant 0 : index
      %c0_82 = arith.constant 0 : index
      %191 = vector.load %arg3[%c0_81, %c0_82] : memref<1x128xf32, #tpu.memory_space<vmem>>, vector<1x128xf32>
      %c0_83 = arith.constant 0 : index
      %c0_84 = arith.constant 0 : index
      %192 = vector.load %arg4[%c0_83, %c0_84] : memref<1x128xf32, #tpu.memory_space<vmem>>, vector<1x128xf32>
      %cst_85 = arith.constant dense<0.000000e+00> : vector<16xf32>
      %193 = vector.multi_reduction <add>, %190, %cst_85 [1] : vector<16x128xf32> to vector<16xf32>
      %194 = vector.shape_cast %193 : vector<16xf32> to vector<16x1xf32>
      %cst_86 = arith.constant 1.280000e+02 : f32
      %195 = vector.broadcast %cst_86 : f32 to vector<16x1xf32>
      %196 = arith.divf %194, %195 : vector<16x1xf32>
      %197 = vector.broadcast %196 : vector<16x1xf32> to vector<16x128xf32>
      %198 = arith.subf %190, %197 : vector<16x128xf32>
      %199 = arith.mulf %198, %198 : vector<16x128xf32>
      %cst_87 = arith.constant dense<0.000000e+00> : vector<16xf32>
      %200 = vector.multi_reduction <add>, %199, %cst_87 [1] : vector<16x128xf32> to vector<16xf32>
      %201 = vector.shape_cast %200 : vector<16xf32> to vector<16x1xf32>
      %cst_88 = arith.constant 1.280000e+02 : f32
      %202 = vector.broadcast %cst_88 : f32 to vector<16x1xf32>
      %203 = arith.divf %201, %202 : vector<16x1xf32>
      %cst_89 = arith.constant 9.99999996E-13 : f32
      %204 = vector.broadcast %cst_89 : f32 to vector<16x1xf32>
      %205 = arith.addf %203, %204 : vector<16x1xf32>
      %206 = math.rsqrt %205 : vector<16x1xf32>
      %207 = vector.broadcast %206 : vector<16x1xf32> to vector<16x128xf32>
      %208 = arith.mulf %198, %207 : vector<16x128xf32>
      %209 = vector.broadcast %191 : vector<1x128xf32> to vector<16x128xf32>
      %210 = arith.mulf %208, %209 : vector<16x128xf32>
      %211 = vector.broadcast %192 : vector<1x128xf32> to vector<16x128xf32>
      %212 = arith.addf %210, %211 : vector<16x128xf32>
      %c0_90 = arith.constant 0 : index
      %c0_91 = arith.constant 0 : index
      %213 = vector.load %arg17[%c0_90, %c0_91] : memref<16x128xf32, #tpu.memory_space<vmem>>, vector<16x128xf32>
      tpu.vector_store %arg17[%c0_90, %c0_91], %212 {strides = array<i32>} : memref<16x128xf32, #tpu.memory_space<vmem>>, vector<16x128xf32>,
    } else {
    }
    %c0 = arith.constant 0 : index
    %c0_1 = arith.constant 0 : index
    %3 = vector.load %arg17[%c0, %c0_1] : memref<16x128xf32, #tpu.memory_space<vmem>>, vector<16x128xf32>
    %c0_2 = arith.constant 0 : index
    %c0_3 = arith.constant 0 : index
    %c0_4 = arith.constant 0 : index
    %4 = vector.load %arg5[%c0_2, %c0_3, %c0_4] : memref<1x128x384xf32, #tpu.memory_space<vmem>>, vector<1x128x384xf32>
    %5 = vector.shape_cast %4 : vector<1x128x384xf32> to vector<128x384xf32>
    %6 = arith.truncf %3 : vector<16x128xf32> to vector<16x128xbf16>
    %7 = arith.truncf %5 : vector<128x384xf32> to vector<128x384xbf16>
    %cst = arith.constant dense<0.000000e+00> : vector<16x384xf32>
    %8 = tpu.matmul %6, %7, %cst {dimension_numbers = #tpu.dot_dimension_numbers<[1], [0], [0], [1], [0, 0, 1, 1], [], []>} : vector<16x128xbf16>, vector<128x384xbf16>, vector<16x384xf32> -> vector<16x384xf32>
    %c0_5 = arith.constant 0 : index
    %c0_6 = arith.constant 0 : index
    %c0_7 = arith.constant 0 : index
    %9 = vector.load %arg6[%c0_5, %c0_6, %c0_7] : memref<1x1x384xf32, #tpu.memory_space<vmem>>, vector<1x1x384xf32>
    %10 = vector.shape_cast %9 : vector<1x1x384xf32> to vector<1x384xf32>
    %11 = vector.broadcast %10 : vector<1x384xf32> to vector<16x384xf32>
    %12 = arith.addf %8, %11 : vector<16x384xf32>
    %c0_8 = arith.constant 0 : index
    %c0_9 = arith.constant 0 : index
    %13 = vector.load %arg2[%c0_8, %c0_9] : memref<16x16xf32, #tpu.memory_space<vmem>>, vector<16x16xf32>
    %14 = vector.extract_strided_slice %12 {offsets = [0, 0], sizes = [16, 32], strides = [1, 1]} : vector<16x384xf32> to vector<16x32xf32>
    %15 = vector.extract_strided_slice %12 {offsets = [0, 128], sizes = [16, 32], strides = [1, 1]} : vector<16x384xf32> to vector<16x32xf32>
    %16 = vector.extract_strided_slice %12 {offsets = [0, 256], sizes = [16, 32], strides = [1, 1]} : vector<16x384xf32> to vector<16x32xf32>
    %17 = arith.truncf %14 : vector<16x32xf32> to vector<16x32xbf16>
    %18 = arith.truncf %15 : vector<16x32xf32> to vector<16x32xbf16>
    %cst_10 = arith.constant dense<0.000000e+00> : vector<16x16xf32>
    %19 = tpu.matmul %17, %18, %cst_10 {dimension_numbers = #tpu.dot_dimension_numbers<[1], [1], [0], [0], [0, 0, 1, 0], [], []>} : vector<16x32xbf16>, vector<16x32xbf16>, vector<16x16xf32> -> vector<16x16xf32>
    %cst_11 = arith.constant 0.176776692 : f32
    %20 = vector.broadcast %cst_11 : f32 to vector<16x16xf32>
    %21 = arith.mulf %19, %20 : vector<16x16xf32>
    %22 = arith.addf %21, %13 : vector<16x16xf32>
    %cst_12 = arith.constant dense<0xFF800000> : vector<16xf32>
    %23 = vector.multi_reduction <maximumf>, %22, %cst_12 [1] : vector<16x16xf32> to vector<16xf32>
    %24 = vector.shape_cast %23 : vector<16xf32> to vector<16x1xf32>
    %25 = vector.broadcast %24 : vector<16x1xf32> to vector<16x16xf32>
    %26 = arith.subf %22, %25 : vector<16x16xf32>
    %27 = math.exp %26 : vector<16x16xf32>
    %cst_13 = arith.constant dense<0.000000e+00> : vector<16xf32>
    %28 = vector.multi_reduction <add>, %27, %cst_13 [1] : vector<16x16xf32> to vector<16xf32>
    %29 = vector.shape_cast %28 : vector<16xf32> to vector<16x1xf32>
    %30 = vector.broadcast %29 : vector<16x1xf32> to vector<16x16xf32>
    %31 = arith.divf %27, %30 : vector<16x16xf32>
    %32 = arith.truncf %31 : vector<16x16xf32> to vector<16x16xbf16>
    %33 = arith.truncf %16 : vector<16x32xf32> to vector<16x32xbf16>
    %cst_14 = arith.constant dense<0.000000e+00> : vector<16x32xf32>
    %34 = tpu.matmul %32, %33, %cst_14 {dimension_numbers = #tpu.dot_dimension_numbers<[1], [0], [0], [1], [0, 0, 1, 1], [], []>} : vector<16x16xbf16>, vector<16x32xbf16>, vector<16x32xf32> -> vector<16x32xf32>
    %35 = vector.extract_strided_slice %12 {offsets = [0, 32], sizes = [16, 32], strides = [1, 1]} : vector<16x384xf32> to vector<16x32xf32>
    %36 = vector.extract_strided_slice %12 {offsets = [0, 160], sizes = [16, 32], strides = [1, 1]} : vector<16x384xf32> to vector<16x32xf32>
    %37 = vector.extract_strided_slice %12 {offsets = [0, 288], sizes = [16, 32], strides = [1, 1]} : vector<16x384xf32> to vector<16x32xf32>
    %38 = arith.truncf %35 : vector<16x32xf32> to vector<16x32xbf16>
    %39 = arith.truncf %36 : vector<16x32xf32> to vector<16x32xbf16>
    %cst_15 = arith.constant dense<0.000000e+00> : vector<16x16xf32>
    %40 = tpu.matmul %38, %39, %cst_15 {dimension_numbers = #tpu.dot_dimension_numbers<[1], [1], [0], [0], [0, 0, 1, 0], [], []>} : vector<16x32xbf16>, vector<16x32xbf16>, vector<16x16xf32> -> vector<16x16xf32>
    %cst_16 = arith.constant 0.176776692 : f32
    %41 = vector.broadcast %cst_16 : f32 to vector<16x16xf32>
    %42 = arith.mulf %40, %41 : vector<16x16xf32>
    %43 = arith.addf %42, %13 : vector<16x16xf32>
    %cst_17 = arith.constant dense<0xFF800000> : vector<16xf32>
    %44 = vector.multi_reduction <maximumf>, %43, %cst_17 [1] : vector<16x16xf32> to vector<16xf32>
    %45 = vector.shape_cast %44 : vector<16xf32> to vector<16x1xf32>
    %46 = vector.broadcast %45 : vector<16x1xf32> to vector<16x16xf32>
    %47 = arith.subf %43, %46 : vector<16x16xf32>
    %48 = math.exp %47 : vector<16x16xf32>
    %cst_18 = arith.constant dense<0.000000e+00> : vector<16xf32>
    %49 = vector.multi_reduction <add>, %48, %cst_18 [1] : vector<16x16xf32> to vector<16xf32>
    %50 = vector.shape_cast %49 : vector<16xf32> to vector<16x1xf32>
    %51 = vector.broadcast %50 : vector<16x1xf32> to vector<16x16xf32>
    %52 = arith.divf %48, %51 : vector<16x16xf32>
    %53 = arith.truncf %52 : vector<16x16xf32> to vector<16x16xbf16>
    %54 = arith.truncf %37 : vector<16x32xf32> to vector<16x32xbf16>
    %cst_19 = arith.constant dense<0.000000e+00> : vector<16x32xf32>
    %55 = tpu.matmul %53, %54, %cst_19 {dimension_numbers = #tpu.dot_dimension_numbers<[1], [0], [0], [1], [0, 0, 1, 1], [], []>} : vector<16x16xbf16>, vector<16x32xbf16>, vector<16x32xf32> -> vector<16x32xf32>
    %56 = vector.extract_strided_slice %12 {offsets = [0, 64], sizes = [16, 32], strides = [1, 1]} : vector<16x384xf32> to vector<16x32xf32>
    %57 = vector.extract_strided_slice %12 {offsets = [0, 192], sizes = [16, 32], strides = [1, 1]} : vector<16x384xf32> to vector<16x32xf32>
    %58 = vector.extract_strided_slice %12 {offsets = [0, 320], sizes = [16, 32], strides = [1, 1]} : vector<16x384xf32> to vector<16x32xf32>
    %59 = arith.truncf %56 : vector<16x32xf32> to vector<16x32xbf16>
    %60 = arith.truncf %57 : vector<16x32xf32> to vector<16x32xbf16>
    %cst_20 = arith.constant dense<0.000000e+00> : vector<16x16xf32>
    %61 = tpu.matmul %59, %60, %cst_20 {dimension_numbers = #tpu.dot_dimension_numbers<[1], [1], [0], [0], [0, 0, 1, 0], [], []>} : vector<16x32xbf16>, vector<16x32xbf16>, vector<16x16xf32> -> vector<16x16xf32>
    %cst_21 = arith.constant 0.176776692 : f32
    %62 = vector.broadcast %cst_21 : f32 to vector<16x16xf32>
    %63 = arith.mulf %61, %62 : vector<16x16xf32>
    %64 = arith.addf %63, %13 : vector<16x16xf32>
    %cst_22 = arith.constant dense<0xFF800000> : vector<16xf32>
    %65 = vector.multi_reduction <maximumf>, %64, %cst_22 [1] : vector<16x16xf32> to vector<16xf32>
    %66 = vector.shape_cast %65 : vector<16xf32> to vector<16x1xf32>
    %67 = vector.broadcast %66 : vector<16x1xf32> to vector<16x16xf32>
    %68 = arith.subf %64, %67 : vector<16x16xf32>
    %69 = math.exp %68 : vector<16x16xf32>
    %cst_23 = arith.constant dense<0.000000e+00> : vector<16xf32>
    %70 = vector.multi_reduction <add>, %69, %cst_23 [1] : vector<16x16xf32> to vector<16xf32>
    %71 = vector.shape_cast %70 : vector<16xf32> to vector<16x1xf32>
    %72 = vector.broadcast %71 : vector<16x1xf32> to vector<16x16xf32>
    %73 = arith.divf %69, %72 : vector<16x16xf32>
    %74 = arith.truncf %73 : vector<16x16xf32> to vector<16x16xbf16>
    %75 = arith.truncf %58 : vector<16x32xf32> to vector<16x32xbf16>
    %cst_24 = arith.constant dense<0.000000e+00> : vector<16x32xf32>
    %76 = tpu.matmul %74, %75, %cst_24 {dimension_numbers = #tpu.dot_dimension_numbers<[1], [0], [0], [1], [0, 0, 1, 1], [], []>} : vector<16x16xbf16>, vector<16x32xbf16>, vector<16x32xf32> -> vector<16x32xf32>
    %77 = vector.extract_strided_slice %12 {offsets = [0, 96], sizes = [16, 32], strides = [1, 1]} : vector<16x384xf32> to vector<16x32xf32>
    %78 = vector.extract_strided_slice %12 {offsets = [0, 224], sizes = [16, 32], strides = [1, 1]} : vector<16x384xf32> to vector<16x32xf32>
    %79 = vector.extract_strided_slice %12 {offsets = [0, 352], sizes = [16, 32], strides = [1, 1]} : vector<16x384xf32> to vector<16x32xf32>
    %80 = arith.truncf %77 : vector<16x32xf32> to vector<16x32xbf16>
    %81 = arith.truncf %78 : vector<16x32xf32> to vector<16x32xbf16>
    %cst_25 = arith.constant dense<0.000000e+00> : vector<16x16xf32>
    %82 = tpu.matmul %80, %81, %cst_25 {dimension_numbers = #tpu.dot_dimension_numbers<[1], [1], [0], [0], [0, 0, 1, 0], [], []>} : vector<16x32xbf16>, vector<16x32xbf16>, vector<16x16xf32> -> vector<16x16xf32>
    %cst_26 = arith.constant 0.176776692 : f32
    %83 = vector.broadcast %cst_26 : f32 to vector<16x16xf32>
    %84 = arith.mulf %82, %83 : vector<16x16xf32>
    %85 = arith.addf %84, %13 : vector<16x16xf32>
    %cst_27 = arith.constant dense<0xFF800000> : vector<16xf32>
    %86 = vector.multi_reduction <maximumf>, %85, %cst_27 [1] : vector<16x16xf32> to vector<16xf32>
    %87 = vector.shape_cast %86 : vector<16xf32> to vector<16x1xf32>
    %88 = vector.broadcast %87 : vector<16x1xf32> to vector<16x16xf32>
    %89 = arith.subf %85, %88 : vector<16x16xf32>
    %90 = math.exp %89 : vector<16x16xf32>
    %cst_28 = arith.constant dense<0.000000e+00> : vector<16xf32>
    %91 = vector.multi_reduction <add>, %90, %cst_28 [1] : vector<16x16xf32> to vector<16xf32>
    %92 = vector.shape_cast %91 : vector<16xf32> to vector<16x1xf32>
    %93 = vector.broadcast %92 : vector<16x1xf32> to vector<16x16xf32>
    %94 = arith.divf %90, %93 : vector<16x16xf32>
    %95 = arith.truncf %94 : vector<16x16xf32> to vector<16x16xbf16>
    %96 = arith.truncf %79 : vector<16x32xf32> to vector<16x32xbf16>
    %cst_29 = arith.constant dense<0.000000e+00> : vector<16x32xf32>
    %97 = tpu.matmul %95, %96, %cst_29 {dimension_numbers = #tpu.dot_dimension_numbers<[1], [0], [0], [1], [0, 0, 1, 1], [], []>} : vector<16x16xbf16>, vector<16x32xbf16>, vector<16x32xf32> -> vector<16x32xf32>
    %98 = tpu.concatenate %34, %55, %76, %97 in 1 : vector<16x32xf32>, vector<16x32xf32>, vector<16x32xf32>, vector<16x32xf32> -> vector<16x128xf32>
    %c0_30 = arith.constant 0 : index
    %c0_31 = arith.constant 0 : index
    %c0_32 = arith.constant 0 : index
    %99 = vector.load %arg7[%c0_30, %c0_31, %c0_32] : memref<1x128x128xf32, #tpu.memory_space<vmem>>, vector<1x128x128xf32>
    %100 = vector.shape_cast %99 : vector<1x128x128xf32> to vector<128x128xf32>
    %101 = arith.truncf %98 : vector<16x128xf32> to vector<16x128xbf16>
    %102 = arith.truncf %100 : vector<128x128xf32> to vector<128x128xbf16>
    %cst_33 = arith.constant dense<0.000000e+00> : vector<16x128xf32>
    %103 = tpu.matmul %101, %102, %cst_33 {dimension_numbers = #tpu.dot_dimension_numbers<[1], [0], [0], [1], [0, 0, 1, 1], [], []>} : vector<16x128xbf16>, vector<128x128xbf16>, vector<16x128xf32> -> vector<16x128xf32>
    %c0_34 = arith.constant 0 : index
    %c0_35 = arith.constant 0 : index
    %c0_36 = arith.constant 0 : index
    %104 = vector.load %arg8[%c0_34, %c0_35, %c0_36] : memref<1x1x128xf32, #tpu.memory_space<vmem>>, vector<1x1x128xf32>
    %105 = vector.shape_cast %104 : vector<1x1x128xf32> to vector<1x128xf32>
    %106 = vector.broadcast %105 : vector<1x128xf32> to vector<16x128xf32>
    %107 = arith.addf %103, %106 : vector<16x128xf32>
    %108 = arith.addf %107, %3 : vector<16x128xf32>
    %c0_37 = arith.constant 0 : index
    %c0_38 = arith.constant 0 : index
    %c0_39 = arith.constant 0 : index
    %109 = vector.load %arg9[%c0_37, %c0_38, %c0_39] : memref<1x1x128xf32, #tpu.memory_space<vmem>>, vector<1x1x128xf32>
    %110 = vector.shape_cast %109 : vector<1x1x128xf32> to vector<1x128xf32>
    %c0_40 = arith.constant 0 : index
    %c0_41 = arith.constant 0 : index
    %c0_42 = arith.constant 0 : index
    %111 = vector.load %arg10[%c0_40, %c0_41, %c0_42] : memref<1x1x128xf32, #tpu.memory_space<vmem>>, vector<1x1x128xf32>
    %112 = vector.shape_cast %111 : vector<1x1x128xf32> to vector<1x128xf32>
    %cst_43 = arith.constant dense<0.000000e+00> : vector<16xf32>
    %113 = vector.multi_reduction <add>, %108, %cst_43 [1] : vector<16x128xf32> to vector<16xf32>
    %114 = vector.shape_cast %113 : vector<16xf32> to vector<16x1xf32>
    %cst_44 = arith.constant 1.280000e+02 : f32
    %115 = vector.broadcast %cst_44 : f32 to vector<16x1xf32>
    %116 = arith.divf %114, %115 : vector<16x1xf32>
    %117 = vector.broadcast %116 : vector<16x1xf32> to vector<16x128xf32>
    %118 = arith.subf %108, %117 : vector<16x128xf32>
    %119 = arith.mulf %118, %118 : vector<16x128xf32>
    %cst_45 = arith.constant dense<0.000000e+00> : vector<16xf32>
    %120 = vector.multi_reduction <add>, %119, %cst_45 [1] : vector<16x128xf32> to vector<16xf32>
    %121 = vector.shape_cast %120 : vector<16xf32> to vector<16x1xf32>
    %cst_46 = arith.constant 1.280000e+02 : f32
    %122 = vector.broadcast %cst_46 : f32 to vector<16x1xf32>
    %123 = arith.divf %121, %122 : vector<16x1xf32>
    %cst_47 = arith.constant 9.99999996E-13 : f32
    %124 = vector.broadcast %cst_47 : f32 to vector<16x1xf32>
    %125 = arith.addf %123, %124 : vector<16x1xf32>
    %126 = math.rsqrt %125 : vector<16x1xf32>
    %127 = vector.broadcast %126 : vector<16x1xf32> to vector<16x128xf32>
    %128 = arith.mulf %118, %127 : vector<16x128xf32>
    %129 = vector.broadcast %110 : vector<1x128xf32> to vector<16x128xf32>
    %130 = arith.mulf %128, %129 : vector<16x128xf32>
    %131 = vector.broadcast %112 : vector<1x128xf32> to vector<16x128xf32>
    %132 = arith.addf %130, %131 : vector<16x128xf32>
    %c0_48 = arith.constant 0 : index
    %c0_49 = arith.constant 0 : index
    %c0_50 = arith.constant 0 : index
    %133 = vector.load %arg11[%c0_48, %c0_49, %c0_50] : memref<1x128x512xf32, #tpu.memory_space<vmem>>, vector<1x128x512xf32>
    %134 = vector.shape_cast %133 : vector<1x128x512xf32> to vector<128x512xf32>
    %135 = arith.truncf %132 : vector<16x128xf32> to vector<16x128xbf16>
    %136 = arith.truncf %134 : vector<128x512xf32> to vector<128x512xbf16>
    %cst_51 = arith.constant dense<0.000000e+00> : vector<16x512xf32>
    %137 = tpu.matmul %135, %136, %cst_51 {dimension_numbers = #tpu.dot_dimension_numbers<[1], [0], [0], [1], [0, 0, 1, 1], [], []>} : vector<16x128xbf16>, vector<128x512xbf16>, vector<16x512xf32> -> vector<16x512xf32>
    %c0_52 = arith.constant 0 : index
    %c0_53 = arith.constant 0 : index
    %c0_54 = arith.constant 0 : index
    %138 = vector.load %arg12[%c0_52, %c0_53, %c0_54] : memref<1x1x512xf32, #tpu.memory_space<vmem>>, vector<1x1x512xf32>
    %139 = vector.shape_cast %138 : vector<1x1x512xf32> to vector<1x512xf32>
    %140 = vector.broadcast %139 : vector<1x512xf32> to vector<16x512xf32>
    %141 = arith.addf %137, %140 : vector<16x512xf32>
    %cst_55 = arith.constant 5.000000e-01 : f32
    %142 = vector.broadcast %cst_55 : f32 to vector<16x512xf32>
    %143 = arith.mulf %142, %141 : vector<16x512xf32>
    %cst_56 = arith.constant 4.471500e-02 : f32
    %144 = vector.broadcast %cst_56 : f32 to vector<16x512xf32>
    %145 = arith.mulf %144, %141 : vector<16x512xf32>
    %146 = arith.mulf %145, %141 : vector<16x512xf32>
    %147 = arith.mulf %146, %141 : vector<16x512xf32>
    %148 = arith.addf %141, %147 : vector<16x512xf32>
    %cst_57 = arith.constant 0.797884583 : f32
    %149 = vector.broadcast %cst_57 : f32 to vector<16x512xf32>
    %150 = arith.mulf %149, %148 : vector<16x512xf32>
    %151 = math.tanh %150 : vector<16x512xf32>
    %cst_58 = arith.constant 1.000000e+00 : f32
    %152 = vector.broadcast %cst_58 : f32 to vector<16x512xf32>
    %153 = arith.addf %152, %151 : vector<16x512xf32>
    %154 = arith.mulf %143, %153 : vector<16x512xf32>
    %c0_59 = arith.constant 0 : index
    %c0_60 = arith.constant 0 : index
    %c0_61 = arith.constant 0 : index
    %155 = vector.load %arg13[%c0_59, %c0_60, %c0_61] : memref<1x512x128xf32, #tpu.memory_space<vmem>>, vector<1x512x128xf32>
    %156 = vector.shape_cast %155 : vector<1x512x128xf32> to vector<512x128xf32>
    %157 = arith.truncf %154 : vector<16x512xf32> to vector<16x512xbf16>
    %158 = arith.truncf %156 : vector<512x128xf32> to vector<512x128xbf16>
    %cst_62 = arith.constant dense<0.000000e+00> : vector<16x128xf32>
    %159 = tpu.matmul %157, %158, %cst_62 {dimension_numbers = #tpu.dot_dimension_numbers<[1], [0], [0], [1], [0, 0, 1, 1], [], []>} : vector<16x512xbf16>, vector<512x128xbf16>, vector<16x128xf32> -> vector<16x128xf32>
    %c0_63 = arith.constant 0 : index
    %c0_64 = arith.constant 0 : index
    %c0_65 = arith.constant 0 : index
    %160 = vector.load %arg14[%c0_63, %c0_64, %c0_65] : memref<1x1x128xf32, #tpu.memory_space<vmem>>, vector<1x1x128xf32>
    %161 = vector.shape_cast %160 : vector<1x1x128xf32> to vector<1x128xf32>
    %162 = vector.broadcast %161 : vector<1x128xf32> to vector<16x128xf32>
    %163 = arith.addf %159, %162 : vector<16x128xf32>
    %164 = arith.addf %163, %132 : vector<16x128xf32>
    %c0_66 = arith.constant 0 : index
    %c0_67 = arith.constant 0 : index
    %c0_68 = arith.constant 0 : index
    %165 = vector.load %arg15[%c0_66, %c0_67, %c0_68] : memref<1x1x128xf32, #tpu.memory_space<vmem>>, vector<1x1x128xf32>
    %166 = vector.shape_cast %165 : vector<1x1x128xf32> to vector<1x128xf32>
    %c0_69 = arith.constant 0 : index
    %c0_70 = arith.constant 0 : index
    %c0_71 = arith.constant 0 : index
    %167 = vector.load %arg16[%c0_69, %c0_70, %c0_71] : memref<1x1x128xf32, #tpu.memory_space<vmem>>, vector<1x1x128xf32>
    %168 = vector.shape_cast %167 : vector<1x1x128xf32> to vector<1x128xf32>
    %cst_72 = arith.constant dense<0.000000e+00> : vector<16xf32>
    %169 = vector.multi_reduction <add>, %164, %cst_72 [1] : vector<16x128xf32> to vector<16xf32>
    %170 = vector.shape_cast %169 : vector<16xf32> to vector<16x1xf32>
    %cst_73 = arith.constant 1.280000e+02 : f32
    %171 = vector.broadcast %cst_73 : f32 to vector<16x1xf32>
    %172 = arith.divf %170, %171 : vector<16x1xf32>
    %173 = vector.broadcast %172 : vector<16x1xf32> to vector<16x128xf32>
    %174 = arith.subf %164, %173 : vector<16x128xf32>
    %175 = arith.mulf %174, %174 : vector<16x128xf32>
    %cst_74 = arith.constant dense<0.000000e+00> : vector<16xf32>
    %176 = vector.multi_reduction <add>, %175, %cst_74 [1] : vector<16x128xf32> to vector<16xf32>
    %177 = vector.shape_cast %176 : vector<16xf32> to vector<16x1xf32>
    %cst_75 = arith.constant 1.280000e+02 : f32
    %178 = vector.broadcast %cst_75 : f32 to vector<16x1xf32>
    %179 = arith.divf %177, %178 : vector<16x1xf32>
    %cst_76 = arith.constant 9.99999996E-13 : f32
    %180 = vector.broadcast %cst_76 : f32 to vector<16x1xf32>
    %181 = arith.addf %179, %180 : vector<16x1xf32>
    %182 = math.rsqrt %181 : vector<16x1xf32>
    %183 = vector.broadcast %182 : vector<16x1xf32> to vector<16x128xf32>
    %184 = arith.mulf %174, %183 : vector<16x128xf32>
    %185 = vector.broadcast %166 : vector<1x128xf32> to vector<16x128xf32>
    %186 = arith.mulf %184, %185 : vector<16x128xf32>
    %187 = vector.broadcast %168 : vector<1x128xf32> to vector<16x128xf32>
    %188 = arith.addf %186, %187 : vector<16x128xf32>
    %c0_77 = arith.constant 0 : index
    %c0_78 = arith.constant 0 : index
    %189 = vector.load %arg17[%c0_77, %c0_78] : memref<16x128xf32, #tpu.memory_space<vmem>>, vector<16x128xf32>
    tpu.vector_store %arg17[%c0_77, %c0_78], %188 {strides = array<i32>} : memref<16x128xf32, #tpu.memory_space<vmem>>, vector<16x128xf32>,
    return
  }
  func.func @transform_0(%arg0: i32) -> (i32, i32) {
    %c0_i32 = arith.constant 0 : i32
    %c0_i32_0 = arith.constant 0 : i32
    %c0_i32_1 = arith.constant 0 : i32
    return %c0_i32, %c0_i32_0 : i32, i32
  }
  func.func @transform_1(%arg0: i32) -> (i32, i32) {
    %c0_i32 = arith.constant 0 : i32
    %c0_i32_0 = arith.constant 0 : i32
    %c0_i32_1 = arith.constant 0 : i32
    return %c0_i32, %c0_i32_0 : i32, i32
  }
  func.func @transform_2(%arg0: i32) -> (i32, i32) {
    %c0_i32 = arith.constant 0 : i32
    %c0_i32_0 = arith.constant 0 : i32
    %c0_i32_1 = arith.constant 0 : i32
    return %c0_i32, %c0_i32_0 : i32, i32
  }
  func.func @transform_3(%arg0: i32) -> (i32, i32) {
    %c0_i32 = arith.constant 0 : i32
    %c0_i32_0 = arith.constant 0 : i32
    %c0_i32_1 = arith.constant 0 : i32
    return %c0_i32, %c0_i32_0 : i32, i32
  }
  func.func @transform_4(%arg0: i32) -> (i32, i32, i32) {
    %c0_i32 = arith.constant 0 : i32
    %c0_i32_0 = arith.constant 0 : i32
    %c0_i32_1 = arith.constant 0 : i32
    return %arg0, %c0_i32, %c0_i32_0 : i32, i32, i32
  }
  func.func @transform_5(%arg0: i32) -> (i32, i32, i32) {
    %c0_i32 = arith.constant 0 : i32
    %c0_i32_0 = arith.constant 0 : i32
    %c0_i32_1 = arith.constant 0 : i32
    return %arg0, %c0_i32, %c0_i32_0 : i32, i32, i32
  }
  func.func @transform_6(%arg0: i32) -> (i32, i32, i32) {
    %c0_i32 = arith.constant 0 : i32
    %c0_i32_0 = arith.constant 0 : i32
    %c0_i32_1 = arith.constant 0 : i32
    return %arg0, %c0_i32, %c0_i32_0 : i32, i32, i32
  }
  func.func @transform_7(%arg0: i32) -> (i32, i32, i32) {
    %c0_i32 = arith.constant 0 : i32
    %c0_i32_0 = arith.constant 0 : i32
    %c0_i32_1 = arith.constant 0 : i32
    return %arg0, %c0_i32, %c0_i32_0 : i32, i32, i32
  }
  func.func @transform_8(%arg0: i32) -> (i32, i32, i32) {
    %c0_i32 = arith.constant 0 : i32
    %c0_i32_0 = arith.constant 0 : i32
    %c0_i32_1 = arith.constant 0 : i32
    return %arg0, %c0_i32, %c0_i32_0 : i32, i32, i32
  }
  func.func @transform_9(%arg0: i32) -> (i32, i32, i32) {
    %c0_i32 = arith.constant 0 : i32
    %c0_i32_0 = arith.constant 0 : i32
    %c0_i32_1 = arith.constant 0 : i32
    return %arg0, %c0_i32, %c0_i32_0 : i32, i32, i32
  }
  func.func @transform_10(%arg0: i32) -> (i32, i32, i32) {
    %c0_i32 = arith.constant 0 : i32
    %c0_i32_0 = arith.constant 0 : i32
    %c0_i32_1 = arith.constant 0 : i32
    return %arg0, %c0_i32, %c0_i32_0 : i32, i32, i32
  }
  func.func @transform_11(%arg0: i32) -> (i32, i32, i32) {
    %c0_i32 = arith.constant 0 : i32
    %c0_i32_0 = arith.constant 0 : i32
    %c0_i32_1 = arith.constant 0 : i32
    return %arg0, %c0_i32, %c0_i32_0 : i32, i32, i32
  }
  func.func @transform_12(%arg0: i32) -> (i32, i32, i32) {
    %c0_i32 = arith.constant 0 : i32
    %c0_i32_0 = arith.constant 0 : i32
    %c0_i32_1 = arith.constant 0 : i32
    return %arg0, %c0_i32, %c0_i32_0 : i32, i32, i32
  }
  func.func @transform_13(%arg0: i32) -> (i32, i32, i32) {
    %c0_i32 = arith.constant 0 : i32
    %c0_i32_0 = arith.constant 0 : i32
    %c0_i32_1 = arith.constant 0 : i32
    return %arg0, %c0_i32, %c0_i32_0 : i32, i32, i32
  }
  func.func @transform_14(%arg0: i32) -> (i32, i32, i32) {
    %c0_i32 = arith.constant 0 : i32
    %c0_i32_0 = arith.constant 0 : i32
    %c0_i32_1 = arith.constant 0 : i32
    return %arg0, %c0_i32, %c0_i32_0 : i32, i32, i32
  }
  func.func @transform_15(%arg0: i32) -> (i32, i32, i32) {
    %c0_i32 = arith.constant 0 : i32
    %c0_i32_0 = arith.constant 0 : i32
    %c0_i32_1 = arith.constant 0 : i32
    return %arg0, %c0_i32, %c0_i32_0 : i32, i32, i32
  }
  func.func @transform_16(%arg0: i32) -> (i32, i32) {
    %c0_i32 = arith.constant 0 : i32
    %c0_i32_0 = arith.constant 0 : i32
    %c0_i32_1 = arith.constant 0 : i32
    return %c0_i32, %c0_i32_0 : i32, i32
  }
}

module attributes {stable_mosaic.version = 11 : i64} {
  func.func @_bilstm_fc_kernel(%arg0: i32, %arg1: memref<16x128xf32, #tpu.memory_space<vmem>>, %arg2: memref<2x1xi32, #tpu.memory_space<vmem>>, %arg3: memref<128x256xf32, #tpu.memory_space<vmem>>, %arg4: memref<1x256xf32, #tpu.memory_space<vmem>>, %arg5: memref<32x128xf32, #tpu.memory_space<vmem>>, %arg6: memref<32x128xf32, #tpu.memory_space<vmem>>, %arg7: memref<64x256xf32, #tpu.memory_space<vmem>>, %arg8: memref<1x256xf32, #tpu.memory_space<vmem>>, %arg9: memref<32x128xf32, #tpu.memory_space<vmem>>, %arg10: memref<32x128xf32, #tpu.memory_space<vmem>>, %arg11: memref<1x64xf32, #tpu.memory_space<vmem>>, %arg12: memref<1x1xf32, #tpu.memory_space<vmem>>, %arg13: memref<2x1xf32, #tpu.memory_space<vmem>>, %arg14: memref<16x256xf32, #tpu.memory_space<vmem>>, %arg15: memref<16x32xf32, #tpu.memory_space<vmem>>, %arg16: memref<16x32xf32, #tpu.memory_space<vmem>>) attributes {dimension_semantics = [#tpu.dimension_semantics<arbitrary>], iteration_bounds = array<i64: 1>, scalar_prefetch = 0 : i64, scratch_operands = 3 : i64, tpu.core_type = #tpu.core_type<tc>, window_params = [{pipeline_mode = #tpu.pipeline_mode<synchronous>, transform_indices = @transform_0, window_bounds = array<i64: 16, 128>}, {pipeline_mode = #tpu.pipeline_mode<synchronous>, transform_indices = @transform_1, window_bounds = array<i64: 2, 1>}, {pipeline_mode = #tpu.pipeline_mode<synchronous>, transform_indices = @transform_2, window_bounds = array<i64: 128, 256>}, {pipeline_mode = #tpu.pipeline_mode<synchronous>, transform_indices = @transform_3, window_bounds = array<i64: 1, 256>}, {pipeline_mode = #tpu.pipeline_mode<synchronous>, transform_indices = @transform_4, window_bounds = array<i64: 32, 128>}, {pipeline_mode = #tpu.pipeline_mode<synchronous>, transform_indices = @transform_5, window_bounds = array<i64: 32, 128>}, {pipeline_mode = #tpu.pipeline_mode<synchronous>, transform_indices = @transform_6, window_bounds = array<i64: 64, 256>}, {pipeline_mode = #tpu.pipeline_mode<synchronous>, transform_indices = @transform_7, window_bounds = array<i64: 1, 256>}, {pipeline_mode = #tpu.pipeline_mode<synchronous>, transform_indices = @transform_8, window_bounds = array<i64: 32, 128>}, {pipeline_mode = #tpu.pipeline_mode<synchronous>, transform_indices = @transform_9, window_bounds = array<i64: 32, 128>}, {pipeline_mode = #tpu.pipeline_mode<synchronous>, transform_indices = @transform_10, window_bounds = array<i64: 1, 64>}, {pipeline_mode = #tpu.pipeline_mode<synchronous>, transform_indices = @transform_11, window_bounds = array<i64: 1, 1>}, {pipeline_mode = #tpu.pipeline_mode<synchronous>, transform_indices = @transform_12, window_bounds = array<i64: 2, 1>}]} {
    %c0 = arith.constant 0 : index
    %c0_0 = arith.constant 0 : index
    %0 = vector.load %arg2[%c0, %c0_0] : memref<2x1xi32, #tpu.memory_space<vmem>>, vector<2x1xi32>
    %c0_1 = arith.constant 0 : index
    %c0_2 = arith.constant 0 : index
    %1 = vector.load %arg1[%c0_1, %c0_2] : memref<16x128xf32, #tpu.memory_space<vmem>>, vector<16x128xf32>
    %c0_3 = arith.constant 0 : index
    %c0_4 = arith.constant 0 : index
    %2 = vector.load %arg3[%c0_3, %c0_4] : memref<128x256xf32, #tpu.memory_space<vmem>>, vector<128x256xf32>
    %3 = arith.truncf %1 : vector<16x128xf32> to vector<16x128xbf16>
    %4 = arith.truncf %2 : vector<128x256xf32> to vector<128x256xbf16>
    %cst = arith.constant dense<0.000000e+00> : vector<16x256xf32>
    %5 = tpu.matmul %3, %4, %cst {dimension_numbers = #tpu.dot_dimension_numbers<[1], [0], [0], [1], [0, 0, 1, 1], [], []>} : vector<16x128xbf16>, vector<128x256xbf16>, vector<16x256xf32> -> vector<16x256xf32>
    %c0_5 = arith.constant 0 : index
    %c0_6 = arith.constant 0 : index
    %6 = vector.load %arg4[%c0_5, %c0_6] : memref<1x256xf32, #tpu.memory_space<vmem>>, vector<1x256xf32>
    %7 = vector.broadcast %6 : vector<1x256xf32> to vector<16x256xf32>
    %8 = arith.addf %5, %7 : vector<16x256xf32>
    %c0_7 = arith.constant 0 : index
    %c0_8 = arith.constant 0 : index
    %9 = vector.load %arg14[%c0_7, %c0_8] : memref<16x256xf32, #tpu.memory_space<vmem>>, vector<16x256xf32>
    tpu.vector_store %arg14[%c0_7, %c0_8], %8 {strides = array<i32>} : memref<16x256xf32, #tpu.memory_space<vmem>>, vector<16x256xf32>,
    %c0_9 = arith.constant 0 : index
    %c0_10 = arith.constant 0 : index
    %10 = vector.load %arg5[%c0_9, %c0_10] : memref<32x128xf32, #tpu.memory_space<vmem>>, vector<32x128xf32>
    %c0_11 = arith.constant 0 : index
    %c0_12 = arith.constant 0 : index
    %11 = vector.load %arg6[%c0_11, %c0_12] : memref<32x128xf32, #tpu.memory_space<vmem>>, vector<32x128xf32>
    %cst_13 = arith.constant 0.000000e+00 : f32
    %12 = vector.broadcast %cst_13 : f32 to vector<2x32xf32>
    %c0_i32 = arith.constant 0 : i32
    %c7_i32 = arith.constant 7 : i32
    %13 = arith.subi %c7_i32, %c0_i32 : i32
    %14 = vector.broadcast %c0_i32 : i32 to vector<2x1xi32>
    %15 = arith.cmpi sgt, %0, %14 : vector<2x1xi32>
    %16 = arith.extui %15 : vector<2x1xi1> to vector<2x1xi32>
    %17 = arith.sitofp %16 : vector<2x1xi32> to vector<2x1xf32>
    %18 = vector.broadcast %13 : i32 to vector<2x1xi32>
    %19 = arith.cmpi sgt, %0, %18 : vector<2x1xi32>
    %20 = arith.extui %19 : vector<2x1xi1> to vector<2x1xi32>
    %21 = arith.sitofp %20 : vector<2x1xi32> to vector<2x1xf32>
    %c2_i32 = arith.constant 2 : i32
    %22 = arith.muli %c0_i32, %c2_i32 : i32
    %23 = arith.index_cast %22 : i32 to index
    %c0_14 = arith.constant 0 : index
    %24 = vector.load %arg14[%23, %c0_14] : memref<16x256xf32, #tpu.memory_space<vmem>>, vector<2x256xf32>
    %c2_i32_15 = arith.constant 2 : i32
    %25 = arith.muli %13, %c2_i32_15 : i32
    %26 = arith.index_cast %25 : i32 to index
    %c0_16 = arith.constant 0 : index
    %27 = vector.load %arg14[%26, %c0_16] : memref<16x256xf32, #tpu.memory_space<vmem>>, vector<2x256xf32>
    %28 = vector.extract_strided_slice %24 {offsets = [0, 0], sizes = [2, 128], strides = [1, 1]} : vector<2x256xf32> to vector<2x128xf32>
    %29 = arith.truncf %12 : vector<2x32xf32> to vector<2x32xbf16>
    %30 = arith.truncf %10 : vector<32x128xf32> to vector<32x128xbf16>
    %cst_17 = arith.constant dense<0.000000e+00> : vector<2x128xf32>
    %31 = tpu.matmul %29, %30, %cst_17 {dimension_numbers = #tpu.dot_dimension_numbers<[1], [0], [0], [1], [0, 0, 1, 1], [], []>} : vector<2x32xbf16>, vector<32x128xbf16>, vector<2x128xf32> -> vector<2x128xf32>
    %32 = arith.addf %28, %31 : vector<2x128xf32>
    %33 = vector.extract_strided_slice %27 {offsets = [0, 128], sizes = [2, 128], strides = [1, 1]} : vector<2x256xf32> to vector<2x128xf32>
    %34 = arith.truncf %12 : vector<2x32xf32> to vector<2x32xbf16>
    %35 = arith.truncf %11 : vector<32x128xf32> to vector<32x128xbf16>
    %cst_18 = arith.constant dense<0.000000e+00> : vector<2x128xf32>
    %36 = tpu.matmul %34, %35, %cst_18 {dimension_numbers = #tpu.dot_dimension_numbers<[1], [0], [0], [1], [0, 0, 1, 1], [], []>} : vector<2x32xbf16>, vector<32x128xbf16>, vector<2x128xf32> -> vector<2x128xf32>
    %37 = arith.addf %33, %36 : vector<2x128xf32>
    %38 = arith.negf %32 : vector<2x128xf32>
    %39 = math.exp %38 : vector<2x128xf32>
    %cst_19 = arith.constant 1.000000e+00 : f32
    %40 = vector.broadcast %cst_19 : f32 to vector<2x128xf32>
    %41 = arith.addf %40, %39 : vector<2x128xf32>
    %42 = arith.divf %40, %41 : vector<2x128xf32>
    %43 = math.tanh %32 : vector<2x128xf32>
    %44 = vector.extract_strided_slice %42 {offsets = [0, 0], sizes = [2, 32], strides = [1, 1]} : vector<2x128xf32> to vector<2x32xf32>
    %45 = vector.extract_strided_slice %42 {offsets = [0, 32], sizes = [2, 32], strides = [1, 1]} : vector<2x128xf32> to vector<2x32xf32>
    %46 = vector.extract_strided_slice %43 {offsets = [0, 64], sizes = [2, 32], strides = [1, 1]} : vector<2x128xf32> to vector<2x32xf32>
    %47 = vector.extract_strided_slice %42 {offsets = [0, 96], sizes = [2, 32], strides = [1, 1]} : vector<2x128xf32> to vector<2x32xf32>
    %48 = arith.mulf %45, %12 : vector<2x32xf32>
    %49 = arith.mulf %44, %46 : vector<2x32xf32>
    %50 = arith.addf %48, %49 : vector<2x32xf32>
    %51 = math.tanh %50 : vector<2x32xf32>
    %52 = arith.mulf %47, %51 : vector<2x32xf32>
    %53 = vector.broadcast %17 : vector<2x1xf32> to vector<2x32xf32>
    %54 = arith.mulf %53, %52 : vector<2x32xf32>
    %cst_20 = arith.constant 1.000000e+00 : f32
    %55 = vector.broadcast %cst_20 : f32 to vector<2x1xf32>
    %56 = arith.subf %55, %17 : vector<2x1xf32>
    %57 = vector.broadcast %56 : vector<2x1xf32> to vector<2x32xf32>
    %58 = arith.mulf %57, %12 : vector<2x32xf32>
    %59 = arith.addf %54, %58 : vector<2x32xf32>
    %60 = vector.broadcast %17 : vector<2x1xf32> to vector<2x32xf32>
    %61 = arith.mulf %60, %50 : vector<2x32xf32>
    %cst_21 = arith.constant 1.000000e+00 : f32
    %62 = vector.broadcast %cst_21 : f32 to vector<2x1xf32>
    %63 = arith.subf %62, %17 : vector<2x1xf32>
    %64 = vector.broadcast %63 : vector<2x1xf32> to vector<2x32xf32>
    %65 = arith.mulf %64, %12 : vector<2x32xf32>
    %66 = arith.addf %61, %65 : vector<2x32xf32>
    %67 = arith.negf %37 : vector<2x128xf32>
    %68 = math.exp %67 : vector<2x128xf32>
    %cst_22 = arith.constant 1.000000e+00 : f32
    %69 = vector.broadcast %cst_22 : f32 to vector<2x128xf32>
    %70 = arith.addf %69, %68 : vector<2x128xf32>
    %71 = arith.divf %69, %70 : vector<2x128xf32>
    %72 = math.tanh %37 : vector<2x128xf32>
    %73 = vector.extract_strided_slice %71 {offsets = [0, 0], sizes = [2, 32], strides = [1, 1]} : vector<2x128xf32> to vector<2x32xf32>
    %74 = vector.extract_strided_slice %71 {offsets = [0, 32], sizes = [2, 32], strides = [1, 1]} : vector<2x128xf32> to vector<2x32xf32>
    %75 = vector.extract_strided_slice %72 {offsets = [0, 64], sizes = [2, 32], strides = [1, 1]} : vector<2x128xf32> to vector<2x32xf32>
    %76 = vector.extract_strided_slice %71 {offsets = [0, 96], sizes = [2, 32], strides = [1, 1]} : vector<2x128xf32> to vector<2x32xf32>
    %77 = arith.mulf %74, %12 : vector<2x32xf32>
    %78 = arith.mulf %73, %75 : vector<2x32xf32>
    %79 = arith.addf %77, %78 : vector<2x32xf32>
    %80 = math.tanh %79 : vector<2x32xf32>
    %81 = arith.mulf %76, %80 : vector<2x32xf32>
    %82 = vector.broadcast %21 : vector<2x1xf32> to vector<2x32xf32>
    %83 = arith.mulf %82, %81 : vector<2x32xf32>
    %cst_23 = arith.constant 1.000000e+00 : f32
    %84 = vector.broadcast %cst_23 : f32 to vector<2x1xf32>
    %85 = arith.subf %84, %21 : vector<2x1xf32>
    %86 = vector.broadcast %85 : vector<2x1xf32> to vector<2x32xf32>
    %87 = arith.mulf %86, %12 : vector<2x32xf32>
    %88 = arith.addf %83, %87 : vector<2x32xf32>
    %89 = vector.broadcast %21 : vector<2x1xf32> to vector<2x32xf32>
    %90 = arith.mulf %89, %79 : vector<2x32xf32>
    %cst_24 = arith.constant 1.000000e+00 : f32
    %91 = vector.broadcast %cst_24 : f32 to vector<2x1xf32>
    %92 = arith.subf %91, %21 : vector<2x1xf32>
    %93 = vector.broadcast %92 : vector<2x1xf32> to vector<2x32xf32>
    %94 = arith.mulf %93, %12 : vector<2x32xf32>
    %95 = arith.addf %90, %94 : vector<2x32xf32>
    %c2_i32_25 = arith.constant 2 : i32
    %96 = arith.muli %c0_i32, %c2_i32_25 : i32
    %97 = arith.index_cast %96 : i32 to index
    %c0_26 = arith.constant 0 : index
    %98 = vector.load %arg15[%97, %c0_26] : memref<16x32xf32, #tpu.memory_space<vmem>>, vector<2x32xf32>
    tpu.vector_store %arg15[%97, %c0_26], %59 {strides = array<i32>} : memref<16x32xf32, #tpu.memory_space<vmem>>, vector<2x32xf32>,
    %c2_i32_27 = arith.constant 2 : i32
    %99 = arith.muli %13, %c2_i32_27 : i32
    %100 = arith.index_cast %99 : i32 to index
    %c0_28 = arith.constant 0 : index
    %101 = vector.load %arg16[%100, %c0_28] : memref<16x32xf32, #tpu.memory_space<vmem>>, vector<2x32xf32>
    tpu.vector_store %arg16[%100, %c0_28], %88 {strides = array<i32>} : memref<16x32xf32, #tpu.memory_space<vmem>>, vector<2x32xf32>,
    %c1_i32 = arith.constant 1 : i32
    %c7_i32_29 = arith.constant 7 : i32
    %102 = arith.subi %c7_i32_29, %c1_i32 : i32
    %103 = vector.broadcast %c1_i32 : i32 to vector<2x1xi32>
    %104 = arith.cmpi sgt, %0, %103 : vector<2x1xi32>
    %105 = arith.extui %104 : vector<2x1xi1> to vector<2x1xi32>
    %106 = arith.sitofp %105 : vector<2x1xi32> to vector<2x1xf32>
    %107 = vector.broadcast %102 : i32 to vector<2x1xi32>
    %108 = arith.cmpi sgt, %0, %107 : vector<2x1xi32>
    %109 = arith.extui %108 : vector<2x1xi1> to vector<2x1xi32>
    %110 = arith.sitofp %109 : vector<2x1xi32> to vector<2x1xf32>
    %c2_i32_30 = arith.constant 2 : i32
    %111 = arith.muli %c1_i32, %c2_i32_30 : i32
    %112 = arith.index_cast %111 : i32 to index
    %c0_31 = arith.constant 0 : index
    %113 = vector.load %arg14[%112, %c0_31] : memref<16x256xf32, #tpu.memory_space<vmem>>, vector<2x256xf32>
    %c2_i32_32 = arith.constant 2 : i32
    %114 = arith.muli %102, %c2_i32_32 : i32
    %115 = arith.index_cast %114 : i32 to index
    %c0_33 = arith.constant 0 : index
    %116 = vector.load %arg14[%115, %c0_33] : memref<16x256xf32, #tpu.memory_space<vmem>>, vector<2x256xf32>
    %117 = vector.extract_strided_slice %113 {offsets = [0, 0], sizes = [2, 128], strides = [1, 1]} : vector<2x256xf32> to vector<2x128xf32>
    %118 = arith.truncf %59 : vector<2x32xf32> to vector<2x32xbf16>
    %119 = arith.truncf %10 : vector<32x128xf32> to vector<32x128xbf16>
    %cst_34 = arith.constant dense<0.000000e+00> : vector<2x128xf32>
    %120 = tpu.matmul %118, %119, %cst_34 {dimension_numbers = #tpu.dot_dimension_numbers<[1], [0], [0], [1], [0, 0, 1, 1], [], []>} : vector<2x32xbf16>, vector<32x128xbf16>, vector<2x128xf32> -> vector<2x128xf32>
    %121 = arith.addf %117, %120 : vector<2x128xf32>
    %122 = vector.extract_strided_slice %116 {offsets = [0, 128], sizes = [2, 128], strides = [1, 1]} : vector<2x256xf32> to vector<2x128xf32>
    %123 = arith.truncf %88 : vector<2x32xf32> to vector<2x32xbf16>
    %124 = arith.truncf %11 : vector<32x128xf32> to vector<32x128xbf16>
    %cst_35 = arith.constant dense<0.000000e+00> : vector<2x128xf32>
    %125 = tpu.matmul %123, %124, %cst_35 {dimension_numbers = #tpu.dot_dimension_numbers<[1], [0], [0], [1], [0, 0, 1, 1], [], []>} : vector<2x32xbf16>, vector<32x128xbf16>, vector<2x128xf32> -> vector<2x128xf32>
    %126 = arith.addf %122, %125 : vector<2x128xf32>
    %127 = arith.negf %121 : vector<2x128xf32>
    %128 = math.exp %127 : vector<2x128xf32>
    %cst_36 = arith.constant 1.000000e+00 : f32
    %129 = vector.broadcast %cst_36 : f32 to vector<2x128xf32>
    %130 = arith.addf %129, %128 : vector<2x128xf32>
    %131 = arith.divf %129, %130 : vector<2x128xf32>
    %132 = math.tanh %121 : vector<2x128xf32>
    %133 = vector.extract_strided_slice %131 {offsets = [0, 0], sizes = [2, 32], strides = [1, 1]} : vector<2x128xf32> to vector<2x32xf32>
    %134 = vector.extract_strided_slice %131 {offsets = [0, 32], sizes = [2, 32], strides = [1, 1]} : vector<2x128xf32> to vector<2x32xf32>
    %135 = vector.extract_strided_slice %132 {offsets = [0, 64], sizes = [2, 32], strides = [1, 1]} : vector<2x128xf32> to vector<2x32xf32>
    %136 = vector.extract_strided_slice %131 {offsets = [0, 96], sizes = [2, 32], strides = [1, 1]} : vector<2x128xf32> to vector<2x32xf32>
    %137 = arith.mulf %134, %66 : vector<2x32xf32>
    %138 = arith.mulf %133, %135 : vector<2x32xf32>
    %139 = arith.addf %137, %138 : vector<2x32xf32>
    %140 = math.tanh %139 : vector<2x32xf32>
    %141 = arith.mulf %136, %140 : vector<2x32xf32>
    %142 = vector.broadcast %106 : vector<2x1xf32> to vector<2x32xf32>
    %143 = arith.mulf %142, %141 : vector<2x32xf32>
    %cst_37 = arith.constant 1.000000e+00 : f32
    %144 = vector.broadcast %cst_37 : f32 to vector<2x1xf32>
    %145 = arith.subf %144, %106 : vector<2x1xf32>
    %146 = vector.broadcast %145 : vector<2x1xf32> to vector<2x32xf32>
    %147 = arith.mulf %146, %59 : vector<2x32xf32>
    %148 = arith.addf %143, %147 : vector<2x32xf32>
    %149 = vector.broadcast %106 : vector<2x1xf32> to vector<2x32xf32>
    %150 = arith.mulf %149, %139 : vector<2x32xf32>
    %cst_38 = arith.constant 1.000000e+00 : f32
    %151 = vector.broadcast %cst_38 : f32 to vector<2x1xf32>
    %152 = arith.subf %151, %106 : vector<2x1xf32>
    %153 = vector.broadcast %152 : vector<2x1xf32> to vector<2x32xf32>
    %154 = arith.mulf %153, %66 : vector<2x32xf32>
    %155 = arith.addf %150, %154 : vector<2x32xf32>
    %156 = arith.negf %126 : vector<2x128xf32>
    %157 = math.exp %156 : vector<2x128xf32>
    %cst_39 = arith.constant 1.000000e+00 : f32
    %158 = vector.broadcast %cst_39 : f32 to vector<2x128xf32>
    %159 = arith.addf %158, %157 : vector<2x128xf32>
    %160 = arith.divf %158, %159 : vector<2x128xf32>
    %161 = math.tanh %126 : vector<2x128xf32>
    %162 = vector.extract_strided_slice %160 {offsets = [0, 0], sizes = [2, 32], strides = [1, 1]} : vector<2x128xf32> to vector<2x32xf32>
    %163 = vector.extract_strided_slice %160 {offsets = [0, 32], sizes = [2, 32], strides = [1, 1]} : vector<2x128xf32> to vector<2x32xf32>
    %164 = vector.extract_strided_slice %161 {offsets = [0, 64], sizes = [2, 32], strides = [1, 1]} : vector<2x128xf32> to vector<2x32xf32>
    %165 = vector.extract_strided_slice %160 {offsets = [0, 96], sizes = [2, 32], strides = [1, 1]} : vector<2x128xf32> to vector<2x32xf32>
    %166 = arith.mulf %163, %95 : vector<2x32xf32>
    %167 = arith.mulf %162, %164 : vector<2x32xf32>
    %168 = arith.addf %166, %167 : vector<2x32xf32>
    %169 = math.tanh %168 : vector<2x32xf32>
    %170 = arith.mulf %165, %169 : vector<2x32xf32>
    %171 = vector.broadcast %110 : vector<2x1xf32> to vector<2x32xf32>
    %172 = arith.mulf %171, %170 : vector<2x32xf32>
    %cst_40 = arith.constant 1.000000e+00 : f32
    %173 = vector.broadcast %cst_40 : f32 to vector<2x1xf32>
    %174 = arith.subf %173, %110 : vector<2x1xf32>
    %175 = vector.broadcast %174 : vector<2x1xf32> to vector<2x32xf32>
    %176 = arith.mulf %175, %88 : vector<2x32xf32>
    %177 = arith.addf %172, %176 : vector<2x32xf32>
    %178 = vector.broadcast %110 : vector<2x1xf32> to vector<2x32xf32>
    %179 = arith.mulf %178, %168 : vector<2x32xf32>
    %cst_41 = arith.constant 1.000000e+00 : f32
    %180 = vector.broadcast %cst_41 : f32 to vector<2x1xf32>
    %181 = arith.subf %180, %110 : vector<2x1xf32>
    %182 = vector.broadcast %181 : vector<2x1xf32> to vector<2x32xf32>
    %183 = arith.mulf %182, %95 : vector<2x32xf32>
    %184 = arith.addf %179, %183 : vector<2x32xf32>
    %c2_i32_42 = arith.constant 2 : i32
    %185 = arith.muli %c1_i32, %c2_i32_42 : i32
    %186 = arith.index_cast %185 : i32 to index
    %c0_43 = arith.constant 0 : index
    %187 = vector.load %arg15[%186, %c0_43] : memref<16x32xf32, #tpu.memory_space<vmem>>, vector<2x32xf32>
    tpu.vector_store %arg15[%186, %c0_43], %148 {strides = array<i32>} : memref<16x32xf32, #tpu.memory_space<vmem>>, vector<2x32xf32>,
    %c2_i32_44 = arith.constant 2 : i32
    %188 = arith.muli %102, %c2_i32_44 : i32
    %189 = arith.index_cast %188 : i32 to index
    %c0_45 = arith.constant 0 : index
    %190 = vector.load %arg16[%189, %c0_45] : memref<16x32xf32, #tpu.memory_space<vmem>>, vector<2x32xf32>
    tpu.vector_store %arg16[%189, %c0_45], %177 {strides = array<i32>} : memref<16x32xf32, #tpu.memory_space<vmem>>, vector<2x32xf32>,
    %c2_i32_46 = arith.constant 2 : i32
    %c7_i32_47 = arith.constant 7 : i32
    %191 = arith.subi %c7_i32_47, %c2_i32_46 : i32
    %192 = vector.broadcast %c2_i32_46 : i32 to vector<2x1xi32>
    %193 = arith.cmpi sgt, %0, %192 : vector<2x1xi32>
    %194 = arith.extui %193 : vector<2x1xi1> to vector<2x1xi32>
    %195 = arith.sitofp %194 : vector<2x1xi32> to vector<2x1xf32>
    %196 = vector.broadcast %191 : i32 to vector<2x1xi32>
    %197 = arith.cmpi sgt, %0, %196 : vector<2x1xi32>
    %198 = arith.extui %197 : vector<2x1xi1> to vector<2x1xi32>
    %199 = arith.sitofp %198 : vector<2x1xi32> to vector<2x1xf32>
    %c2_i32_48 = arith.constant 2 : i32
    %200 = arith.muli %c2_i32_46, %c2_i32_48 : i32
    %201 = arith.index_cast %200 : i32 to index
    %c0_49 = arith.constant 0 : index
    %202 = vector.load %arg14[%201, %c0_49] : memref<16x256xf32, #tpu.memory_space<vmem>>, vector<2x256xf32>
    %c2_i32_50 = arith.constant 2 : i32
    %203 = arith.muli %191, %c2_i32_50 : i32
    %204 = arith.index_cast %203 : i32 to index
    %c0_51 = arith.constant 0 : index
    %205 = vector.load %arg14[%204, %c0_51] : memref<16x256xf32, #tpu.memory_space<vmem>>, vector<2x256xf32>
    %206 = vector.extract_strided_slice %202 {offsets = [0, 0], sizes = [2, 128], strides = [1, 1]} : vector<2x256xf32> to vector<2x128xf32>
    %207 = arith.truncf %148 : vector<2x32xf32> to vector<2x32xbf16>
    %208 = arith.truncf %10 : vector<32x128xf32> to vector<32x128xbf16>
    %cst_52 = arith.constant dense<0.000000e+00> : vector<2x128xf32>
    %209 = tpu.matmul %207, %208, %cst_52 {dimension_numbers = #tpu.dot_dimension_numbers<[1], [0], [0], [1], [0, 0, 1, 1], [], []>} : vector<2x32xbf16>, vector<32x128xbf16>, vector<2x128xf32> -> vector<2x128xf32>
    %210 = arith.addf %206, %209 : vector<2x128xf32>
    %211 = vector.extract_strided_slice %205 {offsets = [0, 128], sizes = [2, 128], strides = [1, 1]} : vector<2x256xf32> to vector<2x128xf32>
    %212 = arith.truncf %177 : vector<2x32xf32> to vector<2x32xbf16>
    %213 = arith.truncf %11 : vector<32x128xf32> to vector<32x128xbf16>
    %cst_53 = arith.constant dense<0.000000e+00> : vector<2x128xf32>
    %214 = tpu.matmul %212, %213, %cst_53 {dimension_numbers = #tpu.dot_dimension_numbers<[1], [0], [0], [1], [0, 0, 1, 1], [], []>} : vector<2x32xbf16>, vector<32x128xbf16>, vector<2x128xf32> -> vector<2x128xf32>
    %215 = arith.addf %211, %214 : vector<2x128xf32>
    %216 = arith.negf %210 : vector<2x128xf32>
    %217 = math.exp %216 : vector<2x128xf32>
    %cst_54 = arith.constant 1.000000e+00 : f32
    %218 = vector.broadcast %cst_54 : f32 to vector<2x128xf32>
    %219 = arith.addf %218, %217 : vector<2x128xf32>
    %220 = arith.divf %218, %219 : vector<2x128xf32>
    %221 = math.tanh %210 : vector<2x128xf32>
    %222 = vector.extract_strided_slice %220 {offsets = [0, 0], sizes = [2, 32], strides = [1, 1]} : vector<2x128xf32> to vector<2x32xf32>
    %223 = vector.extract_strided_slice %220 {offsets = [0, 32], sizes = [2, 32], strides = [1, 1]} : vector<2x128xf32> to vector<2x32xf32>
    %224 = vector.extract_strided_slice %221 {offsets = [0, 64], sizes = [2, 32], strides = [1, 1]} : vector<2x128xf32> to vector<2x32xf32>
    %225 = vector.extract_strided_slice %220 {offsets = [0, 96], sizes = [2, 32], strides = [1, 1]} : vector<2x128xf32> to vector<2x32xf32>
    %226 = arith.mulf %223, %155 : vector<2x32xf32>
    %227 = arith.mulf %222, %224 : vector<2x32xf32>
    %228 = arith.addf %226, %227 : vector<2x32xf32>
    %229 = math.tanh %228 : vector<2x32xf32>
    %230 = arith.mulf %225, %229 : vector<2x32xf32>
    %231 = vector.broadcast %195 : vector<2x1xf32> to vector<2x32xf32>
    %232 = arith.mulf %231, %230 : vector<2x32xf32>
    %cst_55 = arith.constant 1.000000e+00 : f32
    %233 = vector.broadcast %cst_55 : f32 to vector<2x1xf32>
    %234 = arith.subf %233, %195 : vector<2x1xf32>
    %235 = vector.broadcast %234 : vector<2x1xf32> to vector<2x32xf32>
    %236 = arith.mulf %235, %148 : vector<2x32xf32>
    %237 = arith.addf %232, %236 : vector<2x32xf32>
    %238 = vector.broadcast %195 : vector<2x1xf32> to vector<2x32xf32>
    %239 = arith.mulf %238, %228 : vector<2x32xf32>
    %cst_56 = arith.constant 1.000000e+00 : f32
    %240 = vector.broadcast %cst_56 : f32 to vector<2x1xf32>
    %241 = arith.subf %240, %195 : vector<2x1xf32>
    %242 = vector.broadcast %241 : vector<2x1xf32> to vector<2x32xf32>
    %243 = arith.mulf %242, %155 : vector<2x32xf32>
    %244 = arith.addf %239, %243 : vector<2x32xf32>
    %245 = arith.negf %215 : vector<2x128xf32>
    %246 = math.exp %245 : vector<2x128xf32>
    %cst_57 = arith.constant 1.000000e+00 : f32
    %247 = vector.broadcast %cst_57 : f32 to vector<2x128xf32>
    %248 = arith.addf %247, %246 : vector<2x128xf32>
    %249 = arith.divf %247, %248 : vector<2x128xf32>
    %250 = math.tanh %215 : vector<2x128xf32>
    %251 = vector.extract_strided_slice %249 {offsets = [0, 0], sizes = [2, 32], strides = [1, 1]} : vector<2x128xf32> to vector<2x32xf32>
    %252 = vector.extract_strided_slice %249 {offsets = [0, 32], sizes = [2, 32], strides = [1, 1]} : vector<2x128xf32> to vector<2x32xf32>
    %253 = vector.extract_strided_slice %250 {offsets = [0, 64], sizes = [2, 32], strides = [1, 1]} : vector<2x128xf32> to vector<2x32xf32>
    %254 = vector.extract_strided_slice %249 {offsets = [0, 96], sizes = [2, 32], strides = [1, 1]} : vector<2x128xf32> to vector<2x32xf32>
    %255 = arith.mulf %252, %184 : vector<2x32xf32>
    %256 = arith.mulf %251, %253 : vector<2x32xf32>
    %257 = arith.addf %255, %256 : vector<2x32xf32>
    %258 = math.tanh %257 : vector<2x32xf32>
    %259 = arith.mulf %254, %258 : vector<2x32xf32>
    %260 = vector.broadcast %199 : vector<2x1xf32> to vector<2x32xf32>
    %261 = arith.mulf %260, %259 : vector<2x32xf32>
    %cst_58 = arith.constant 1.000000e+00 : f32
    %262 = vector.broadcast %cst_58 : f32 to vector<2x1xf32>
    %263 = arith.subf %262, %199 : vector<2x1xf32>
    %264 = vector.broadcast %263 : vector<2x1xf32> to vector<2x32xf32>
    %265 = arith.mulf %264, %177 : vector<2x32xf32>
    %266 = arith.addf %261, %265 : vector<2x32xf32>
    %267 = vector.broadcast %199 : vector<2x1xf32> to vector<2x32xf32>
    %268 = arith.mulf %267, %257 : vector<2x32xf32>
    %cst_59 = arith.constant 1.000000e+00 : f32
    %269 = vector.broadcast %cst_59 : f32 to vector<2x1xf32>
    %270 = arith.subf %269, %199 : vector<2x1xf32>
    %271 = vector.broadcast %270 : vector<2x1xf32> to vector<2x32xf32>
    %272 = arith.mulf %271, %184 : vector<2x32xf32>
    %273 = arith.addf %268, %272 : vector<2x32xf32>
    %c2_i32_60 = arith.constant 2 : i32
    %274 = arith.muli %c2_i32_46, %c2_i32_60 : i32
    %275 = arith.index_cast %274 : i32 to index
    %c0_61 = arith.constant 0 : index
    %276 = vector.load %arg15[%275, %c0_61] : memref<16x32xf32, #tpu.memory_space<vmem>>, vector<2x32xf32>
    tpu.vector_store %arg15[%275, %c0_61], %237 {strides = array<i32>} : memref<16x32xf32, #tpu.memory_space<vmem>>, vector<2x32xf32>,
    %c2_i32_62 = arith.constant 2 : i32
    %277 = arith.muli %191, %c2_i32_62 : i32
    %278 = arith.index_cast %277 : i32 to index
    %c0_63 = arith.constant 0 : index
    %279 = vector.load %arg16[%278, %c0_63] : memref<16x32xf32, #tpu.memory_space<vmem>>, vector<2x32xf32>
    tpu.vector_store %arg16[%278, %c0_63], %266 {strides = array<i32>} : memref<16x32xf32, #tpu.memory_space<vmem>>, vector<2x32xf32>,
    %c3_i32 = arith.constant 3 : i32
    %c7_i32_64 = arith.constant 7 : i32
    %280 = arith.subi %c7_i32_64, %c3_i32 : i32
    %281 = vector.broadcast %c3_i32 : i32 to vector<2x1xi32>
    %282 = arith.cmpi sgt, %0, %281 : vector<2x1xi32>
    %283 = arith.extui %282 : vector<2x1xi1> to vector<2x1xi32>
    %284 = arith.sitofp %283 : vector<2x1xi32> to vector<2x1xf32>
    %285 = vector.broadcast %280 : i32 to vector<2x1xi32>
    %286 = arith.cmpi sgt, %0, %285 : vector<2x1xi32>
    %287 = arith.extui %286 : vector<2x1xi1> to vector<2x1xi32>
    %288 = arith.sitofp %287 : vector<2x1xi32> to vector<2x1xf32>
    %c2_i32_65 = arith.constant 2 : i32
    %289 = arith.muli %c3_i32, %c2_i32_65 : i32
    %290 = arith.index_cast %289 : i32 to index
    %c0_66 = arith.constant 0 : index
    %291 = vector.load %arg14[%290, %c0_66] : memref<16x256xf32, #tpu.memory_space<vmem>>, vector<2x256xf32>
    %c2_i32_67 = arith.constant 2 : i32
    %292 = arith.muli %280, %c2_i32_67 : i32
    %293 = arith.index_cast %292 : i32 to index
    %c0_68 = arith.constant 0 : index
    %294 = vector.load %arg14[%293, %c0_68] : memref<16x256xf32, #tpu.memory_space<vmem>>, vector<2x256xf32>
    %295 = vector.extract_strided_slice %291 {offsets = [0, 0], sizes = [2, 128], strides = [1, 1]} : vector<2x256xf32> to vector<2x128xf32>
    %296 = arith.truncf %237 : vector<2x32xf32> to vector<2x32xbf16>
    %297 = arith.truncf %10 : vector<32x128xf32> to vector<32x128xbf16>
    %cst_69 = arith.constant dense<0.000000e+00> : vector<2x128xf32>
    %298 = tpu.matmul %296, %297, %cst_69 {dimension_numbers = #tpu.dot_dimension_numbers<[1], [0], [0], [1], [0, 0, 1, 1], [], []>} : vector<2x32xbf16>, vector<32x128xbf16>, vector<2x128xf32> -> vector<2x128xf32>
    %299 = arith.addf %295, %298 : vector<2x128xf32>
    %300 = vector.extract_strided_slice %294 {offsets = [0, 128], sizes = [2, 128], strides = [1, 1]} : vector<2x256xf32> to vector<2x128xf32>
    %301 = arith.truncf %266 : vector<2x32xf32> to vector<2x32xbf16>
    %302 = arith.truncf %11 : vector<32x128xf32> to vector<32x128xbf16>
    %cst_70 = arith.constant dense<0.000000e+00> : vector<2x128xf32>
    %303 = tpu.matmul %301, %302, %cst_70 {dimension_numbers = #tpu.dot_dimension_numbers<[1], [0], [0], [1], [0, 0, 1, 1], [], []>} : vector<2x32xbf16>, vector<32x128xbf16>, vector<2x128xf32> -> vector<2x128xf32>
    %304 = arith.addf %300, %303 : vector<2x128xf32>
    %305 = arith.negf %299 : vector<2x128xf32>
    %306 = math.exp %305 : vector<2x128xf32>
    %cst_71 = arith.constant 1.000000e+00 : f32
    %307 = vector.broadcast %cst_71 : f32 to vector<2x128xf32>
    %308 = arith.addf %307, %306 : vector<2x128xf32>
    %309 = arith.divf %307, %308 : vector<2x128xf32>
    %310 = math.tanh %299 : vector<2x128xf32>
    %311 = vector.extract_strided_slice %309 {offsets = [0, 0], sizes = [2, 32], strides = [1, 1]} : vector<2x128xf32> to vector<2x32xf32>
    %312 = vector.extract_strided_slice %309 {offsets = [0, 32], sizes = [2, 32], strides = [1, 1]} : vector<2x128xf32> to vector<2x32xf32>
    %313 = vector.extract_strided_slice %310 {offsets = [0, 64], sizes = [2, 32], strides = [1, 1]} : vector<2x128xf32> to vector<2x32xf32>
    %314 = vector.extract_strided_slice %309 {offsets = [0, 96], sizes = [2, 32], strides = [1, 1]} : vector<2x128xf32> to vector<2x32xf32>
    %315 = arith.mulf %312, %244 : vector<2x32xf32>
    %316 = arith.mulf %311, %313 : vector<2x32xf32>
    %317 = arith.addf %315, %316 : vector<2x32xf32>
    %318 = math.tanh %317 : vector<2x32xf32>
    %319 = arith.mulf %314, %318 : vector<2x32xf32>
    %320 = vector.broadcast %284 : vector<2x1xf32> to vector<2x32xf32>
    %321 = arith.mulf %320, %319 : vector<2x32xf32>
    %cst_72 = arith.constant 1.000000e+00 : f32
    %322 = vector.broadcast %cst_72 : f32 to vector<2x1xf32>
    %323 = arith.subf %322, %284 : vector<2x1xf32>
    %324 = vector.broadcast %323 : vector<2x1xf32> to vector<2x32xf32>
    %325 = arith.mulf %324, %237 : vector<2x32xf32>
    %326 = arith.addf %321, %325 : vector<2x32xf32>
    %327 = vector.broadcast %284 : vector<2x1xf32> to vector<2x32xf32>
    %328 = arith.mulf %327, %317 : vector<2x32xf32>
    %cst_73 = arith.constant 1.000000e+00 : f32
    %329 = vector.broadcast %cst_73 : f32 to vector<2x1xf32>
    %330 = arith.subf %329, %284 : vector<2x1xf32>
    %331 = vector.broadcast %330 : vector<2x1xf32> to vector<2x32xf32>
    %332 = arith.mulf %331, %244 : vector<2x32xf32>
    %333 = arith.addf %328, %332 : vector<2x32xf32>
    %334 = arith.negf %304 : vector<2x128xf32>
    %335 = math.exp %334 : vector<2x128xf32>
    %cst_74 = arith.constant 1.000000e+00 : f32
    %336 = vector.broadcast %cst_74 : f32 to vector<2x128xf32>
    %337 = arith.addf %336, %335 : vector<2x128xf32>
    %338 = arith.divf %336, %337 : vector<2x128xf32>
    %339 = math.tanh %304 : vector<2x128xf32>
    %340 = vector.extract_strided_slice %338 {offsets = [0, 0], sizes = [2, 32], strides = [1, 1]} : vector<2x128xf32> to vector<2x32xf32>
    %341 = vector.extract_strided_slice %338 {offsets = [0, 32], sizes = [2, 32], strides = [1, 1]} : vector<2x128xf32> to vector<2x32xf32>
    %342 = vector.extract_strided_slice %339 {offsets = [0, 64], sizes = [2, 32], strides = [1, 1]} : vector<2x128xf32> to vector<2x32xf32>
    %343 = vector.extract_strided_slice %338 {offsets = [0, 96], sizes = [2, 32], strides = [1, 1]} : vector<2x128xf32> to vector<2x32xf32>
    %344 = arith.mulf %341, %273 : vector<2x32xf32>
    %345 = arith.mulf %340, %342 : vector<2x32xf32>
    %346 = arith.addf %344, %345 : vector<2x32xf32>
    %347 = math.tanh %346 : vector<2x32xf32>
    %348 = arith.mulf %343, %347 : vector<2x32xf32>
    %349 = vector.broadcast %288 : vector<2x1xf32> to vector<2x32xf32>
    %350 = arith.mulf %349, %348 : vector<2x32xf32>
    %cst_75 = arith.constant 1.000000e+00 : f32
    %351 = vector.broadcast %cst_75 : f32 to vector<2x1xf32>
    %352 = arith.subf %351, %288 : vector<2x1xf32>
    %353 = vector.broadcast %352 : vector<2x1xf32> to vector<2x32xf32>
    %354 = arith.mulf %353, %266 : vector<2x32xf32>
    %355 = arith.addf %350, %354 : vector<2x32xf32>
    %356 = vector.broadcast %288 : vector<2x1xf32> to vector<2x32xf32>
    %357 = arith.mulf %356, %346 : vector<2x32xf32>
    %cst_76 = arith.constant 1.000000e+00 : f32
    %358 = vector.broadcast %cst_76 : f32 to vector<2x1xf32>
    %359 = arith.subf %358, %288 : vector<2x1xf32>
    %360 = vector.broadcast %359 : vector<2x1xf32> to vector<2x32xf32>
    %361 = arith.mulf %360, %273 : vector<2x32xf32>
    %362 = arith.addf %357, %361 : vector<2x32xf32>
    %c2_i32_77 = arith.constant 2 : i32
    %363 = arith.muli %c3_i32, %c2_i32_77 : i32
    %364 = arith.index_cast %363 : i32 to index
    %c0_78 = arith.constant 0 : index
    %365 = vector.load %arg15[%364, %c0_78] : memref<16x32xf32, #tpu.memory_space<vmem>>, vector<2x32xf32>
    tpu.vector_store %arg15[%364, %c0_78], %326 {strides = array<i32>} : memref<16x32xf32, #tpu.memory_space<vmem>>, vector<2x32xf32>,
    %c2_i32_79 = arith.constant 2 : i32
    %366 = arith.muli %280, %c2_i32_79 : i32
    %367 = arith.index_cast %366 : i32 to index
    %c0_80 = arith.constant 0 : index
    %368 = vector.load %arg16[%367, %c0_80] : memref<16x32xf32, #tpu.memory_space<vmem>>, vector<2x32xf32>
    tpu.vector_store %arg16[%367, %c0_80], %355 {strides = array<i32>} : memref<16x32xf32, #tpu.memory_space<vmem>>, vector<2x32xf32>,
    %c4_i32 = arith.constant 4 : i32
    %c7_i32_81 = arith.constant 7 : i32
    %369 = arith.subi %c7_i32_81, %c4_i32 : i32
    %370 = vector.broadcast %c4_i32 : i32 to vector<2x1xi32>
    %371 = arith.cmpi sgt, %0, %370 : vector<2x1xi32>
    %372 = arith.extui %371 : vector<2x1xi1> to vector<2x1xi32>
    %373 = arith.sitofp %372 : vector<2x1xi32> to vector<2x1xf32>
    %374 = vector.broadcast %369 : i32 to vector<2x1xi32>
    %375 = arith.cmpi sgt, %0, %374 : vector<2x1xi32>
    %376 = arith.extui %375 : vector<2x1xi1> to vector<2x1xi32>
    %377 = arith.sitofp %376 : vector<2x1xi32> to vector<2x1xf32>
    %c2_i32_82 = arith.constant 2 : i32
    %378 = arith.muli %c4_i32, %c2_i32_82 : i32
    %379 = arith.index_cast %378 : i32 to index
    %c0_83 = arith.constant 0 : index
    %380 = vector.load %arg14[%379, %c0_83] : memref<16x256xf32, #tpu.memory_space<vmem>>, vector<2x256xf32>
    %c2_i32_84 = arith.constant 2 : i32
    %381 = arith.muli %369, %c2_i32_84 : i32
    %382 = arith.index_cast %381 : i32 to index
    %c0_85 = arith.constant 0 : index
    %383 = vector.load %arg14[%382, %c0_85] : memref<16x256xf32, #tpu.memory_space<vmem>>, vector<2x256xf32>
    %384 = vector.extract_strided_slice %380 {offsets = [0, 0], sizes = [2, 128], strides = [1, 1]} : vector<2x256xf32> to vector<2x128xf32>
    %385 = arith.truncf %326 : vector<2x32xf32> to vector<2x32xbf16>
    %386 = arith.truncf %10 : vector<32x128xf32> to vector<32x128xbf16>
    %cst_86 = arith.constant dense<0.000000e+00> : vector<2x128xf32>
    %387 = tpu.matmul %385, %386, %cst_86 {dimension_numbers = #tpu.dot_dimension_numbers<[1], [0], [0], [1], [0, 0, 1, 1], [], []>} : vector<2x32xbf16>, vector<32x128xbf16>, vector<2x128xf32> -> vector<2x128xf32>
    %388 = arith.addf %384, %387 : vector<2x128xf32>
    %389 = vector.extract_strided_slice %383 {offsets = [0, 128], sizes = [2, 128], strides = [1, 1]} : vector<2x256xf32> to vector<2x128xf32>
    %390 = arith.truncf %355 : vector<2x32xf32> to vector<2x32xbf16>
    %391 = arith.truncf %11 : vector<32x128xf32> to vector<32x128xbf16>
    %cst_87 = arith.constant dense<0.000000e+00> : vector<2x128xf32>
    %392 = tpu.matmul %390, %391, %cst_87 {dimension_numbers = #tpu.dot_dimension_numbers<[1], [0], [0], [1], [0, 0, 1, 1], [], []>} : vector<2x32xbf16>, vector<32x128xbf16>, vector<2x128xf32> -> vector<2x128xf32>
    %393 = arith.addf %389, %392 : vector<2x128xf32>
    %394 = arith.negf %388 : vector<2x128xf32>
    %395 = math.exp %394 : vector<2x128xf32>
    %cst_88 = arith.constant 1.000000e+00 : f32
    %396 = vector.broadcast %cst_88 : f32 to vector<2x128xf32>
    %397 = arith.addf %396, %395 : vector<2x128xf32>
    %398 = arith.divf %396, %397 : vector<2x128xf32>
    %399 = math.tanh %388 : vector<2x128xf32>
    %400 = vector.extract_strided_slice %398 {offsets = [0, 0], sizes = [2, 32], strides = [1, 1]} : vector<2x128xf32> to vector<2x32xf32>
    %401 = vector.extract_strided_slice %398 {offsets = [0, 32], sizes = [2, 32], strides = [1, 1]} : vector<2x128xf32> to vector<2x32xf32>
    %402 = vector.extract_strided_slice %399 {offsets = [0, 64], sizes = [2, 32], strides = [1, 1]} : vector<2x128xf32> to vector<2x32xf32>
    %403 = vector.extract_strided_slice %398 {offsets = [0, 96], sizes = [2, 32], strides = [1, 1]} : vector<2x128xf32> to vector<2x32xf32>
    %404 = arith.mulf %401, %333 : vector<2x32xf32>
    %405 = arith.mulf %400, %402 : vector<2x32xf32>
    %406 = arith.addf %404, %405 : vector<2x32xf32>
    %407 = math.tanh %406 : vector<2x32xf32>
    %408 = arith.mulf %403, %407 : vector<2x32xf32>
    %409 = vector.broadcast %373 : vector<2x1xf32> to vector<2x32xf32>
    %410 = arith.mulf %409, %408 : vector<2x32xf32>
    %cst_89 = arith.constant 1.000000e+00 : f32
    %411 = vector.broadcast %cst_89 : f32 to vector<2x1xf32>
    %412 = arith.subf %411, %373 : vector<2x1xf32>
    %413 = vector.broadcast %412 : vector<2x1xf32> to vector<2x32xf32>
    %414 = arith.mulf %413, %326 : vector<2x32xf32>
    %415 = arith.addf %410, %414 : vector<2x32xf32>
    %416 = vector.broadcast %373 : vector<2x1xf32> to vector<2x32xf32>
    %417 = arith.mulf %416, %406 : vector<2x32xf32>
    %cst_90 = arith.constant 1.000000e+00 : f32
    %418 = vector.broadcast %cst_90 : f32 to vector<2x1xf32>
    %419 = arith.subf %418, %373 : vector<2x1xf32>
    %420 = vector.broadcast %419 : vector<2x1xf32> to vector<2x32xf32>
    %421 = arith.mulf %420, %333 : vector<2x32xf32>
    %422 = arith.addf %417, %421 : vector<2x32xf32>
    %423 = arith.negf %393 : vector<2x128xf32>
    %424 = math.exp %423 : vector<2x128xf32>
    %cst_91 = arith.constant 1.000000e+00 : f32
    %425 = vector.broadcast %cst_91 : f32 to vector<2x128xf32>
    %426 = arith.addf %425, %424 : vector<2x128xf32>
    %427 = arith.divf %425, %426 : vector<2x128xf32>
    %428 = math.tanh %393 : vector<2x128xf32>
    %429 = vector.extract_strided_slice %427 {offsets = [0, 0], sizes = [2, 32], strides = [1, 1]} : vector<2x128xf32> to vector<2x32xf32>
    %430 = vector.extract_strided_slice %427 {offsets = [0, 32], sizes = [2, 32], strides = [1, 1]} : vector<2x128xf32> to vector<2x32xf32>
    %431 = vector.extract_strided_slice %428 {offsets = [0, 64], sizes = [2, 32], strides = [1, 1]} : vector<2x128xf32> to vector<2x32xf32>
    %432 = vector.extract_strided_slice %427 {offsets = [0, 96], sizes = [2, 32], strides = [1, 1]} : vector<2x128xf32> to vector<2x32xf32>
    %433 = arith.mulf %430, %362 : vector<2x32xf32>
    %434 = arith.mulf %429, %431 : vector<2x32xf32>
    %435 = arith.addf %433, %434 : vector<2x32xf32>
    %436 = math.tanh %435 : vector<2x32xf32>
    %437 = arith.mulf %432, %436 : vector<2x32xf32>
    %438 = vector.broadcast %377 : vector<2x1xf32> to vector<2x32xf32>
    %439 = arith.mulf %438, %437 : vector<2x32xf32>
    %cst_92 = arith.constant 1.000000e+00 : f32
    %440 = vector.broadcast %cst_92 : f32 to vector<2x1xf32>
    %441 = arith.subf %440, %377 : vector<2x1xf32>
    %442 = vector.broadcast %441 : vector<2x1xf32> to vector<2x32xf32>
    %443 = arith.mulf %442, %355 : vector<2x32xf32>
    %444 = arith.addf %439, %443 : vector<2x32xf32>
    %445 = vector.broadcast %377 : vector<2x1xf32> to vector<2x32xf32>
    %446 = arith.mulf %445, %435 : vector<2x32xf32>
    %cst_93 = arith.constant 1.000000e+00 : f32
    %447 = vector.broadcast %cst_93 : f32 to vector<2x1xf32>
    %448 = arith.subf %447, %377 : vector<2x1xf32>
    %449 = vector.broadcast %448 : vector<2x1xf32> to vector<2x32xf32>
    %450 = arith.mulf %449, %362 : vector<2x32xf32>
    %451 = arith.addf %446, %450 : vector<2x32xf32>
    %c2_i32_94 = arith.constant 2 : i32
    %452 = arith.muli %c4_i32, %c2_i32_94 : i32
    %453 = arith.index_cast %452 : i32 to index
    %c0_95 = arith.constant 0 : index
    %454 = vector.load %arg15[%453, %c0_95] : memref<16x32xf32, #tpu.memory_space<vmem>>, vector<2x32xf32>
    tpu.vector_store %arg15[%453, %c0_95], %415 {strides = array<i32>} : memref<16x32xf32, #tpu.memory_space<vmem>>, vector<2x32xf32>,
    %c2_i32_96 = arith.constant 2 : i32
    %455 = arith.muli %369, %c2_i32_96 : i32
    %456 = arith.index_cast %455 : i32 to index
    %c0_97 = arith.constant 0 : index
    %457 = vector.load %arg16[%456, %c0_97] : memref<16x32xf32, #tpu.memory_space<vmem>>, vector<2x32xf32>
    tpu.vector_store %arg16[%456, %c0_97], %444 {strides = array<i32>} : memref<16x32xf32, #tpu.memory_space<vmem>>, vector<2x32xf32>,
    %c5_i32 = arith.constant 5 : i32
    %c7_i32_98 = arith.constant 7 : i32
    %458 = arith.subi %c7_i32_98, %c5_i32 : i32
    %459 = vector.broadcast %c5_i32 : i32 to vector<2x1xi32>
    %460 = arith.cmpi sgt, %0, %459 : vector<2x1xi32>
    %461 = arith.extui %460 : vector<2x1xi1> to vector<2x1xi32>
    %462 = arith.sitofp %461 : vector<2x1xi32> to vector<2x1xf32>
    %463 = vector.broadcast %458 : i32 to vector<2x1xi32>
    %464 = arith.cmpi sgt, %0, %463 : vector<2x1xi32>
    %465 = arith.extui %464 : vector<2x1xi1> to vector<2x1xi32>
    %466 = arith.sitofp %465 : vector<2x1xi32> to vector<2x1xf32>
    %c2_i32_99 = arith.constant 2 : i32
    %467 = arith.muli %c5_i32, %c2_i32_99 : i32
    %468 = arith.index_cast %467 : i32 to index
    %c0_100 = arith.constant 0 : index
    %469 = vector.load %arg14[%468, %c0_100] : memref<16x256xf32, #tpu.memory_space<vmem>>, vector<2x256xf32>
    %c2_i32_101 = arith.constant 2 : i32
    %470 = arith.muli %458, %c2_i32_101 : i32
    %471 = arith.index_cast %470 : i32 to index
    %c0_102 = arith.constant 0 : index
    %472 = vector.load %arg14[%471, %c0_102] : memref<16x256xf32, #tpu.memory_space<vmem>>, vector<2x256xf32>
    %473 = vector.extract_strided_slice %469 {offsets = [0, 0], sizes = [2, 128], strides = [1, 1]} : vector<2x256xf32> to vector<2x128xf32>
    %474 = arith.truncf %415 : vector<2x32xf32> to vector<2x32xbf16>
    %475 = arith.truncf %10 : vector<32x128xf32> to vector<32x128xbf16>
    %cst_103 = arith.constant dense<0.000000e+00> : vector<2x128xf32>
    %476 = tpu.matmul %474, %475, %cst_103 {dimension_numbers = #tpu.dot_dimension_numbers<[1], [0], [0], [1], [0, 0, 1, 1], [], []>} : vector<2x32xbf16>, vector<32x128xbf16>, vector<2x128xf32> -> vector<2x128xf32>
    %477 = arith.addf %473, %476 : vector<2x128xf32>
    %478 = vector.extract_strided_slice %472 {offsets = [0, 128], sizes = [2, 128], strides = [1, 1]} : vector<2x256xf32> to vector<2x128xf32>
    %479 = arith.truncf %444 : vector<2x32xf32> to vector<2x32xbf16>
    %480 = arith.truncf %11 : vector<32x128xf32> to vector<32x128xbf16>
    %cst_104 = arith.constant dense<0.000000e+00> : vector<2x128xf32>
    %481 = tpu.matmul %479, %480, %cst_104 {dimension_numbers = #tpu.dot_dimension_numbers<[1], [0], [0], [1], [0, 0, 1, 1], [], []>} : vector<2x32xbf16>, vector<32x128xbf16>, vector<2x128xf32> -> vector<2x128xf32>
    %482 = arith.addf %478, %481 : vector<2x128xf32>
    %483 = arith.negf %477 : vector<2x128xf32>
    %484 = math.exp %483 : vector<2x128xf32>
    %cst_105 = arith.constant 1.000000e+00 : f32
    %485 = vector.broadcast %cst_105 : f32 to vector<2x128xf32>
    %486 = arith.addf %485, %484 : vector<2x128xf32>
    %487 = arith.divf %485, %486 : vector<2x128xf32>
    %488 = math.tanh %477 : vector<2x128xf32>
    %489 = vector.extract_strided_slice %487 {offsets = [0, 0], sizes = [2, 32], strides = [1, 1]} : vector<2x128xf32> to vector<2x32xf32>
    %490 = vector.extract_strided_slice %487 {offsets = [0, 32], sizes = [2, 32], strides = [1, 1]} : vector<2x128xf32> to vector<2x32xf32>
    %491 = vector.extract_strided_slice %488 {offsets = [0, 64], sizes = [2, 32], strides = [1, 1]} : vector<2x128xf32> to vector<2x32xf32>
    %492 = vector.extract_strided_slice %487 {offsets = [0, 96], sizes = [2, 32], strides = [1, 1]} : vector<2x128xf32> to vector<2x32xf32>
    %493 = arith.mulf %490, %422 : vector<2x32xf32>
    %494 = arith.mulf %489, %491 : vector<2x32xf32>
    %495 = arith.addf %493, %494 : vector<2x32xf32>
    %496 = math.tanh %495 : vector<2x32xf32>
    %497 = arith.mulf %492, %496 : vector<2x32xf32>
    %498 = vector.broadcast %462 : vector<2x1xf32> to vector<2x32xf32>
    %499 = arith.mulf %498, %497 : vector<2x32xf32>
    %cst_106 = arith.constant 1.000000e+00 : f32
    %500 = vector.broadcast %cst_106 : f32 to vector<2x1xf32>
    %501 = arith.subf %500, %462 : vector<2x1xf32>
    %502 = vector.broadcast %501 : vector<2x1xf32> to vector<2x32xf32>
    %503 = arith.mulf %502, %415 : vector<2x32xf32>
    %504 = arith.addf %499, %503 : vector<2x32xf32>
    %505 = vector.broadcast %462 : vector<2x1xf32> to vector<2x32xf32>
    %506 = arith.mulf %505, %495 : vector<2x32xf32>
    %cst_107 = arith.constant 1.000000e+00 : f32
    %507 = vector.broadcast %cst_107 : f32 to vector<2x1xf32>
    %508 = arith.subf %507, %462 : vector<2x1xf32>
    %509 = vector.broadcast %508 : vector<2x1xf32> to vector<2x32xf32>
    %510 = arith.mulf %509, %422 : vector<2x32xf32>
    %511 = arith.addf %506, %510 : vector<2x32xf32>
    %512 = arith.negf %482 : vector<2x128xf32>
    %513 = math.exp %512 : vector<2x128xf32>
    %cst_108 = arith.constant 1.000000e+00 : f32
    %514 = vector.broadcast %cst_108 : f32 to vector<2x128xf32>
    %515 = arith.addf %514, %513 : vector<2x128xf32>
    %516 = arith.divf %514, %515 : vector<2x128xf32>
    %517 = math.tanh %482 : vector<2x128xf32>
    %518 = vector.extract_strided_slice %516 {offsets = [0, 0], sizes = [2, 32], strides = [1, 1]} : vector<2x128xf32> to vector<2x32xf32>
    %519 = vector.extract_strided_slice %516 {offsets = [0, 32], sizes = [2, 32], strides = [1, 1]} : vector<2x128xf32> to vector<2x32xf32>
    %520 = vector.extract_strided_slice %517 {offsets = [0, 64], sizes = [2, 32], strides = [1, 1]} : vector<2x128xf32> to vector<2x32xf32>
    %521 = vector.extract_strided_slice %516 {offsets = [0, 96], sizes = [2, 32], strides = [1, 1]} : vector<2x128xf32> to vector<2x32xf32>
    %522 = arith.mulf %519, %451 : vector<2x32xf32>
    %523 = arith.mulf %518, %520 : vector<2x32xf32>
    %524 = arith.addf %522, %523 : vector<2x32xf32>
    %525 = math.tanh %524 : vector<2x32xf32>
    %526 = arith.mulf %521, %525 : vector<2x32xf32>
    %527 = vector.broadcast %466 : vector<2x1xf32> to vector<2x32xf32>
    %528 = arith.mulf %527, %526 : vector<2x32xf32>
    %cst_109 = arith.constant 1.000000e+00 : f32
    %529 = vector.broadcast %cst_109 : f32 to vector<2x1xf32>
    %530 = arith.subf %529, %466 : vector<2x1xf32>
    %531 = vector.broadcast %530 : vector<2x1xf32> to vector<2x32xf32>
    %532 = arith.mulf %531, %444 : vector<2x32xf32>
    %533 = arith.addf %528, %532 : vector<2x32xf32>
    %534 = vector.broadcast %466 : vector<2x1xf32> to vector<2x32xf32>
    %535 = arith.mulf %534, %524 : vector<2x32xf32>
    %cst_110 = arith.constant 1.000000e+00 : f32
    %536 = vector.broadcast %cst_110 : f32 to vector<2x1xf32>
    %537 = arith.subf %536, %466 : vector<2x1xf32>
    %538 = vector.broadcast %537 : vector<2x1xf32> to vector<2x32xf32>
    %539 = arith.mulf %538, %451 : vector<2x32xf32>
    %540 = arith.addf %535, %539 : vector<2x32xf32>
    %c2_i32_111 = arith.constant 2 : i32
    %541 = arith.muli %c5_i32, %c2_i32_111 : i32
    %542 = arith.index_cast %541 : i32 to index
    %c0_112 = arith.constant 0 : index
    %543 = vector.load %arg15[%542, %c0_112] : memref<16x32xf32, #tpu.memory_space<vmem>>, vector<2x32xf32>
    tpu.vector_store %arg15[%542, %c0_112], %504 {strides = array<i32>} : memref<16x32xf32, #tpu.memory_space<vmem>>, vector<2x32xf32>,
    %c2_i32_113 = arith.constant 2 : i32
    %544 = arith.muli %458, %c2_i32_113 : i32
    %545 = arith.index_cast %544 : i32 to index
    %c0_114 = arith.constant 0 : index
    %546 = vector.load %arg16[%545, %c0_114] : memref<16x32xf32, #tpu.memory_space<vmem>>, vector<2x32xf32>
    tpu.vector_store %arg16[%545, %c0_114], %533 {strides = array<i32>} : memref<16x32xf32, #tpu.memory_space<vmem>>, vector<2x32xf32>,
    %c6_i32 = arith.constant 6 : i32
    %c7_i32_115 = arith.constant 7 : i32
    %547 = arith.subi %c7_i32_115, %c6_i32 : i32
    %548 = vector.broadcast %c6_i32 : i32 to vector<2x1xi32>
    %549 = arith.cmpi sgt, %0, %548 : vector<2x1xi32>
    %550 = arith.extui %549 : vector<2x1xi1> to vector<2x1xi32>
    %551 = arith.sitofp %550 : vector<2x1xi32> to vector<2x1xf32>
    %552 = vector.broadcast %547 : i32 to vector<2x1xi32>
    %553 = arith.cmpi sgt, %0, %552 : vector<2x1xi32>
    %554 = arith.extui %553 : vector<2x1xi1> to vector<2x1xi32>
    %555 = arith.sitofp %554 : vector<2x1xi32> to vector<2x1xf32>
    %c2_i32_116 = arith.constant 2 : i32
    %556 = arith.muli %c6_i32, %c2_i32_116 : i32
    %557 = arith.index_cast %556 : i32 to index
    %c0_117 = arith.constant 0 : index
    %558 = vector.load %arg14[%557, %c0_117] : memref<16x256xf32, #tpu.memory_space<vmem>>, vector<2x256xf32>
    %c2_i32_118 = arith.constant 2 : i32
    %559 = arith.muli %547, %c2_i32_118 : i32
    %560 = arith.index_cast %559 : i32 to index
    %c0_119 = arith.constant 0 : index
    %561 = vector.load %arg14[%560, %c0_119] : memref<16x256xf32, #tpu.memory_space<vmem>>, vector<2x256xf32>
    %562 = vector.extract_strided_slice %558 {offsets = [0, 0], sizes = [2, 128], strides = [1, 1]} : vector<2x256xf32> to vector<2x128xf32>
    %563 = arith.truncf %504 : vector<2x32xf32> to vector<2x32xbf16>
    %564 = arith.truncf %10 : vector<32x128xf32> to vector<32x128xbf16>
    %cst_120 = arith.constant dense<0.000000e+00> : vector<2x128xf32>
    %565 = tpu.matmul %563, %564, %cst_120 {dimension_numbers = #tpu.dot_dimension_numbers<[1], [0], [0], [1], [0, 0, 1, 1], [], []>} : vector<2x32xbf16>, vector<32x128xbf16>, vector<2x128xf32> -> vector<2x128xf32>
    %566 = arith.addf %562, %565 : vector<2x128xf32>
    %567 = vector.extract_strided_slice %561 {offsets = [0, 128], sizes = [2, 128], strides = [1, 1]} : vector<2x256xf32> to vector<2x128xf32>
    %568 = arith.truncf %533 : vector<2x32xf32> to vector<2x32xbf16>
    %569 = arith.truncf %11 : vector<32x128xf32> to vector<32x128xbf16>
    %cst_121 = arith.constant dense<0.000000e+00> : vector<2x128xf32>
    %570 = tpu.matmul %568, %569, %cst_121 {dimension_numbers = #tpu.dot_dimension_numbers<[1], [0], [0], [1], [0, 0, 1, 1], [], []>} : vector<2x32xbf16>, vector<32x128xbf16>, vector<2x128xf32> -> vector<2x128xf32>
    %571 = arith.addf %567, %570 : vector<2x128xf32>
    %572 = arith.negf %566 : vector<2x128xf32>
    %573 = math.exp %572 : vector<2x128xf32>
    %cst_122 = arith.constant 1.000000e+00 : f32
    %574 = vector.broadcast %cst_122 : f32 to vector<2x128xf32>
    %575 = arith.addf %574, %573 : vector<2x128xf32>
    %576 = arith.divf %574, %575 : vector<2x128xf32>
    %577 = math.tanh %566 : vector<2x128xf32>
    %578 = vector.extract_strided_slice %576 {offsets = [0, 0], sizes = [2, 32], strides = [1, 1]} : vector<2x128xf32> to vector<2x32xf32>
    %579 = vector.extract_strided_slice %576 {offsets = [0, 32], sizes = [2, 32], strides = [1, 1]} : vector<2x128xf32> to vector<2x32xf32>
    %580 = vector.extract_strided_slice %577 {offsets = [0, 64], sizes = [2, 32], strides = [1, 1]} : vector<2x128xf32> to vector<2x32xf32>
    %581 = vector.extract_strided_slice %576 {offsets = [0, 96], sizes = [2, 32], strides = [1, 1]} : vector<2x128xf32> to vector<2x32xf32>
    %582 = arith.mulf %579, %511 : vector<2x32xf32>
    %583 = arith.mulf %578, %580 : vector<2x32xf32>
    %584 = arith.addf %582, %583 : vector<2x32xf32>
    %585 = math.tanh %584 : vector<2x32xf32>
    %586 = arith.mulf %581, %585 : vector<2x32xf32>
    %587 = vector.broadcast %551 : vector<2x1xf32> to vector<2x32xf32>
    %588 = arith.mulf %587, %586 : vector<2x32xf32>
    %cst_123 = arith.constant 1.000000e+00 : f32
    %589 = vector.broadcast %cst_123 : f32 to vector<2x1xf32>
    %590 = arith.subf %589, %551 : vector<2x1xf32>
    %591 = vector.broadcast %590 : vector<2x1xf32> to vector<2x32xf32>
    %592 = arith.mulf %591, %504 : vector<2x32xf32>
    %593 = arith.addf %588, %592 : vector<2x32xf32>
    %594 = vector.broadcast %551 : vector<2x1xf32> to vector<2x32xf32>
    %595 = arith.mulf %594, %584 : vector<2x32xf32>
    %cst_124 = arith.constant 1.000000e+00 : f32
    %596 = vector.broadcast %cst_124 : f32 to vector<2x1xf32>
    %597 = arith.subf %596, %551 : vector<2x1xf32>
    %598 = vector.broadcast %597 : vector<2x1xf32> to vector<2x32xf32>
    %599 = arith.mulf %598, %511 : vector<2x32xf32>
    %600 = arith.addf %595, %599 : vector<2x32xf32>
    %601 = arith.negf %571 : vector<2x128xf32>
    %602 = math.exp %601 : vector<2x128xf32>
    %cst_125 = arith.constant 1.000000e+00 : f32
    %603 = vector.broadcast %cst_125 : f32 to vector<2x128xf32>
    %604 = arith.addf %603, %602 : vector<2x128xf32>
    %605 = arith.divf %603, %604 : vector<2x128xf32>
    %606 = math.tanh %571 : vector<2x128xf32>
    %607 = vector.extract_strided_slice %605 {offsets = [0, 0], sizes = [2, 32], strides = [1, 1]} : vector<2x128xf32> to vector<2x32xf32>
    %608 = vector.extract_strided_slice %605 {offsets = [0, 32], sizes = [2, 32], strides = [1, 1]} : vector<2x128xf32> to vector<2x32xf32>
    %609 = vector.extract_strided_slice %606 {offsets = [0, 64], sizes = [2, 32], strides = [1, 1]} : vector<2x128xf32> to vector<2x32xf32>
    %610 = vector.extract_strided_slice %605 {offsets = [0, 96], sizes = [2, 32], strides = [1, 1]} : vector<2x128xf32> to vector<2x32xf32>
    %611 = arith.mulf %608, %540 : vector<2x32xf32>
    %612 = arith.mulf %607, %609 : vector<2x32xf32>
    %613 = arith.addf %611, %612 : vector<2x32xf32>
    %614 = math.tanh %613 : vector<2x32xf32>
    %615 = arith.mulf %610, %614 : vector<2x32xf32>
    %616 = vector.broadcast %555 : vector<2x1xf32> to vector<2x32xf32>
    %617 = arith.mulf %616, %615 : vector<2x32xf32>
    %cst_126 = arith.constant 1.000000e+00 : f32
    %618 = vector.broadcast %cst_126 : f32 to vector<2x1xf32>
    %619 = arith.subf %618, %555 : vector<2x1xf32>
    %620 = vector.broadcast %619 : vector<2x1xf32> to vector<2x32xf32>
    %621 = arith.mulf %620, %533 : vector<2x32xf32>
    %622 = arith.addf %617, %621 : vector<2x32xf32>
    %623 = vector.broadcast %555 : vector<2x1xf32> to vector<2x32xf32>
    %624 = arith.mulf %623, %613 : vector<2x32xf32>
    %cst_127 = arith.constant 1.000000e+00 : f32
    %625 = vector.broadcast %cst_127 : f32 to vector<2x1xf32>
    %626 = arith.subf %625, %555 : vector<2x1xf32>
    %627 = vector.broadcast %626 : vector<2x1xf32> to vector<2x32xf32>
    %628 = arith.mulf %627, %540 : vector<2x32xf32>
    %629 = arith.addf %624, %628 : vector<2x32xf32>
    %c2_i32_128 = arith.constant 2 : i32
    %630 = arith.muli %c6_i32, %c2_i32_128 : i32
    %631 = arith.index_cast %630 : i32 to index
    %c0_129 = arith.constant 0 : index
    %632 = vector.load %arg15[%631, %c0_129] : memref<16x32xf32, #tpu.memory_space<vmem>>, vector<2x32xf32>
    tpu.vector_store %arg15[%631, %c0_129], %593 {strides = array<i32>} : memref<16x32xf32, #tpu.memory_space<vmem>>, vector<2x32xf32>,
    %c2_i32_130 = arith.constant 2 : i32
    %633 = arith.muli %547, %c2_i32_130 : i32
    %634 = arith.index_cast %633 : i32 to index
    %c0_131 = arith.constant 0 : index
    %635 = vector.load %arg16[%634, %c0_131] : memref<16x32xf32, #tpu.memory_space<vmem>>, vector<2x32xf32>
    tpu.vector_store %arg16[%634, %c0_131], %622 {strides = array<i32>} : memref<16x32xf32, #tpu.memory_space<vmem>>, vector<2x32xf32>,
    %c7_i32_132 = arith.constant 7 : i32
    %c7_i32_133 = arith.constant 7 : i32
    %636 = arith.subi %c7_i32_133, %c7_i32_132 : i32
    %637 = vector.broadcast %c7_i32_132 : i32 to vector<2x1xi32>
    %638 = arith.cmpi sgt, %0, %637 : vector<2x1xi32>
    %639 = arith.extui %638 : vector<2x1xi1> to vector<2x1xi32>
    %640 = arith.sitofp %639 : vector<2x1xi32> to vector<2x1xf32>
    %641 = vector.broadcast %636 : i32 to vector<2x1xi32>
    %642 = arith.cmpi sgt, %0, %641 : vector<2x1xi32>
    %643 = arith.extui %642 : vector<2x1xi1> to vector<2x1xi32>
    %644 = arith.sitofp %643 : vector<2x1xi32> to vector<2x1xf32>
    %c2_i32_134 = arith.constant 2 : i32
    %645 = arith.muli %c7_i32_132, %c2_i32_134 : i32
    %646 = arith.index_cast %645 : i32 to index
    %c0_135 = arith.constant 0 : index
    %647 = vector.load %arg14[%646, %c0_135] : memref<16x256xf32, #tpu.memory_space<vmem>>, vector<2x256xf32>
    %c2_i32_136 = arith.constant 2 : i32
    %648 = arith.muli %636, %c2_i32_136 : i32
    %649 = arith.index_cast %648 : i32 to index
    %c0_137 = arith.constant 0 : index
    %650 = vector.load %arg14[%649, %c0_137] : memref<16x256xf32, #tpu.memory_space<vmem>>, vector<2x256xf32>
    %651 = vector.extract_strided_slice %647 {offsets = [0, 0], sizes = [2, 128], strides = [1, 1]} : vector<2x256xf32> to vector<2x128xf32>
    %652 = arith.truncf %593 : vector<2x32xf32> to vector<2x32xbf16>
    %653 = arith.truncf %10 : vector<32x128xf32> to vector<32x128xbf16>
    %cst_138 = arith.constant dense<0.000000e+00> : vector<2x128xf32>
    %654 = tpu.matmul %652, %653, %cst_138 {dimension_numbers = #tpu.dot_dimension_numbers<[1], [0], [0], [1], [0, 0, 1, 1], [], []>} : vector<2x32xbf16>, vector<32x128xbf16>, vector<2x128xf32> -> vector<2x128xf32>
    %655 = arith.addf %651, %654 : vector<2x128xf32>
    %656 = vector.extract_strided_slice %650 {offsets = [0, 128], sizes = [2, 128], strides = [1, 1]} : vector<2x256xf32> to vector<2x128xf32>
    %657 = arith.truncf %622 : vector<2x32xf32> to vector<2x32xbf16>
    %658 = arith.truncf %11 : vector<32x128xf32> to vector<32x128xbf16>
    %cst_139 = arith.constant dense<0.000000e+00> : vector<2x128xf32>
    %659 = tpu.matmul %657, %658, %cst_139 {dimension_numbers = #tpu.dot_dimension_numbers<[1], [0], [0], [1], [0, 0, 1, 1], [], []>} : vector<2x32xbf16>, vector<32x128xbf16>, vector<2x128xf32> -> vector<2x128xf32>
    %660 = arith.addf %656, %659 : vector<2x128xf32>
    %661 = arith.negf %655 : vector<2x128xf32>
    %662 = math.exp %661 : vector<2x128xf32>
    %cst_140 = arith.constant 1.000000e+00 : f32
    %663 = vector.broadcast %cst_140 : f32 to vector<2x128xf32>
    %664 = arith.addf %663, %662 : vector<2x128xf32>
    %665 = arith.divf %663, %664 : vector<2x128xf32>
    %666 = math.tanh %655 : vector<2x128xf32>
    %667 = vector.extract_strided_slice %665 {offsets = [0, 0], sizes = [2, 32], strides = [1, 1]} : vector<2x128xf32> to vector<2x32xf32>
    %668 = vector.extract_strided_slice %665 {offsets = [0, 32], sizes = [2, 32], strides = [1, 1]} : vector<2x128xf32> to vector<2x32xf32>
    %669 = vector.extract_strided_slice %666 {offsets = [0, 64], sizes = [2, 32], strides = [1, 1]} : vector<2x128xf32> to vector<2x32xf32>
    %670 = vector.extract_strided_slice %665 {offsets = [0, 96], sizes = [2, 32], strides = [1, 1]} : vector<2x128xf32> to vector<2x32xf32>
    %671 = arith.mulf %668, %600 : vector<2x32xf32>
    %672 = arith.mulf %667, %669 : vector<2x32xf32>
    %673 = arith.addf %671, %672 : vector<2x32xf32>
    %674 = math.tanh %673 : vector<2x32xf32>
    %675 = arith.mulf %670, %674 : vector<2x32xf32>
    %676 = vector.broadcast %640 : vector<2x1xf32> to vector<2x32xf32>
    %677 = arith.mulf %676, %675 : vector<2x32xf32>
    %cst_141 = arith.constant 1.000000e+00 : f32
    %678 = vector.broadcast %cst_141 : f32 to vector<2x1xf32>
    %679 = arith.subf %678, %640 : vector<2x1xf32>
    %680 = vector.broadcast %679 : vector<2x1xf32> to vector<2x32xf32>
    %681 = arith.mulf %680, %593 : vector<2x32xf32>
    %682 = arith.addf %677, %681 : vector<2x32xf32>
    %683 = vector.broadcast %640 : vector<2x1xf32> to vector<2x32xf32>
    %684 = arith.mulf %683, %673 : vector<2x32xf32>
    %cst_142 = arith.constant 1.000000e+00 : f32
    %685 = vector.broadcast %cst_142 : f32 to vector<2x1xf32>
    %686 = arith.subf %685, %640 : vector<2x1xf32>
    %687 = vector.broadcast %686 : vector<2x1xf32> to vector<2x32xf32>
    %688 = arith.mulf %687, %600 : vector<2x32xf32>
    %689 = arith.addf %684, %688 : vector<2x32xf32>
    %690 = arith.negf %660 : vector<2x128xf32>
    %691 = math.exp %690 : vector<2x128xf32>
    %cst_143 = arith.constant 1.000000e+00 : f32
    %692 = vector.broadcast %cst_143 : f32 to vector<2x128xf32>
    %693 = arith.addf %692, %691 : vector<2x128xf32>
    %694 = arith.divf %692, %693 : vector<2x128xf32>
    %695 = math.tanh %660 : vector<2x128xf32>
    %696 = vector.extract_strided_slice %694 {offsets = [0, 0], sizes = [2, 32], strides = [1, 1]} : vector<2x128xf32> to vector<2x32xf32>
    %697 = vector.extract_strided_slice %694 {offsets = [0, 32], sizes = [2, 32], strides = [1, 1]} : vector<2x128xf32> to vector<2x32xf32>
    %698 = vector.extract_strided_slice %695 {offsets = [0, 64], sizes = [2, 32], strides = [1, 1]} : vector<2x128xf32> to vector<2x32xf32>
    %699 = vector.extract_strided_slice %694 {offsets = [0, 96], sizes = [2, 32], strides = [1, 1]} : vector<2x128xf32> to vector<2x32xf32>
    %700 = arith.mulf %697, %629 : vector<2x32xf32>
    %701 = arith.mulf %696, %698 : vector<2x32xf32>
    %702 = arith.addf %700, %701 : vector<2x32xf32>
    %703 = math.tanh %702 : vector<2x32xf32>
    %704 = arith.mulf %699, %703 : vector<2x32xf32>
    %705 = vector.broadcast %644 : vector<2x1xf32> to vector<2x32xf32>
    %706 = arith.mulf %705, %704 : vector<2x32xf32>
    %cst_144 = arith.constant 1.000000e+00 : f32
    %707 = vector.broadcast %cst_144 : f32 to vector<2x1xf32>
    %708 = arith.subf %707, %644 : vector<2x1xf32>
    %709 = vector.broadcast %708 : vector<2x1xf32> to vector<2x32xf32>
    %710 = arith.mulf %709, %622 : vector<2x32xf32>
    %711 = arith.addf %706, %710 : vector<2x32xf32>
    %712 = vector.broadcast %644 : vector<2x1xf32> to vector<2x32xf32>
    %713 = arith.mulf %712, %702 : vector<2x32xf32>
    %cst_145 = arith.constant 1.000000e+00 : f32
    %714 = vector.broadcast %cst_145 : f32 to vector<2x1xf32>
    %715 = arith.subf %714, %644 : vector<2x1xf32>
    %716 = vector.broadcast %715 : vector<2x1xf32> to vector<2x32xf32>
    %717 = arith.mulf %716, %629 : vector<2x32xf32>
    %718 = arith.addf %713, %717 : vector<2x32xf32>
    %c2_i32_146 = arith.constant 2 : i32
    %719 = arith.muli %c7_i32_132, %c2_i32_146 : i32
    %720 = arith.index_cast %719 : i32 to index
    %c0_147 = arith.constant 0 : index
    %721 = vector.load %arg15[%720, %c0_147] : memref<16x32xf32, #tpu.memory_space<vmem>>, vector<2x32xf32>
    tpu.vector_store %arg15[%720, %c0_147], %682 {strides = array<i32>} : memref<16x32xf32, #tpu.memory_space<vmem>>, vector<2x32xf32>,
    %c2_i32_148 = arith.constant 2 : i32
    %722 = arith.muli %636, %c2_i32_148 : i32
    %723 = arith.index_cast %722 : i32 to index
    %c0_149 = arith.constant 0 : index
    %724 = vector.load %arg16[%723, %c0_149] : memref<16x32xf32, #tpu.memory_space<vmem>>, vector<2x32xf32>
    tpu.vector_store %arg16[%723, %c0_149], %711 {strides = array<i32>} : memref<16x32xf32, #tpu.memory_space<vmem>>, vector<2x32xf32>,
    %c8_i32 = arith.constant 8 : i32
    %c0_150 = arith.constant 0 : index
    %c0_151 = arith.constant 0 : index
    %725 = vector.load %arg15[%c0_150, %c0_151] : memref<16x32xf32, #tpu.memory_space<vmem>>, vector<16x32xf32>
    %c0_152 = arith.constant 0 : index
    %c0_153 = arith.constant 0 : index
    %726 = vector.load %arg7[%c0_152, %c0_153] : memref<64x256xf32, #tpu.memory_space<vmem>>, vector<32x256xf32>
    %727 = arith.truncf %725 : vector<16x32xf32> to vector<16x32xbf16>
    %728 = arith.truncf %726 : vector<32x256xf32> to vector<32x256xbf16>
    %cst_154 = arith.constant dense<0.000000e+00> : vector<16x256xf32>
    %729 = tpu.matmul %727, %728, %cst_154 {dimension_numbers = #tpu.dot_dimension_numbers<[1], [0], [0], [1], [0, 0, 1, 1], [], []>} : vector<16x32xbf16>, vector<32x256xbf16>, vector<16x256xf32> -> vector<16x256xf32>
    %c0_155 = arith.constant 0 : index
    %c0_156 = arith.constant 0 : index
    %730 = vector.load %arg16[%c0_155, %c0_156] : memref<16x32xf32, #tpu.memory_space<vmem>>, vector<16x32xf32>
    %c32 = arith.constant 32 : index
    %c0_157 = arith.constant 0 : index
    %731 = vector.load %arg7[%c32, %c0_157] : memref<64x256xf32, #tpu.memory_space<vmem>>, vector<32x256xf32>
    %732 = arith.truncf %730 : vector<16x32xf32> to vector<16x32xbf16>
    %733 = arith.truncf %731 : vector<32x256xf32> to vector<32x256xbf16>
    %cst_158 = arith.constant dense<0.000000e+00> : vector<16x256xf32>
    %734 = tpu.matmul %732, %733, %cst_158 {dimension_numbers = #tpu.dot_dimension_numbers<[1], [0], [0], [1], [0, 0, 1, 1], [], []>} : vector<16x32xbf16>, vector<32x256xbf16>, vector<16x256xf32> -> vector<16x256xf32>
    %735 = arith.addf %729, %734 : vector<16x256xf32>
    %c0_159 = arith.constant 0 : index
    %c0_160 = arith.constant 0 : index
    %736 = vector.load %arg8[%c0_159, %c0_160] : memref<1x256xf32, #tpu.memory_space<vmem>>, vector<1x256xf32>
    %737 = vector.broadcast %736 : vector<1x256xf32> to vector<16x256xf32>
    %738 = arith.addf %735, %737 : vector<16x256xf32>
    %c0_161 = arith.constant 0 : index
    %c0_162 = arith.constant 0 : index
    %739 = vector.load %arg14[%c0_161, %c0_162] : memref<16x256xf32, #tpu.memory_space<vmem>>, vector<16x256xf32>
    tpu.vector_store %arg14[%c0_161, %c0_162], %738 {strides = array<i32>} : memref<16x256xf32, #tpu.memory_space<vmem>>, vector<16x256xf32>,
    %c0_163 = arith.constant 0 : index
    %c0_164 = arith.constant 0 : index
    %740 = vector.load %arg9[%c0_163, %c0_164] : memref<32x128xf32, #tpu.memory_space<vmem>>, vector<32x128xf32>
    %c0_165 = arith.constant 0 : index
    %c0_166 = arith.constant 0 : index
    %741 = vector.load %arg10[%c0_165, %c0_166] : memref<32x128xf32, #tpu.memory_space<vmem>>, vector<32x128xf32>
    %c0_i32_167 = arith.constant 0 : i32
    %c7_i32_168 = arith.constant 7 : i32
    %742 = arith.subi %c7_i32_168, %c0_i32_167 : i32
    %743 = vector.broadcast %c0_i32_167 : i32 to vector<2x1xi32>
    %744 = arith.cmpi sgt, %0, %743 : vector<2x1xi32>
    %745 = arith.extui %744 : vector<2x1xi1> to vector<2x1xi32>
    %746 = arith.sitofp %745 : vector<2x1xi32> to vector<2x1xf32>
    %747 = vector.broadcast %742 : i32 to vector<2x1xi32>
    %748 = arith.cmpi sgt, %0, %747 : vector<2x1xi32>
    %749 = arith.extui %748 : vector<2x1xi1> to vector<2x1xi32>
    %750 = arith.sitofp %749 : vector<2x1xi32> to vector<2x1xf32>
    %c2_i32_169 = arith.constant 2 : i32
    %751 = arith.muli %c0_i32_167, %c2_i32_169 : i32
    %752 = arith.index_cast %751 : i32 to index
    %c0_170 = arith.constant 0 : index
    %753 = vector.load %arg14[%752, %c0_170] : memref<16x256xf32, #tpu.memory_space<vmem>>, vector<2x256xf32>
    %c2_i32_171 = arith.constant 2 : i32
    %754 = arith.muli %742, %c2_i32_171 : i32
    %755 = arith.index_cast %754 : i32 to index
    %c0_172 = arith.constant 0 : index
    %756 = vector.load %arg14[%755, %c0_172] : memref<16x256xf32, #tpu.memory_space<vmem>>, vector<2x256xf32>
    %757 = vector.extract_strided_slice %753 {offsets = [0, 0], sizes = [2, 128], strides = [1, 1]} : vector<2x256xf32> to vector<2x128xf32>
    %758 = arith.truncf %12 : vector<2x32xf32> to vector<2x32xbf16>
    %759 = arith.truncf %740 : vector<32x128xf32> to vector<32x128xbf16>
    %cst_173 = arith.constant dense<0.000000e+00> : vector<2x128xf32>
    %760 = tpu.matmul %758, %759, %cst_173 {dimension_numbers = #tpu.dot_dimension_numbers<[1], [0], [0], [1], [0, 0, 1, 1], [], []>} : vector<2x32xbf16>, vector<32x128xbf16>, vector<2x128xf32> -> vector<2x128xf32>
    %761 = arith.addf %757, %760 : vector<2x128xf32>
    %762 = vector.extract_strided_slice %756 {offsets = [0, 128], sizes = [2, 128], strides = [1, 1]} : vector<2x256xf32> to vector<2x128xf32>
    %763 = arith.truncf %12 : vector<2x32xf32> to vector<2x32xbf16>
    %764 = arith.truncf %741 : vector<32x128xf32> to vector<32x128xbf16>
    %cst_174 = arith.constant dense<0.000000e+00> : vector<2x128xf32>
    %765 = tpu.matmul %763, %764, %cst_174 {dimension_numbers = #tpu.dot_dimension_numbers<[1], [0], [0], [1], [0, 0, 1, 1], [], []>} : vector<2x32xbf16>, vector<32x128xbf16>, vector<2x128xf32> -> vector<2x128xf32>
    %766 = arith.addf %762, %765 : vector<2x128xf32>
    %767 = arith.negf %761 : vector<2x128xf32>
    %768 = math.exp %767 : vector<2x128xf32>
    %cst_175 = arith.constant 1.000000e+00 : f32
    %769 = vector.broadcast %cst_175 : f32 to vector<2x128xf32>
    %770 = arith.addf %769, %768 : vector<2x128xf32>
    %771 = arith.divf %769, %770 : vector<2x128xf32>
    %772 = math.tanh %761 : vector<2x128xf32>
    %773 = vector.extract_strided_slice %771 {offsets = [0, 0], sizes = [2, 32], strides = [1, 1]} : vector<2x128xf32> to vector<2x32xf32>
    %774 = vector.extract_strided_slice %771 {offsets = [0, 32], sizes = [2, 32], strides = [1, 1]} : vector<2x128xf32> to vector<2x32xf32>
    %775 = vector.extract_strided_slice %772 {offsets = [0, 64], sizes = [2, 32], strides = [1, 1]} : vector<2x128xf32> to vector<2x32xf32>
    %776 = vector.extract_strided_slice %771 {offsets = [0, 96], sizes = [2, 32], strides = [1, 1]} : vector<2x128xf32> to vector<2x32xf32>
    %777 = arith.mulf %774, %12 : vector<2x32xf32>
    %778 = arith.mulf %773, %775 : vector<2x32xf32>
    %779 = arith.addf %777, %778 : vector<2x32xf32>
    %780 = math.tanh %779 : vector<2x32xf32>
    %781 = arith.mulf %776, %780 : vector<2x32xf32>
    %782 = vector.broadcast %746 : vector<2x1xf32> to vector<2x32xf32>
    %783 = arith.mulf %782, %781 : vector<2x32xf32>
    %cst_176 = arith.constant 1.000000e+00 : f32
    %784 = vector.broadcast %cst_176 : f32 to vector<2x1xf32>
    %785 = arith.subf %784, %746 : vector<2x1xf32>
    %786 = vector.broadcast %785 : vector<2x1xf32> to vector<2x32xf32>
    %787 = arith.mulf %786, %12 : vector<2x32xf32>
    %788 = arith.addf %783, %787 : vector<2x32xf32>
    %789 = vector.broadcast %746 : vector<2x1xf32> to vector<2x32xf32>
    %790 = arith.mulf %789, %779 : vector<2x32xf32>
    %cst_177 = arith.constant 1.000000e+00 : f32
    %791 = vector.broadcast %cst_177 : f32 to vector<2x1xf32>
    %792 = arith.subf %791, %746 : vector<2x1xf32>
    %793 = vector.broadcast %792 : vector<2x1xf32> to vector<2x32xf32>
    %794 = arith.mulf %793, %12 : vector<2x32xf32>
    %795 = arith.addf %790, %794 : vector<2x32xf32>
    %796 = arith.negf %766 : vector<2x128xf32>
    %797 = math.exp %796 : vector<2x128xf32>
    %cst_178 = arith.constant 1.000000e+00 : f32
    %798 = vector.broadcast %cst_178 : f32 to vector<2x128xf32>
    %799 = arith.addf %798, %797 : vector<2x128xf32>
    %800 = arith.divf %798, %799 : vector<2x128xf32>
    %801 = math.tanh %766 : vector<2x128xf32>
    %802 = vector.extract_strided_slice %800 {offsets = [0, 0], sizes = [2, 32], strides = [1, 1]} : vector<2x128xf32> to vector<2x32xf32>
    %803 = vector.extract_strided_slice %800 {offsets = [0, 32], sizes = [2, 32], strides = [1, 1]} : vector<2x128xf32> to vector<2x32xf32>
    %804 = vector.extract_strided_slice %801 {offsets = [0, 64], sizes = [2, 32], strides = [1, 1]} : vector<2x128xf32> to vector<2x32xf32>
    %805 = vector.extract_strided_slice %800 {offsets = [0, 96], sizes = [2, 32], strides = [1, 1]} : vector<2x128xf32> to vector<2x32xf32>
    %806 = arith.mulf %803, %12 : vector<2x32xf32>
    %807 = arith.mulf %802, %804 : vector<2x32xf32>
    %808 = arith.addf %806, %807 : vector<2x32xf32>
    %809 = math.tanh %808 : vector<2x32xf32>
    %810 = arith.mulf %805, %809 : vector<2x32xf32>
    %811 = vector.broadcast %750 : vector<2x1xf32> to vector<2x32xf32>
    %812 = arith.mulf %811, %810 : vector<2x32xf32>
    %cst_179 = arith.constant 1.000000e+00 : f32
    %813 = vector.broadcast %cst_179 : f32 to vector<2x1xf32>
    %814 = arith.subf %813, %750 : vector<2x1xf32>
    %815 = vector.broadcast %814 : vector<2x1xf32> to vector<2x32xf32>
    %816 = arith.mulf %815, %12 : vector<2x32xf32>
    %817 = arith.addf %812, %816 : vector<2x32xf32>
    %818 = vector.broadcast %750 : vector<2x1xf32> to vector<2x32xf32>
    %819 = arith.mulf %818, %808 : vector<2x32xf32>
    %cst_180 = arith.constant 1.000000e+00 : f32
    %820 = vector.broadcast %cst_180 : f32 to vector<2x1xf32>
    %821 = arith.subf %820, %750 : vector<2x1xf32>
    %822 = vector.broadcast %821 : vector<2x1xf32> to vector<2x32xf32>
    %823 = arith.mulf %822, %12 : vector<2x32xf32>
    %824 = arith.addf %819, %823 : vector<2x32xf32>
    %c1_i32_181 = arith.constant 1 : i32
    %c7_i32_182 = arith.constant 7 : i32
    %825 = arith.subi %c7_i32_182, %c1_i32_181 : i32
    %826 = vector.broadcast %c1_i32_181 : i32 to vector<2x1xi32>
    %827 = arith.cmpi sgt, %0, %826 : vector<2x1xi32>
    %828 = arith.extui %827 : vector<2x1xi1> to vector<2x1xi32>
    %829 = arith.sitofp %828 : vector<2x1xi32> to vector<2x1xf32>
    %830 = vector.broadcast %825 : i32 to vector<2x1xi32>
    %831 = arith.cmpi sgt, %0, %830 : vector<2x1xi32>
    %832 = arith.extui %831 : vector<2x1xi1> to vector<2x1xi32>
    %833 = arith.sitofp %832 : vector<2x1xi32> to vector<2x1xf32>
    %c2_i32_183 = arith.constant 2 : i32
    %834 = arith.muli %c1_i32_181, %c2_i32_183 : i32
    %835 = arith.index_cast %834 : i32 to index
    %c0_184 = arith.constant 0 : index
    %836 = vector.load %arg14[%835, %c0_184] : memref<16x256xf32, #tpu.memory_space<vmem>>, vector<2x256xf32>
    %c2_i32_185 = arith.constant 2 : i32
    %837 = arith.muli %825, %c2_i32_185 : i32
    %838 = arith.index_cast %837 : i32 to index
    %c0_186 = arith.constant 0 : index
    %839 = vector.load %arg14[%838, %c0_186] : memref<16x256xf32, #tpu.memory_space<vmem>>, vector<2x256xf32>
    %840 = vector.extract_strided_slice %836 {offsets = [0, 0], sizes = [2, 128], strides = [1, 1]} : vector<2x256xf32> to vector<2x128xf32>
    %841 = arith.truncf %788 : vector<2x32xf32> to vector<2x32xbf16>
    %842 = arith.truncf %740 : vector<32x128xf32> to vector<32x128xbf16>
    %cst_187 = arith.constant dense<0.000000e+00> : vector<2x128xf32>
    %843 = tpu.matmul %841, %842, %cst_187 {dimension_numbers = #tpu.dot_dimension_numbers<[1], [0], [0], [1], [0, 0, 1, 1], [], []>} : vector<2x32xbf16>, vector<32x128xbf16>, vector<2x128xf32> -> vector<2x128xf32>
    %844 = arith.addf %840, %843 : vector<2x128xf32>
    %845 = vector.extract_strided_slice %839 {offsets = [0, 128], sizes = [2, 128], strides = [1, 1]} : vector<2x256xf32> to vector<2x128xf32>
    %846 = arith.truncf %817 : vector<2x32xf32> to vector<2x32xbf16>
    %847 = arith.truncf %741 : vector<32x128xf32> to vector<32x128xbf16>
    %cst_188 = arith.constant dense<0.000000e+00> : vector<2x128xf32>
    %848 = tpu.matmul %846, %847, %cst_188 {dimension_numbers = #tpu.dot_dimension_numbers<[1], [0], [0], [1], [0, 0, 1, 1], [], []>} : vector<2x32xbf16>, vector<32x128xbf16>, vector<2x128xf32> -> vector<2x128xf32>
    %849 = arith.addf %845, %848 : vector<2x128xf32>
    %850 = arith.negf %844 : vector<2x128xf32>
    %851 = math.exp %850 : vector<2x128xf32>
    %cst_189 = arith.constant 1.000000e+00 : f32
    %852 = vector.broadcast %cst_189 : f32 to vector<2x128xf32>
    %853 = arith.addf %852, %851 : vector<2x128xf32>
    %854 = arith.divf %852, %853 : vector<2x128xf32>
    %855 = math.tanh %844 : vector<2x128xf32>
    %856 = vector.extract_strided_slice %854 {offsets = [0, 0], sizes = [2, 32], strides = [1, 1]} : vector<2x128xf32> to vector<2x32xf32>
    %857 = vector.extract_strided_slice %854 {offsets = [0, 32], sizes = [2, 32], strides = [1, 1]} : vector<2x128xf32> to vector<2x32xf32>
    %858 = vector.extract_strided_slice %855 {offsets = [0, 64], sizes = [2, 32], strides = [1, 1]} : vector<2x128xf32> to vector<2x32xf32>
    %859 = vector.extract_strided_slice %854 {offsets = [0, 96], sizes = [2, 32], strides = [1, 1]} : vector<2x128xf32> to vector<2x32xf32>
    %860 = arith.mulf %857, %795 : vector<2x32xf32>
    %861 = arith.mulf %856, %858 : vector<2x32xf32>
    %862 = arith.addf %860, %861 : vector<2x32xf32>
    %863 = math.tanh %862 : vector<2x32xf32>
    %864 = arith.mulf %859, %863 : vector<2x32xf32>
    %865 = vector.broadcast %829 : vector<2x1xf32> to vector<2x32xf32>
    %866 = arith.mulf %865, %864 : vector<2x32xf32>
    %cst_190 = arith.constant 1.000000e+00 : f32
    %867 = vector.broadcast %cst_190 : f32 to vector<2x1xf32>
    %868 = arith.subf %867, %829 : vector<2x1xf32>
    %869 = vector.broadcast %868 : vector<2x1xf32> to vector<2x32xf32>
    %870 = arith.mulf %869, %788 : vector<2x32xf32>
    %871 = arith.addf %866, %870 : vector<2x32xf32>
    %872 = vector.broadcast %829 : vector<2x1xf32> to vector<2x32xf32>
    %873 = arith.mulf %872, %862 : vector<2x32xf32>
    %cst_191 = arith.constant 1.000000e+00 : f32
    %874 = vector.broadcast %cst_191 : f32 to vector<2x1xf32>
    %875 = arith.subf %874, %829 : vector<2x1xf32>
    %876 = vector.broadcast %875 : vector<2x1xf32> to vector<2x32xf32>
    %877 = arith.mulf %876, %795 : vector<2x32xf32>
    %878 = arith.addf %873, %877 : vector<2x32xf32>
    %879 = arith.negf %849 : vector<2x128xf32>
    %880 = math.exp %879 : vector<2x128xf32>
    %cst_192 = arith.constant 1.000000e+00 : f32
    %881 = vector.broadcast %cst_192 : f32 to vector<2x128xf32>
    %882 = arith.addf %881, %880 : vector<2x128xf32>
    %883 = arith.divf %881, %882 : vector<2x128xf32>
    %884 = math.tanh %849 : vector<2x128xf32>
    %885 = vector.extract_strided_slice %883 {offsets = [0, 0], sizes = [2, 32], strides = [1, 1]} : vector<2x128xf32> to vector<2x32xf32>
    %886 = vector.extract_strided_slice %883 {offsets = [0, 32], sizes = [2, 32], strides = [1, 1]} : vector<2x128xf32> to vector<2x32xf32>
    %887 = vector.extract_strided_slice %884 {offsets = [0, 64], sizes = [2, 32], strides = [1, 1]} : vector<2x128xf32> to vector<2x32xf32>
    %888 = vector.extract_strided_slice %883 {offsets = [0, 96], sizes = [2, 32], strides = [1, 1]} : vector<2x128xf32> to vector<2x32xf32>
    %889 = arith.mulf %886, %824 : vector<2x32xf32>
    %890 = arith.mulf %885, %887 : vector<2x32xf32>
    %891 = arith.addf %889, %890 : vector<2x32xf32>
    %892 = math.tanh %891 : vector<2x32xf32>
    %893 = arith.mulf %888, %892 : vector<2x32xf32>
    %894 = vector.broadcast %833 : vector<2x1xf32> to vector<2x32xf32>
    %895 = arith.mulf %894, %893 : vector<2x32xf32>
    %cst_193 = arith.constant 1.000000e+00 : f32
    %896 = vector.broadcast %cst_193 : f32 to vector<2x1xf32>
    %897 = arith.subf %896, %833 : vector<2x1xf32>
    %898 = vector.broadcast %897 : vector<2x1xf32> to vector<2x32xf32>
    %899 = arith.mulf %898, %817 : vector<2x32xf32>
    %900 = arith.addf %895, %899 : vector<2x32xf32>
    %901 = vector.broadcast %833 : vector<2x1xf32> to vector<2x32xf32>
    %902 = arith.mulf %901, %891 : vector<2x32xf32>
    %cst_194 = arith.constant 1.000000e+00 : f32
    %903 = vector.broadcast %cst_194 : f32 to vector<2x1xf32>
    %904 = arith.subf %903, %833 : vector<2x1xf32>
    %905 = vector.broadcast %904 : vector<2x1xf32> to vector<2x32xf32>
    %906 = arith.mulf %905, %824 : vector<2x32xf32>
    %907 = arith.addf %902, %906 : vector<2x32xf32>
    %c2_i32_195 = arith.constant 2 : i32
    %c7_i32_196 = arith.constant 7 : i32
    %908 = arith.subi %c7_i32_196, %c2_i32_195 : i32
    %909 = vector.broadcast %c2_i32_195 : i32 to vector<2x1xi32>
    %910 = arith.cmpi sgt, %0, %909 : vector<2x1xi32>
    %911 = arith.extui %910 : vector<2x1xi1> to vector<2x1xi32>
    %912 = arith.sitofp %911 : vector<2x1xi32> to vector<2x1xf32>
    %913 = vector.broadcast %908 : i32 to vector<2x1xi32>
    %914 = arith.cmpi sgt, %0, %913 : vector<2x1xi32>
    %915 = arith.extui %914 : vector<2x1xi1> to vector<2x1xi32>
    %916 = arith.sitofp %915 : vector<2x1xi32> to vector<2x1xf32>
    %c2_i32_197 = arith.constant 2 : i32
    %917 = arith.muli %c2_i32_195, %c2_i32_197 : i32
    %918 = arith.index_cast %917 : i32 to index
    %c0_198 = arith.constant 0 : index
    %919 = vector.load %arg14[%918, %c0_198] : memref<16x256xf32, #tpu.memory_space<vmem>>, vector<2x256xf32>
    %c2_i32_199 = arith.constant 2 : i32
    %920 = arith.muli %908, %c2_i32_199 : i32
    %921 = arith.index_cast %920 : i32 to index
    %c0_200 = arith.constant 0 : index
    %922 = vector.load %arg14[%921, %c0_200] : memref<16x256xf32, #tpu.memory_space<vmem>>, vector<2x256xf32>
    %923 = vector.extract_strided_slice %919 {offsets = [0, 0], sizes = [2, 128], strides = [1, 1]} : vector<2x256xf32> to vector<2x128xf32>
    %924 = arith.truncf %871 : vector<2x32xf32> to vector<2x32xbf16>
    %925 = arith.truncf %740 : vector<32x128xf32> to vector<32x128xbf16>
    %cst_201 = arith.constant dense<0.000000e+00> : vector<2x128xf32>
    %926 = tpu.matmul %924, %925, %cst_201 {dimension_numbers = #tpu.dot_dimension_numbers<[1], [0], [0], [1], [0, 0, 1, 1], [], []>} : vector<2x32xbf16>, vector<32x128xbf16>, vector<2x128xf32> -> vector<2x128xf32>
    %927 = arith.addf %923, %926 : vector<2x128xf32>
    %928 = vector.extract_strided_slice %922 {offsets = [0, 128], sizes = [2, 128], strides = [1, 1]} : vector<2x256xf32> to vector<2x128xf32>
    %929 = arith.truncf %900 : vector<2x32xf32> to vector<2x32xbf16>
    %930 = arith.truncf %741 : vector<32x128xf32> to vector<32x128xbf16>
    %cst_202 = arith.constant dense<0.000000e+00> : vector<2x128xf32>
    %931 = tpu.matmul %929, %930, %cst_202 {dimension_numbers = #tpu.dot_dimension_numbers<[1], [0], [0], [1], [0, 0, 1, 1], [], []>} : vector<2x32xbf16>, vector<32x128xbf16>, vector<2x128xf32> -> vector<2x128xf32>
    %932 = arith.addf %928, %931 : vector<2x128xf32>
    %933 = arith.negf %927 : vector<2x128xf32>
    %934 = math.exp %933 : vector<2x128xf32>
    %cst_203 = arith.constant 1.000000e+00 : f32
    %935 = vector.broadcast %cst_203 : f32 to vector<2x128xf32>
    %936 = arith.addf %935, %934 : vector<2x128xf32>
    %937 = arith.divf %935, %936 : vector<2x128xf32>
    %938 = math.tanh %927 : vector<2x128xf32>
    %939 = vector.extract_strided_slice %937 {offsets = [0, 0], sizes = [2, 32], strides = [1, 1]} : vector<2x128xf32> to vector<2x32xf32>
    %940 = vector.extract_strided_slice %937 {offsets = [0, 32], sizes = [2, 32], strides = [1, 1]} : vector<2x128xf32> to vector<2x32xf32>
    %941 = vector.extract_strided_slice %938 {offsets = [0, 64], sizes = [2, 32], strides = [1, 1]} : vector<2x128xf32> to vector<2x32xf32>
    %942 = vector.extract_strided_slice %937 {offsets = [0, 96], sizes = [2, 32], strides = [1, 1]} : vector<2x128xf32> to vector<2x32xf32>
    %943 = arith.mulf %940, %878 : vector<2x32xf32>
    %944 = arith.mulf %939, %941 : vector<2x32xf32>
    %945 = arith.addf %943, %944 : vector<2x32xf32>
    %946 = math.tanh %945 : vector<2x32xf32>
    %947 = arith.mulf %942, %946 : vector<2x32xf32>
    %948 = vector.broadcast %912 : vector<2x1xf32> to vector<2x32xf32>
    %949 = arith.mulf %948, %947 : vector<2x32xf32>
    %cst_204 = arith.constant 1.000000e+00 : f32
    %950 = vector.broadcast %cst_204 : f32 to vector<2x1xf32>
    %951 = arith.subf %950, %912 : vector<2x1xf32>
    %952 = vector.broadcast %951 : vector<2x1xf32> to vector<2x32xf32>
    %953 = arith.mulf %952, %871 : vector<2x32xf32>
    %954 = arith.addf %949, %953 : vector<2x32xf32>
    %955 = vector.broadcast %912 : vector<2x1xf32> to vector<2x32xf32>
    %956 = arith.mulf %955, %945 : vector<2x32xf32>
    %cst_205 = arith.constant 1.000000e+00 : f32
    %957 = vector.broadcast %cst_205 : f32 to vector<2x1xf32>
    %958 = arith.subf %957, %912 : vector<2x1xf32>
    %959 = vector.broadcast %958 : vector<2x1xf32> to vector<2x32xf32>
    %960 = arith.mulf %959, %878 : vector<2x32xf32>
    %961 = arith.addf %956, %960 : vector<2x32xf32>
    %962 = arith.negf %932 : vector<2x128xf32>
    %963 = math.exp %962 : vector<2x128xf32>
    %cst_206 = arith.constant 1.000000e+00 : f32
    %964 = vector.broadcast %cst_206 : f32 to vector<2x128xf32>
    %965 = arith.addf %964, %963 : vector<2x128xf32>
    %966 = arith.divf %964, %965 : vector<2x128xf32>
    %967 = math.tanh %932 : vector<2x128xf32>
    %968 = vector.extract_strided_slice %966 {offsets = [0, 0], sizes = [2, 32], strides = [1, 1]} : vector<2x128xf32> to vector<2x32xf32>
    %969 = vector.extract_strided_slice %966 {offsets = [0, 32], sizes = [2, 32], strides = [1, 1]} : vector<2x128xf32> to vector<2x32xf32>
    %970 = vector.extract_strided_slice %967 {offsets = [0, 64], sizes = [2, 32], strides = [1, 1]} : vector<2x128xf32> to vector<2x32xf32>
    %971 = vector.extract_strided_slice %966 {offsets = [0, 96], sizes = [2, 32], strides = [1, 1]} : vector<2x128xf32> to vector<2x32xf32>
    %972 = arith.mulf %969, %907 : vector<2x32xf32>
    %973 = arith.mulf %968, %970 : vector<2x32xf32>
    %974 = arith.addf %972, %973 : vector<2x32xf32>
    %975 = math.tanh %974 : vector<2x32xf32>
    %976 = arith.mulf %971, %975 : vector<2x32xf32>
    %977 = vector.broadcast %916 : vector<2x1xf32> to vector<2x32xf32>
    %978 = arith.mulf %977, %976 : vector<2x32xf32>
    %cst_207 = arith.constant 1.000000e+00 : f32
    %979 = vector.broadcast %cst_207 : f32 to vector<2x1xf32>
    %980 = arith.subf %979, %916 : vector<2x1xf32>
    %981 = vector.broadcast %980 : vector<2x1xf32> to vector<2x32xf32>
    %982 = arith.mulf %981, %900 : vector<2x32xf32>
    %983 = arith.addf %978, %982 : vector<2x32xf32>
    %984 = vector.broadcast %916 : vector<2x1xf32> to vector<2x32xf32>
    %985 = arith.mulf %984, %974 : vector<2x32xf32>
    %cst_208 = arith.constant 1.000000e+00 : f32
    %986 = vector.broadcast %cst_208 : f32 to vector<2x1xf32>
    %987 = arith.subf %986, %916 : vector<2x1xf32>
    %988 = vector.broadcast %987 : vector<2x1xf32> to vector<2x32xf32>
    %989 = arith.mulf %988, %907 : vector<2x32xf32>
    %990 = arith.addf %985, %989 : vector<2x32xf32>
    %c3_i32_209 = arith.constant 3 : i32
    %c7_i32_210 = arith.constant 7 : i32
    %991 = arith.subi %c7_i32_210, %c3_i32_209 : i32
    %992 = vector.broadcast %c3_i32_209 : i32 to vector<2x1xi32>
    %993 = arith.cmpi sgt, %0, %992 : vector<2x1xi32>
    %994 = arith.extui %993 : vector<2x1xi1> to vector<2x1xi32>
    %995 = arith.sitofp %994 : vector<2x1xi32> to vector<2x1xf32>
    %996 = vector.broadcast %991 : i32 to vector<2x1xi32>
    %997 = arith.cmpi sgt, %0, %996 : vector<2x1xi32>
    %998 = arith.extui %997 : vector<2x1xi1> to vector<2x1xi32>
    %999 = arith.sitofp %998 : vector<2x1xi32> to vector<2x1xf32>
    %c2_i32_211 = arith.constant 2 : i32
    %1000 = arith.muli %c3_i32_209, %c2_i32_211 : i32
    %1001 = arith.index_cast %1000 : i32 to index
    %c0_212 = arith.constant 0 : index
    %1002 = vector.load %arg14[%1001, %c0_212] : memref<16x256xf32, #tpu.memory_space<vmem>>, vector<2x256xf32>
    %c2_i32_213 = arith.constant 2 : i32
    %1003 = arith.muli %991, %c2_i32_213 : i32
    %1004 = arith.index_cast %1003 : i32 to index
    %c0_214 = arith.constant 0 : index
    %1005 = vector.load %arg14[%1004, %c0_214] : memref<16x256xf32, #tpu.memory_space<vmem>>, vector<2x256xf32>
    %1006 = vector.extract_strided_slice %1002 {offsets = [0, 0], sizes = [2, 128], strides = [1, 1]} : vector<2x256xf32> to vector<2x128xf32>
    %1007 = arith.truncf %954 : vector<2x32xf32> to vector<2x32xbf16>
    %1008 = arith.truncf %740 : vector<32x128xf32> to vector<32x128xbf16>
    %cst_215 = arith.constant dense<0.000000e+00> : vector<2x128xf32>
    %1009 = tpu.matmul %1007, %1008, %cst_215 {dimension_numbers = #tpu.dot_dimension_numbers<[1], [0], [0], [1], [0, 0, 1, 1], [], []>} : vector<2x32xbf16>, vector<32x128xbf16>, vector<2x128xf32> -> vector<2x128xf32>
    %1010 = arith.addf %1006, %1009 : vector<2x128xf32>
    %1011 = vector.extract_strided_slice %1005 {offsets = [0, 128], sizes = [2, 128], strides = [1, 1]} : vector<2x256xf32> to vector<2x128xf32>
    %1012 = arith.truncf %983 : vector<2x32xf32> to vector<2x32xbf16>
    %1013 = arith.truncf %741 : vector<32x128xf32> to vector<32x128xbf16>
    %cst_216 = arith.constant dense<0.000000e+00> : vector<2x128xf32>
    %1014 = tpu.matmul %1012, %1013, %cst_216 {dimension_numbers = #tpu.dot_dimension_numbers<[1], [0], [0], [1], [0, 0, 1, 1], [], []>} : vector<2x32xbf16>, vector<32x128xbf16>, vector<2x128xf32> -> vector<2x128xf32>
    %1015 = arith.addf %1011, %1014 : vector<2x128xf32>
    %1016 = arith.negf %1010 : vector<2x128xf32>
    %1017 = math.exp %1016 : vector<2x128xf32>
    %cst_217 = arith.constant 1.000000e+00 : f32
    %1018 = vector.broadcast %cst_217 : f32 to vector<2x128xf32>
    %1019 = arith.addf %1018, %1017 : vector<2x128xf32>
    %1020 = arith.divf %1018, %1019 : vector<2x128xf32>
    %1021 = math.tanh %1010 : vector<2x128xf32>
    %1022 = vector.extract_strided_slice %1020 {offsets = [0, 0], sizes = [2, 32], strides = [1, 1]} : vector<2x128xf32> to vector<2x32xf32>
    %1023 = vector.extract_strided_slice %1020 {offsets = [0, 32], sizes = [2, 32], strides = [1, 1]} : vector<2x128xf32> to vector<2x32xf32>
    %1024 = vector.extract_strided_slice %1021 {offsets = [0, 64], sizes = [2, 32], strides = [1, 1]} : vector<2x128xf32> to vector<2x32xf32>
    %1025 = vector.extract_strided_slice %1020 {offsets = [0, 96], sizes = [2, 32], strides = [1, 1]} : vector<2x128xf32> to vector<2x32xf32>
    %1026 = arith.mulf %1023, %961 : vector<2x32xf32>
    %1027 = arith.mulf %1022, %1024 : vector<2x32xf32>
    %1028 = arith.addf %1026, %1027 : vector<2x32xf32>
    %1029 = math.tanh %1028 : vector<2x32xf32>
    %1030 = arith.mulf %1025, %1029 : vector<2x32xf32>
    %1031 = vector.broadcast %995 : vector<2x1xf32> to vector<2x32xf32>
    %1032 = arith.mulf %1031, %1030 : vector<2x32xf32>
    %cst_218 = arith.constant 1.000000e+00 : f32
    %1033 = vector.broadcast %cst_218 : f32 to vector<2x1xf32>
    %1034 = arith.subf %1033, %995 : vector<2x1xf32>
    %1035 = vector.broadcast %1034 : vector<2x1xf32> to vector<2x32xf32>
    %1036 = arith.mulf %1035, %954 : vector<2x32xf32>
    %1037 = arith.addf %1032, %1036 : vector<2x32xf32>
    %1038 = vector.broadcast %995 : vector<2x1xf32> to vector<2x32xf32>
    %1039 = arith.mulf %1038, %1028 : vector<2x32xf32>
    %cst_219 = arith.constant 1.000000e+00 : f32
    %1040 = vector.broadcast %cst_219 : f32 to vector<2x1xf32>
    %1041 = arith.subf %1040, %995 : vector<2x1xf32>
    %1042 = vector.broadcast %1041 : vector<2x1xf32> to vector<2x32xf32>
    %1043 = arith.mulf %1042, %961 : vector<2x32xf32>
    %1044 = arith.addf %1039, %1043 : vector<2x32xf32>
    %1045 = arith.negf %1015 : vector<2x128xf32>
    %1046 = math.exp %1045 : vector<2x128xf32>
    %cst_220 = arith.constant 1.000000e+00 : f32
    %1047 = vector.broadcast %cst_220 : f32 to vector<2x128xf32>
    %1048 = arith.addf %1047, %1046 : vector<2x128xf32>
    %1049 = arith.divf %1047, %1048 : vector<2x128xf32>
    %1050 = math.tanh %1015 : vector<2x128xf32>
    %1051 = vector.extract_strided_slice %1049 {offsets = [0, 0], sizes = [2, 32], strides = [1, 1]} : vector<2x128xf32> to vector<2x32xf32>
    %1052 = vector.extract_strided_slice %1049 {offsets = [0, 32], sizes = [2, 32], strides = [1, 1]} : vector<2x128xf32> to vector<2x32xf32>
    %1053 = vector.extract_strided_slice %1050 {offsets = [0, 64], sizes = [2, 32], strides = [1, 1]} : vector<2x128xf32> to vector<2x32xf32>
    %1054 = vector.extract_strided_slice %1049 {offsets = [0, 96], sizes = [2, 32], strides = [1, 1]} : vector<2x128xf32> to vector<2x32xf32>
    %1055 = arith.mulf %1052, %990 : vector<2x32xf32>
    %1056 = arith.mulf %1051, %1053 : vector<2x32xf32>
    %1057 = arith.addf %1055, %1056 : vector<2x32xf32>
    %1058 = math.tanh %1057 : vector<2x32xf32>
    %1059 = arith.mulf %1054, %1058 : vector<2x32xf32>
    %1060 = vector.broadcast %999 : vector<2x1xf32> to vector<2x32xf32>
    %1061 = arith.mulf %1060, %1059 : vector<2x32xf32>
    %cst_221 = arith.constant 1.000000e+00 : f32
    %1062 = vector.broadcast %cst_221 : f32 to vector<2x1xf32>
    %1063 = arith.subf %1062, %999 : vector<2x1xf32>
    %1064 = vector.broadcast %1063 : vector<2x1xf32> to vector<2x32xf32>
    %1065 = arith.mulf %1064, %983 : vector<2x32xf32>
    %1066 = arith.addf %1061, %1065 : vector<2x32xf32>
    %1067 = vector.broadcast %999 : vector<2x1xf32> to vector<2x32xf32>
    %1068 = arith.mulf %1067, %1057 : vector<2x32xf32>
    %cst_222 = arith.constant 1.000000e+00 : f32
    %1069 = vector.broadcast %cst_222 : f32 to vector<2x1xf32>
    %1070 = arith.subf %1069, %999 : vector<2x1xf32>
    %1071 = vector.broadcast %1070 : vector<2x1xf32> to vector<2x32xf32>
    %1072 = arith.mulf %1071, %990 : vector<2x32xf32>
    %1073 = arith.addf %1068, %1072 : vector<2x32xf32>
    %c4_i32_223 = arith.constant 4 : i32
    %c7_i32_224 = arith.constant 7 : i32
    %1074 = arith.subi %c7_i32_224, %c4_i32_223 : i32
    %1075 = vector.broadcast %c4_i32_223 : i32 to vector<2x1xi32>
    %1076 = arith.cmpi sgt, %0, %1075 : vector<2x1xi32>
    %1077 = arith.extui %1076 : vector<2x1xi1> to vector<2x1xi32>
    %1078 = arith.sitofp %1077 : vector<2x1xi32> to vector<2x1xf32>
    %1079 = vector.broadcast %1074 : i32 to vector<2x1xi32>
    %1080 = arith.cmpi sgt, %0, %1079 : vector<2x1xi32>
    %1081 = arith.extui %1080 : vector<2x1xi1> to vector<2x1xi32>
    %1082 = arith.sitofp %1081 : vector<2x1xi32> to vector<2x1xf32>
    %c2_i32_225 = arith.constant 2 : i32
    %1083 = arith.muli %c4_i32_223, %c2_i32_225 : i32
    %1084 = arith.index_cast %1083 : i32 to index
    %c0_226 = arith.constant 0 : index
    %1085 = vector.load %arg14[%1084, %c0_226] : memref<16x256xf32, #tpu.memory_space<vmem>>, vector<2x256xf32>
    %c2_i32_227 = arith.constant 2 : i32
    %1086 = arith.muli %1074, %c2_i32_227 : i32
    %1087 = arith.index_cast %1086 : i32 to index
    %c0_228 = arith.constant 0 : index
    %1088 = vector.load %arg14[%1087, %c0_228] : memref<16x256xf32, #tpu.memory_space<vmem>>, vector<2x256xf32>
    %1089 = vector.extract_strided_slice %1085 {offsets = [0, 0], sizes = [2, 128], strides = [1, 1]} : vector<2x256xf32> to vector<2x128xf32>
    %1090 = arith.truncf %1037 : vector<2x32xf32> to vector<2x32xbf16>
    %1091 = arith.truncf %740 : vector<32x128xf32> to vector<32x128xbf16>
    %cst_229 = arith.constant dense<0.000000e+00> : vector<2x128xf32>
    %1092 = tpu.matmul %1090, %1091, %cst_229 {dimension_numbers = #tpu.dot_dimension_numbers<[1], [0], [0], [1], [0, 0, 1, 1], [], []>} : vector<2x32xbf16>, vector<32x128xbf16>, vector<2x128xf32> -> vector<2x128xf32>
    %1093 = arith.addf %1089, %1092 : vector<2x128xf32>
    %1094 = vector.extract_strided_slice %1088 {offsets = [0, 128], sizes = [2, 128], strides = [1, 1]} : vector<2x256xf32> to vector<2x128xf32>
    %1095 = arith.truncf %1066 : vector<2x32xf32> to vector<2x32xbf16>
    %1096 = arith.truncf %741 : vector<32x128xf32> to vector<32x128xbf16>
    %cst_230 = arith.constant dense<0.000000e+00> : vector<2x128xf32>
    %1097 = tpu.matmul %1095, %1096, %cst_230 {dimension_numbers = #tpu.dot_dimension_numbers<[1], [0], [0], [1], [0, 0, 1, 1], [], []>} : vector<2x32xbf16>, vector<32x128xbf16>, vector<2x128xf32> -> vector<2x128xf32>
    %1098 = arith.addf %1094, %1097 : vector<2x128xf32>
    %1099 = arith.negf %1093 : vector<2x128xf32>
    %1100 = math.exp %1099 : vector<2x128xf32>
    %cst_231 = arith.constant 1.000000e+00 : f32
    %1101 = vector.broadcast %cst_231 : f32 to vector<2x128xf32>
    %1102 = arith.addf %1101, %1100 : vector<2x128xf32>
    %1103 = arith.divf %1101, %1102 : vector<2x128xf32>
    %1104 = math.tanh %1093 : vector<2x128xf32>
    %1105 = vector.extract_strided_slice %1103 {offsets = [0, 0], sizes = [2, 32], strides = [1, 1]} : vector<2x128xf32> to vector<2x32xf32>
    %1106 = vector.extract_strided_slice %1103 {offsets = [0, 32], sizes = [2, 32], strides = [1, 1]} : vector<2x128xf32> to vector<2x32xf32>
    %1107 = vector.extract_strided_slice %1104 {offsets = [0, 64], sizes = [2, 32], strides = [1, 1]} : vector<2x128xf32> to vector<2x32xf32>
    %1108 = vector.extract_strided_slice %1103 {offsets = [0, 96], sizes = [2, 32], strides = [1, 1]} : vector<2x128xf32> to vector<2x32xf32>
    %1109 = arith.mulf %1106, %1044 : vector<2x32xf32>
    %1110 = arith.mulf %1105, %1107 : vector<2x32xf32>
    %1111 = arith.addf %1109, %1110 : vector<2x32xf32>
    %1112 = math.tanh %1111 : vector<2x32xf32>
    %1113 = arith.mulf %1108, %1112 : vector<2x32xf32>
    %1114 = vector.broadcast %1078 : vector<2x1xf32> to vector<2x32xf32>
    %1115 = arith.mulf %1114, %1113 : vector<2x32xf32>
    %cst_232 = arith.constant 1.000000e+00 : f32
    %1116 = vector.broadcast %cst_232 : f32 to vector<2x1xf32>
    %1117 = arith.subf %1116, %1078 : vector<2x1xf32>
    %1118 = vector.broadcast %1117 : vector<2x1xf32> to vector<2x32xf32>
    %1119 = arith.mulf %1118, %1037 : vector<2x32xf32>
    %1120 = arith.addf %1115, %1119 : vector<2x32xf32>
    %1121 = vector.broadcast %1078 : vector<2x1xf32> to vector<2x32xf32>
    %1122 = arith.mulf %1121, %1111 : vector<2x32xf32>
    %cst_233 = arith.constant 1.000000e+00 : f32
    %1123 = vector.broadcast %cst_233 : f32 to vector<2x1xf32>
    %1124 = arith.subf %1123, %1078 : vector<2x1xf32>
    %1125 = vector.broadcast %1124 : vector<2x1xf32> to vector<2x32xf32>
    %1126 = arith.mulf %1125, %1044 : vector<2x32xf32>
    %1127 = arith.addf %1122, %1126 : vector<2x32xf32>
    %1128 = arith.negf %1098 : vector<2x128xf32>
    %1129 = math.exp %1128 : vector<2x128xf32>
    %cst_234 = arith.constant 1.000000e+00 : f32
    %1130 = vector.broadcast %cst_234 : f32 to vector<2x128xf32>
    %1131 = arith.addf %1130, %1129 : vector<2x128xf32>
    %1132 = arith.divf %1130, %1131 : vector<2x128xf32>
    %1133 = math.tanh %1098 : vector<2x128xf32>
    %1134 = vector.extract_strided_slice %1132 {offsets = [0, 0], sizes = [2, 32], strides = [1, 1]} : vector<2x128xf32> to vector<2x32xf32>
    %1135 = vector.extract_strided_slice %1132 {offsets = [0, 32], sizes = [2, 32], strides = [1, 1]} : vector<2x128xf32> to vector<2x32xf32>
    %1136 = vector.extract_strided_slice %1133 {offsets = [0, 64], sizes = [2, 32], strides = [1, 1]} : vector<2x128xf32> to vector<2x32xf32>
    %1137 = vector.extract_strided_slice %1132 {offsets = [0, 96], sizes = [2, 32], strides = [1, 1]} : vector<2x128xf32> to vector<2x32xf32>
    %1138 = arith.mulf %1135, %1073 : vector<2x32xf32>
    %1139 = arith.mulf %1134, %1136 : vector<2x32xf32>
    %1140 = arith.addf %1138, %1139 : vector<2x32xf32>
    %1141 = math.tanh %1140 : vector<2x32xf32>
    %1142 = arith.mulf %1137, %1141 : vector<2x32xf32>
    %1143 = vector.broadcast %1082 : vector<2x1xf32> to vector<2x32xf32>
    %1144 = arith.mulf %1143, %1142 : vector<2x32xf32>
    %cst_235 = arith.constant 1.000000e+00 : f32
    %1145 = vector.broadcast %cst_235 : f32 to vector<2x1xf32>
    %1146 = arith.subf %1145, %1082 : vector<2x1xf32>
    %1147 = vector.broadcast %1146 : vector<2x1xf32> to vector<2x32xf32>
    %1148 = arith.mulf %1147, %1066 : vector<2x32xf32>
    %1149 = arith.addf %1144, %1148 : vector<2x32xf32>
    %1150 = vector.broadcast %1082 : vector<2x1xf32> to vector<2x32xf32>
    %1151 = arith.mulf %1150, %1140 : vector<2x32xf32>
    %cst_236 = arith.constant 1.000000e+00 : f32
    %1152 = vector.broadcast %cst_236 : f32 to vector<2x1xf32>
    %1153 = arith.subf %1152, %1082 : vector<2x1xf32>
    %1154 = vector.broadcast %1153 : vector<2x1xf32> to vector<2x32xf32>
    %1155 = arith.mulf %1154, %1073 : vector<2x32xf32>
    %1156 = arith.addf %1151, %1155 : vector<2x32xf32>
    %c5_i32_237 = arith.constant 5 : i32
    %c7_i32_238 = arith.constant 7 : i32
    %1157 = arith.subi %c7_i32_238, %c5_i32_237 : i32
    %1158 = vector.broadcast %c5_i32_237 : i32 to vector<2x1xi32>
    %1159 = arith.cmpi sgt, %0, %1158 : vector<2x1xi32>
    %1160 = arith.extui %1159 : vector<2x1xi1> to vector<2x1xi32>
    %1161 = arith.sitofp %1160 : vector<2x1xi32> to vector<2x1xf32>
    %1162 = vector.broadcast %1157 : i32 to vector<2x1xi32>
    %1163 = arith.cmpi sgt, %0, %1162 : vector<2x1xi32>
    %1164 = arith.extui %1163 : vector<2x1xi1> to vector<2x1xi32>
    %1165 = arith.sitofp %1164 : vector<2x1xi32> to vector<2x1xf32>
    %c2_i32_239 = arith.constant 2 : i32
    %1166 = arith.muli %c5_i32_237, %c2_i32_239 : i32
    %1167 = arith.index_cast %1166 : i32 to index
    %c0_240 = arith.constant 0 : index
    %1168 = vector.load %arg14[%1167, %c0_240] : memref<16x256xf32, #tpu.memory_space<vmem>>, vector<2x256xf32>
    %c2_i32_241 = arith.constant 2 : i32
    %1169 = arith.muli %1157, %c2_i32_241 : i32
    %1170 = arith.index_cast %1169 : i32 to index
    %c0_242 = arith.constant 0 : index
    %1171 = vector.load %arg14[%1170, %c0_242] : memref<16x256xf32, #tpu.memory_space<vmem>>, vector<2x256xf32>
    %1172 = vector.extract_strided_slice %1168 {offsets = [0, 0], sizes = [2, 128], strides = [1, 1]} : vector<2x256xf32> to vector<2x128xf32>
    %1173 = arith.truncf %1120 : vector<2x32xf32> to vector<2x32xbf16>
    %1174 = arith.truncf %740 : vector<32x128xf32> to vector<32x128xbf16>
    %cst_243 = arith.constant dense<0.000000e+00> : vector<2x128xf32>
    %1175 = tpu.matmul %1173, %1174, %cst_243 {dimension_numbers = #tpu.dot_dimension_numbers<[1], [0], [0], [1], [0, 0, 1, 1], [], []>} : vector<2x32xbf16>, vector<32x128xbf16>, vector<2x128xf32> -> vector<2x128xf32>
    %1176 = arith.addf %1172, %1175 : vector<2x128xf32>
    %1177 = vector.extract_strided_slice %1171 {offsets = [0, 128], sizes = [2, 128], strides = [1, 1]} : vector<2x256xf32> to vector<2x128xf32>
    %1178 = arith.truncf %1149 : vector<2x32xf32> to vector<2x32xbf16>
    %1179 = arith.truncf %741 : vector<32x128xf32> to vector<32x128xbf16>
    %cst_244 = arith.constant dense<0.000000e+00> : vector<2x128xf32>
    %1180 = tpu.matmul %1178, %1179, %cst_244 {dimension_numbers = #tpu.dot_dimension_numbers<[1], [0], [0], [1], [0, 0, 1, 1], [], []>} : vector<2x32xbf16>, vector<32x128xbf16>, vector<2x128xf32> -> vector<2x128xf32>
    %1181 = arith.addf %1177, %1180 : vector<2x128xf32>
    %1182 = arith.negf %1176 : vector<2x128xf32>
    %1183 = math.exp %1182 : vector<2x128xf32>
    %cst_245 = arith.constant 1.000000e+00 : f32
    %1184 = vector.broadcast %cst_245 : f32 to vector<2x128xf32>
    %1185 = arith.addf %1184, %1183 : vector<2x128xf32>
    %1186 = arith.divf %1184, %1185 : vector<2x128xf32>
    %1187 = math.tanh %1176 : vector<2x128xf32>
    %1188 = vector.extract_strided_slice %1186 {offsets = [0, 0], sizes = [2, 32], strides = [1, 1]} : vector<2x128xf32> to vector<2x32xf32>
    %1189 = vector.extract_strided_slice %1186 {offsets = [0, 32], sizes = [2, 32], strides = [1, 1]} : vector<2x128xf32> to vector<2x32xf32>
    %1190 = vector.extract_strided_slice %1187 {offsets = [0, 64], sizes = [2, 32], strides = [1, 1]} : vector<2x128xf32> to vector<2x32xf32>
    %1191 = vector.extract_strided_slice %1186 {offsets = [0, 96], sizes = [2, 32], strides = [1, 1]} : vector<2x128xf32> to vector<2x32xf32>
    %1192 = arith.mulf %1189, %1127 : vector<2x32xf32>
    %1193 = arith.mulf %1188, %1190 : vector<2x32xf32>
    %1194 = arith.addf %1192, %1193 : vector<2x32xf32>
    %1195 = math.tanh %1194 : vector<2x32xf32>
    %1196 = arith.mulf %1191, %1195 : vector<2x32xf32>
    %1197 = vector.broadcast %1161 : vector<2x1xf32> to vector<2x32xf32>
    %1198 = arith.mulf %1197, %1196 : vector<2x32xf32>
    %cst_246 = arith.constant 1.000000e+00 : f32
    %1199 = vector.broadcast %cst_246 : f32 to vector<2x1xf32>
    %1200 = arith.subf %1199, %1161 : vector<2x1xf32>
    %1201 = vector.broadcast %1200 : vector<2x1xf32> to vector<2x32xf32>
    %1202 = arith.mulf %1201, %1120 : vector<2x32xf32>
    %1203 = arith.addf %1198, %1202 : vector<2x32xf32>
    %1204 = vector.broadcast %1161 : vector<2x1xf32> to vector<2x32xf32>
    %1205 = arith.mulf %1204, %1194 : vector<2x32xf32>
    %cst_247 = arith.constant 1.000000e+00 : f32
    %1206 = vector.broadcast %cst_247 : f32 to vector<2x1xf32>
    %1207 = arith.subf %1206, %1161 : vector<2x1xf32>
    %1208 = vector.broadcast %1207 : vector<2x1xf32> to vector<2x32xf32>
    %1209 = arith.mulf %1208, %1127 : vector<2x32xf32>
    %1210 = arith.addf %1205, %1209 : vector<2x32xf32>
    %1211 = arith.negf %1181 : vector<2x128xf32>
    %1212 = math.exp %1211 : vector<2x128xf32>
    %cst_248 = arith.constant 1.000000e+00 : f32
    %1213 = vector.broadcast %cst_248 : f32 to vector<2x128xf32>
    %1214 = arith.addf %1213, %1212 : vector<2x128xf32>
    %1215 = arith.divf %1213, %1214 : vector<2x128xf32>
    %1216 = math.tanh %1181 : vector<2x128xf32>
    %1217 = vector.extract_strided_slice %1215 {offsets = [0, 0], sizes = [2, 32], strides = [1, 1]} : vector<2x128xf32> to vector<2x32xf32>
    %1218 = vector.extract_strided_slice %1215 {offsets = [0, 32], sizes = [2, 32], strides = [1, 1]} : vector<2x128xf32> to vector<2x32xf32>
    %1219 = vector.extract_strided_slice %1216 {offsets = [0, 64], sizes = [2, 32], strides = [1, 1]} : vector<2x128xf32> to vector<2x32xf32>
    %1220 = vector.extract_strided_slice %1215 {offsets = [0, 96], sizes = [2, 32], strides = [1, 1]} : vector<2x128xf32> to vector<2x32xf32>
    %1221 = arith.mulf %1218, %1156 : vector<2x32xf32>
    %1222 = arith.mulf %1217, %1219 : vector<2x32xf32>
    %1223 = arith.addf %1221, %1222 : vector<2x32xf32>
    %1224 = math.tanh %1223 : vector<2x32xf32>
    %1225 = arith.mulf %1220, %1224 : vector<2x32xf32>
    %1226 = vector.broadcast %1165 : vector<2x1xf32> to vector<2x32xf32>
    %1227 = arith.mulf %1226, %1225 : vector<2x32xf32>
    %cst_249 = arith.constant 1.000000e+00 : f32
    %1228 = vector.broadcast %cst_249 : f32 to vector<2x1xf32>
    %1229 = arith.subf %1228, %1165 : vector<2x1xf32>
    %1230 = vector.broadcast %1229 : vector<2x1xf32> to vector<2x32xf32>
    %1231 = arith.mulf %1230, %1149 : vector<2x32xf32>
    %1232 = arith.addf %1227, %1231 : vector<2x32xf32>
    %1233 = vector.broadcast %1165 : vector<2x1xf32> to vector<2x32xf32>
    %1234 = arith.mulf %1233, %1223 : vector<2x32xf32>
    %cst_250 = arith.constant 1.000000e+00 : f32
    %1235 = vector.broadcast %cst_250 : f32 to vector<2x1xf32>
    %1236 = arith.subf %1235, %1165 : vector<2x1xf32>
    %1237 = vector.broadcast %1236 : vector<2x1xf32> to vector<2x32xf32>
    %1238 = arith.mulf %1237, %1156 : vector<2x32xf32>
    %1239 = arith.addf %1234, %1238 : vector<2x32xf32>
    %c6_i32_251 = arith.constant 6 : i32
    %c7_i32_252 = arith.constant 7 : i32
    %1240 = arith.subi %c7_i32_252, %c6_i32_251 : i32
    %1241 = vector.broadcast %c6_i32_251 : i32 to vector<2x1xi32>
    %1242 = arith.cmpi sgt, %0, %1241 : vector<2x1xi32>
    %1243 = arith.extui %1242 : vector<2x1xi1> to vector<2x1xi32>
    %1244 = arith.sitofp %1243 : vector<2x1xi32> to vector<2x1xf32>
    %1245 = vector.broadcast %1240 : i32 to vector<2x1xi32>
    %1246 = arith.cmpi sgt, %0, %1245 : vector<2x1xi32>
    %1247 = arith.extui %1246 : vector<2x1xi1> to vector<2x1xi32>
    %1248 = arith.sitofp %1247 : vector<2x1xi32> to vector<2x1xf32>
    %c2_i32_253 = arith.constant 2 : i32
    %1249 = arith.muli %c6_i32_251, %c2_i32_253 : i32
    %1250 = arith.index_cast %1249 : i32 to index
    %c0_254 = arith.constant 0 : index
    %1251 = vector.load %arg14[%1250, %c0_254] : memref<16x256xf32, #tpu.memory_space<vmem>>, vector<2x256xf32>
    %c2_i32_255 = arith.constant 2 : i32
    %1252 = arith.muli %1240, %c2_i32_255 : i32
    %1253 = arith.index_cast %1252 : i32 to index
    %c0_256 = arith.constant 0 : index
    %1254 = vector.load %arg14[%1253, %c0_256] : memref<16x256xf32, #tpu.memory_space<vmem>>, vector<2x256xf32>
    %1255 = vector.extract_strided_slice %1251 {offsets = [0, 0], sizes = [2, 128], strides = [1, 1]} : vector<2x256xf32> to vector<2x128xf32>
    %1256 = arith.truncf %1203 : vector<2x32xf32> to vector<2x32xbf16>
    %1257 = arith.truncf %740 : vector<32x128xf32> to vector<32x128xbf16>
    %cst_257 = arith.constant dense<0.000000e+00> : vector<2x128xf32>
    %1258 = tpu.matmul %1256, %1257, %cst_257 {dimension_numbers = #tpu.dot_dimension_numbers<[1], [0], [0], [1], [0, 0, 1, 1], [], []>} : vector<2x32xbf16>, vector<32x128xbf16>, vector<2x128xf32> -> vector<2x128xf32>
    %1259 = arith.addf %1255, %1258 : vector<2x128xf32>
    %1260 = vector.extract_strided_slice %1254 {offsets = [0, 128], sizes = [2, 128], strides = [1, 1]} : vector<2x256xf32> to vector<2x128xf32>
    %1261 = arith.truncf %1232 : vector<2x32xf32> to vector<2x32xbf16>
    %1262 = arith.truncf %741 : vector<32x128xf32> to vector<32x128xbf16>
    %cst_258 = arith.constant dense<0.000000e+00> : vector<2x128xf32>
    %1263 = tpu.matmul %1261, %1262, %cst_258 {dimension_numbers = #tpu.dot_dimension_numbers<[1], [0], [0], [1], [0, 0, 1, 1], [], []>} : vector<2x32xbf16>, vector<32x128xbf16>, vector<2x128xf32> -> vector<2x128xf32>
    %1264 = arith.addf %1260, %1263 : vector<2x128xf32>
    %1265 = arith.negf %1259 : vector<2x128xf32>
    %1266 = math.exp %1265 : vector<2x128xf32>
    %cst_259 = arith.constant 1.000000e+00 : f32
    %1267 = vector.broadcast %cst_259 : f32 to vector<2x128xf32>
    %1268 = arith.addf %1267, %1266 : vector<2x128xf32>
    %1269 = arith.divf %1267, %1268 : vector<2x128xf32>
    %1270 = math.tanh %1259 : vector<2x128xf32>
    %1271 = vector.extract_strided_slice %1269 {offsets = [0, 0], sizes = [2, 32], strides = [1, 1]} : vector<2x128xf32> to vector<2x32xf32>
    %1272 = vector.extract_strided_slice %1269 {offsets = [0, 32], sizes = [2, 32], strides = [1, 1]} : vector<2x128xf32> to vector<2x32xf32>
    %1273 = vector.extract_strided_slice %1270 {offsets = [0, 64], sizes = [2, 32], strides = [1, 1]} : vector<2x128xf32> to vector<2x32xf32>
    %1274 = vector.extract_strided_slice %1269 {offsets = [0, 96], sizes = [2, 32], strides = [1, 1]} : vector<2x128xf32> to vector<2x32xf32>
    %1275 = arith.mulf %1272, %1210 : vector<2x32xf32>
    %1276 = arith.mulf %1271, %1273 : vector<2x32xf32>
    %1277 = arith.addf %1275, %1276 : vector<2x32xf32>
    %1278 = math.tanh %1277 : vector<2x32xf32>
    %1279 = arith.mulf %1274, %1278 : vector<2x32xf32>
    %1280 = vector.broadcast %1244 : vector<2x1xf32> to vector<2x32xf32>
    %1281 = arith.mulf %1280, %1279 : vector<2x32xf32>
    %cst_260 = arith.constant 1.000000e+00 : f32
    %1282 = vector.broadcast %cst_260 : f32 to vector<2x1xf32>
    %1283 = arith.subf %1282, %1244 : vector<2x1xf32>
    %1284 = vector.broadcast %1283 : vector<2x1xf32> to vector<2x32xf32>
    %1285 = arith.mulf %1284, %1203 : vector<2x32xf32>
    %1286 = arith.addf %1281, %1285 : vector<2x32xf32>
    %1287 = vector.broadcast %1244 : vector<2x1xf32> to vector<2x32xf32>
    %1288 = arith.mulf %1287, %1277 : vector<2x32xf32>
    %cst_261 = arith.constant 1.000000e+00 : f32
    %1289 = vector.broadcast %cst_261 : f32 to vector<2x1xf32>
    %1290 = arith.subf %1289, %1244 : vector<2x1xf32>
    %1291 = vector.broadcast %1290 : vector<2x1xf32> to vector<2x32xf32>
    %1292 = arith.mulf %1291, %1210 : vector<2x32xf32>
    %1293 = arith.addf %1288, %1292 : vector<2x32xf32>
    %1294 = arith.negf %1264 : vector<2x128xf32>
    %1295 = math.exp %1294 : vector<2x128xf32>
    %cst_262 = arith.constant 1.000000e+00 : f32
    %1296 = vector.broadcast %cst_262 : f32 to vector<2x128xf32>
    %1297 = arith.addf %1296, %1295 : vector<2x128xf32>
    %1298 = arith.divf %1296, %1297 : vector<2x128xf32>
    %1299 = math.tanh %1264 : vector<2x128xf32>
    %1300 = vector.extract_strided_slice %1298 {offsets = [0, 0], sizes = [2, 32], strides = [1, 1]} : vector<2x128xf32> to vector<2x32xf32>
    %1301 = vector.extract_strided_slice %1298 {offsets = [0, 32], sizes = [2, 32], strides = [1, 1]} : vector<2x128xf32> to vector<2x32xf32>
    %1302 = vector.extract_strided_slice %1299 {offsets = [0, 64], sizes = [2, 32], strides = [1, 1]} : vector<2x128xf32> to vector<2x32xf32>
    %1303 = vector.extract_strided_slice %1298 {offsets = [0, 96], sizes = [2, 32], strides = [1, 1]} : vector<2x128xf32> to vector<2x32xf32>
    %1304 = arith.mulf %1301, %1239 : vector<2x32xf32>
    %1305 = arith.mulf %1300, %1302 : vector<2x32xf32>
    %1306 = arith.addf %1304, %1305 : vector<2x32xf32>
    %1307 = math.tanh %1306 : vector<2x32xf32>
    %1308 = arith.mulf %1303, %1307 : vector<2x32xf32>
    %1309 = vector.broadcast %1248 : vector<2x1xf32> to vector<2x32xf32>
    %1310 = arith.mulf %1309, %1308 : vector<2x32xf32>
    %cst_263 = arith.constant 1.000000e+00 : f32
    %1311 = vector.broadcast %cst_263 : f32 to vector<2x1xf32>
    %1312 = arith.subf %1311, %1248 : vector<2x1xf32>
    %1313 = vector.broadcast %1312 : vector<2x1xf32> to vector<2x32xf32>
    %1314 = arith.mulf %1313, %1232 : vector<2x32xf32>
    %1315 = arith.addf %1310, %1314 : vector<2x32xf32>
    %1316 = vector.broadcast %1248 : vector<2x1xf32> to vector<2x32xf32>
    %1317 = arith.mulf %1316, %1306 : vector<2x32xf32>
    %cst_264 = arith.constant 1.000000e+00 : f32
    %1318 = vector.broadcast %cst_264 : f32 to vector<2x1xf32>
    %1319 = arith.subf %1318, %1248 : vector<2x1xf32>
    %1320 = vector.broadcast %1319 : vector<2x1xf32> to vector<2x32xf32>
    %1321 = arith.mulf %1320, %1239 : vector<2x32xf32>
    %1322 = arith.addf %1317, %1321 : vector<2x32xf32>
    %c7_i32_265 = arith.constant 7 : i32
    %c7_i32_266 = arith.constant 7 : i32
    %1323 = arith.subi %c7_i32_266, %c7_i32_265 : i32
    %1324 = vector.broadcast %c7_i32_265 : i32 to vector<2x1xi32>
    %1325 = arith.cmpi sgt, %0, %1324 : vector<2x1xi32>
    %1326 = arith.extui %1325 : vector<2x1xi1> to vector<2x1xi32>
    %1327 = arith.sitofp %1326 : vector<2x1xi32> to vector<2x1xf32>
    %1328 = vector.broadcast %1323 : i32 to vector<2x1xi32>
    %1329 = arith.cmpi sgt, %0, %1328 : vector<2x1xi32>
    %1330 = arith.extui %1329 : vector<2x1xi1> to vector<2x1xi32>
    %1331 = arith.sitofp %1330 : vector<2x1xi32> to vector<2x1xf32>
    %c2_i32_267 = arith.constant 2 : i32
    %1332 = arith.muli %c7_i32_265, %c2_i32_267 : i32
    %1333 = arith.index_cast %1332 : i32 to index
    %c0_268 = arith.constant 0 : index
    %1334 = vector.load %arg14[%1333, %c0_268] : memref<16x256xf32, #tpu.memory_space<vmem>>, vector<2x256xf32>
    %c2_i32_269 = arith.constant 2 : i32
    %1335 = arith.muli %1323, %c2_i32_269 : i32
    %1336 = arith.index_cast %1335 : i32 to index
    %c0_270 = arith.constant 0 : index
    %1337 = vector.load %arg14[%1336, %c0_270] : memref<16x256xf32, #tpu.memory_space<vmem>>, vector<2x256xf32>
    %1338 = vector.extract_strided_slice %1334 {offsets = [0, 0], sizes = [2, 128], strides = [1, 1]} : vector<2x256xf32> to vector<2x128xf32>
    %1339 = arith.truncf %1286 : vector<2x32xf32> to vector<2x32xbf16>
    %1340 = arith.truncf %740 : vector<32x128xf32> to vector<32x128xbf16>
    %cst_271 = arith.constant dense<0.000000e+00> : vector<2x128xf32>
    %1341 = tpu.matmul %1339, %1340, %cst_271 {dimension_numbers = #tpu.dot_dimension_numbers<[1], [0], [0], [1], [0, 0, 1, 1], [], []>} : vector<2x32xbf16>, vector<32x128xbf16>, vector<2x128xf32> -> vector<2x128xf32>
    %1342 = arith.addf %1338, %1341 : vector<2x128xf32>
    %1343 = vector.extract_strided_slice %1337 {offsets = [0, 128], sizes = [2, 128], strides = [1, 1]} : vector<2x256xf32> to vector<2x128xf32>
    %1344 = arith.truncf %1315 : vector<2x32xf32> to vector<2x32xbf16>
    %1345 = arith.truncf %741 : vector<32x128xf32> to vector<32x128xbf16>
    %cst_272 = arith.constant dense<0.000000e+00> : vector<2x128xf32>
    %1346 = tpu.matmul %1344, %1345, %cst_272 {dimension_numbers = #tpu.dot_dimension_numbers<[1], [0], [0], [1], [0, 0, 1, 1], [], []>} : vector<2x32xbf16>, vector<32x128xbf16>, vector<2x128xf32> -> vector<2x128xf32>
    %1347 = arith.addf %1343, %1346 : vector<2x128xf32>
    %1348 = arith.negf %1342 : vector<2x128xf32>
    %1349 = math.exp %1348 : vector<2x128xf32>
    %cst_273 = arith.constant 1.000000e+00 : f32
    %1350 = vector.broadcast %cst_273 : f32 to vector<2x128xf32>
    %1351 = arith.addf %1350, %1349 : vector<2x128xf32>
    %1352 = arith.divf %1350, %1351 : vector<2x128xf32>
    %1353 = math.tanh %1342 : vector<2x128xf32>
    %1354 = vector.extract_strided_slice %1352 {offsets = [0, 0], sizes = [2, 32], strides = [1, 1]} : vector<2x128xf32> to vector<2x32xf32>
    %1355 = vector.extract_strided_slice %1352 {offsets = [0, 32], sizes = [2, 32], strides = [1, 1]} : vector<2x128xf32> to vector<2x32xf32>
    %1356 = vector.extract_strided_slice %1353 {offsets = [0, 64], sizes = [2, 32], strides = [1, 1]} : vector<2x128xf32> to vector<2x32xf32>
    %1357 = vector.extract_strided_slice %1352 {offsets = [0, 96], sizes = [2, 32], strides = [1, 1]} : vector<2x128xf32> to vector<2x32xf32>
    %1358 = arith.mulf %1355, %1293 : vector<2x32xf32>
    %1359 = arith.mulf %1354, %1356 : vector<2x32xf32>
    %1360 = arith.addf %1358, %1359 : vector<2x32xf32>
    %1361 = math.tanh %1360 : vector<2x32xf32>
    %1362 = arith.mulf %1357, %1361 : vector<2x32xf32>
    %1363 = vector.broadcast %1327 : vector<2x1xf32> to vector<2x32xf32>
    %1364 = arith.mulf %1363, %1362 : vector<2x32xf32>
    %cst_274 = arith.constant 1.000000e+00 : f32
    %1365 = vector.broadcast %cst_274 : f32 to vector<2x1xf32>
    %1366 = arith.subf %1365, %1327 : vector<2x1xf32>
    %1367 = vector.broadcast %1366 : vector<2x1xf32> to vector<2x32xf32>
    %1368 = arith.mulf %1367, %1286 : vector<2x32xf32>
    %1369 = arith.addf %1364, %1368 : vector<2x32xf32>
    %1370 = vector.broadcast %1327 : vector<2x1xf32> to vector<2x32xf32>
    %1371 = arith.mulf %1370, %1360 : vector<2x32xf32>
    %cst_275 = arith.constant 1.000000e+00 : f32
    %1372 = vector.broadcast %cst_275 : f32 to vector<2x1xf32>
    %1373 = arith.subf %1372, %1327 : vector<2x1xf32>
    %1374 = vector.broadcast %1373 : vector<2x1xf32> to vector<2x32xf32>
    %1375 = arith.mulf %1374, %1293 : vector<2x32xf32>
    %1376 = arith.addf %1371, %1375 : vector<2x32xf32>
    %1377 = arith.negf %1347 : vector<2x128xf32>
    %1378 = math.exp %1377 : vector<2x128xf32>
    %cst_276 = arith.constant 1.000000e+00 : f32
    %1379 = vector.broadcast %cst_276 : f32 to vector<2x128xf32>
    %1380 = arith.addf %1379, %1378 : vector<2x128xf32>
    %1381 = arith.divf %1379, %1380 : vector<2x128xf32>
    %1382 = math.tanh %1347 : vector<2x128xf32>
    %1383 = vector.extract_strided_slice %1381 {offsets = [0, 0], sizes = [2, 32], strides = [1, 1]} : vector<2x128xf32> to vector<2x32xf32>
    %1384 = vector.extract_strided_slice %1381 {offsets = [0, 32], sizes = [2, 32], strides = [1, 1]} : vector<2x128xf32> to vector<2x32xf32>
    %1385 = vector.extract_strided_slice %1382 {offsets = [0, 64], sizes = [2, 32], strides = [1, 1]} : vector<2x128xf32> to vector<2x32xf32>
    %1386 = vector.extract_strided_slice %1381 {offsets = [0, 96], sizes = [2, 32], strides = [1, 1]} : vector<2x128xf32> to vector<2x32xf32>
    %1387 = arith.mulf %1384, %1322 : vector<2x32xf32>
    %1388 = arith.mulf %1383, %1385 : vector<2x32xf32>
    %1389 = arith.addf %1387, %1388 : vector<2x32xf32>
    %1390 = math.tanh %1389 : vector<2x32xf32>
    %1391 = arith.mulf %1386, %1390 : vector<2x32xf32>
    %1392 = vector.broadcast %1331 : vector<2x1xf32> to vector<2x32xf32>
    %1393 = arith.mulf %1392, %1391 : vector<2x32xf32>
    %cst_277 = arith.constant 1.000000e+00 : f32
    %1394 = vector.broadcast %cst_277 : f32 to vector<2x1xf32>
    %1395 = arith.subf %1394, %1331 : vector<2x1xf32>
    %1396 = vector.broadcast %1395 : vector<2x1xf32> to vector<2x32xf32>
    %1397 = arith.mulf %1396, %1315 : vector<2x32xf32>
    %1398 = arith.addf %1393, %1397 : vector<2x32xf32>
    %1399 = vector.broadcast %1331 : vector<2x1xf32> to vector<2x32xf32>
    %1400 = arith.mulf %1399, %1389 : vector<2x32xf32>
    %cst_278 = arith.constant 1.000000e+00 : f32
    %1401 = vector.broadcast %cst_278 : f32 to vector<2x1xf32>
    %1402 = arith.subf %1401, %1331 : vector<2x1xf32>
    %1403 = vector.broadcast %1402 : vector<2x1xf32> to vector<2x32xf32>
    %1404 = arith.mulf %1403, %1322 : vector<2x32xf32>
    %1405 = arith.addf %1400, %1404 : vector<2x32xf32>
    %c8_i32_279 = arith.constant 8 : i32
    %c0_280 = arith.constant 0 : index
    %c0_281 = arith.constant 0 : index
    %1406 = vector.load %arg11[%c0_280, %c0_281] : memref<1x64xf32, #tpu.memory_space<vmem>>, vector<1x64xf32>
    %1407 = vector.extract_strided_slice %1406 {offsets = [0, 0], sizes = [1, 32], strides = [1, 1]} : vector<1x64xf32> to vector<1x32xf32>
    %1408 = vector.broadcast %1407 : vector<1x32xf32> to vector<2x32xf32>
    %1409 = arith.mulf %1369, %1408 : vector<2x32xf32>
    %cst_282 = arith.constant dense<0.000000e+00> : vector<2xf32>
    %1410 = vector.multi_reduction <add>, %1409, %cst_282 [1] : vector<2x32xf32> to vector<2xf32>
    %1411 = vector.shape_cast %1410 : vector<2xf32> to vector<2x1xf32>
    %1412 = vector.extract_strided_slice %1406 {offsets = [0, 32], sizes = [1, 32], strides = [1, 1]} : vector<1x64xf32> to vector<1x32xf32>
    %1413 = vector.broadcast %1412 : vector<1x32xf32> to vector<2x32xf32>
    %1414 = arith.mulf %1398, %1413 : vector<2x32xf32>
    %cst_283 = arith.constant dense<0.000000e+00> : vector<2xf32>
    %1415 = vector.multi_reduction <add>, %1414, %cst_283 [1] : vector<2x32xf32> to vector<2xf32>
    %1416 = vector.shape_cast %1415 : vector<2xf32> to vector<2x1xf32>
    %1417 = arith.addf %1411, %1416 : vector<2x1xf32>
    %c0_284 = arith.constant 0 : index
    %c0_285 = arith.constant 0 : index
    %1418 = vector.load %arg12[%c0_284, %c0_285] : memref<1x1xf32, #tpu.memory_space<vmem>>, vector<1x1xf32>
    %1419 = vector.broadcast %1418 : vector<1x1xf32> to vector<2x1xf32>
    %1420 = arith.addf %1417, %1419 : vector<2x1xf32>
    %c0_286 = arith.constant 0 : index
    %c0_287 = arith.constant 0 : index
    %1421 = vector.load %arg13[%c0_286, %c0_287] : memref<2x1xf32, #tpu.memory_space<vmem>>, vector<2x1xf32>
    tpu.vector_store %arg13[%c0_286, %c0_287], %1420 {strides = array<i32>} : memref<2x1xf32, #tpu.memory_space<vmem>>, vector<2x1xf32>,
    return
  }
  func.func @transform_0(%arg0: i32) -> (i32, i32) {
    %c0_i32 = arith.constant 0 : i32
    %c0_i32_0 = arith.constant 0 : i32
    %c0_i32_1 = arith.constant 0 : i32
    return %c0_i32, %c0_i32_0 : i32, i32
  }
  func.func @transform_1(%arg0: i32) -> (i32, i32) {
    %c0_i32 = arith.constant 0 : i32
    %c0_i32_0 = arith.constant 0 : i32
    %c0_i32_1 = arith.constant 0 : i32
    return %c0_i32, %c0_i32_0 : i32, i32
  }
  func.func @transform_2(%arg0: i32) -> (i32, i32) {
    %c0_i32 = arith.constant 0 : i32
    %c0_i32_0 = arith.constant 0 : i32
    %c0_i32_1 = arith.constant 0 : i32
    return %c0_i32, %c0_i32_0 : i32, i32
  }
  func.func @transform_3(%arg0: i32) -> (i32, i32) {
    %c0_i32 = arith.constant 0 : i32
    %c0_i32_0 = arith.constant 0 : i32
    %c0_i32_1 = arith.constant 0 : i32
    return %c0_i32, %c0_i32_0 : i32, i32
  }
  func.func @transform_4(%arg0: i32) -> (i32, i32) {
    %c0_i32 = arith.constant 0 : i32
    %c0_i32_0 = arith.constant 0 : i32
    %c0_i32_1 = arith.constant 0 : i32
    return %c0_i32, %c0_i32_0 : i32, i32
  }
  func.func @transform_5(%arg0: i32) -> (i32, i32) {
    %c0_i32 = arith.constant 0 : i32
    %c0_i32_0 = arith.constant 0 : i32
    %c0_i32_1 = arith.constant 0 : i32
    return %c0_i32, %c0_i32_0 : i32, i32
  }
  func.func @transform_6(%arg0: i32) -> (i32, i32) {
    %c0_i32 = arith.constant 0 : i32
    %c0_i32_0 = arith.constant 0 : i32
    %c0_i32_1 = arith.constant 0 : i32
    return %c0_i32, %c0_i32_0 : i32, i32
  }
  func.func @transform_7(%arg0: i32) -> (i32, i32) {
    %c0_i32 = arith.constant 0 : i32
    %c0_i32_0 = arith.constant 0 : i32
    %c0_i32_1 = arith.constant 0 : i32
    return %c0_i32, %c0_i32_0 : i32, i32
  }
  func.func @transform_8(%arg0: i32) -> (i32, i32) {
    %c0_i32 = arith.constant 0 : i32
    %c0_i32_0 = arith.constant 0 : i32
    %c0_i32_1 = arith.constant 0 : i32
    return %c0_i32, %c0_i32_0 : i32, i32
  }
  func.func @transform_9(%arg0: i32) -> (i32, i32) {
    %c0_i32 = arith.constant 0 : i32
    %c0_i32_0 = arith.constant 0 : i32
    %c0_i32_1 = arith.constant 0 : i32
    return %c0_i32, %c0_i32_0 : i32, i32
  }
  func.func @transform_10(%arg0: i32) -> (i32, i32) {
    %c0_i32 = arith.constant 0 : i32
    %c0_i32_0 = arith.constant 0 : i32
    %c0_i32_1 = arith.constant 0 : i32
    return %c0_i32, %c0_i32_0 : i32, i32
  }
  func.func @transform_11(%arg0: i32) -> (i32, i32) {
    %c0_i32 = arith.constant 0 : i32
    %c0_i32_0 = arith.constant 0 : i32
    %c0_i32_1 = arith.constant 0 : i32
    return %c0_i32, %c0_i32_0 : i32, i32
  }
  func.func @transform_12(%arg0: i32) -> (i32, i32) {
    %c0_i32 = arith.constant 0 : i32
    %c0_i32_0 = arith.constant 0 : i32
    %c0_i32_1 = arith.constant 0 : i32
    return %c0_i32, %c0_i32_0 : i32, i32
  }
}

</mosaic_0001>

<bundles_post_ra>
// kernel: bert_bilstm_forward.2
= control target key start
LH: loop header
LB: loop body
LE: loop exit
PB: predicated region body
PF: predicated region fallthrough
CT: control target
= control target key end

     0   :  { %s3687_s0 = inlined_call_operand.vmem [shape: f32[16,128], index: 0, kind: input, shape index: {}]   ;;  %s3688_s1 = inlined_call_operand.vmem [shape: f32[16,16], index: 1, kind: input, shape index: {}]   ;;  %s3689_s2 = inlined_call_operand.vmem [shape: f32[1,128], index: 2, kind: input, shape index: {}]   ;;  %s3690_s3 = inlined_call_operand.vmem [shape: f32[1,128], index: 3, kind: input, shape index: {}]   ;;  %s3691_s4 = inlined_call_operand.hbm [shape: f32[2,128,384], index: 4, kind: input, shape index: {}]   ;;  %s3692_s5 = inlined_call_operand.vmem [shape: f32[2,1,384], index: 5, kind: input, shape index: {}]   ;;  %s3693_s6 = inlined_call_operand.hbm [shape: f32[2,128,128], index: 6, kind: input, shape index: {}]   ;;  %s3694_s7 = inlined_call_operand.vmem [shape: f32[2,1,128], index: 7, kind: input, shape index: {}]   ;;  %s3695_s8 = inlined_call_operand.vmem [shape: f32[2,1,128], index: 8, kind: input, shape index: {}]   ;;  %s3696_s9 = inlined_call_operand.vmem [shape: f32[2,1,128], index: 9, kind: input, shape index: {}]   ;;  %s3697_s10 = inlined_call_operand.hbm [shape: f32[2,128,512], index: 10, kind: input, shape index: {}]   ;;  %s3698_s11 = inlined_call_operand.vmem [shape: f32[2,1,512], index: 11, kind: input, shape index: {}]   ;;  %s3699_s12 = inlined_call_operand.hbm [shape: f32[2,512,128], index: 12, kind: input, shape index: {}]   ;;  %s3700_s13 = inlined_call_operand.vmem [shape: f32[2,1,128], index: 13, kind: input, shape index: {}]   ;;  %s3701_s14 = inlined_call_operand.vmem [shape: f32[2,1,128], index: 14, kind: input, shape index: {}]   ;;  %s3702_s15 = inlined_call_operand.vmem [shape: f32[2,1,128], index: 15, kind: input, shape index: {}]   ;;  %s3703_s16 = inlined_call_operand.vmem [shape: f32[16,128], index: 16, kind: output, shape index: {}]  }
   0x1   :  { %3714 = sst [smem:[#allocation15_spill]] %s3687_s0 }
   0x2   :  { %3715 = sst [smem:[#allocation16_spill]] %s3688_s1 }
   0x3   :  { %3716 = sst [smem:[#allocation17_spill]] %s3689_s2 }
   0x4   :  { %3717 = sst [smem:[#allocation18_spill]] %s3690_s3 }
   0x5   :  { %3718 = sst [smem:[#allocation19_spill]] %s3691_s4 }
   0x6   :  { %3719 = sst [smem:[#allocation20_spill]] %s3693_s6 }
   0x7   :  { %3720 = sst [smem:[#allocation21_spill]] %s3697_s10 }
   0x8   :  { %3721 = sst [smem:[#allocation22_spill]] %s3699_s12 }
   0x9   :  { %3722 = sst [smem:[#allocation23_spill]] %s3702_s15 }
   0xa   :  { %3723 = sst [smem:[#allocation24_spill]] %s3703_s16 }
   0xb   :  { %21 = vsyncpa [#allocation3], 0 }
   0xc   :  { %23 = vsyncpa [#allocation3 + $0x1], 0 }
   0xd   :  { %24 = vsyncpa [#allocation5], 0 }
   0xe   :  { %26 = vsyncpa [#allocation5 + $0x1], 0 }
   0xf   :  { %27 = vsyncpa [#allocation8], 0 }
  0x10   :  { %29 = vsyncpa [#allocation8 + $0x1], 0  ;;  %s2948_s21 = smov 0   ;;  %s2950_s22 = smov 0  }
  0x11   :  { %s2952_s23 = smov 0   ;;  %s2954_s24 = smov 0  }
  0x12 LB: > { %3724 = sst [smem:[#allocation12_spill]] %s2841_s23  ;;  %s2967_s25 = sadd.s32 4294967295, %s2845_s24   ;;  %s2845_s24 = sphi %s2954_s24, %s3750_s24   ;;  %s2841_s23 = sphi %s2952_s23, %s3752_s23   ;;  %s2837_s22 = sphi %s2950_s22, %s3754_s22   ;;  %s2833_s21 = sphi %s2948_s21, %s3753_s21  }
  0x13   : > { %s2970_s26 = sadd.s32 1, %s2845_s24   ;;  %s126_s28 = sadd.s32 1, %s2841_s23 }
  0x14   : > { %3725 = sst [smem:[#allocation13_spill]] %s2970_s26  ;;  %s123_s27 = ssub.s32 %s2845_s24, %s2970_s26 }
  0x15   : > { %p124_p0 = scmp.eq.s32.totalorder %s123_s27, 0  ;;  %p133_p1 = scmp.ne.s32.totalorder %s2841_s23, %s2837_s22 }
  0x16   : > { %p134_p2 = scmp.eq.s32.totalorder %s2845_s24, 0  ;;  %p139_p3 = scmp.ne.s32.totalorder %s2837_s22, %s2833_s21 }
  0x17   : > { %s2980_s29 = scalar_select %p124_p0, %s2841_s23, %s126_s28  }
  0x18   : > { %p135_p4 = por %p134_p2, %p133_p1  ;;  %p140_p5 = scmp.eq.s32.totalorder %s2967_s25, 0 }
  0x19   : > { %3726 = sst [smem:[#allocation14_spill]] %s2980_s29  ;;  %p2563_p6 = scmp.lt.s32.totalorder %s2845_s24, 2 }
  0x1a   : > { %p2984_p7 = por %p140_p5, %p139_p3  ;;  %s2989_s0 = sand.u32 1, %s2841_s23  }
  0x1b   : > { %p2991_p8 = pnand %p2563_p6, %p135_p4  ;;  %s510_s18 = sand.u32 1, %s2845_s24  }
  0x1c   : > { %s3727_s30 = scalar_select %p2984_p7, 1, 0 }
  0x1d   : > { %s2336_s19 = sshll.u32 %s2989_s0, 7  ;;  %s2369_s20 = sshll.u32 %s2845_s24, 11 }
  0x1e   : > { %s514_s21 = scalar_lea.vmem [#allocation4], %s2336_s19  ;;  %s3729_s6 = sld [smem:[#allocation20_spill]] }
  0x1f   : > { %s521_s27 = sshll.u32 %s514_s21, 4  ;;  %s3005_s23 = scalar_lea.sflag [#allocation5], %s510_s18  ;;  %s3003_s27 = int_to_ptr.vmem [resolvable:$true] %s521_s27 }
  0x20   : > { %p3011_p10 = pneg %p2991_p8 }
  0x24   : > { %s3001_s26 = scalar_lea.hbm %s3729_s6, %s2369_s20  ;;  %s2688_s20 = scalar_lea.hbm %s3729_s6, 4096 }
  0x25   : > { %s2683_s1 = scalar_lea.hbm %s3001_s26, 2048  ;;  %p2689_p13 = scmp.lt.u32.totalorder %s3001_s26, %s3729_s6 }
  0x26   : > { %p2684_p9 = scmp.ne.s32.totalorder %s3001_s26, %s2683_s1  ;;  %p2690_p0 = scmp.lt.u32.totalorder %s2688_s20, %s2683_s1 }
  0x27   : > { %p2692_p2 = scmp.lt.u32.totalorder %s2683_s1, %s3001_s26 }
  0x28   : > { %p2686_p11 = pnand %p3011_p10, %p2684_p9  ;;  %p2691_p1 = por %p2690_p0, %p2689_p13 }
  0x2a   : > { %p2687_p12 = pneg %p2686_p11  ;;  %p2693_p3 = por %p2692_p2, %p2691_p1 }
  0x2c   : > { %p2694_p4 = pnand %p2693_p3, %p2687_p12 }
  0x2e   : > { %2697 = shalt.err (!%p2694_p4)
}
  0x2f   : > { %s2698_s18 = scalar_lea.vmem %s3003_s27, 2048  ;;  %s2847_s29 = smov [#allocation4]  }
  0x30   : > { %p2699_p5 = scmp.ne.s32.totalorder %s3003_s27, %s2698_s18  ;;  %s2703_s19 = sshll.u32 %s2847_s29, 4  ;;  %s2704_s19 = int_to_ptr.vmem [resolvable:$false] %s2703_s19 }
  0x31   : > { %s2705_s21 = scalar_lea.vmem %s2704_s19, 4096  ;;  %p2706_p11 = scmp.lt.s32.totalorder %s3003_s27, %s2704_s19 }
  0x32   : > { %p2701_p6 = pnand %p2699_p5, %p3011_p10  ;;  %p2707_p7 = scmp.lt.s32.totalorder %s2705_s21, %s2698_s18 }
  0x34   : > { %p2702_p9 = pneg %p2701_p6  ;;  %p2708_p13 = por %p2707_p7, %p2706_p11 }
  0x36   : > { %p2709_p0 = pnand %p2708_p13, %p2702_p9 }
  0x38   : > { %2712 = shalt.err (!%p2709_p0)
}
  0x39   : > { %s3712_s1 = smov 128   ;;  %s3713_s20 = smov 8  }
  0x3a   : > { %2556 = dma.hbm_to_vmem [thread:$0]  (!%p2991_p8), %s3001_s26, 2048, %s3003_s27, %s3005_s23, %s3712_s1, %s3712_s1, %s3713_s20  }
  0x3b   : > { %p2345_p7 = scmp.ge.s32.totalorder %s2845_s24, 1  ;;  %p614_p12 = scmp.lt.s32.totalorder %s2845_s24, 3 }
  0x3c   : > { %s2538_s28 = smul.u32 384, %s2989_s0  ;;  %s3732_s4 = sld [smem:[#allocation19_spill]] }
  0x3d   : > { %p3041_p1 = pnand %p2345_p7, %p614_p12  ;;  %s2539_s29 = smul.u32 6144, %s2845_s24 }
  0x3e   : > { %s486_s3 = scalar_lea.vmem [#allocation2], %s2538_s28  ;;  %s483_s26 = scalar_lea.sflag [#allocation3], %s2989_s0 }
  0x3f   : > { %s3731_s18 = scalar_select %p3041_p1, 1, 0 }
  0x40   : > { %s493_s2 = sshll.u32 %s486_s3, 4  ;;  %s3051_s2 = int_to_ptr.vmem [resolvable:$true] %s493_s2 }
  0x42   : > { %s3049_s6 = scalar_lea.hbm %s3732_s4, %s2539_s29  ;;  %s2718_s19 = scalar_lea.hbm %s3732_s4, 12288 }
  0x43   : > { %s2713_s27 = scalar_lea.hbm %s3049_s6, 6144  ;;  %p2719_p5 = scmp.lt.u32.totalorder %s3049_s6, %s3732_s4 }
  0x44   : > { %p2714_p2 = scmp.ne.s32.totalorder %s3049_s6, %s2713_s27  ;;  %p2720_p6 = scmp.lt.u32.totalorder %s2718_s19, %s2713_s27 }
  0x45   : > { %p2722_p11 = scmp.lt.u32.totalorder %s2713_s27, %s3049_s6 }
  0x46   : > { %p2716_p3 = pnand %p2714_p2, %p3011_p10  ;;  %p2721_p9 = por %p2720_p6, %p2719_p5 }
  0x48   : > { %p2717_p4 = pneg %p2716_p3  ;;  %p2723_p13 = por %p2722_p11, %p2721_p9 }
  0x4a   : > { %p2724_p0 = pnand %p2723_p13, %p2717_p4 }
  0x4c   : > { %2727 = shalt.err (!%p2724_p0)
}
  0x4d   : > { %s2728_s3 = scalar_lea.vmem %s3051_s2, 6144  ;;  %s2850_s1 = smov [#allocation2]  }
  0x4e   : > { %p2729_p7 = scmp.ne.s32.totalorder %s3051_s2, %s2728_s3  ;;  %s2733_s20 = sshll.u32 %s2850_s1, 4  ;;  %s2734_s20 = int_to_ptr.vmem [resolvable:$false] %s2733_s20 }
  0x4f   : > { %s2735_s28 = scalar_lea.vmem %s2734_s20, 12288  ;;  %p2736_p3 = scmp.lt.s32.totalorder %s3051_s2, %s2734_s20 }
  0x50   : > { %p2731_p12 = pnand %p2729_p7, %p3011_p10  ;;  %p2737_p1 = scmp.lt.s32.totalorder %s2735_s28, %s2728_s3 }
  0x52   : > { %p2732_p2 = pneg %p2731_p12  ;;  %p2738_p5 = por %p2737_p1, %p2736_p3 }
  0x54   : > { %p2739_p6 = pnand %p2738_p5, %p2732_p2 }
  0x56   : > { %2742 = shalt.err (!%p2739_p6)
}
  0x57   : > { %s2851_s27 = smov 384   ;;  %s2852_s19 = smov 24  }
  0x58   : > { %2553 = dma.hbm_to_vmem [thread:$0]  (!%p2991_p8), %s3049_s6, 6144, %s3051_s2, %s483_s26, %s2851_s27, %s2851_s27, %s2852_s19  }
  0x59   : > { %s2339_s29 = sshll.u32 %s2989_s0, 9  ;;  %s2370_s21 = sshll.u32 %s2845_s24, 13 }
  0x5a   : > { %s3733_s10 = sld [smem:[#allocation21_spill]]  ;;  %s553_s28 = scalar_lea.vmem [#allocation6], %s2339_s29 }
  0x5b   : > { %s560_s4 = sshll.u32 %s553_s28, 4  ;;  %s3088_s4 = int_to_ptr.vmem [resolvable:$true] %s560_s4 }
  0x60   : > { %s3084_s20 = scalar_lea.hbm %s3733_s10, %s2370_s21  ;;  %s2748_s26 = scalar_lea.hbm %s3733_s10, 16384 }
  0x61   : > { %s2743_s15 = scalar_lea.hbm %s3084_s20, 8192  ;;  %p2749_p11 = scmp.lt.u32.totalorder %s3084_s20, %s3733_s10 }
  0x62   : > { %p2744_p1 = scmp.ne.s32.totalorder %s3084_s20, %s2743_s15  ;;  %p2750_p13 = scmp.lt.u32.totalorder %s2748_s26, %s2743_s15 }
  0x63   : > { %p2752_p7 = scmp.lt.u32.totalorder %s2743_s15, %s3084_s20 }
  0x64   : > { %p2746_p4 = pnand %p2744_p1, %p3011_p10  ;;  %p2751_p0 = por %p2750_p13, %p2749_p11 }
  0x66   : > { %p2747_p9 = pneg %p2746_p4  ;;  %p2753_p12 = por %p2752_p7, %p2751_p0 }
  0x68   : > { %p2754_p2 = pnand %p2753_p12, %p2747_p9 }
  0x6a   : > { %2757 = shalt.err (!%p2754_p2)
}
  0x6b   : > { %s2758_s3 = scalar_lea.vmem %s3088_s4, 8192  ;;  %s2853_s1 = smov [#allocation6]  }
  0x6c   : > { %p2759_p3 = scmp.ne.s32.totalorder %s3088_s4, %s2758_s3  ;;  %s2763_s28 = sshll.u32 %s2853_s1, 4  ;;  %s2764_s28 = int_to_ptr.vmem [resolvable:$false] %s2763_s28 }
  0x6d   : > { %s2765_s2 = scalar_lea.vmem %s2764_s28, 16384  ;;  %p2766_p1 = scmp.lt.s32.totalorder %s3088_s4, %s2764_s28 }
  0x6e   : > { %p2761_p5 = pnand %p2759_p3, %p3011_p10  ;;  %p2767_p4 = scmp.lt.s32.totalorder %s2765_s2, %s2758_s3 }
  0x70   : > { %p2762_p6 = pneg %p2761_p5  ;;  %p2768_p11 = por %p2767_p4, %p2766_p1 }
  0x72   : > { %p2769_p13 = pnand %p2768_p11, %p2762_p6 }
  0x74   : > { %2772 = shalt.err (!%p2769_p13)
}
  0x75   : > { %s2854_s15 = smov 512   ;;  %s2855_s6 = smov 32  }
  0x76   : > { %2559 = dma.hbm_to_vmem [thread:$0]  (!%p2991_p8), %s3084_s20, 8192, %s3088_s4, %s3005_s23, %s2854_s15, %s2854_s15, %s2855_s6  }
  0x77   : > { %s3734_s12 = sld [smem:[#allocation22_spill]]  ;;  %s581_s3 = scalar_lea.vmem [#allocation7], %s2339_s29 }
  0x78   : > { %s588_s1 = sshll.u32 %s581_s3, 4  ;;  %s578_s28 = scalar_lea.sflag [#allocation8], %s2989_s0  ;;  %s3121_s1 = int_to_ptr.vmem [resolvable:$true] %s588_s1 }
  0x7d   : > { %s3117_s19 = scalar_lea.hbm %s3734_s12, %s2370_s21  ;;  %s2778_s24 = scalar_lea.hbm %s3734_s12, 16384 }
  0x7e   : > { %s2773_s2 = scalar_lea.hbm %s3117_s19, 8192  ;;  %p2779_p12 = scmp.lt.u32.totalorder %s3117_s19, %s3734_s12 }
  0x7f   : > { %p2774_p9 = scmp.ne.s32.totalorder %s3117_s19, %s2773_s2  ;;  %p2780_p2 = scmp.lt.u32.totalorder %s2778_s24, %s2773_s2 }
  0x80   : > { %p2782_p5 = scmp.lt.u32.totalorder %s2773_s2, %s3117_s19 }
  0x81   : > { %p2776_p0 = pnand %p2774_p9, %p3011_p10  ;;  %p2781_p3 = por %p2780_p2, %p2779_p12 }
  0x83   : > { %p2777_p7 = pneg %p2776_p0  ;;  %p2783_p6 = por %p2782_p5, %p2781_p3 }
  0x85   : > { %p2784_p1 = pnand %p2783_p6, %p2777_p7 }
  0x87   : > { %2787 = shalt.err (!%p2784_p1)
}
  0x88   : > { %s2788_s29 = scalar_lea.vmem %s3121_s1, 8192  ;;  %s2856_s15 = smov [#allocation7]  }
  0x89   : > { %p2789_p4 = scmp.ne.s32.totalorder %s3121_s1, %s2788_s29  ;;  %s2793_s6 = sshll.u32 %s2856_s15, 4  ;;  %s2794_s6 = int_to_ptr.vmem [resolvable:$false] %s2793_s6 }
  0x8a   : > { %s2795_s26 = scalar_lea.vmem %s2794_s6, 16384  ;;  %p2796_p9 = scmp.lt.s32.totalorder %s3121_s1, %s2794_s6 }
  0x8b   : > { %p2791_p11 = pnand %p2789_p4, %p3011_p10  ;;  %p2797_p0 = scmp.lt.s32.totalorder %s2795_s26, %s2788_s29 }
  0x8d   : > { %p2792_p13 = pneg %p2791_p11  ;;  %p2798_p12 = por %p2797_p0, %p2796_p9 }
  0x8f   : > { %p2799_p2 = pnand %p2798_p12, %p2792_p13 }
  0x91   : > { %2802 = shalt.err (!%p2799_p2)
}
  0x92   : > { %s3735_s27 = smov 8   ;;  %s3736_s3 = smov 128  }
  0x93   : > { %2562 = dma.hbm_to_vmem [thread:$0]  (!%p2991_p8), %s3117_s19, 8192, %s3121_s1, %s578_s28, %s3736_s3, %s3736_s3, %s3735_s27  }
  0x94   : > { %p3737_p10 = scmp.ne.s32.totalorder %s3731_s18, 0 }
  0x95   : > { %s620_s16 = sand.u32 (!%p3737_p10), 1, %s2837_s22   ;;  %p3738_p7 = scmp.ne.s32.totalorder (!%p3737_p10), %s3727_s30, 0 }
  0x96   : > { %618 = sbr.rel (%p3737_p10) target bundleno = 3512 (0xdb8), region = 84  ;;  %s621_s4 = scalar_lea.sflag (!%p3737_p10), [#allocation3], %s620_s16 }
  0x97   : > { %s2540_s2 = smul.u32 (!%p3737_p10), 384, %s620_s16 }
  0x99   : > { %s3153_s23 = scalar_lea.vmem (!%p3737_p10), [#allocation2], %s2540_s2 }
  0x9d   : > { %2820 = dma.done.wait (%p3738_p7), %s621_s4, 6144  }
  0x9e   : > { %2822 = vsyncadd (%p3738_p7), %s621_s4, 4294961152  ;;  %s629_s0 = sand.u32 1, %s2967_s25   ;;  %s2346_s17 = sshll.u32 %s620_s16, 7 }
  0x9f   : > { %s630_s19 = scalar_lea.sflag [#allocation5], %s629_s0  ;;  %s3160_s1 = scalar_lea.vmem [#allocation4], %s2346_s17 }
  0xa0   : > { %2824 = dma.done.wait (%p3738_p7), %s630_s19, 10240  }
  0xa1   : > { %2826 = vsyncadd (%p3738_p7), %s630_s19, 4294957056  ;;  %s2347_s18 = sshll.u32 %s620_s16, 9  ;;  %s648_s24 = scalar_lea.sflag [#allocation8], %s620_s16 }
  0xa2   : > { %s3166_s28 = scalar_lea.vmem [#allocation6], %s2347_s18  ;;  %s3168_s21 = scalar_lea.vmem [#allocation7], %s2347_s18 }
  0xa3   : > { %2828 = dma.done.wait (%p3738_p7), %s648_s24, 8192  }
  0xa4   : > { %2830 = vsyncadd (%p3738_p7), %s648_s24, 4294959104  ;;  %p736_p8 = scmp.lt.s32.totalorder %s2967_s25, 1  ;;  %s3739_s26 = sld [smem:[#allocation23_spill]] }
  0xa5   : > { %p2350_p3 = scmp.ne.s32.totalorder %s2967_s25, 0 }
  0xa6   : > { %s3176_s20 = scalar_select %p736_p8, %s2967_s25, 1 }
  0xa7   : > { %766 = sbr.rel (%p2350_p3) target bundleno = 490 (0x1ea), region = 104  ;;  %s3740_s10 = sld [smem:[#allocation15_spill]] (!%p2350_p3) }
  0xa8   : > { %s2541_s29 = smul.u32 3, %s3176_s20  ;;  %s2349_s18 = sshll.u32 %s3176_s20, 2 }
  0xa9   : > { %s3200_s12 = scalar_lea.vmem %s3698_s11, %s2349_s18  ;;  %s755_s30 = scalar_lea.vmem %s3700_s13, %s3176_s20 }
  0xaa   : > { %s3194_s19 = scalar_lea.vmem %s3692_s5, %s2541_s29  ;;  %s758_s16 = scalar_lea.vmem %s3701_s14, %s3176_s20 }
  0xab   : > { %s761_s0 = scalar_lea.vmem %s3739_s26, %s3176_s20  ;;  %s3741_s3 = sld [smem:[#allocation17_spill]] (!%p2350_p3) }
  0xac   : > { %s3742_s6 = sld [smem:[#allocation18_spill]] (!%p2350_p3)  ;;  %s3743_s29 = sld [smem:[#allocation24_spill]] (!%p2350_p3) }
  0xad   : > { %v767_v0 = vld [vmem:[%s3740_s10] sm:$0xff] (!%p2350_p3)  ;;  %v768_v1 = vld [vmem:[%s3740_s10 + $0x8] sm:$0xff] (!%p2350_p3) }
  0xae   : > { %771 = vadd.xlane.f32.xlu0 %v767_v0 }
  0xb1   : > { %v2351_v17 = vld [vmem:[%s3741_s3] ss:$0 sm:$0xff] }
  0xb2   : > { %773 = vadd.xlane.f32.xlu0 %v768_v1  ;;  %v2352_v19 = vld [vmem:[%s3742_s6] ss:$0 sm:$0xff] }
 0x13b   : > { %v772_v2 = vpop.xlane.xlu0 %771 }
 0x13c   : > { %v776_v3 = vmul.f32 0.0078125, %v772_v2 }
 0x13e   : > { %v778_v4 = vsub.f32 %v767_v0, %v776_v3 }
 0x13f   : > { %v774_v5 = vpop.xlane.xlu0 %773 }
 0x140   : > { %v777_v6 = vmul.f32 0.0078125, %v774_v5  ;;  %v780_v7 = vmul.f32 %v778_v4, %v778_v4 }
 0x142   : > { %v779_v8 = vsub.f32 %v768_v1, %v777_v6  ;;  %782 = vadd.xlane.f32.xlu1 %v780_v7 }
 0x144   : > { %v781_v9 = vmul.f32 %v779_v8, %v779_v8 }
 0x146   : > { %784 = vadd.xlane.f32.xlu1 %v781_v9 }
 0x1cf   : > { %v783_v10 = vpop.xlane.xlu1 %782 }
 0x1d0   : > { %v786_v11 = vmul.f32 0.0078125, %v783_v10 }
 0x1d2   : > { %v788_v12 = vadd.f32 1e-12, %v786_v11 }
 0x1d3   : > { %v785_v13 = vpop.xlane.xlu1 %784 }
 0x1d4   : > { %2608 = vrsqrt.f32 %v788_v12  ;;  %v787_v14 = vmul.f32 0.0078125, %v785_v13 }
 0x1d6   : > { %v789_v15 = vadd.f32 1e-12, %v787_v14 }
 0x1d8   : > { %2610 = vrsqrt.f32 %v789_v15 }
 0x1de   : > { %v2609_v16 = vpop.eup %2608 }
 0x1df   : > { %v792_v18 = vmul.f32 %v2609_v16, %v778_v4 }
 0x1e1   : > { %v800_v20 = vmul.f32 %v2351_v17, %v792_v18 }
 0x1e2   : > { %v2611_v21 = vpop.eup %2610 }
 0x1e3   : > { %v808_v22 = vadd.f32 %v2352_v19, %v800_v20  ;;  %v793_v23 = vmul.f32 %v2611_v21, %v779_v8 }
 0x1e5   : > { %810 = vst [vmem:[%s3743_s29] sm:$0xff] %v808_v22  ;;  %v801_v24 = vmul.f32 %v2351_v17, %v793_v23 }
 0x1e7   : > { %v809_v25 = vadd.f32 %v2352_v19, %v801_v24 }
 0x1e9   : > { %811 = vst [vmem:[%s3743_s29 + $0x8] sm:$0xff] %v809_v25 }
 0x1ea PF: > { %v815_v26 = vld [vmem:[%s3153_s23 + $0x8] sm:$0xff]  ;;  %v818_v27 = vld [vmem:[%s3153_s23 + $0x20] sm:$0xff]  ;;  %v817_v30 = vld [vmem:[%s3153_s23 + $0x18] sm:$0xff]  ;;  %v2857_v33 = vmov 0   ;;  %v2858_v34 = vmov 0.0   ;;  %s3744_s26 = sld [smem:[#allocation24_spill]]  ;;  %s3746_s24 = scalar_lea.vmem %s3694_s7, %s3176_s20 }
 0x1eb   : > { %v814_v28 = vld [vmem:[%s3153_s23] sm:$0xff]  ;;  %v864_v29 = vpack.c.bf16 %v818_v27, %v815_v26  ;;  %v821_v31 = vld [vmem:[%s3153_s23 + $0x38] sm:$0xff]  ;;  %v824_v32 = vld [vmem:[%s3153_s23 + $0x50] sm:$0xff]  ;;  %936 = vmatprep.mubr.bf16.mxu0 %v2857_v33  ;;  %2450 = vmatprep.subr.bf16.mxu1 %v2858_v34  ;;  %vm2859_vm0 = vmmov 0   ;;  %vm992_vm1 = vcmask 261120   ;;  %s3745_s15 = sld [smem:[#allocation16_spill]]  ;;  %s3747_s3 = scalar_lea.vmem %s3695_s8, %s3176_s20 }
 0x1ec   : > { %v863_v35 = vpack.c.bf16 %v817_v30, %v814_v28  ;;  %v867_v36 = vpack.c.bf16 %v824_v32, %v821_v31  ;;  %v820_v37 = vld [vmem:[%s3153_s23 + $0x30] sm:$0xff]  ;;  %v823_v38 = vld [vmem:[%s3153_s23 + $0x48] sm:$0xff]  ;;  %v830_v40 = vld [vmem:[%s3153_s23 + $0x80] sm:$0xff]  ;;  %2466 = vmatprep.mubr.msk.bf16.mxu1 %vm2859_vm0, %v2858_v34  ;;  %vm1044_vm2 = vcmask 130048   ;;  %s2860_s2 = smov 96   ;;  %s2861_s29 = smov 32  }
 0x1ed   : > { %v827_v39 = vld [vmem:[%s3153_s23 + $0x68] sm:$0xff]  ;;  %904 = vmatprep.subr.bf16.mxu0 %v864_v29  ;;  %v866_v41 = vpack.c.bf16 %v823_v38, %v820_v37  ;;  %v826_v43 = vld [vmem:[%s3153_s23 + $0x60] sm:$0xff]  ;;  %v829_v44 = vld [vmem:[%s3153_s23 + $0x78] sm:$0xff]  ;;  %s2862_s17 = smov 64   ;;  %vm1517_vm3 = vcmask 523264   ;;  %vm1520_vm4 = vcmask 785408  }
 0x1ee   : > { %905 = vmatpush1.bf16.msra.mxu0 %v863_v35  ;;  %v870_v42 = vpack.c.bf16 %v830_v40, %v827_v39  ;;  %v833_v45 = vld [vmem:[%s3153_s23 + $0x98] sm:$0xff]  ;;  %v836_v46 = vld [vmem:[%s3153_s23 + $0xb0] sm:$0xff]  ;;  %v869_v47 = vpack.c.bf16 %v829_v44, %v826_v43  ;;  %v835_v50 = vld [vmem:[%s3153_s23 + $0xa8] sm:$0xff] }
 0x1ef   : > { %906 = vmatprep.subr.bf16.mxu0 %v867_v36  ;;  %v873_v48 = vpack.c.bf16 %v836_v46, %v833_v45  ;;  %v832_v49 = vld [vmem:[%s3153_s23 + $0x90] sm:$0xff]  ;;  %v839_v51 = vld [vmem:[%s3153_s23 + $0xc8] sm:$0xff]  ;;  %v842_v52 = vld [vmem:[%s3153_s23 + $0xe0] sm:$0xff] }
 0x1f0   : > { %v816_v53 = vld [vmem:[%s3153_s23 + $0x10] sm:$0xff]  ;;  %v819_v54 = vld [vmem:[%s3153_s23 + $0x28] sm:$0xff]  ;;  %v872_v55 = vpack.c.bf16 %v835_v50, %v832_v49  ;;  %v822_v57 = vld [vmem:[%s3153_s23 + $0x40] sm:$0xff]  ;;  %v876_v59 = vpack.c.bf16 %v842_v52, %v839_v51 }
 0x1f1   : > { %v865_v56 = vpack.c.bf16 %v819_v54, %v816_v53  ;;  %v825_v58 = vld [vmem:[%s3153_s23 + $0x58] sm:$0xff]  ;;  %v838_v60 = vld [vmem:[%s3153_s23 + $0xc0] sm:$0xff]  ;;  %v848_v63 = vld [vmem:[%s3153_s23 + $0x110] sm:$0xff] }
 0x1f2   : > { %907 = vmatpush1.bf16.msra.mxu0 %v866_v41  ;;  %v841_v61 = vld [vmem:[%s3153_s23 + $0xd8] sm:$0xff]  ;;  %v868_v0 = vpack.c.bf16 %v825_v58, %v822_v57  ;;  %v828_v1 = vld [vmem:[%s3153_s23 + $0x70] sm:$0xff]  ;;  %v831_v2 = vld [vmem:[%s3153_s23 + $0x88] sm:$0xff]  ;;  %v889_v41 = vlaneseq }
 0x1f3   : > { %908 = vmatprep.subr.bf16.mxu0 %v870_v42  ;;  %v845_v62 = vld [vmem:[%s3153_s23 + $0xf8] sm:$0xff]  ;;  %2451 = vmatpush3.bf16.msra.mxu1 %v865_v56  ;;  %v875_v3 = vpack.c.bf16 %v841_v61, %v838_v60  ;;  %v844_v5 = vld [vmem:[%s3153_s23 + $0xf0] sm:$0xff]  ;;  %v847_v6 = vld [vmem:[%s3153_s23 + $0x108] sm:$0xff]  ;;  %v871_v9 = vpack.c.bf16 %v831_v2, %v828_v1 }
 0x1f4   : > { %2452 = vmatprep.subr.bf16.mxu1 %v2858_v34  ;;  %v879_v4 = vpack.c.bf16 %v848_v63, %v845_v62  ;;  %v851_v7 = vld [vmem:[%s3153_s23 + $0x128] sm:$0xff]  ;;  %v854_v8 = vld [vmem:[%s3153_s23 + $0x140] sm:$0xff]  ;;  %v837_v11 = vld [vmem:[%s3153_s23 + $0xb8] sm:$0xff]  ;;  %v878_v12 = vpack.c.bf16 %v847_v6, %v844_v5  ;;  %v3310_v42 = vshrl.u32 %v889_v41, 7 }
 0x1f5   : > { %v834_v10 = vld [vmem:[%s3153_s23 + $0xa0] sm:$0xff]  ;;  %v882_v13 = vpack.c.bf16 %v854_v8, %v851_v7  ;;  %v853_v15 = vld [vmem:[%s3153_s23 + $0x138] sm:$0xff]  ;;  %v860_v17 = vld [vmem:[%s3153_s23 + $0x170] sm:$0xff] }
 0x1f6   : > { %909 = vmatpush1.bf16.msra.mxu0 %v869_v47  ;;  %v850_v14 = vld [vmem:[%s3153_s23 + $0x120] sm:$0xff]  ;;  %v857_v16 = vld [vmem:[%s3153_s23 + $0x158] sm:$0xff]  ;;  %v874_v18 = vpack.c.bf16 %v837_v11, %v834_v10  ;;  %v840_v19 = vld [vmem:[%s3153_s23 + $0xd0] sm:$0xff]  ;;  %v891_v43 = vsub.s32 0, %v3310_v42  ;;  %v895_v45 = vsub.s32 1, %v3310_v42 }
 0x1f7   : > { %910 = vmatprep.subr.bf16.mxu0 %v873_v48  ;;  %2453 = vmatpush3.bf16.msra.mxu1 %v868_v0  ;;  %v843_v20 = vld [vmem:[%s3153_s23 + $0xe8] sm:$0xff]  ;;  %v881_v21 = vpack.c.bf16 %v853_v15, %v850_v14  ;;  %v885_v22 = vpack.c.bf16 %v860_v17, %v857_v16  ;;  %v856_v23 = vld [vmem:[%s3153_s23 + $0x150] sm:$0xff]  ;;  %v846_v26 = vld [vmem:[%s3153_s23 + $0x100] sm:$0xff] }
 0x1f8   : > { %2454 = vmatprep.subr.bf16.mxu1 %v2858_v34  ;;  %v859_v24 = vld [vmem:[%s3153_s23 + $0x168] sm:$0xff]  ;;  %v877_v25 = vpack.c.bf16 %v843_v20, %v840_v19  ;;  %v849_v27 = vld [vmem:[%s3153_s23 + $0x118] sm:$0xff]  ;;  %v3286_v29 = vld [vmem:[%s3744_s26] sm:$0xff] }
 0x1f9   : > { %v884_v28 = vpack.c.bf16 %v859_v24, %v856_v23  ;;  %v3291_v30 = vld [vmem:[%s3744_s26 + $0x8] sm:$0xff]  ;;  %v880_v31 = vpack.c.bf16 %v849_v27, %v846_v26  ;;  %v852_v35 = vld [vmem:[%s3153_s23 + $0x130] sm:$0xff]  ;;  %v858_v38 = vld [vmem:[%s3153_s23 + $0x160] sm:$0xff] }
 0x1fa   : > { %911 = vmatpush1.bf16.msra.mxu0 %v872_v55  ;;  %v862_v32 = vpack.c.bf16 %v3291_v30, %v3286_v29  ;;  %v855_v36 = vld [vmem:[%s3153_s23 + $0x148] sm:$0xff]  ;;  %v861_v39 = vld [vmem:[%s3153_s23 + $0x178] sm:$0xff]  ;;  %v887_v44 = vld [vmem:[%s3194_s19] sm:$0x7]  ;;  %s3748_s19 = scalar_lea.vmem %s3696_s9, %s3176_s20 }
 0x1fb   : > { %912 = vmatprep.subr.bf16.mxu0 %v876_v59  ;;  %2455 = vmatpush3.bf16.msra.mxu1 %v871_v9  ;;  %v883_v37 = vpack.c.bf16 %v855_v36, %v852_v35  ;;  %v886_v40 = vpack.c.bf16 %v861_v39, %v858_v38  ;;  %v892_v46 = vrot.slane %v887_v44, %v891_v43  ;;  %v899_v59 = vsub.s32 2, %v3310_v42  ;;  %v3334_v5 = vld [vmem:[%s3745_s15] sm:$0xff]  ;;  %v3339_v9 = vld [vmem:[%s3745_s15 + $0x8] sm:$0xff] }
 0x1fc   : > { %2456 = vmatprep.subr.bf16.mxu1 %v2858_v34  ;;  %v896_v48 = vrot.slane %v887_v44, %v895_v45 }
 0x1fd   : > { %v900_v60 = vrot.slane %v887_v44, %v899_v59 }
 0x1fe   : > { %913 = vmatpush1.bf16.msra.mxu0 %v875_v3 }
 0x1ff   : > { %914 = vmatprep.subr.bf16.mxu0 %v879_v4  ;;  %2457 = vmatpush3.bf16.msra.mxu1 %v874_v18 }
 0x200   : > { %2458 = vmatprep.subr.bf16.mxu1 %v2858_v34 }
 0x202   : > { %915 = vmatpush1.bf16.msra.mxu0 %v878_v12 }
 0x203   : > { %916 = vmatprep.subr.bf16.mxu0 %v882_v13  ;;  %2459 = vmatpush3.bf16.msra.mxu1 %v877_v25 }
 0x204   : > { %2460 = vmatprep.subr.bf16.mxu1 %v2858_v34 }
 0x206   : > { %917 = vmatpush1.bf16.msra.mxu0 %v881_v21 }
 0x207   : > { %918 = vmatprep.subr.bf16.mxu0 %v885_v22  ;;  %2461 = vmatpush3.bf16.msra.mxu1 %v880_v31 }
 0x208   : > { %2462 = vmatprep.subr.bf16.mxu1 %v2858_v34 }
 0x20a   : > { %919 = vmatpush1.bf16.msra.mxu0 %v884_v28 }
 0x20b   : > { %2494 = vmatprep.subr.bf16.mxu0 %v2858_v34  ;;  %2463 = vmatpush3.bf16.msra.mxu1 %v883_v37 }
 0x20c   : > { %2464 = vmatprep.subr.bf16.mxu1 %v2858_v34 }
 0x20d   : > { %937 = vmatmul.mubr.bf16.vlgmr.msra.gmra.mrb[0].mxu0 %v862_v32 }
 0x20e   : > { %2496 = vmatprep.mubr.msk.bf16.mxu0 %vm2859_vm0, %v2858_v34 }
 0x20f   : > { %2465 = vmatpush3.bf16.msra.mxu1 %v886_v40 }
 0x210   : > { %2470 = vmatprep.subr.bf16.mxu1 %v2858_v34 }
 0x212   : > { %2467 = vmatmul.mubr.bf16.vlgmr.msra.gmra.mrb[0].mxu1 %v862_v32 }
 0x213   : > { %2472 = vmatprep.mubr.msk.bf16.mxu1 %vm2859_vm0, %v2858_v34 }
 0x2e0   : > { %v938_v47 = vpop.f32.mrb[0].mxu0 }
 0x2e1   : > { %v940_v49 = vpop.f32.mrb[1].mxu0  ;;  %v939_v51 = vadd.f32 %v938_v47, %v892_v46 }
 0x2e2   : > { %v942_v50 = vpop.f32.mrb[2].mxu0  ;;  %v941_v54 = vadd.f32 %v940_v49, %v896_v48 }
 0x2e3   : > { %v943_v52 = vadd.f32 %v942_v50, %v892_v46  ;;  %v944_v53 = vpop.f32.mrb[3].mxu0 }
 0x2e4   : > { %v945_v55 = vadd.f32 %v944_v53, %v896_v48 }
 0x2e5   : > { %v990_v56 = vpack.c.bf16 %v943_v52, %v939_v51  ;;  %v981_v61 = vpop.f32.mrb[0].mxu1 }
 0x2e6   : > { %v991_v57 = vpack.c.bf16 %v945_v55, %v941_v54  ;;  %v982_v62 = vadd.f32 %v981_v61, %v900_v60  ;;  %v2468_v63 = vpop.f32.mrb[1].mxu1 }
 0x2e7   : > { %v984_v0 = vpop.f32.mrb[2].mxu1 }
 0x2e8   : > { %v997_v58 = vsel %vm992_vm1, %v991_v57, 0  ;;  %v985_v1 = vadd.f32 %v984_v0, %v900_v60  ;;  %v2469_v2 = vpop.f32.mrb[3].mxu1 }
 0x2e9   : > { %2471 = vmatpush3.bf16.xpose.msra.mxu1 %v997_v58 }
 0x2ea   : > { %2476 = vmatprep.subr.bf16.mxu1 %v2858_v34  ;;  %v3327_v3 = vpack.c.bf16 %v985_v1, %v982_v62 }
 0x2f0   : > { %2473 = vmatmul.mubr.msk.bf16.vlgmr.msra.gmra.mrb[4].mxu1 %vm992_vm1, %v990_v56 }
 0x2f1   : > { %2478 = vmatprep.mubr.msk.bf16.mxu1 %vm2859_vm0, %v2858_v34  ;;  %2477 = vmatpush3.bf16.msra.mxu1 %v3327_v3 }
 0x2f2   : > { %2482 = vmatprep.subr.bf16.mxu1 %v2858_v34 }
 0x3c3   : > { %v1033_v4 = vpop.f32.mrb[4].mxu1 }
 0x3c4   : > { %v1040_v6 = vmul.f32 0.17677669, %v1033_v4  ;;  %v2474_v7 = vpop.f32.mrb[5].mxu1 }
 0x3c5   : > { %v1036_v8 = vpop.f32.mrb[6].mxu1 }
 0x3c6   : > { %v1041_v10 = vmul.f32 0.17677669, %v1036_v8  ;;  %v2475_v11 = vpop.f32.mrb[7].mxu1  ;;  %v1042_v12 = vadd.f32 %v1040_v6, %v3334_v5 }
 0x3c8   : > { %v1045_v13 = vsel %vm1044_vm2, %v1042_v12, -inf  ;;  %v1043_v14 = vadd.f32 %v1041_v10, %v3339_v9 }
 0x3c9   : > { %1046 = vmax.xlane.f32.xlu0 %v1045_v13 }
 0x3ca   : > { %v1048_v15 = vsel %vm1044_vm2, %v1043_v14, -inf }
 0x3cd   : > { %1049 = vmax.xlane.f32.xlu0 %v1048_v15 }
 0x3e3   : > { %1117 = vrot.lane.b32.xlu0 %v991_v57, %s2860_s2 }
 0x3e7   : > { %1368 = vrot.lane.b32.xlu0 %v991_v57, %s2861_s29 }
 0x456   : > { %v1047_v16 = vpop.xlane.xlu0 %1046 }
 0x457   : > { %v1051_v17 = vsub.f32 %v1042_v12, %v1047_v16 }
 0x459   : > { %v1053_v18 = vmul.f32 1.442695, %v1051_v17 }
 0x45a   : > { %v1050_v19 = vpop.xlane.xlu0 %1049 }
 0x45b   : > { %2627 = vpow2.f32 %v1053_v18  ;;  %v1052_v20 = vsub.f32 %v1043_v14, %v1050_v19 }
 0x45d   : > { %v1055_v21 = vmul.f32 1.442695, %v1052_v20 }
 0x45e   : > { %v1118_v31 = vpop.permute.xlu0 %1117 }
 0x45f   : > { %2629 = vpow2.f32 %v1055_v21  ;;  %v1123_v44 = vsel %vm992_vm1, %v1118_v31, 0 }
 0x462   : > { %v1369_v40 = vpop.permute.xlu0 %1368 }
 0x463   : > { %v1374_v47 = vsel %vm992_vm1, %v1369_v40, 0 }
 0x465   : > { %v2628_v22 = vpop.eup %2627 }
 0x466   : > { %v1057_v23 = vsel %vm1044_vm2, %v2628_v22, 0.0 }
 0x467   : > { %1058 = vadd.xlane.f32.xlu1 %v1057_v23 }
 0x469   : > { %v2630_v24 = vpop.eup %2629 }
 0x46a   : > { %v1060_v25 = vsel %vm1044_vm2, %v2630_v24, 0.0 }
 0x46b   : > { %1061 = vadd.xlane.f32.xlu1 %v1060_v25 }
 0x47c   : > { %1114 = vrot.lane.b32.xlu1 %v990_v56, %s2860_s2 }
 0x480   : > { %1243 = vrot.lane.b32.xlu1 %v991_v57, %s2862_s17 }
 0x484   : > { %1241 = vrot.lane.b32.xlu1 %v990_v56, %s2862_s17 }
 0x488   : > { %1366 = vrot.lane.b32.xlu1 %v990_v56, %s2861_s29 }
 0x4f4   : > { %v1059_v26 = vpop.xlane.xlu1 %1058 }
 0x4f5   : > { %2631 = vrcp.f32 %v1059_v26 }
 0x4f8   : > { %v1062_v27 = vpop.xlane.xlu1 %1061 }
 0x4f9   : > { %2633 = vrcp.f32 %v1062_v27 }
 0x4fc   : > { %v1115_v28 = vpop.permute.xlu1 %1114 }
 0x4ff   : > { %v2632_v35 = vpop.eup %2631 }
 0x500   : > { %v1244_v32 = vpop.permute.xlu1 %1243  ;;  %v1064_v38 = vmul.f32 %v2632_v35, %v2628_v22 }
 0x501   : > { %v1249_v36 = vsel %vm992_vm1, %v1244_v32, 0 }
 0x502   : > { %2495 = vmatpush3.bf16.xpose.msra.mxu0 %v1249_v36 }
 0x503   : > { %v2634_v37 = vpop.eup %2633  ;;  %2506 = vmatprep.subr.bf16.mxu0 %v2858_v34 }
 0x504   : > { %v1066_v39 = vmul.f32 %v2634_v37, %v2630_v24  ;;  %v1242_v46 = vpop.permute.xlu1 %1241 }
 0x506   : > { %v1067_v41 = vpack.c.bf16 %v1066_v39, %v1064_v38 }
 0x508   : > { %2479 = vmatmul.mubr.msk.bf16.vlgmr.msra.gmra.mrb[8].mxu1 %vm1044_vm2, %v1067_v41  ;;  %v1367_v48 = vpop.permute.xlu1 %1366 }
 0x509   : > { %2483 = vmatpush3.bf16.xpose.msra.mxu1 %v1123_v44  ;;  %2497 = vmatmul.mubr.msk.bf16.vlgmr.msra.gmra.mrb[4].mxu0 %vm992_vm1, %v1242_v46 }
 0x50a   : > { %2507 = vmatpush3.bf16.xpose.msra.mxu0 %v1374_v47  ;;  %2484 = vmatprep.mubr.msk.bf16.mxu1 %vm2859_vm0, %v2858_v34 }
 0x50b   : > { %2508 = vmatprep.mubr.msk.bf16.mxu0 %vm2859_vm0, %v2858_v34  ;;  %2488 = vmatprep.subr.bf16.mxu1 %v2858_v34 }
 0x50c   : > { %2518 = vmatprep.subr.bf16.mxu0 %v2858_v34 }
 0x510   : > { %2485 = vmatmul.mubr.msk.bf16.vlgmr.msra.gmra.mrb[12].mxu1 %vm992_vm1, %v1115_v28 }
 0x511   : > { %2509 = vmatmul.mubr.msk.bf16.vlgmr.msra.gmra.mrb[8].mxu0 %vm992_vm1, %v1367_v48  ;;  %2490 = vmatprep.mubr.msk.bf16.mxu1 %vm2859_vm0, %v2858_v34 }
 0x512   : > { %2534 = vmatprep.mubr.msk.bf16.mxu0 %vm2859_vm0, %v2858_v34 }
 0x5db   : > { %v3371_v49 = vpop.f32.mrb[8].mxu1 }
 0x5dc   : > { %v2480_v50 = vpop.f32.mrb[9].mxu1  ;;  %v1285_v51 = vpop.f32.mrb[4].mxu0 }
 0x5dd   : > { %v3373_v52 = vpop.f32.mrb[10].mxu1  ;;  %v2498_v53 = vpop.f32.mrb[5].mxu0  ;;  %v1292_v58 = vmul.f32 0.17677669, %v1285_v51 }
 0x5de   : > { %v2481_v54 = vpop.f32.mrb[11].mxu1  ;;  %v1288_v55 = vpop.f32.mrb[6].mxu0 }
 0x5df   : > { %v2499_v56 = vpop.f32.mrb[7].mxu0  ;;  %v1293_v10 = vmul.f32 0.17677669, %v1288_v55  ;;  %v1294_v13 = vadd.f32 %v1292_v58, %v3334_v5 }
 0x5e1   : > { %v1296_v17 = vsel %vm1044_vm2, %v1294_v13, -inf  ;;  %v1295_v18 = vadd.f32 %v1293_v10, %v3339_v9 }
 0x5e3   : > { %v1159_v57 = vpop.f32.mrb[12].mxu1  ;;  %v1299_v20 = vsel %vm1044_vm2, %v1295_v18, -inf }
 0x5e4   : > { %v1166_v60 = vmul.f32 0.17677669, %v1159_v57  ;;  %v2486_v61 = vpop.f32.mrb[13].mxu1  ;;  %v1410_v62 = vpop.f32.mrb[8].mxu0 }
 0x5e5   : > { %v1162_v63 = vpop.f32.mrb[14].mxu1  ;;  %v2510_v0 = vpop.f32.mrb[9].mxu0  ;;  %v1417_v16 = vmul.f32 0.17677669, %v1410_v62 }
 0x5e6   : > { %v1167_v1 = vmul.f32 0.17677669, %v1162_v63  ;;  %v2487_v2 = vpop.f32.mrb[15].mxu1  ;;  %v1413_v4 = vpop.f32.mrb[10].mxu0  ;;  %v1168_v6 = vadd.f32 %v1166_v60, %v3334_v5 }
 0x5e7   : > { %v1418_v7 = vmul.f32 0.17677669, %v1413_v4  ;;  %v2511_v8 = vpop.f32.mrb[11].mxu0  ;;  %v1419_v21 = vadd.f32 %v1417_v16, %v3334_v5 }
 0x5e8   : > { %v1170_v11 = vsel %vm1044_vm2, %v1168_v6, -inf  ;;  %v1169_v12 = vadd.f32 %v1167_v1, %v3339_v9 }
 0x5e9   : > { %1171 = vmax.xlane.f32.xlu0 %v1170_v11  ;;  %v1420_v15 = vadd.f32 %v1418_v7, %v3339_v9  ;;  %v1421_v22 = vsel %vm1044_vm2, %v1419_v21, -inf }
 0x5ea   : > { %v1173_v14 = vsel %vm1044_vm2, %v1169_v12, -inf }
 0x5eb   : > { %1174 = vmax.xlane.f32.xlu1 %v1173_v14  ;;  %v1424_v19 = vsel %vm1044_vm2, %v1420_v15, -inf }
 0x5ed   : > { %1297 = vmax.xlane.f32.xlu0 %v1296_v17 }
 0x5ef   : > { %1425 = vmax.xlane.f32.xlu1 %v1424_v19 }
 0x5f1   : > { %1300 = vmax.xlane.f32.xlu0 %v1299_v20 }
 0x5f5   : > { %1422 = vmax.xlane.f32.xlu0 %v1421_v22 }
 0x676   : > { %v1172_v23 = vpop.xlane.xlu0 %1171 }
 0x677   : > { %v1176_v35 = vsub.f32 %v1168_v6, %v1172_v23  ;;  %v1523_v23 = vld [vmem:[%s3160_s1] sm:$0xff] }
 0x678   : > { %v1175_v24 = vpop.xlane.xlu1 %1174 }
 0x679   : > { %v1177_v36 = vsub.f32 %v1169_v12, %v1175_v24  ;;  %v1178_v40 = vmul.f32 1.442695, %v1176_v35  ;;  %v1524_v24 = vld [vmem:[%s3160_s1 + $0x8] sm:$0xff]  ;;  %v1529_v35 = vld [vmem:[%s3160_s1 + $0x30] sm:$0xff] }
 0x67a   : > { %v1298_v25 = vpop.xlane.xlu0 %1297 }
 0x67b   : > { %v1302_v26 = vsub.f32 %v1294_v13, %v1298_v25  ;;  %v1180_v41 = vmul.f32 1.442695, %v1177_v36  ;;  %v1525_v25 = vld [vmem:[%s3160_s1 + $0x10] sm:$0xff]  ;;  %v1530_v36 = vld [vmem:[%s3160_s1 + $0x38] sm:$0xff] }
 0x67c   : > { %v1426_v27 = vpop.xlane.xlu1 %1425 }
 0x67d   : > { %v1304_v28 = vmul.f32 1.442695, %v1302_v26  ;;  %v1428_v31 = vsub.f32 %v1420_v15, %v1426_v27  ;;  %v1540_v26 = vpack.c.bf16 %v1524_v24, %v1523_v23  ;;  %v1526_v27 = vld [vmem:[%s3160_s1 + $0x18] sm:$0xff] }
 0x67e   : > { %v1301_v9 = vpop.xlane.xlu0 %1300 }
 0x67f   : > { %2635 = vpow2.f32 %v1304_v28  ;;  %v1303_v32 = vsub.f32 %v1295_v18, %v1301_v9  ;;  %v1431_v37 = vmul.f32 1.442695, %v1428_v31  ;;  %2519 = vmatpush3.bf16.msra.mxu0 %v1540_v26  ;;  %v1541_v28 = vpack.c.bf16 %v1526_v27, %v1525_v25  ;;  %v1527_v31 = vld [vmem:[%s3160_s1 + $0x20] sm:$0xff]  ;;  %v1528_v9 = vld [vmem:[%s3160_s1 + $0x28] sm:$0xff] }
 0x680   : > { %2520 = vmatprep.subr.bf16.mxu0 %v2858_v34 }
 0x681   : > { %v1306_v38 = vmul.f32 1.442695, %v1303_v32  ;;  %v1542_v32 = vpack.c.bf16 %v1528_v9, %v1527_v31  ;;  %v1640_v31 = vld [vmem:[%s3166_s28 + $0x8] sm:$0xff] }
 0x682   : > { %v1423_v39 = vpop.xlane.xlu0 %1422  ;;  %v1644_v9 = vld [vmem:[%s3166_s28 + $0x28] sm:$0xff] }
 0x683   : > { %2637 = vpow2.f32 %v1306_v38  ;;  %v1427_v5 = vsub.f32 %v1419_v21, %v1423_v39  ;;  %2521 = vmatpush3.bf16.msra.mxu0 %v1541_v28  ;;  %v1531_v38 = vld [vmem:[%s3160_s1 + $0x40] sm:$0xff]  ;;  %v1532_v39 = vld [vmem:[%s3160_s1 + $0x48] sm:$0xff] }
 0x684   : > { %2639 = vpow2.f32 %v1431_v37  ;;  %2522 = vmatprep.subr.bf16.mxu0 %v2858_v34  ;;  %v1543_v37 = vpack.c.bf16 %v1530_v36, %v1529_v35  ;;  %v1705_v35 = vpack.c.bf16 %v1644_v9, %v1640_v31  ;;  %v1646_v36 = vld [vmem:[%s3166_s28 + $0x38] sm:$0xff]  ;;  %v1671_v9 = vld [vmem:[%s3166_s28 + $0x100] sm:$0xff] }
 0x685   : > { %v1429_v44 = vmul.f32 1.442695, %v1427_v5  ;;  %v1544_v5 = vpack.c.bf16 %v1532_v39, %v1531_v38  ;;  %v1643_v38 = vld [vmem:[%s3166_s28 + $0x20] sm:$0xff]  ;;  %v1678_v31 = vld [vmem:[%s3166_s28 + $0x138] sm:$0xff] }
 0x687   : > { %2641 = vpow2.f32 %v1429_v44  ;;  %2523 = vmatpush3.bf16.msra.mxu0 %v1542_v32  ;;  %v1534_v44 = vld [vmem:[%s3160_s1 + $0x58] sm:$0xff] }
 0x688   : > { %2643 = vpow2.f32 %v1178_v40  ;;  %2524 = vmatprep.subr.bf16.mxu0 %v2858_v34  ;;  %v1642_v32 = vld [vmem:[%s3166_s28 + $0x18] sm:$0xff] }
 0x689   : > { %v2636_v46 = vpop.eup %2635  ;;  %2645 = vpow2.f32 %v1180_v41  ;;  %v1533_v41 = vld [vmem:[%s3160_s1 + $0x50] sm:$0xff]  ;;  %v1707_v39 = vpack.c.bf16 %v1646_v36, %v1642_v32  ;;  %v1675_v32 = vld [vmem:[%s3166_s28 + $0x120] sm:$0xff] }
 0x68a   : > { %v1308_v47 = vsel %vm1044_vm2, %v2636_v46, 0.0  ;;  %v1720_v36 = vpack.c.bf16 %v1675_v32, %v1671_v9  ;;  %v1933_v32 = vld [vmem:[%s3168_s21 + $0x88] sm:$0xff] }
 0x68b   : > { %1309 = vadd.xlane.f32.xlu0 %v1308_v47  ;;  %2525 = vmatpush3.bf16.msra.mxu0 %v1543_v37  ;;  %v1545_v47 = vpack.c.bf16 %v1534_v44, %v1533_v41  ;;  %v1639_v37 = vld [vmem:[%s3166_s28] sm:$0xff]  ;;  %v1645_v41 = vld [vmem:[%s3166_s28 + $0x30] sm:$0xff]  ;;  %v1648_v44 = vld [vmem:[%s3166_s28 + $0x48] sm:$0xff] }
 0x68c   : > { %2526 = vmatprep.subr.bf16.mxu0 %v2858_v34 }
 0x68d   : > { %v2638_v48 = vpop.eup %2637 }
 0x68e   : > { %v1311_v50 = vsel %vm1044_vm2, %v2638_v48, 0.0  ;;  %v2640_v51 = vpop.eup %2639 }
 0x68f   : > { %1312 = vadd.xlane.f32.xlu1 %v1311_v50  ;;  %v1436_v56 = vsel %vm1044_vm2, %v2640_v51, 0.0  ;;  %2527 = vmatpush3.bf16.msra.mxu0 %v1544_v5  ;;  %v1535_v50 = vld [vmem:[%s3160_s1 + $0x60] sm:$0xff]  ;;  %v1704_v5 = vpack.c.bf16 %v1643_v38, %v1639_v37  ;;  %v1673_v37 = vld [vmem:[%s3166_s28 + $0x110] sm:$0xff] }
 0x690   : > { %2528 = vmatprep.subr.bf16.mxu0 %v2858_v34  ;;  %v1677_v38 = vld [vmem:[%s3166_s28 + $0x130] sm:$0xff] }
 0x691   : > { %v2642_v53 = vpop.eup %2641 }
 0x692   : > { %v2644_v54 = vpop.eup %2643  ;;  %v1433_v55 = vsel %vm1044_vm2, %v2642_v53, 0.0 }
 0x693   : > { %v2646_v57 = vpop.eup %2645  ;;  %1434 = vadd.xlane.f32.xlu0 %v1433_v55  ;;  %1437 = vadd.xlane.f32.xlu1 %v1436_v56  ;;  %v1182_v58 = vsel %vm1044_vm2, %v2644_v54, 0.0 }
 0x694   : > { %v1185_v60 = vsel %vm1044_vm2, %v2646_v57, 0.0  ;;  %2529 = vmatpush3.bf16.msra.mxu0 %v1545_v47  ;;  %v1654_v47 = vld [vmem:[%s3166_s28 + $0x78] sm:$0xff] }
 0x695   : > { %2530 = vmatprep.subr.bf16.mxu0 %v2858_v34 }
 0x697   : > { %1183 = vadd.xlane.f32.xlu0 %v1182_v58  ;;  %1186 = vadd.xlane.f32.xlu1 %v1185_v60  ;;  %v1538_v58 = vld [vmem:[%s3160_s1 + $0x78] sm:$0xff] }
 0x6a8   : > { %1319 = vrot.lane.b32.xlu1 %v3327_v3, %s2862_s17 }
 0x6ac   : > { %1444 = vrot.lane.b32.xlu1 %v3327_v3, %s2861_s29 }
 0x6ad   : > { %1194 = vrot.lane.b32.xlu0 %v3327_v3, %s2860_s2 }
 0x718   : > { %v1310_v61 = vpop.xlane.xlu0 %1309 }
 0x71c   : > { %v1313_v62 = vpop.xlane.xlu1 %1312 }
 0x720   : > { %v1435_v63 = vpop.xlane.xlu0 %1434  ;;  %v1438_v0 = vpop.xlane.xlu1 %1437 }
 0x724   : > { %v1184_v1 = vpop.xlane.xlu0 %1183  ;;  %v1187_v2 = vpop.xlane.xlu1 %1186 }
 0x725   : > { %2647 = vrcp.f32 %v1184_v1 }
 0x726   : > { %2649 = vrcp.f32 %v1187_v2 }
 0x727   : > { %2651 = vrcp.f32 %v1313_v62 }
 0x728   : > { %v1195_v4 = vpop.permute.xlu0 %1194  ;;  %2653 = vrcp.f32 %v1310_v61  ;;  %v1320_v12 = vpop.permute.xlu1 %1319 }
 0x729   : > { %2489 = vmatpush3.bf16.msra.mxu1 %v1195_v4  ;;  %2655 = vrcp.f32 %v1435_v63 }
 0x72a   : > { %2500 = vmatprep.subr.bf16.mxu1 %v2858_v34  ;;  %2657 = vrcp.f32 %v1438_v0 }
 0x72c   : > { %v1445_v19 = vpop.permute.xlu1 %1444 }
 0x72f   : > { %v2648_v6 = vpop.eup %2647 }
 0x730   : > { %v2650_v7 = vpop.eup %2649  ;;  %v1189_v8 = vmul.f32 %v2648_v6, %v2644_v54 }
 0x731   : > { %v1191_v10 = vmul.f32 %v2650_v7, %v2646_v57  ;;  %v2652_v11 = vpop.eup %2651  ;;  %v1537_v57 = vld [vmem:[%s3160_s1 + $0x70] sm:$0xff] }
 0x732   : > { %v2654_v13 = vpop.eup %2653  ;;  %v1317_v14 = vmul.f32 %v2652_v11, %v2638_v48  ;;  %v1547_v61 = vpack.c.bf16 %v1538_v58, %v1537_v57 }
 0x733   : > { %v1192_v3 = vpack.c.bf16 %v1191_v10, %v1189_v8  ;;  %v1315_v15 = vmul.f32 %v2654_v13, %v2636_v46  ;;  %v2656_v16 = vpop.eup %2655 }
 0x734   : > { %v2658_v18 = vpop.eup %2657  ;;  %v1440_v20 = vmul.f32 %v2656_v16, %v2642_v53 }
 0x735   : > { %2491 = vmatmul.mubr.msk.bf16.vlgmr.msra.gmra.mrb[16].mxu1 %vm1044_vm2, %v1192_v3  ;;  %v1318_v17 = vpack.c.bf16 %v1317_v14, %v1315_v15  ;;  %v1442_v21 = vmul.f32 %v2658_v18, %v2640_v51  ;;  %v1536_v51 = vld [vmem:[%s3160_s1 + $0x68] sm:$0xff] }
 0x736   : > { %2501 = vmatpush3.bf16.msra.mxu1 %v1320_v12  ;;  %2502 = vmatprep.mubr.msk.bf16.mxu1 %vm2859_vm0, %v2858_v34  ;;  %v1546_v55 = vpack.c.bf16 %v1536_v51, %v1535_v50 }
 0x737   : > { %2512 = vmatprep.subr.bf16.mxu1 %v2858_v34  ;;  %v1443_v22 = vpack.c.bf16 %v1442_v21, %v1440_v20 }
 0x738   : > { %2531 = vmatpush3.bf16.msra.mxu0 %v1546_v55 }
 0x739   : > { %2532 = vmatprep.subr.bf16.mxu0 %v2858_v34 }
 0x73c   : > { %2533 = vmatpush3.bf16.msra.mxu0 %v1547_v61  ;;  %v1647_v61 = vld [vmem:[%s3166_s28 + $0x40] sm:$0xff] }
 0x73d   : > { %2503 = vmatmul.mubr.msk.bf16.vlgmr.msra.gmra.mrb[20].mxu1 %vm1044_vm2, %v1318_v17  ;;  %1801 = vmatprep.subr.bf16.mxu0 %v1707_v39  ;;  %v1722_v39 = vpack.c.bf16 %v1677_v38, %v1673_v37  ;;  %v1965_v37 = vld [vmem:[%s3168_s21 + $0x188] sm:$0xff]  ;;  %v1916_v38 = vld [vmem:[%s3168_s21] sm:$0xff] }
 0x73e   : > { %2513 = vmatpush3.bf16.msra.mxu1 %v1445_v19  ;;  %2514 = vmatprep.mubr.msk.bf16.mxu1 %vm2859_vm0, %v2858_v34 }
 0x73f   : > { %1758 = vmatprep.subr.bf16.mxu1 %v1705_v35 }
 0x745   : > { %2515 = vmatmul.mubr.msk.bf16.vlgmr.msra.gmra.mrb[24].mxu1 %vm1044_vm2, %v1443_v22 }
 0x746   : > { %1790 = vmatprep.mubr.bf16.mxu1 %v2857_v33  ;;  %1759 = vmatpush1.bf16.msra.mxu1 %v1704_v5  ;;  %v1680_v5 = vld [vmem:[%s3166_s28 + $0x148] sm:$0xff] }
 0x808   : > { %v1234_v40 = vpop.f32.mrb[16].mxu1 }
 0x809   : > { %v2492_v46 = vpop.f32.mrb[17].mxu1 }
 0x80a   : > { %v1237_v48 = vpop.f32.mrb[18].mxu1  ;;  %v1652_v46 = vld [vmem:[%s3166_s28 + $0x68] sm:$0xff] }
 0x80b   : > { %v2612_v53 = vpack.i.bf16 %v1237_v48, %v1234_v40  ;;  %v2493_v54 = vpop.f32.mrb[19].mxu1  ;;  %v1641_v40 = vld [vmem:[%s3166_s28 + $0x10] sm:$0xff]  ;;  %v1709_v48 = vpack.c.bf16 %v1652_v46, %v1648_v44  ;;  %v1679_v46 = vld [vmem:[%s3166_s28 + $0x140] sm:$0xff] }
 0x80d   : > { %2613 = vrot.lane.b32.xlu1 %v2612_v53, %s2861_s29  ;;  %1760 = vmatprep.subr.bf16.mxu1 %v1709_v48 }
 0x810   : > { %v1359_v56 = vpop.f32.mrb[20].mxu1 }
 0x811   : > { %v2504_v60 = vpop.f32.mrb[21].mxu1 }
 0x812   : > { %v1362_v62 = vpop.f32.mrb[22].mxu1 }
 0x813   : > { %v2617_v63 = vpack.i.bf16 %v1362_v62, %v1359_v56  ;;  %v2505_v0 = vpop.f32.mrb[23].mxu1  ;;  %v1651_v62 = vld [vmem:[%s3166_s28 + $0x60] sm:$0xff] }
 0x814   : > { %v1708_v0 = vpack.c.bf16 %v1651_v62, %v1647_v61  ;;  %v1694_v61 = vld [vmem:[%s3166_s28 + $0x1b8] sm:$0xff]  ;;  %v1687_v62 = vld [vmem:[%s3166_s28 + $0x180] sm:$0xff] }
 0x815   : > { %2618 = vrot.lane.b32.xlu0 %v2617_v63, %s2862_s17  ;;  %v1649_v63 = vld [vmem:[%s3166_s28 + $0x50] sm:$0xff] }
 0x816   : > { %1761 = vmatpush1.bf16.msra.mxu1 %v1708_v0 }
 0x818   : > { %v1484_v1 = vpop.f32.mrb[24].mxu1 }
 0x819   : > { %v2516_v2 = vpop.f32.mrb[25].mxu1 }
 0x81a   : > { %v1487_v4 = vpop.f32.mrb[26].mxu1 }
 0x81b   : > { %v2622_v6 = vpack.i.bf16 %v1487_v4, %v1484_v1  ;;  %v2517_v7 = vpop.f32.mrb[27].mxu1  ;;  %v1653_v1 = vld [vmem:[%s3166_s28 + $0x70] sm:$0xff]  ;;  %v1656_v4 = vld [vmem:[%s3166_s28 + $0x88] sm:$0xff] }
 0x81c   : > { %v1710_v2 = vpack.c.bf16 %v1653_v1, %v1649_v63  ;;  %v1658_v7 = vld [vmem:[%s3166_s28 + $0x98] sm:$0xff]  ;;  %v1691_v63 = vld [vmem:[%s3166_s28 + $0x1a0] sm:$0xff] }
 0x81d   : > { %2623 = vrot.lane.b32.xlu1 %v2622_v6, %s2860_s2  ;;  %v1660_v6 = vld [vmem:[%s3166_s28 + $0xa8] sm:$0xff]  ;;  %v1728_v1 = vpack.c.bf16 %v1691_v63, %v1687_v62  ;;  %v1936_v62 = vld [vmem:[%s3168_s21 + $0xa0] sm:$0xff] }
 0x81e   : > { %v1937_v63 = vld [vmem:[%s3168_s21 + $0xa8] sm:$0xff] }
 0x87f   : > { %v2614_v8 = vpop.permute.xlu1 %2613 }
 0x880   : > { %v2616_v34 = vunpack.i.h.bf16 %v2614_v8  ;;  %v2615_v3 = vunpack.i.l.bf16 %v2614_v8  ;;  %v1713_v8 = vpack.c.bf16 %v1660_v6, %v1656_v4  ;;  %v1693_v4 = vld [vmem:[%s3166_s28 + $0x1b0] sm:$0xff]  ;;  %v1696_v6 = vld [vmem:[%s3166_s28 + $0x1c8] sm:$0xff] }
 0x882   : > { %v1516_v14 = vsel %vm992_vm1, %v3373_v52, %v2616_v34  ;;  %v1515_v15 = vsel %vm992_vm1, %v3371_v49, %v2615_v3  ;;  %v2361_v52 = vld [vmem:[%s3746_s24] ss:$0 sm:$0xff]  ;;  %1762 = vmatprep.subr.bf16.mxu1 %v1713_v8  ;;  %v1700_v8 = vld [vmem:[%s3166_s28 + $0x1e8] sm:$0xff] }
 0x883   : > { %v1655_v34 = vld [vmem:[%s3166_s28 + $0x80] sm:$0xff] }
 0x884   : > { %v1659_v3 = vld [vmem:[%s3166_s28 + $0xa0] sm:$0xff] }
 0x887   : > { %v2619_v10 = vpop.permute.xlu0 %2618 }
 0x888   : > { %v2621_v11 = vunpack.i.h.bf16 %v2619_v10  ;;  %v2620_v12 = vunpack.i.l.bf16 %v2619_v10  ;;  %v1662_v10 = vld [vmem:[%s3166_s28 + $0xb8] sm:$0xff] }
 0x88a   : > { %v1519_v18 = vsel %vm1517_vm3, %v1516_v14, %v2621_v11  ;;  %v1518_v19 = vsel %vm1517_vm3, %v1515_v15, %v2620_v12  ;;  %v1715_v11 = vpack.c.bf16 %v1662_v10, %v1658_v7  ;;  %v1712_v12 = vpack.c.bf16 %v1659_v3, %v1655_v34  ;;  %v1661_v14 = vld [vmem:[%s3166_s28 + $0xb0] sm:$0xff]  ;;  %v1698_v10 = vld [vmem:[%s3166_s28 + $0x1d8] sm:$0xff] }
 0x88b   : > { %v1702_v34 = vld [vmem:[%s3166_s28 + $0x1f8] sm:$0xff]  ;;  %v1733_v3 = vpack.c.bf16 %v1700_v8, %v1696_v6  ;;  %v1921_v6 = vld [vmem:[%s3168_s21 + $0x28] sm:$0xff] }
 0x88c   : > { %1763 = vmatpush1.bf16.msra.mxu1 %v1712_v12  ;;  %v1695_v12 = vld [vmem:[%s3166_s28 + $0x1c0] sm:$0xff] }
 0x88f   : > { %v2624_v13 = vpop.permute.xlu1 %2623 }
 0x890   : > { %v2626_v16 = vunpack.i.h.bf16 %v2624_v13  ;;  %v2625_v17 = vunpack.i.l.bf16 %v2624_v13  ;;  %v1657_v13 = vld [vmem:[%s3166_s28 + $0x90] sm:$0xff] }
 0x891   : > { %v1714_v15 = vpack.c.bf16 %v1661_v14, %v1657_v13  ;;  %v1699_v13 = vld [vmem:[%s3166_s28 + $0x1e0] sm:$0xff]  ;;  %v1697_v14 = vld [vmem:[%s3166_s28 + $0x1d0] sm:$0xff] }
 0x892   : > { %v1522_v20 = vsel %vm1520_vm4, %v1519_v18, %v2626_v16  ;;  %v1521_v21 = vsel %vm1520_vm4, %v1518_v19, %v2625_v17  ;;  %v1664_v16 = vld [vmem:[%s3166_s28 + $0xc8] sm:$0xff]  ;;  %v1666_v18 = vld [vmem:[%s3166_s28 + $0xd8] sm:$0xff] }
 0x893   : > { %v1539_v22 = vpack.c.bf16 %v1522_v20, %v1521_v21  ;;  %v1668_v17 = vld [vmem:[%s3166_s28 + $0xe8] sm:$0xff]  ;;  %v1670_v20 = vld [vmem:[%s3166_s28 + $0xf8] sm:$0xff]  ;;  %v1663_v21 = vld [vmem:[%s3166_s28 + $0xc0] sm:$0xff] }
 0x894   : > { %v1717_v19 = vpack.c.bf16 %v1668_v17, %v1664_v16  ;;  %v1701_v16 = vld [vmem:[%s3166_s28 + $0x1f0] sm:$0xff] }
 0x895   : > { %2535 = vmatmul.mubr.bf16.vlgmr.msra.gmra.mrb[12].mxu0 %v1539_v22  ;;  %v1667_v22 = vld [vmem:[%s3166_s28 + $0xe0] sm:$0xff]  ;;  %v1734_v17 = vpack.c.bf16 %v1701_v16, %v1697_v14  ;;  %v1922_v16 = vld [vmem:[%s3168_s21 + $0x30] sm:$0xff] }
 0x896   : > { %1833 = vmatprep.mubr.bf16.mxu0 %v2857_v33  ;;  %1764 = vmatprep.subr.bf16.mxu1 %v1717_v19 }
 0x968   : > { %v1589_v49 = vpop.f32.mrb[12].mxu0 }
 0x969   : > { %v1590_v23 = vadd.f32 %v2361_v52, %v1589_v49  ;;  %v2536_v24 = vpop.f32.mrb[13].mxu0  ;;  %v1716_v49 = vpack.c.bf16 %v1667_v22, %v1663_v21 }
 0x96a   : > { %v1592_v25 = vpop.f32.mrb[14].mxu0  ;;  %v1669_v24 = vld [vmem:[%s3166_s28 + $0xf0] sm:$0xff] }
 0x96b   : > { %v1593_v26 = vadd.f32 %v2361_v52, %v1592_v25  ;;  %v2537_v27 = vpop.f32.mrb[15].mxu0  ;;  %v1596_v28 = vadd.f32 %v1590_v23, %v3286_v29  ;;  %v1706_v29 = vpack.c.bf16 %v1645_v41, %v1641_v40  ;;  %v1719_v52 = vpack.c.bf16 %v1670_v20, %v1666_v18  ;;  %v1665_v23 = vld [vmem:[%s3166_s28 + $0xd0] sm:$0xff]  ;;  %1765 = vmatpush1.bf16.msra.mxu1 %v1716_v49  ;;  %v1684_v40 = vld [vmem:[%s3166_s28 + $0x168] sm:$0xff]  ;;  %v1682_v41 = vld [vmem:[%s3166_s28 + $0x158] sm:$0xff] }
 0x96c   : > { %v1718_v25 = vpack.c.bf16 %v1669_v24, %v1665_v23  ;;  %v1676_v27 = vld [vmem:[%s3166_s28 + $0x128] sm:$0xff]  ;;  %v1725_v44 = vpack.c.bf16 %v1684_v40, %v1680_v5  ;;  %v2362_v24 = vld [vmem:[%s3747_s3] ss:$0 sm:$0xff] }
 0x96d   : > { %1600 = vadd.xlane.f32.xlu0 %v1596_v28  ;;  %v1597_v33 = vadd.f32 %v1593_v26, %v3291_v30  ;;  %v1650_v30 = vld [vmem:[%s3166_s28 + $0x58] sm:$0xff]  ;;  %1802 = vmatpush1.bf16.msra.mxu0 %v1706_v29  ;;  %v1672_v26 = vld [vmem:[%s3166_s28 + $0x108] sm:$0xff] }
 0x96e   : > { %v1711_v50 = vpack.c.bf16 %v1654_v47, %v1650_v30  ;;  %v1686_v29 = vld [vmem:[%s3166_s28 + $0x178] sm:$0xff]  ;;  %v1683_v30 = vld [vmem:[%s3166_s28 + $0x160] sm:$0xff] }
 0x96f   : > { %1602 = vadd.xlane.f32.xlu1 %v1597_v33  ;;  %v1727_v47 = vpack.c.bf16 %v1686_v29, %v1682_v41  ;;  %v1724_v48 = vpack.c.bf16 %v1683_v30, %v1679_v46  ;;  %v1948_v41 = vld [vmem:[%s3168_s21 + $0x100] sm:$0xff]  ;;  %v1934_v46 = vld [vmem:[%s3168_s21 + $0x90] sm:$0xff]  ;;  %v1935_v30 = vld [vmem:[%s3168_s21 + $0x98] sm:$0xff] }
 0x970   : > { %1803 = vmatprep.subr.bf16.mxu0 %v1711_v50  ;;  %v1681_v50 = vld [vmem:[%s3166_s28 + $0x150] sm:$0xff] }
 0x971   : > { %1804 = vmatpush1.bf16.msra.mxu0 %v1710_v2  ;;  %v1689_v2 = vld [vmem:[%s3166_s28 + $0x190] sm:$0xff] }
 0x972   : > { %1805 = vmatprep.subr.bf16.mxu0 %v1715_v11  ;;  %v1730_v7 = vpack.c.bf16 %v1693_v4, %v1689_v2  ;;  %v1735_v11 = vpack.c.bf16 %v1702_v34, %v1698_v10  ;;  %v1969_v2 = vld [vmem:[%s3168_s21 + $0x1a8] sm:$0xff]  ;;  %v1920_v4 = vld [vmem:[%s3168_s21 + $0x20] sm:$0xff] }
 0x973   : > { %v1986_v8 = vpack.c.bf16 %v1921_v6, %v1920_v4  ;;  %v1952_v10 = vld [vmem:[%s3168_s21 + $0x120] sm:$0xff]  ;;  %v1953_v34 = vld [vmem:[%s3168_s21 + $0x128] sm:$0xff]  ;;  %v1979_v6 = vld [vmem:[%s3168_s21 + $0x1f8] sm:$0xff] }
 0x975   : > { %1806 = vmatpush1.bf16.msra.mxu0 %v1714_v15  ;;  %v1732_v15 = vpack.c.bf16 %v1699_v13, %v1695_v12  ;;  %v1939_v12 = vld [vmem:[%s3168_s21 + $0xb8] sm:$0xff]  ;;  %v1970_v13 = vld [vmem:[%s3168_s21 + $0x1b0] sm:$0xff] }
 0x976   : > { %1807 = vmatprep.subr.bf16.mxu0 %v1719_v52 }
 0x979   : > { %1808 = vmatpush1.bf16.msra.mxu0 %v1718_v25 }
 0x9fa   : > { %v1601_v51 = vpop.xlane.xlu0 %1600 }
 0x9fb   : > { %v1605_v53 = vmul.f32 0.0078125, %v1601_v51  ;;  %v1685_v51 = vld [vmem:[%s3166_s28 + $0x170] sm:$0xff] }
 0x9fc   : > { %v1603_v54 = vpop.xlane.xlu1 %1602 }
 0x9fd   : > { %v3459_v55 = vsub.f32 %v1596_v28, %v1605_v53  ;;  %v1606_v56 = vmul.f32 0.0078125, %v1603_v54  ;;  %v1674_v28 = vld [vmem:[%s3166_s28 + $0x118] sm:$0xff]  ;;  %v1726_v53 = vpack.c.bf16 %v1685_v51, %v1681_v50  ;;  %v1688_v54 = vld [vmem:[%s3166_s28 + $0x188] sm:$0xff]  ;;  %v1918_v51 = vld [vmem:[%s3168_s21 + $0x10] sm:$0xff] }
 0x9fe   : > { %v1723_v35 = vpack.c.bf16 %v1678_v31, %v1674_v28  ;;  %v2363_v28 = vld [vmem:[%s3748_s19] ss:$0 sm:$0xff]  ;;  %v1967_v50 = vld [vmem:[%s3168_s21 + $0x198] sm:$0xff] }
 0x9ff   : > { %v3461_v57 = vsub.f32 %v1597_v33, %v1606_v56  ;;  %v1609_v58 = vmul.f32 %v3459_v55, %v3459_v55  ;;  %v1721_v33 = vpack.c.bf16 %v1676_v27, %v1672_v26  ;;  %v1692_v56 = vld [vmem:[%s3166_s28 + $0x1a8] sm:$0xff] }
 0xa00   : > { %1809 = vmatprep.subr.bf16.mxu0 %v1723_v35  ;;  %v1964_v35 = vld [vmem:[%s3168_s21 + $0x180] sm:$0xff] }
 0xa01   : > { %1611 = vadd.xlane.f32.xlu0 %v1609_v58  ;;  %v1610_v60 = vmul.f32 %v3461_v57, %v3461_v57  ;;  %1766 = vmatprep.subr.bf16.mxu1 %v1721_v33  ;;  %v1690_v58 = vld [vmem:[%s3166_s28 + $0x198] sm:$0xff]  ;;  %v2008_v5 = vpack.c.bf16 %v1965_v37, %v1964_v35  ;;  %v1974_v37 = vld [vmem:[%s3168_s21 + $0x1d0] sm:$0xff] }
 0xa02   : > { %1767 = vmatpush1.bf16.msra.mxu1 %v1720_v36  ;;  %1810 = vmatpush1.bf16.msra.mxu0 %v1722_v39  ;;  %v1731_v0 = vpack.c.bf16 %v1694_v61, %v1690_v58  ;;  %v1917_v39 = vld [vmem:[%s3168_s21 + $0x8] sm:$0xff]  ;;  %v1950_v58 = vld [vmem:[%s3168_s21 + $0x110] sm:$0xff] }
 0xa03   : > { %1768 = vmatprep.subr.bf16.mxu1 %v1725_v44  ;;  %1811 = vmatprep.subr.bf16.mxu0 %v1727_v47  ;;  %v1984_v40 = vpack.c.bf16 %v1917_v39, %v1916_v38  ;;  %v1949_v44 = vld [vmem:[%s3168_s21 + $0x108] sm:$0xff]  ;;  %v1966_v47 = vld [vmem:[%s3168_s21 + $0x190] sm:$0xff]  ;;  %v1975_v38 = vld [vmem:[%s3168_s21 + $0x1d8] sm:$0xff] }
 0xa04   : > { %v2000_v29 = vpack.c.bf16 %v1949_v44, %v1948_v41  ;;  %v1927_v41 = vld [vmem:[%s3168_s21 + $0x58] sm:$0xff]  ;;  %v1958_v44 = vld [vmem:[%s3168_s21 + $0x150] sm:$0xff] }
 0xa05   : > { %1613 = vadd.xlane.f32.xlu0 %v1610_v60  ;;  %v1729_v60 = vpack.c.bf16 %v1692_v56, %v1688_v54  ;;  %v2009_v54 = vpack.c.bf16 %v1967_v50, %v1966_v47  ;;  %v1945_v47 = vld [vmem:[%s3168_s21 + $0xe8] sm:$0xff] }
 0xa06   : > { %1769 = vmatpush1.bf16.msra.mxu1 %v1724_v48  ;;  %1812 = vmatpush1.bf16.msra.mxu0 %v1726_v53  ;;  %v1993_v48 = vpack.c.bf16 %v1935_v30, %v1934_v46  ;;  %v1919_v53 = vld [vmem:[%s3168_s21 + $0x18] sm:$0xff]  ;;  %v1944_v30 = vld [vmem:[%s3168_s21 + $0xe0] sm:$0xff] }
 0xa07   : > { %1770 = vmatprep.subr.bf16.mxu1 %v1729_v60  ;;  %1813 = vmatprep.subr.bf16.mxu0 %v1731_v0  ;;  %v1985_v56 = vpack.c.bf16 %v1919_v53, %v1918_v51  ;;  %v1951_v60 = vld [vmem:[%s3168_s21 + $0x118] sm:$0xff]  ;;  %v1968_v0 = vld [vmem:[%s3168_s21 + $0x1a0] sm:$0xff]  ;;  %v1998_v50 = vpack.c.bf16 %v1945_v47, %v1944_v30  ;;  %v1977_v53 = vld [vmem:[%s3168_s21 + $0x1e8] sm:$0xff] }
 0xa08   : > { %v2001_v61 = vpack.c.bf16 %v1951_v60, %v1950_v58  ;;  %v1959_v46 = vld [vmem:[%s3168_s21 + $0x158] sm:$0xff]  ;;  %v1976_v51 = vld [vmem:[%s3168_s21 + $0x1e0] sm:$0xff]  ;;  %v1929_v58 = vld [vmem:[%s3168_s21 + $0x68] sm:$0xff] }
 0xa09   : > { %v1960_v60 = vld [vmem:[%s3168_s21 + $0x160] sm:$0xff] }
 0xa0a   : > { %1771 = vmatpush1.bf16.msra.mxu1 %v1728_v1  ;;  %1814 = vmatpush1.bf16.msra.mxu0 %v1730_v7  ;;  %v1994_v1 = vpack.c.bf16 %v1937_v63, %v1936_v62  ;;  %v2010_v7 = vpack.c.bf16 %v1969_v2, %v1968_v0  ;;  %v1946_v63 = vld [vmem:[%s3168_s21 + $0xf0] sm:$0xff]  ;;  %v1947_v0 = vld [vmem:[%s3168_s21 + $0xf8] sm:$0xff] }
 0xa0b   : > { %1772 = vmatprep.subr.bf16.mxu1 %v1733_v3  ;;  %1815 = vmatprep.subr.bf16.mxu0 %v1735_v11  ;;  %v2002_v3 = vpack.c.bf16 %v1953_v34, %v1952_v10  ;;  %v1938_v11 = vld [vmem:[%s3168_s21 + $0xb0] sm:$0xff]  ;;  %v1999_v4 = vpack.c.bf16 %v1947_v0, %v1946_v63 }
 0xa0c   : > { %v1995_v14 = vpack.c.bf16 %v1939_v12, %v1938_v11  ;;  %v1962_v34 = vld [vmem:[%s3168_s21 + $0x170] sm:$0xff] }
 0xa0e   : > { %1773 = vmatpush1.bf16.msra.mxu1 %v1732_v15  ;;  %1816 = vmatpush1.bf16.msra.mxu0 %v1734_v17  ;;  %v1971_v15 = vld [vmem:[%s3168_s21 + $0x1b8] sm:$0xff] }
 0xa0f   : > { %2428 = vmatprep.subr.bf16.mxu0 %v2008_v5  ;;  %v1923_v17 = vld [vmem:[%s3168_s21 + $0x38] sm:$0xff]  ;;  %v2013_v5 = vpack.c.bf16 %v1975_v38, %v1974_v37 }
 0xa8e   : > { %v1612_v18 = vpop.xlane.xlu0 %1611 }
 0xa8f   : > { %v1615_v19 = vmul.f32 0.0078125, %v1612_v18  ;;  %v2011_v18 = vpack.c.bf16 %v1971_v15, %v1970_v13  ;;  %v1736_v13 = vld [vmem:[%s3200_s12] sm:$0xf] }
 0xa90   : > { %v1741_v15 = vrot.slane %v1736_v13, %v891_v43 }
 0xa91   : > { %v1617_v20 = vadd.f32 1e-12, %v1615_v19  ;;  %v1987_v19 = vpack.c.bf16 %v1923_v17, %v1922_v16  ;;  %v1749_v16 = vrot.slane %v1736_v13, %v899_v59  ;;  %v1745_v17 = vrot.slane %v1736_v13, %v895_v45 }
 0xa92   : > { %v1614_v21 = vpop.xlane.xlu0 %1613 }
 0xa93   : > { %2659 = vrsqrt.f32 %v1617_v20  ;;  %v1616_v22 = vmul.f32 0.0078125, %v1614_v21  ;;  %v1954_v20 = vld [vmem:[%s3168_s21 + $0x130] sm:$0xff]  ;;  %v1955_v21 = vld [vmem:[%s3168_s21 + $0x138] sm:$0xff] }
 0xa95   : > { %v1618_v52 = vadd.f32 1e-12, %v1616_v22  ;;  %v2003_v22 = vpack.c.bf16 %v1955_v21, %v1954_v20 }
 0xa97   : > { %2661 = vrsqrt.f32 %v1618_v52  ;;  %v1940_v52 = vld [vmem:[%s3168_s21 + $0xc0] sm:$0xff] }
 0xa9d   : > { %v2660_v49 = vpop.eup %2659 }
 0xa9e   : > { %v1621_v23 = vmul.f32 %v2660_v49, %v3459_v55  ;;  %v1941_v49 = vld [vmem:[%s3168_s21 + $0xc8] sm:$0xff] }
 0xaa0   : > { %v1629_v27 = vmul.f32 %v2362_v24, %v1621_v23  ;;  %v1972_v23 = vld [vmem:[%s3168_s21 + $0x1c0] sm:$0xff] }
 0xaa1   : > { %v2662_v25 = vpop.eup %2661 }
 0xaa2   : > { %v1622_v26 = vmul.f32 %v2662_v25, %v3461_v57  ;;  %v3531_v55 = vadd.f32 %v2363_v28, %v1629_v27  ;;  %v1932_v57 = vld [vmem:[%s3168_s21 + $0x80] sm:$0xff]  ;;  %v1973_v25 = vld [vmem:[%s3168_s21 + $0x1c8] sm:$0xff] }
 0xaa3   : > { %v1992_v36 = vpack.c.bf16 %v1933_v32, %v1932_v57  ;;  %v1925_v27 = vld [vmem:[%s3168_s21 + $0x48] sm:$0xff]  ;;  %v1942_v32 = vld [vmem:[%s3168_s21 + $0xd0] sm:$0xff] }
 0xaa4   : > { %v1630_v33 = vmul.f32 %v2362_v24, %v1622_v26  ;;  %v1996_v24 = vpack.c.bf16 %v1941_v49, %v1940_v52  ;;  %v1924_v26 = vld [vmem:[%s3168_s21 + $0x40] sm:$0xff]  ;;  %v1957_v57 = vld [vmem:[%s3168_s21 + $0x148] sm:$0xff] }
 0xaa5   : > { %2406 = vmatprep.subr.bf16.mxu1 %v1992_v36  ;;  %v1943_v36 = vld [vmem:[%s3168_s21 + $0xd8] sm:$0xff] }
 0xaa6   : > { %v3533_v31 = vadd.f32 %v2363_v28, %v1630_v33  ;;  %v2012_v28 = vpack.c.bf16 %v1973_v25, %v1972_v23  ;;  %v1988_v33 = vpack.c.bf16 %v1925_v27, %v1924_v26  ;;  %v1997_v39 = vpack.c.bf16 %v1943_v36, %v1942_v32 }
 0xaa8   : > { %v1703_v9 = vpack.c.bf16 %v3533_v31, %v3531_v55 }
 0xaaa   : > { %1791 = vmatmul.mubr.bf16.vlgmr.msra.gmra.mrb[28].mxu1 %v1703_v9  ;;  %1834 = vmatmul.mubr.bf16.vlgmr.msra.gmra.mrb[16].mxu0 %v1703_v9  ;;  %v1956_v9 = vld [vmem:[%s3168_s21 + $0x140] sm:$0xff] }
 0xaab   : > { %2407 = vmatpush3.bf16.msra.mxu1 %v1984_v40  ;;  %2429 = vmatpush3.bf16.msra.mxu0 %v2000_v29  ;;  %v2004_v35 = vpack.c.bf16 %v1957_v57, %v1956_v9  ;;  %v1926_v40 = vld [vmem:[%s3168_s21 + $0x50] sm:$0xff] }
 0xaac   : > { %2408 = vmatprep.subr.bf16.mxu1 %v1993_v48  ;;  %2430 = vmatprep.subr.bf16.mxu0 %v2009_v54  ;;  %v1989_v29 = vpack.c.bf16 %v1927_v41, %v1926_v40  ;;  %v2005_v48 = vpack.c.bf16 %v1959_v46, %v1958_v44  ;;  %v1928_v54 = vld [vmem:[%s3168_s21 + $0x60] sm:$0xff] }
 0xaad   : > { %v1990_v62 = vpack.c.bf16 %v1929_v58, %v1928_v54 }
 0xaaf   : > { %2409 = vmatpush3.bf16.msra.mxu1 %v1985_v56  ;;  %2431 = vmatpush3.bf16.msra.mxu0 %v2001_v61  ;;  %v2014_v56 = vpack.c.bf16 %v1977_v53, %v1976_v51  ;;  %v1961_v61 = vld [vmem:[%s3168_s21 + $0x168] sm:$0xff] }
 0xab0   : > { %2410 = vmatprep.subr.bf16.mxu1 %v1994_v1  ;;  %2432 = vmatprep.subr.bf16.mxu0 %v2010_v7  ;;  %v1978_v1 = vld [vmem:[%s3168_s21 + $0x1f0] sm:$0xff]  ;;  %v2006_v2 = vpack.c.bf16 %v1961_v61, %v1960_v60 }
 0xab1   : > { %v1930_v7 = vld [vmem:[%s3168_s21 + $0x70] sm:$0xff]  ;;  %v2015_v10 = vpack.c.bf16 %v1979_v6, %v1978_v1 }
 0xab3   : > { %2411 = vmatpush3.bf16.msra.mxu1 %v1986_v8  ;;  %2433 = vmatpush3.bf16.msra.mxu0 %v2002_v3  ;;  %v1931_v8 = vld [vmem:[%s3168_s21 + $0x78] sm:$0xff] }
 0xab4   : > { %2412 = vmatprep.subr.bf16.mxu1 %v1995_v14  ;;  %2434 = vmatprep.subr.bf16.mxu0 %v2011_v18  ;;  %v1963_v3 = vld [vmem:[%s3168_s21 + $0x178] sm:$0xff]  ;;  %v1991_v11 = vpack.c.bf16 %v1931_v8, %v1930_v7  ;;  %v1752_v14 = vsub.s32 3, %v3310_v42 }
 0xab5   : > { %v2007_v12 = vpack.c.bf16 %v1963_v3, %v1962_v34 }
 0xab6   : > { %v1753_v18 = vrot.slane %v1736_v13, %v1752_v14 }
 0xab7   : > { %2413 = vmatpush3.bf16.msra.mxu1 %v1987_v19  ;;  %2435 = vmatpush3.bf16.msra.mxu0 %v2003_v22 }
 0xab8   : > { %2414 = vmatprep.subr.bf16.mxu1 %v1996_v24  ;;  %2436 = vmatprep.subr.bf16.mxu0 %v2012_v28 }
 0xabb   : > { %2415 = vmatpush3.bf16.msra.mxu1 %v1988_v33  ;;  %2437 = vmatpush3.bf16.msra.mxu0 %v2004_v35 }
 0xabc   : > { %2416 = vmatprep.subr.bf16.mxu1 %v1997_v39  ;;  %2438 = vmatprep.subr.bf16.mxu0 %v2013_v5 }
 0xabf   : > { %2417 = vmatpush3.bf16.msra.mxu1 %v1989_v29  ;;  %2439 = vmatpush3.bf16.msra.mxu0 %v2005_v48 }
 0xac0   : > { %2418 = vmatprep.subr.bf16.mxu1 %v1998_v50  ;;  %2440 = vmatprep.subr.bf16.mxu0 %v2014_v56 }
 0xac3   : > { %2419 = vmatpush3.bf16.msra.mxu1 %v1990_v62  ;;  %2441 = vmatpush3.bf16.msra.mxu0 %v2006_v2 }
 0xac4   : > { %2420 = vmatprep.subr.bf16.mxu1 %v1999_v4  ;;  %2442 = vmatprep.subr.bf16.mxu0 %v2015_v10 }
 0xac7   : > { %2421 = vmatpush3.bf16.msra.mxu1 %v1991_v11  ;;  %2443 = vmatpush3.bf16.msra.mxu0 %v2007_v12 }
 0xb7d   : > { %v1792_v19 = vpop.f32.mrb[28].mxu1  ;;  %v1835_v20 = vpop.f32.mrb[16].mxu0 }
 0xb7e   : > { %v3609_v21 = vadd.f32 %v1792_v19, %v1741_v15  ;;  %v3611_v22 = vadd.f32 %v1835_v20, %v1749_v16  ;;  %v1794_v52 = vpop.f32.mrb[29].mxu1  ;;  %v1837_v49 = vpop.f32.mrb[17].mxu0 }
 0xb7f   : > { %v3613_v23 = vadd.f32 %v1794_v52, %v1745_v17  ;;  %v3615_v24 = vadd.f32 %v1837_v49, %v1753_v18  ;;  %v1796_v43 = vpop.f32.mrb[30].mxu1  ;;  %v1839_v25 = vpop.f32.mrb[18].mxu0 }
 0xb80   : > { %v1852_v59 = vmul.f32 0.044715, %v3609_v21  ;;  %v1854_v42 = vmul.f32 0.044715, %v3611_v22  ;;  %v1797_v45 = vadd.f32 %v1796_v43, %v1741_v15  ;;  %v1840_v26 = vadd.f32 %v1839_v25, %v1749_v16  ;;  %v1798_v27 = vpop.f32.mrb[31].mxu1  ;;  %v1841_v28 = vpop.f32.mrb[19].mxu0 }
 0xb81   : > { %v1853_v33 = vmul.f32 0.044715, %v3613_v23  ;;  %v1855_v9 = vmul.f32 0.044715, %v3615_v24  ;;  %v3621_v57 = vadd.f32 %v1798_v27, %v1745_v17  ;;  %v3623_v32 = vadd.f32 %v1841_v28, %v1753_v18 }
 0xb82   : > { %v1860_v35 = vmul.f32 %v1852_v59, %v3609_v21  ;;  %v1862_v36 = vmul.f32 %v1854_v42, %v3611_v22  ;;  %v1856_v37 = vmul.f32 0.044715, %v1797_v45  ;;  %v1858_v38 = vmul.f32 0.044715, %v1840_v26 }
 0xb83   : > { %v1861_v39 = vmul.f32 %v1853_v33, %v3613_v23  ;;  %v1863_v5 = vmul.f32 %v1855_v9, %v3615_v24  ;;  %v1857_v40 = vmul.f32 0.044715, %v3621_v57  ;;  %v1859_v41 = vmul.f32 0.044715, %v3623_v32 }
 0xb84   : > { %v1868_v44 = vmul.f32 %v1860_v35, %v3609_v21  ;;  %v1870_v29 = vmul.f32 %v1862_v36, %v3611_v22  ;;  %v1864_v46 = vmul.f32 %v1856_v37, %v1797_v45  ;;  %v1866_v30 = vmul.f32 %v1858_v38, %v1840_v26 }
 0xb85   : > { %v1869_v47 = vmul.f32 %v1861_v39, %v3613_v23  ;;  %v1871_v48 = vmul.f32 %v1863_v5, %v3615_v24  ;;  %v1865_v50 = vmul.f32 %v1857_v40, %v3621_v57  ;;  %v1867_v51 = vmul.f32 %v1859_v41, %v3623_v32 }
 0xb86   : > { %v1876_v53 = vadd.f32 %v1868_v44, %v3609_v21  ;;  %v1878_v54 = vadd.f32 %v1870_v29, %v3611_v22  ;;  %v1872_v56 = vmul.f32 %v1864_v46, %v1797_v45  ;;  %v1874_v58 = vmul.f32 %v1866_v30, %v1840_v26 }
 0xb87   : > { %v1873_v60 = vmul.f32 %v1865_v50, %v3621_v57  ;;  %v1875_v61 = vmul.f32 %v1867_v51, %v3623_v32  ;;  %v1877_v2 = vadd.f32 %v1869_v47, %v3613_v23  ;;  %v1879_v8 = vadd.f32 %v1871_v48, %v3615_v24 }
 0xb88   : > { %v1884_v62 = vmul.f32 0.7978846, %v1876_v53  ;;  %v1886_v63 = vmul.f32 0.7978846, %v1878_v54  ;;  %v1880_v0 = vadd.f32 %v1872_v56, %v1797_v45  ;;  %v1882_v1 = vadd.f32 %v1874_v58, %v1840_v26 }
 0xb89   : > { %v1881_v4 = vadd.f32 %v1873_v60, %v3621_v57  ;;  %v1885_v10 = vmul.f32 0.7978846, %v1877_v2  ;;  %v1883_v3 = vadd.f32 %v1875_v61, %v3623_v32  ;;  %v1887_v11 = vmul.f32 0.7978846, %v1879_v8 }
 0xb8a   : > { %2663 = vtanh.f32 %v1884_v62  ;;  %v1888_v6 = vmul.f32 0.7978846, %v1880_v0  ;;  %v1890_v7 = vmul.f32 0.7978846, %v1882_v1  ;;  %v1844_v19 = vmul.f32 0.5, %v3609_v21 }
 0xb8b   : > { %2665 = vtanh.f32 %v1886_v63  ;;  %v1889_v34 = vmul.f32 0.7978846, %v1881_v4  ;;  %v1891_v12 = vmul.f32 0.7978846, %v1883_v3  ;;  %v1848_v20 = vmul.f32 0.5, %v1797_v45 }
 0xb8c   : > { %2667 = vtanh.f32 %v1888_v6  ;;  %v1846_v43 = vmul.f32 0.5, %v3611_v22  ;;  %v1850_v25 = vmul.f32 0.5, %v1840_v26  ;;  %v1845_v27 = vmul.f32 0.5, %v3613_v23 }
 0xb8d   : > { %2669 = vtanh.f32 %v1890_v7  ;;  %v1849_v36 = vmul.f32 0.5, %v3621_v57  ;;  %v1847_v45 = vmul.f32 0.5, %v3615_v24  ;;  %v1851_v5 = vmul.f32 0.5, %v3623_v32  ;;  %v2364_v24 = vld [vmem:[%s755_s30] ss:$0 sm:$0xff] }
 0xb8e   : > { %2671 = vtanh.f32 %v1885_v10 }
 0xb8f   : > { %2673 = vtanh.f32 %v1889_v34 }
 0xb90   : > { %2675 = vtanh.f32 %v1887_v11 }
 0xb91   : > { %2677 = vtanh.f32 %v1891_v12 }
 0xb94   : > { %v2664_v13 = vpop.eup %2663 }
 0xb95   : > { %v2666_v14 = vpop.eup %2665  ;;  %v1900_v15 = vadd.f32 1.0, %v2664_v13 }
 0xb96   : > { %v2668_v16 = vpop.eup %2667  ;;  %v1902_v17 = vadd.f32 1.0, %v2666_v14 }
 0xb97   : > { %v2670_v18 = vpop.eup %2669  ;;  %v1904_v52 = vadd.f32 1.0, %v2668_v16  ;;  %v1908_v33 = vmul.f32 %v1900_v15, %v1844_v19  ;;  %v2365_v19 = vld [vmem:[%s758_s16] ss:$0 sm:$0xff] }
 0xb98   : > { %v2672_v49 = vpop.eup %2671  ;;  %v1906_v59 = vadd.f32 1.0, %v2670_v18  ;;  %v1910_v38 = vmul.f32 %v1902_v17, %v1846_v43 }
 0xb99   : > { %v2674_v42 = vpop.eup %2673  ;;  %v1901_v28 = vadd.f32 1.0, %v2672_v49  ;;  %v1912_v9 = vmul.f32 %v1904_v52, %v1848_v20  ;;  %v2366_v49 = vld [vmem:[%s761_s0] ss:$0 sm:$0xff] }
 0xb9a   : > { %v2676_v35 = vpop.eup %2675  ;;  %v1905_v37 = vadd.f32 1.0, %v2674_v42  ;;  %v1914_v39 = vmul.f32 %v1906_v59, %v1850_v25 }
 0xb9b   : > { %v2678_v21 = vpop.eup %2677  ;;  %v1903_v22 = vadd.f32 1.0, %v2676_v35  ;;  %v1980_v26 = vpack.c.bf16 %v1912_v9, %v1908_v33  ;;  %v1909_v40 = vmul.f32 %v1901_v28, %v1845_v27 }
 0xb9c   : > { %v1913_v41 = vmul.f32 %v1905_v37, %v1849_v36  ;;  %v1907_v23 = vadd.f32 1.0, %v2678_v21  ;;  %v1982_v44 = vpack.c.bf16 %v1914_v39, %v1910_v38 }
 0xb9d   : > { %v1911_v46 = vmul.f32 %v1903_v22, %v1847_v45 }
 0xb9e   : > { %v1981_v29 = vpack.c.bf16 %v1913_v41, %v1909_v40  ;;  %v1915_v30 = vmul.f32 %v1907_v23, %v1851_v5 }
 0xba0   : > { %2055 = vmatprep.mubr.bf16.mxu1 %v1981_v29  ;;  %v1983_v57 = vpack.c.bf16 %v1915_v30, %v1911_v46 }
 0xba1   : > { %2056 = vmatmul.mubr.bf16.vlgmr.msra.gmra.mrb[32].mxu1 %v1980_v26 }
 0xba2   : > { %2096 = vmatprep.mubr.bf16.mxu0 %v1983_v57 }
 0xba3   : > { %2097 = vmatmul.mubr.bf16.vlgmr.msra.gmra.mrb[20].mxu0 %v1982_v44 }
 0xc74   : > { %v2422_v47 = vpop.f32.mrb[32].mxu1 }
 0xc75   : > { %v2423_v32 = vpop.f32.mrb[33].mxu1 }
 0xc76   : > { %v2444_v48 = vpop.f32.mrb[20].mxu0  ;;  %v2424_v50 = vadd.f32 %v2423_v32, %v2422_v47  ;;  %v2425_v51 = vpop.f32.mrb[34].mxu1 }
 0xc77   : > { %v2445_v53 = vpop.f32.mrb[21].mxu0  ;;  %v2426_v54 = vpop.f32.mrb[35].mxu1 }
 0xc78   : > { %v2058_v56 = vadd.f32 %v2424_v50, %v2364_v24  ;;  %v2446_v58 = vadd.f32 %v2445_v53, %v2444_v48  ;;  %v2447_v60 = vpop.f32.mrb[22].mxu0  ;;  %v2427_v61 = vadd.f32 %v2426_v54, %v2425_v51 }
 0xc79   : > { %v2448_v62 = vpop.f32.mrb[23].mxu0 }
 0xc7a   : > { %v2099_v63 = vadd.f32 %v2446_v58, %v2058_v56  ;;  %v2061_v0 = vadd.f32 %v2427_v61, %v2364_v24  ;;  %v2449_v1 = vadd.f32 %v2448_v62, %v2447_v60 }
 0xc7c   : > { %v2102_v2 = vadd.f32 %v2449_v1, %v2061_v0  ;;  %v2105_v4 = vadd.f32 %v2099_v63, %v3531_v55 }
 0xc7e   : > { %2109 = vadd.xlane.f32.xlu0 %v2105_v4  ;;  %v2106_v6 = vadd.f32 %v2102_v2, %v3533_v31 }
 0xc80   : > { %2111 = vadd.xlane.f32.xlu1 %v2106_v6 }
 0xd0b   : > { %v2110_v7 = vpop.xlane.xlu0 %2109 }
 0xd0c   : > { %v2113_v8 = vmul.f32 0.0078125, %v2110_v7 }
 0xd0d   : > { %v2112_v10 = vpop.xlane.xlu1 %2111 }
 0xd0e   : > { %v2115_v34 = vsub.f32 %v2105_v4, %v2113_v8  ;;  %v2114_v3 = vmul.f32 0.0078125, %v2112_v10 }
 0xd10   : > { %v2116_v11 = vsub.f32 %v2106_v6, %v2114_v3  ;;  %v2117_v12 = vmul.f32 %v2115_v34, %v2115_v34 }
 0xd12   : > { %2119 = vadd.xlane.f32.xlu0 %v2117_v12  ;;  %v2118_v13 = vmul.f32 %v2116_v11, %v2116_v11 }
 0xd14   : > { %2121 = vadd.xlane.f32.xlu1 %v2118_v13 }
 0xd9f   : > { %v2120_v14 = vpop.xlane.xlu0 %2119 }
 0xda0   : > { %v2123_v15 = vmul.f32 0.0078125, %v2120_v14 }
 0xda1   : > { %v2122_v16 = vpop.xlane.xlu1 %2121 }
 0xda2   : > { %v2125_v55 = vadd.f32 1e-12, %v2123_v15  ;;  %v2124_v17 = vmul.f32 0.0078125, %v2122_v16 }
 0xda4   : > { %2679 = vrsqrt.f32 %v2125_v55  ;;  %v2126_v31 = vadd.f32 1e-12, %v2124_v17 }
 0xda6   : > { %2681 = vrsqrt.f32 %v2126_v31 }
 0xdae   : > { %v2680_v18 = vpop.eup %2679 }
 0xdaf   : > { %v2129_v20 = vmul.f32 %v2680_v18, %v2115_v34 }
 0xdb0   : > { %v2682_v52 = vpop.eup %2681 }
 0xdb1   : > { %v2137_v43 = vmul.f32 %v2365_v19, %v2129_v20  ;;  %v2130_v25 = vmul.f32 %v2682_v52, %v2116_v11 }
 0xdb3   : > { %v2145_v59 = vadd.f32 %v2366_v49, %v2137_v43  ;;  %v2138_v42 = vmul.f32 %v2365_v19, %v2130_v25 }
 0xdb5   : > { %2147 = vst [vmem:[%s3744_s26] sm:$0xff] %v2145_v59  ;;  %v2146_v27 = vadd.f32 %v2366_v49, %v2138_v42 }
 0xdb7   : > { %2148 = vst [vmem:[%s3744_s26 + $0x8] sm:$0xff] %v2146_v27 }
 0xdb8 PF: > { %s3750_s24 = sld [smem:[#allocation13_spill]]  ;;  %s3751_s16 = sld [smem:[#allocation12_spill]] }
 0xdb9   : > { %s3752_s23 = sld [smem:[#allocation14_spill]]  ;;  %s3753_s21 = smov %s2837_s22 }
 0xdbe   : > { %p32_p5 = scmp.ge.s32.totalorder %s3750_s24, 4   ;;  %s3754_s22 = smov %s3751_s16 }
 0xdc0   :  { %34 = sbr.rel (!%p32_p5) target bundleno = 18 (0x12), region = 185 }
 0xdc7   :  { %2160 = vsyncpa [#allocation3], 1 }
 0xdc8   :  { %2162 = vsyncpa [#allocation3 + $0x1], 1 }
 0xdc9   :  { %2163 = vsyncpa [#allocation5], 1 }
 0xdca   :  { %2165 = vsyncpa [#allocation5 + $0x1], 1 }
 0xdcb   :  { %2166 = vsyncpa [#allocation8], 1 }
 0xdcc   :  { %2168 = vsyncpa [#allocation8 + $0x1], 1 }

// kernel: bert_bilstm_forward.3
= control target key start
LH: loop header
LB: loop body
LE: loop exit
PB: predicated region body
PF: predicated region fallthrough
CT: control target
= control target key end

     0   :  { %v4127_v3 = vmov 0.0   ;;  %v4128_v4 = vmov 0   ;;  %vm4129_vm0 = vmmov 0   ;;  %s4130_s13 = smov 64   ;;  %s4132_s14 = smov 96   ;;  %vm173_vm3 = vcmask 261120   ;;  %s5313_s2 = inlined_call_operand.vmem [shape: f32[128,256], index: 2, kind: input, shape index: {}]   ;;  %s5314_s4 = inlined_call_operand.vmem [shape: f32[32,128], index: 4, kind: input, shape index: {}]   ;;  %s5315_s5 = inlined_call_operand.vmem [shape: f32[32,128], index: 5, kind: input, shape index: {}]   ;;  %s5316_s0 = inlined_call_operand.vmem [shape: f32[16,128], index: 0, kind: input, shape index: {}]   ;;  %s5317_s3 = inlined_call_operand.vmem [shape: f32[1,256], index: 3, kind: input, shape index: {}]   ;;  %s5318_s1 = inlined_call_operand.vmem [shape: s32[2,1], index: 1, kind: input, shape index: {}]   ;;  %s5319_s6 = inlined_call_operand.vmem [shape: f32[64,256], index: 6, kind: input, shape index: {}]   ;;  %s5320_s8 = inlined_call_operand.vmem [shape: f32[32,128], index: 8, kind: input, shape index: {}]   ;;  %s5321_s9 = inlined_call_operand.vmem [shape: f32[32,128], index: 9, kind: input, shape index: {}]   ;;  %s5322_s7 = inlined_call_operand.vmem [shape: f32[1,256], index: 7, kind: input, shape index: {}]   ;;  %s5323_s10 = inlined_call_operand.vmem [shape: f32[1,64], index: 10, kind: input, shape index: {}]   ;;  %s5324_s11 = inlined_call_operand.<no memory space> [shape: f32[1,1], index: 11, kind: input, shape index: {}]   ;;  %s5325_s12 = inlined_call_operand.vmem [shape: f32[2,1], index: 12, kind: output, shape index: {}]  }
   0x1   :  { %v48_v0 = vld [vmem:[%s5313_s2 + $0x8] sm:$0xff]  ;;  %v50_v1 = vld [vmem:[%s5313_s2 + $0x18] sm:$0xff]  ;;  %v47_v2 = vld [vmem:[%s5313_s2] sm:$0xff]  ;;  %3603 = vmatprep.subr.bf16.mxu1 %v4127_v3  ;;  %140 = vmatprep.mubr.bf16.mxu0 %v4128_v4  ;;  %vm358_vm4 = vcmask 254976   ;;  %vm3429_vm11 = vcmask 1024  }
   0x2   :  { %v81_v5 = vpack.c.bf16 %v50_v1, %v48_v0  ;;  %v49_v6 = vld [vmem:[%s5313_s2 + $0x10] sm:$0xff]  ;;  %v52_v7 = vld [vmem:[%s5313_s2 + $0x28] sm:$0xff]  ;;  %v54_v8 = vld [vmem:[%s5313_s2 + $0x38] sm:$0xff]  ;;  %3607 = vmatprep.mubr.msk.bf16.mxu1 %vm4129_vm0, %v4127_v3  ;;  %3869 = vset.pattern.permute.xlu0 %v4128_v4  ;;  %v98_v1 = vlaneseq }
   0x3   :  { %v80_v9 = vpack.c.bf16 %v49_v6, %v47_v2  ;;  %v83_v10 = vpack.c.bf16 %v54_v8, %v52_v7  ;;  %v51_v11 = vld [vmem:[%s5313_s2 + $0x20] sm:$0xff]  ;;  %v53_v12 = vld [vmem:[%s5313_s2 + $0x30] sm:$0xff]  ;;  %v56_v13 = vld [vmem:[%s5313_s2 + $0x48] sm:$0xff]  ;;  %3870 = vset.pattern.permute.xlu1 %v4128_v4 }
   0x4   :  { %108 = vmatprep.subr.bf16.mxu0 %v81_v5  ;;  %v58_v14 = vld [vmem:[%s5313_s2 + $0x58] sm:$0xff]  ;;  %v82_v15 = vpack.c.bf16 %v53_v12, %v51_v11  ;;  %v55_v17 = vld [vmem:[%s5313_s2 + $0x40] sm:$0xff]  ;;  %v57_v18 = vld [vmem:[%s5313_s2 + $0x50] sm:$0xff]  ;;  %v4363_v8 = vshrl.u32 %v98_v1, 7 }
   0x5   :  { %109 = vmatpush1.bf16.msra.mxu0 %v80_v9  ;;  %v85_v16 = vpack.c.bf16 %v58_v14, %v56_v13  ;;  %v60_v19 = vld [vmem:[%s5313_s2 + $0x68] sm:$0xff]  ;;  %v62_v20 = vld [vmem:[%s5313_s2 + $0x78] sm:$0xff]  ;;  %v84_v21 = vpack.c.bf16 %v57_v18, %v55_v17  ;;  %v59_v23 = vld [vmem:[%s5313_s2 + $0x60] sm:$0xff] }
   0x6   :  { %110 = vmatprep.subr.bf16.mxu0 %v83_v10  ;;  %v87_v22 = vpack.c.bf16 %v62_v20, %v60_v19  ;;  %v61_v24 = vld [vmem:[%s5313_s2 + $0x70] sm:$0xff]  ;;  %v64_v25 = vld [vmem:[%s5313_s2 + $0x88] sm:$0xff]  ;;  %v66_v26 = vld [vmem:[%s5313_s2 + $0x98] sm:$0xff]  ;;  %v100_v9 = vsub.s32 0, %v4363_v8  ;;  %v104_v12 = vsub.s32 1, %v4363_v8 }
   0x7   :  { %v155_v27 = vld [vmem:[%s5314_s4] sm:$0xff]  ;;  %v156_v28 = vld [vmem:[%s5314_s4 + $0x8] sm:$0xff]  ;;  %v86_v30 = vpack.c.bf16 %v61_v24, %v59_v23  ;;  %v157_v31 = vld [vmem:[%s5314_s4 + $0x10] sm:$0xff]  ;;  %v89_v33 = vpack.c.bf16 %v66_v26, %v64_v25 }
   0x8   :  { %v4264_v29 = vpack.c.bf16 %v156_v28, %v155_v27  ;;  %v158_v32 = vld [vmem:[%s5314_s4 + $0x18] sm:$0xff]  ;;  %v63_v34 = vld [vmem:[%s5313_s2 + $0x80] sm:$0xff]  ;;  %v65_v35 = vld [vmem:[%s5313_s2 + $0x90] sm:$0xff] }
   0x9   :  { %111 = vmatpush1.bf16.msra.mxu0 %v82_v15  ;;  %v68_v36 = vld [vmem:[%s5313_s2 + $0xa8] sm:$0xff]  ;;  %v4282_v37 = vpack.c.bf16 %v158_v32, %v157_v31  ;;  %v70_v38 = vld [vmem:[%s5313_s2 + $0xb8] sm:$0xff]  ;;  %v159_v39 = vld [vmem:[%s5315_s5] sm:$0xff]  ;;  %v88_v41 = vpack.c.bf16 %v65_v35, %v63_v34 }
   0xa   :  { %112 = vmatprep.subr.bf16.mxu0 %v85_v16  ;;  %3604 = vmatpush3.bf16.msra.mxu1 %v4264_v29  ;;  %v160_v40 = vld [vmem:[%s5315_s5 + $0x8] sm:$0xff]  ;;  %v91_v42 = vpack.c.bf16 %v70_v38, %v68_v36  ;;  %v67_v43 = vld [vmem:[%s5313_s2 + $0xa0] sm:$0xff]  ;;  %v69_v44 = vld [vmem:[%s5313_s2 + $0xb0] sm:$0xff] }
   0xb   :  { %3605 = vmatprep.subr.bf16.mxu1 %v4127_v3  ;;  %v72_v45 = vld [vmem:[%s5313_s2 + $0xc8] sm:$0xff]  ;;  %v4304_v46 = vpack.c.bf16 %v160_v40, %v159_v39  ;;  %v74_v47 = vld [vmem:[%s5313_s2 + $0xd8] sm:$0xff]  ;;  %v161_v48 = vld [vmem:[%s5315_s5 + $0x10] sm:$0xff]  ;;  %v90_v50 = vpack.c.bf16 %v69_v44, %v67_v43 }
   0xc   :  { %v162_v49 = vld [vmem:[%s5315_s5 + $0x18] sm:$0xff]  ;;  %v93_v51 = vpack.c.bf16 %v74_v47, %v72_v45  ;;  %v71_v52 = vld [vmem:[%s5313_s2 + $0xc0] sm:$0xff]  ;;  %v73_v53 = vld [vmem:[%s5313_s2 + $0xd0] sm:$0xff] }
   0xd   :  { %113 = vmatpush1.bf16.msra.mxu0 %v84_v21  ;;  %v4324_v54 = vpack.c.bf16 %v162_v49, %v161_v48  ;;  %v76_v55 = vld [vmem:[%s5313_s2 + $0xe8] sm:$0xff]  ;;  %v78_v56 = vld [vmem:[%s5313_s2 + $0xf8] sm:$0xff]  ;;  %v92_v57 = vpack.c.bf16 %v73_v53, %v71_v52  ;;  %v75_v59 = vld [vmem:[%s5313_s2 + $0xe0] sm:$0xff] }
   0xe   :  { %114 = vmatprep.subr.bf16.mxu0 %v87_v22  ;;  %3606 = vmatpush3.bf16.msra.mxu1 %v4282_v37  ;;  %v95_v58 = vpack.c.bf16 %v78_v56, %v76_v55  ;;  %v77_v60 = vld [vmem:[%s5313_s2 + $0xf0] sm:$0xff]  ;;  %v45_v62 = vld [vmem:[%s5316_s0] sm:$0xff]  ;;  %v46_v63 = vld [vmem:[%s5316_s0 + $0x8] sm:$0xff] }
   0xf   :  { %3611 = vmatprep.subr.bf16.mxu1 %v4127_v3  ;;  %v94_v61 = vpack.c.bf16 %v77_v60, %v75_v59  ;;  %v79_v0 = vpack.c.bf16 %v46_v63, %v45_v62  ;;  %v96_v11 = vld [vmem:[%s5317_s3] sm:$0x3] }
  0x10   :  { %v101_v16 = vrot.slane %v96_v11, %v100_v9  ;;  %v105_v17 = vrot.slane %v96_v11, %v104_v12 }
  0x11   :  { %115 = vmatpush1.bf16.msra.mxu0 %v86_v30  ;;  %3608 = vmatmul.mubr.bf16.vlgmr.msra.gmra.mrb[0].mxu1 %v4128_v4 }
  0x12   :  { %116 = vmatprep.subr.bf16.mxu0 %v89_v33  ;;  %3612 = vmatpush3.bf16.msra.mxu1 %v4304_v46  ;;  %v4377_v33 = vld [vmem:[%s5318_s1] sm:$0x3]  ;;  %s4131_s1 = smov 32  }
  0x13   :  { %3613 = vmatprep.subr.bf16.mxu1 %v4127_v3  ;;  %3615 = vmatprep.mubr.msk.bf16.mxu1 %vm4129_vm0, %v4127_v3  ;;  %vm163_vm1 = vcmp.gt.s32.totalorder %v4377_v33, 0  ;;  %vm166_vm2 = vcmp.gt.s32.totalorder %v4377_v33, 7  ;;  %vm361_vm5 = vcmp.gt.s32.totalorder %v4377_v33, 1  ;;  %vm364_vm6 = vcmp.gt.s32.totalorder %v4377_v33, 6 }
  0x14   :  { %v3435_v35 = vsel %vm163_vm1, 1.0, %v4127_v3  ;;  %v3436_v59 = vsel %vm166_vm2, 1.0, %v4127_v3  ;;  %vm591_vm7 = vcmp.gt.s32.totalorder %v4377_v33, 5  ;;  %vm588_vm8 = vcmp.gt.s32.totalorder %v4377_v33, 2 }
  0x15   :  { %117 = vmatpush1.bf16.msra.mxu0 %v88_v41  ;;  %vm809_vm9 = vcmp.gt.s32.totalorder %v4377_v33, 4  ;;  %vm806_vm10 = vcmp.gt.s32.totalorder %v4377_v33, 3 }
  0x16   :  { %118 = vmatprep.subr.bf16.mxu0 %v91_v42  ;;  %3614 = vmatpush3.bf16.msra.mxu1 %v4324_v54 }
  0x17   :  { %3619 = vmatprep.subr.bf16.mxu1 %v4127_v3 }
  0x19   :  { %119 = vmatpush1.bf16.msra.mxu0 %v90_v50  ;;  %3616 = vmatmul.mubr.bf16.vlgmr.msra.gmra.mrb[4].mxu1 %v4128_v4  ;;  %v294_v50 = vsub.f32 1.0, %v3435_v35 }
  0x1a   :  { %120 = vmatprep.subr.bf16.mxu0 %v93_v51  ;;  %3620 = vmatpush3.bf16.msra.mxu1 %v4264_v29 }
  0x1b   :  { %3621 = vmatprep.subr.bf16.mxu1 %v4127_v3  ;;  %3623 = vmatprep.mubr.msk.bf16.mxu1 %vm4129_vm0, %v4127_v3 }
  0x1d   :  { %121 = vmatpush1.bf16.msra.mxu0 %v92_v57 }
  0x1e   :  { %122 = vmatprep.subr.bf16.mxu0 %v95_v58  ;;  %3622 = vmatpush3.bf16.msra.mxu1 %v4282_v37 }
  0x1f   :  { %3627 = vmatprep.subr.bf16.mxu1 %v4127_v3 }
  0x21   :  { %123 = vmatpush1.bf16.msra.mxu0 %v94_v61  ;;  %v339_v61 = vsub.f32 1.0, %v3436_v59 }
  0x22   :  { %3635 = vmatprep.subr.bf16.mxu0 %v4127_v3 }
  0x24   :  { %141 = vmatmul.mubr.bf16.vlgmr.msra.gmra.mrb[0].mxu0 %v79_v0 }
  0x25   :  { %3636 = vmatpush3.bf16.msra.mxu0 %v4264_v29  ;;  %3639 = vmatprep.mubr.msk.bf16.mxu0 %vm4129_vm0, %v4127_v3 }
  0x26   :  { %3637 = vmatprep.subr.bf16.mxu0 %v4127_v3 }
  0x29   :  { %3638 = vmatpush3.bf16.msra.mxu0 %v4282_v37 }
  0x2a   :  { %3651 = vmatprep.subr.bf16.mxu0 %v4127_v3 }
  0xe4   :  { %v211_v2 = vpop.f32.mrb[0].mxu1 }
  0xe5   :  { %v3609_v5 = vpop.f32.mrb[1].mxu1 }
  0xe6   :  { %v214_v6 = vpop.f32.mrb[2].mxu1 }
  0xe7   :  { %v3610_v7 = vpop.f32.mrb[3].mxu1 }
  0xec   :  { %v254_v10 = vpop.f32.mrb[4].mxu1 }
  0xed   :  { %v3617_v13 = vpop.f32.mrb[5].mxu1  ;;  %v261_v27 = vrot.slane %v254_v10, 2 }
  0xee   :  { %v257_v14 = vpop.f32.mrb[6].mxu1 }
  0xef   :  { %v3618_v15 = vpop.f32.mrb[7].mxu1 }
  0xf7   :  { %v142_v18 = vpop.f32.mrb[0].mxu0 }
  0xf8   :  { %v143_v19 = vadd.f32 %v142_v18, %v101_v16  ;;  %v144_v20 = vpop.f32.mrb[1].mxu0 }
  0xf9   :  { %v145_v21 = vadd.f32 %v144_v20, %v105_v17  ;;  %v146_v22 = vpop.f32.mrb[2].mxu0 }
  0xfa   :  { %151 = vst [vmem:[#allocation2] sm:$0xff] %v143_v19  ;;  %v147_v23 = vadd.f32 %v146_v22, %v101_v16  ;;  %v148_v24 = vpop.f32.mrb[3].mxu0 }
  0xfb   :  { %152 = vst [vmem:[#allocation2 + $0x8] sm:$0xff] %v145_v21  ;;  %v149_v25 = vadd.f32 %v148_v24, %v105_v17 }
  0xfc   :  { %153 = vst [vmem:[#allocation2 + $0x10] sm:$0xff] %v147_v23 }
  0xfd   :  { %154 = vst [vmem:[#allocation2 + $0x18] sm:$0xff] %v149_v25 }
 0x101   :  { %v169_v26 = vld [vmem:[#allocation2] sm:$0x3] }
 0x102   :  { %v217_v28 = vadd.f32 %v211_v2, %v169_v26  ;;  %v367_v26 = vld [vmem:[#allocation2] sm:$0xc] }
 0x104   :  { %3871 = vtanh.f32 %v217_v28  ;;  %v170_v30 = vld [vmem:[#allocation2 + $0x18] sm:$0xc0]  ;;  %v3437_v36 = vmul.f32 -1.442695, %v217_v28 }
 0x105   :  { %v263_v31 = vadd.f32 %v261_v27, %v170_v30 }
 0x107   :  { %3873 = vtanh.f32 %v263_v31  ;;  %v3438_v38 = vmul.f32 -1.442695, %v263_v31 }
 0x108   :  { %3875 = vpow2.f32 %v3437_v36 }
 0x109   :  { %3877 = vpow2.f32 %v3438_v38 }
 0x10e   :  { %v3872_v32 = vpop.eup %3871 }
 0x10f   :  { %273 = vrot.lane.b32.xlu0 %v3872_v32, %s4130_s13 }
 0x111   :  { %v3874_v34 = vpop.eup %3873 }
 0x112   :  { %v3876_v39 = vpop.eup %3875 }
 0x113   :  { %313 = vrot.lane.b32.xlu0 %v3874_v34, %s4130_s13  ;;  %v267_v40 = vadd.f32 1.0, %v3876_v39  ;;  %v3878_v41 = vpop.eup %3877 }
 0x114   :  { %v307_v42 = vadd.f32 1.0, %v3878_v41 }
 0x115   :  { %3879 = vrcp.f32 %v267_v40 }
 0x116   :  { %3881 = vrcp.f32 %v307_v42 }
 0x117   :  { %290 = vperm.xlu0 %3869, %v3435_v35   ;;  %v368_v35 = vld [vmem:[#allocation2 + $0x18] sm:$0x30] }
 0x11f   :  { %v3880_v43 = vpop.eup %3879 }
 0x120   :  { %v3882_v47 = vpop.eup %3881  ;;  %v271_v51 = vmul.f32 0.0, %v3880_v43 }
 0x121   :  { %v311_v55 = vmul.f32 0.0, %v3882_v47 }
 0x181   :  { %v274_v44 = vpop.permute.xlu0 %273 }
 0x182   :  { %v276_v45 = vmul.f32 %v3880_v43, %v274_v44 }
 0x184   :  { %278 = vrot.lane.b32.xlu1 %v276_v45, %s4131_s1 }
 0x185   :  { %v314_v48 = vpop.permute.xlu0 %313 }
 0x186   :  { %v316_v49 = vmul.f32 %v3882_v47, %v314_v48 }
 0x188   :  { %318 = vrot.lane.b32.xlu1 %v316_v49, %s4131_s1 }
 0x18c   :  { %297 = vperm.xlu1 %3870, %v294_v50  }
 0x196   :  { %v4394_v63 = vpop.permute.xlu0 %290 }
 0x1f6   :  { %v279_v52 = vpop.permute.xlu1 %278 }
 0x1f7   :  { %v4385_v53 = vadd.f32 %v279_v52, %v271_v51 }
 0x1f9   :  { %3883 = vtanh.f32 %v4385_v53 }
 0x1fa   :  { %v319_v56 = vpop.permute.xlu1 %318 }
 0x1fb   :  { %v321_v57 = vadd.f32 %v319_v56, %v311_v55 }
 0x1fd   :  { %3885 = vtanh.f32 %v321_v57  ;;  %v348_v14 = vrot.slane %v321_v57, 6  ;;  %v3439_v57 = vsel %vm361_vm5, 1.0, %v4127_v3 }
 0x203   :  { %v3884_v58 = vpop.eup %3883 }
 0x204   :  { %284 = vrot.lane.b32.xlu1 %v3884_v58, %s4130_s13 }
 0x207   :  { %v3886_v60 = vpop.eup %3885 }
 0x208   :  { %324 = vrot.lane.b32.xlu0 %v3886_v60, %s4130_s13  ;;  %330 = vperm.xlu1 %3870, %v3436_v59   ;;  %v506_v59 = vsub.f32 1.0, %v3439_v57 }
 0x20b   :  { %v4392_v62 = vpop.permute.xlu1 %297 }
 0x20c   :  { %342 = vperm.xlu0 %3869, %v339_v61   ;;  %v4397_v2 = vmul.f32 0.0, %v4392_v62 }
 0x276   :  { %v285_v0 = vpop.permute.xlu1 %284 }
 0x277   :  { %v287_v1 = vmul.f32 %v3880_v43, %v285_v0  ;;  %v3440_v0 = vsel %vm364_vm6, 1.0, %v4127_v3 }
 0x279   :  { %v293_v5 = vmul.f32 %v4394_v63, %v287_v1 }
 0x27a   :  { %v325_v6 = vpop.permute.xlu0 %324 }
 0x27b   :  { %v4401_v7 = vadd.f32 %v4397_v2, %v293_v5  ;;  %v327_v10 = vmul.f32 %v3882_v47, %v325_v6  ;;  %v302_v5 = vmul.f32 %v4394_v63, %v4385_v53 }
 0x27d   :  { %v334_v11 = vrot.slane %v327_v10, 6  ;;  %v369_v13 = vpack.c.bf16 %v4401_v7, %v4401_v7  ;;  %v4454_v6 = vadd.f32 %v302_v5, %v4397_v2  ;;  %v594_v5 = vld [vmem:[#allocation2] sm:$0x30] }
 0x27f   :  { %335 = vrot.lane.b32.xlu0 %v334_v11, %s4131_s1  ;;  %371 = vrot.lane.b32.xlu1 %v369_v13, %s4131_s1  ;;  %v476_v13 = vrot.slane %v4454_v6, 6 }
 0x283   :  { %349 = vrot.lane.b32.xlu1 %v348_v14, %s4132_s14 }
 0x287   :  { %v4408_v15 = vpop.permute.xlu1 %330 }
 0x28b   :  { %v4410_v16 = vpop.permute.xlu0 %342 }
 0x28c   :  { %v4413_v19 = vmul.f32 0.0, %v4410_v16 }
 0x2f1   :  { %v336_v17 = vpop.permute.xlu0 %335  ;;  %v372_v18 = vpop.permute.xlu1 %371 }
 0x2f2   :  { %v338_v20 = vmul.f32 %v336_v17, %v4408_v15  ;;  %3624 = vmatmul.mubr.msk.bf16.vlgmr.msra.gmra.mrb[8].mxu1 %vm173_vm3, %v372_v18 }
 0x2f3   :  { %3628 = vmatpush3.bf16.msra.mxu1 %v4304_v46  ;;  %3631 = vmatprep.mubr.msk.bf16.mxu1 %vm4129_vm0, %v4127_v3 }
 0x2f4   :  { %v4421_v21 = vadd.f32 %v4413_v19, %v338_v20  ;;  %3629 = vmatprep.subr.bf16.mxu1 %v4127_v3 }
 0x2f5   :  { %v350_v41 = vpop.permute.xlu1 %349 }
 0x2f6   :  { %360 = vst.msk [vmem:[#allocation4 + $0xe] sm:$0x3] %vm358_vm4, %v4421_v21  ;;  %v420_v22 = vpack.c.bf16 %v4421_v21, %v4421_v21  ;;  %v352_v42 = vmul.f32 %v350_v41, %v4408_v15 }
 0x2f7   :  { %3630 = vmatpush3.bf16.msra.mxu1 %v4324_v54 }
 0x2f8   :  { %3643 = vmatprep.subr.bf16.mxu1 %v4127_v3  ;;  %v4440_v43 = vadd.f32 %v352_v42, %v4413_v19 }
 0x2fa   :  { %3632 = vmatmul.mubr.msk.bf16.vlgmr.msra.gmra.mrb[12].mxu1 %vm173_vm3, %v420_v22  ;;  %v538_v45 = vrot.slane %v4440_v43, 4 }
 0x2fb   :  { %3644 = vmatpush3.bf16.msra.mxu1 %v4304_v46  ;;  %3647 = vmatprep.mubr.msk.bf16.mxu1 %vm4129_vm0, %v4127_v3 }
 0x2fc   :  { %3645 = vmatprep.subr.bf16.mxu1 %v4127_v3 }
 0x2ff   :  { %3646 = vmatpush3.bf16.msra.mxu1 %v4324_v54 }
 0x300   :  { %3659 = vmatprep.subr.bf16.mxu1 %v4127_v3 }
 0x3c5   :  { %v410_v23 = vpop.f32.mrb[8].mxu1 }
 0x3c6   :  { %v417_v24 = vrot.slane %v410_v23, 6  ;;  %v3625_v25 = vpop.f32.mrb[9].mxu1 }
 0x3c7   :  { %v413_v27 = vpop.f32.mrb[10].mxu1  ;;  %v570_v25 = vsub.f32 1.0, %v3440_v0 }
 0x3c8   :  { %v419_v28 = vadd.f32 %v417_v24, %v367_v26  ;;  %v3626_v30 = vpop.f32.mrb[11].mxu1 }
 0x3ca   :  { %3887 = vtanh.f32 %v419_v28  ;;  %v3443_v47 = vmul.f32 -1.442695, %v419_v28 }
 0x3cd   :  { %v458_v31 = vpop.f32.mrb[12].mxu1 }
 0x3ce   :  { %v465_v32 = vrot.slane %v458_v31, 4  ;;  %v3633_v34 = vpop.f32.mrb[13].mxu1 }
 0x3cf   :  { %v461_v36 = vpop.f32.mrb[14].mxu1 }
 0x3d0   :  { %v467_v38 = vadd.f32 %v465_v32, %v368_v35  ;;  %v3634_v39 = vpop.f32.mrb[15].mxu1 }
 0x3d2   :  { %3889 = vtanh.f32 %v467_v38  ;;  %v3444_v48 = vmul.f32 -1.442695, %v467_v38 }
 0x3d3   :  { %3891 = vpow2.f32 %v3443_v47 }
 0x3d4   :  { %v3888_v40 = vpop.eup %3887  ;;  %3893 = vpow2.f32 %v3444_v48 }
 0x3d5   :  { %480 = vrot.lane.b32.xlu1 %v3888_v40, %s4130_s13 }
 0x3dc   :  { %v3890_v44 = vpop.eup %3889 }
 0x3dd   :  { %544 = vrot.lane.b32.xlu0 %v3890_v44, %s4130_s13  ;;  %v3892_v49 = vpop.eup %3891 }
 0x3de   :  { %v471_v50 = vadd.f32 1.0, %v3892_v49  ;;  %v3894_v51 = vpop.eup %3893 }
 0x3df   :  { %v533_v52 = vadd.f32 1.0, %v3894_v51 }
 0x3e0   :  { %3895 = vrcp.f32 %v471_v50 }
 0x3e1   :  { %539 = vrot.lane.b32.xlu0 %v538_v45, %s4131_s1  ;;  %3897 = vrcp.f32 %v533_v52 }
 0x3ea   :  { %v3896_v55 = vpop.eup %3895 }
 0x3eb   :  { %v3898_v60 = vpop.eup %3897  ;;  %v478_v18 = vmul.f32 %v3896_v55, %v476_v13 }
 0x447   :  { %v481_v56 = vpop.permute.xlu1 %480 }
 0x448   :  { %v483_v58 = vmul.f32 %v3896_v55, %v481_v56 }
 0x44a   :  { %485 = vrot.lane.b32.xlu0 %v483_v58, %s4131_s1 }
 0x44e   :  { %509 = vperm.xlu0 %3869, %v506_v59  }
 0x44f   :  { %v545_v61 = vpop.permute.xlu0 %544 }
 0x450   :  { %v547_v1 = vmul.f32 %v3898_v60, %v545_v61 }
 0x452   :  { %549 = vrot.lane.b32.xlu1 %v547_v1, %s4131_s1  ;;  %561 = vperm.xlu0 %3869, %v3440_v0  }
 0x453   :  { %v540_v10 = vpop.permute.xlu0 %539 }
 0x454   :  { %v542_v11 = vmul.f32 %v3898_v60, %v540_v10 }
 0x4bc   :  { %v486_v14 = vpop.permute.xlu0 %485 }
 0x4bd   :  { %v488_v22 = vadd.f32 %v486_v14, %v478_v18 }
 0x4bf   :  { %v519_v36 = vrot.slane %v488_v22, 2 }
 0x4c4   :  { %v550_v17 = vpop.permute.xlu1 %549 }
 0x4c5   :  { %v552_v20 = vadd.f32 %v550_v17, %v542_v11 }
 0x4c7   :  { %3899 = vtanh.f32 %v552_v20  ;;  %v579_v35 = vrot.slane %v552_v20, 4 }
 0x4c8   :  { %3901 = vtanh.f32 %v488_v22 }
 0x4cd   :  { %v4459_v53 = vpop.permute.xlu0 %509 }
 0x4ce   :  { %v512_v26 = vmul.f32 %v4459_v53, %v4401_v7 }
 0x4d1   :  { %v3900_v23 = vpop.eup %3899  ;;  %v4470_v39 = vpop.permute.xlu0 %561 }
 0x4d2   :  { %555 = vrot.lane.b32.xlu1 %v3900_v23, %s4130_s13  ;;  %v3902_v24 = vpop.eup %3901  ;;  %v524_v23 = vmul.f32 %v4459_v53, %v4454_v6 }
 0x4d6   :  { %491 = vrot.lane.b32.xlu1 %v3902_v24, %s4130_s13 }
 0x4da   :  { %573 = vperm.xlu1 %3870, %v570_v25  }
 0x4de   :  { %497 = vperm.xlu1 %3870, %v3439_v57   ;;  %v595_v57 = vld [vmem:[#allocation2 + $0x18] sm:$0xc] }
 0x4e2   :  { %514 = vrot.lane.b32.xlu1 %v512_v26, %s4131_s1 }
 0x544   :  { %v556_v27 = vpop.permute.xlu1 %555 }
 0x545   :  { %v558_v28 = vmul.f32 %v3898_v60, %v556_v27 }
 0x547   :  { %v565_v30 = vrot.slane %v558_v28, 4 }
 0x548   :  { %v492_v31 = vpop.permute.xlu1 %491 }
 0x549   :  { %v494_v32 = vmul.f32 %v3896_v55, %v492_v31  ;;  %566 = vrot.lane.b32.xlu0 %v565_v30, %s4131_s1 }
 0x54b   :  { %v501_v34 = vrot.slane %v494_v32, 2 }
 0x54d   :  { %502 = vrot.lane.b32.xlu0 %v501_v34, %s4131_s1 }
 0x551   :  { %580 = vrot.lane.b32.xlu0 %v579_v35, %s4132_s14 }
 0x555   :  { %520 = vrot.lane.b32.xlu0 %v519_v36, %s4132_s14 }
 0x559   :  { %v4468_v38 = vpop.permute.xlu1 %573 }
 0x55a   :  { %v576_v44 = vmul.f32 %v4468_v38, %v4421_v21  ;;  %v584_v20 = vmul.f32 %v4468_v38, %v4440_v43 }
 0x55d   :  { %v4472_v40 = vpop.permute.xlu1 %497 }
 0x561   :  { %v515_v50 = vpop.permute.xlu1 %514 }
 0x5bb   :  { %v567_v41 = vpop.permute.xlu0 %566 }
 0x5bc   :  { %v569_v42 = vmul.f32 %v567_v41, %v4470_v39 }
 0x5be   :  { %v4477_v45 = vadd.f32 %v576_v44, %v569_v42 }
 0x5bf   :  { %v503_v47 = vpop.permute.xlu0 %502 }
 0x5c0   :  { %587 = vst.msk [vmem:[#allocation4 + $0xc] sm:$0x3] %vm358_vm4, %v4477_v45  ;;  %v644_v48 = vpack.c.bf16 %v4477_v45, %v4477_v45  ;;  %v505_v49 = vmul.f32 %v503_v47, %v4472_v40 }
 0x5c2   :  { %v4484_v51 = vadd.f32 %v515_v50, %v505_v49  ;;  %3648 = vmatmul.mubr.msk.bf16.vlgmr.msra.gmra.mrb[16].mxu1 %vm173_vm3, %v644_v48 }
 0x5c3   :  { %3660 = vmatpush3.bf16.msra.mxu1 %v4304_v46  ;;  %3663 = vmatprep.mubr.msk.bf16.mxu1 %vm4129_vm0, %v4127_v3  ;;  %v581_v14 = vpop.permute.xlu0 %580 }
 0x5c4   :  { %586 = vst.msk [vmem:[#allocation3 + $0x2] sm:$0x3] %vm358_vm4, %v4484_v51  ;;  %v596_v21 = vpack.c.bf16 %v4484_v51, %v4484_v51  ;;  %3661 = vmatprep.subr.bf16.mxu1 %v4127_v3  ;;  %v583_v17 = vmul.f32 %v581_v14, %v4470_v39 }
 0x5c6   :  { %3640 = vmatmul.mubr.msk.bf16.vlgmr.msra.gmra.mrb[4].mxu0 %vm173_vm3, %v596_v21  ;;  %v4508_v22 = vadd.f32 %v584_v20, %v583_v17 }
 0x5c7   :  { %3662 = vmatpush3.bf16.msra.mxu1 %v4324_v54  ;;  %3652 = vmatpush3.bf16.msra.mxu0 %v4264_v29  ;;  %v521_v32 = vpop.permute.xlu0 %520 }
 0x5c8   :  { %3653 = vmatprep.subr.bf16.mxu0 %v4127_v3  ;;  %3655 = vmatprep.mubr.msk.bf16.mxu0 %vm4129_vm0, %v4127_v3  ;;  %v756_v25 = vrot.slane %v4508_v22, 6  ;;  %v523_v36 = vmul.f32 %v521_v32, %v4472_v40 }
 0x5c9   :  { %3675 = vmatprep.subr.bf16.mxu1 %v4127_v3 }
 0x5cb   :  { %3654 = vmatpush3.bf16.msra.mxu0 %v4282_v37 }
 0x5cc   :  { %3667 = vmatprep.subr.bf16.mxu0 %v4127_v3 }
 0x695   :  { %v682_v52 = vpop.f32.mrb[16].mxu1 }
 0x696   :  { %v689_v55 = vrot.slane %v682_v52, 6  ;;  %v3649_v56 = vpop.f32.mrb[17].mxu1 }
 0x697   :  { %v685_v58 = vpop.f32.mrb[18].mxu1 }
 0x698   :  { %v691_v59 = vadd.f32 %v689_v55, %v595_v57  ;;  %v3650_v60 = vpop.f32.mrb[19].mxu1 }
 0x699   :  { %v634_v61 = vpop.f32.mrb[4].mxu0 }
 0x69a   :  { %3903 = vtanh.f32 %v691_v59  ;;  %v641_v0 = vrot.slane %v634_v61, 4  ;;  %v3641_v1 = vpop.f32.mrb[5].mxu0  ;;  %v3450_v26 = vmul.f32 -1.442695, %v691_v59  ;;  %v3446_v61 = vsel %vm591_vm7, 1.0, %v4127_v3 }
 0x69b   :  { %v637_v10 = vpop.f32.mrb[6].mxu0  ;;  %v788_v1 = vsub.f32 1.0, %v3446_v61 }
 0x69c   :  { %v643_v11 = vadd.f32 %v641_v0, %v594_v5  ;;  %v3642_v13 = vpop.f32.mrb[7].mxu0  ;;  %v3445_v5 = vsel %vm588_vm8, 1.0, %v4127_v3 }
 0x69d   :  { %v732_v14 = vsub.f32 1.0, %v3445_v5 }
 0x69e   :  { %3905 = vtanh.f32 %v643_v11  ;;  %v3449_v27 = vmul.f32 -1.442695, %v643_v11 }
 0x69f   :  { %3907 = vpow2.f32 %v3450_v26 }
 0x6a0   :  { %3909 = vpow2.f32 %v3449_v27 }
 0x6a4   :  { %v3904_v18 = vpop.eup %3903 }
 0x6a5   :  { %762 = vrot.lane.b32.xlu1 %v3904_v18, %s4130_s13 }
 0x6a8   :  { %v3906_v24 = vpop.eup %3905 }
 0x6a9   :  { %526 = vrot.lane.b32.xlu1 %v524_v23, %s4132_s14  ;;  %706 = vrot.lane.b32.xlu0 %v3906_v24, %s4130_s13  ;;  %v3908_v43 = vpop.eup %3907 }
 0x6aa   :  { %v751_v28 = vadd.f32 1.0, %v3908_v43  ;;  %v3910_v30 = vpop.eup %3909 }
 0x6ab   :  { %v695_v31 = vadd.f32 1.0, %v3910_v30 }
 0x6ac   :  { %3911 = vrcp.f32 %v751_v28 }
 0x6ad   :  { %757 = vrot.lane.b32.xlu1 %v756_v25, %s4131_s1  ;;  %3913 = vrcp.f32 %v695_v31 }
 0x6b6   :  { %v3912_v6 = vpop.eup %3911 }
 0x6b7   :  { %v3914_v41 = vpop.eup %3913 }
 0x717   :  { %v763_v34 = vpop.permute.xlu1 %762 }
 0x718   :  { %v765_v35 = vmul.f32 %v3912_v6, %v763_v34 }
 0x71a   :  { %767 = vrot.lane.b32.xlu0 %v765_v35, %s4131_s1 }
 0x71b   :  { %v707_v42 = vpop.permute.xlu0 %706  ;;  %v527_v44 = vpop.permute.xlu1 %526 }
 0x71c   :  { %v709_v47 = vmul.f32 %v3914_v41, %v707_v42  ;;  %v4518_v48 = vadd.f32 %v527_v44, %v523_v36 }
 0x71e   :  { %v700_v49 = vrot.slane %v4518_v48, 4  ;;  %711 = vrot.lane.b32.xlu0 %v709_v47, %s4131_s1 }
 0x71f   :  { %v758_v50 = vpop.permute.xlu1 %757 }
 0x720   :  { %701 = vrot.lane.b32.xlu1 %v700_v49, %s4131_s1  ;;  %v760_v21 = vmul.f32 %v3912_v6, %v758_v50 }
 0x78c   :  { %v768_v52 = vpop.permute.xlu0 %767 }
 0x78d   :  { %v770_v55 = vadd.f32 %v768_v52, %v760_v21 }
 0x78f   :  { %3915 = vtanh.f32 %v770_v55  ;;  %v797_v20 = vrot.slane %v770_v55, 2  ;;  %v813_v55 = vld [vmem:[#allocation2 + $0x18] sm:$0x3] }
 0x790   :  { %v712_v58 = vpop.permute.xlu0 %711 }
 0x792   :  { %v702_v56 = vpop.permute.xlu1 %701 }
 0x793   :  { %v704_v57 = vmul.f32 %v3914_v41, %v702_v56 }
 0x795   :  { %v714_v59 = vadd.f32 %v712_v58, %v704_v57 }
 0x797   :  { %3917 = vtanh.f32 %v714_v59  ;;  %v741_v24 = vrot.slane %v714_v59, 4 }
 0x799   :  { %v3916_v60 = vpop.eup %3915 }
 0x79a   :  { %773 = vrot.lane.b32.xlu1 %v3916_v60, %s4130_s13 }
 0x79e   :  { %779 = vperm.xlu1 %3870, %v3446_v61  }
 0x7a1   :  { %v3918_v0 = vpop.eup %3917 }
 0x7a2   :  { %717 = vrot.lane.b32.xlu0 %v3918_v0, %s4130_s13 }
 0x7a6   :  { %791 = vperm.xlu0 %3869, %v788_v1  }
 0x7aa   :  { %723 = vperm.xlu0 %3869, %v3445_v5   ;;  %v812_v5 = vld [vmem:[#allocation2] sm:$0xc0] }
 0x80c   :  { %v774_v10 = vpop.permute.xlu1 %773 }
 0x80d   :  { %v776_v11 = vmul.f32 %v3912_v6, %v774_v10 }
 0x80f   :  { %v783_v13 = vrot.slane %v776_v11, 2 }
 0x811   :  { %784 = vrot.lane.b32.xlu1 %v783_v13, %s4131_s1 }
 0x814   :  { %v718_v17 = vpop.permute.xlu0 %717 }
 0x815   :  { %v720_v18 = vmul.f32 %v3914_v41, %v718_v17  ;;  %735 = vperm.xlu1 %3870, %v732_v14  }
 0x817   :  { %v727_v23 = vrot.slane %v720_v18, 4 }
 0x819   :  { %728 = vrot.lane.b32.xlu0 %v727_v23, %s4131_s1  ;;  %798 = vrot.lane.b32.xlu1 %v797_v20, %s4132_s14 }
 0x81d   :  { %742 = vrot.lane.b32.xlu1 %v741_v24, %s4132_s14  ;;  %v4533_v25 = vpop.permute.xlu1 %779 }
 0x825   :  { %v4535_v26 = vpop.permute.xlu0 %791 }
 0x826   :  { %v794_v43 = vmul.f32 %v4535_v26, %v4477_v45  ;;  %v802_v42 = vmul.f32 %v4535_v26, %v4508_v22 }
 0x829   :  { %v4551_v45 = vpop.permute.xlu0 %723 }
 0x883   :  { %v785_v27 = vpop.permute.xlu1 %784 }
 0x884   :  { %v787_v28 = vmul.f32 %v785_v27, %v4533_v25 }
 0x886   :  { %v4540_v30 = vadd.f32 %v794_v43, %v787_v28  ;;  %v3452_v43 = vsel %vm809_vm9, 1.0, %v4127_v3 }
 0x888   :  { %805 = vst.msk [vmem:[#allocation4 + $0xa] sm:$0x3] %vm358_vm4, %v4540_v30  ;;  %v862_v31 = vpack.c.bf16 %v4540_v30, %v4540_v30 }
 0x88a   :  { %3664 = vmatmul.mubr.msk.bf16.vlgmr.msra.gmra.mrb[20].mxu1 %vm173_vm3, %v862_v31 }
 0x88b   :  { %3676 = vmatpush3.bf16.msra.mxu1 %v4304_v46  ;;  %3679 = vmatprep.mubr.msk.bf16.mxu1 %vm4129_vm0, %v4127_v3  ;;  %v729_v6 = vpop.permute.xlu0 %728 }
 0x88c   :  { %3677 = vmatprep.subr.bf16.mxu1 %v4127_v3  ;;  %v731_v34 = vmul.f32 %v729_v6, %v4551_v45  ;;  %v997_v6 = vsub.f32 1.0, %v3452_v43 }
 0x88f   :  { %3678 = vmatpush3.bf16.msra.mxu1 %v4324_v54 }
 0x890   :  { %3691 = vmatprep.subr.bf16.mxu1 %v4127_v3 }
 0x894   :  { %v4555_v32 = vpop.permute.xlu1 %735 }
 0x895   :  { %v738_v35 = vmul.f32 %v4555_v32, %v4484_v51  ;;  %v746_v51 = vmul.f32 %v4555_v32, %v4518_v48 }
 0x897   :  { %v4560_v36 = vadd.f32 %v738_v35, %v731_v34 }
 0x898   :  { %v799_v41 = vpop.permute.xlu1 %798 }
 0x899   :  { %v801_v44 = vmul.f32 %v799_v41, %v4533_v25  ;;  %804 = vst.msk [vmem:[#allocation3 + $0x4] sm:$0x3] %vm358_vm4, %v4560_v36  ;;  %v814_v47 = vpack.c.bf16 %v4560_v36, %v4560_v36 }
 0x89b   :  { %v4569_v49 = vadd.f32 %v802_v42, %v801_v44  ;;  %3656 = vmatmul.mubr.msk.bf16.vlgmr.msra.gmra.mrb[8].mxu0 %vm173_vm3, %v814_v47 }
 0x89c   :  { %v743_v50 = vpop.permute.xlu1 %742  ;;  %3668 = vmatpush3.bf16.msra.mxu0 %v4264_v29  ;;  %3671 = vmatprep.mubr.msk.bf16.mxu0 %vm4129_vm0, %v4127_v3 }
 0x89d   :  { %v745_v22 = vmul.f32 %v743_v50, %v4551_v45  ;;  %971 = vrot.lane.b32.xlu1 %v4569_v49, %s4131_s1  ;;  %3669 = vmatprep.subr.bf16.mxu0 %v4127_v3 }
 0x89f   :  { %v4581_v21 = vadd.f32 %v746_v51, %v745_v22 }
 0x8a0   :  { %3670 = vmatpush3.bf16.msra.mxu0 %v4282_v37 }
 0x8a1   :  { %v915_v52 = vrot.slane %v4581_v21, 2  ;;  %3683 = vmatprep.subr.bf16.mxu0 %v4127_v3 }
 0x8a3   :  { %916 = vrot.lane.b32.xlu1 %v915_v52, %s4131_s1 }
 0x90f   :  { %v972_v44 = vpop.permute.xlu1 %971 }
 0x915   :  { %v917_v52 = vpop.permute.xlu1 %916 }
 0x95d   :  { %v900_v56 = vpop.f32.mrb[20].mxu1 }
 0x95e   :  { %v906_v48 = vadd.f32 %v900_v56, %v813_v55  ;;  %v3665_v57 = vpop.f32.mrb[21].mxu1 }
 0x95f   :  { %v903_v58 = vpop.f32.mrb[22].mxu1 }
 0x960   :  { %3919 = vtanh.f32 %v906_v48  ;;  %v3666_v59 = vpop.f32.mrb[23].mxu1  ;;  %v3456_v17 = vmul.f32 -1.442695, %v906_v48 }
 0x961   :  { %v3451_v59 = vsel %vm806_vm10, 1.0, %v4127_v3 }
 0x96a   :  { %v3920_v60 = vpop.eup %3919 }
 0x96b   :  { %976 = vrot.lane.b32.xlu0 %v3920_v60, %s4130_s13 }
 0x96e   :  { %v852_v61 = vpop.f32.mrb[8].mxu0 }
 0x96f   :  { %v859_v0 = vrot.slane %v852_v61, 2  ;;  %v3657_v1 = vpop.f32.mrb[9].mxu0  ;;  %v947_v61 = vsub.f32 1.0, %v3451_v59 }
 0x970   :  { %v855_v10 = vpop.f32.mrb[10].mxu0 }
 0x971   :  { %v861_v11 = vadd.f32 %v859_v0, %v812_v5  ;;  %v3658_v13 = vpop.f32.mrb[11].mxu0 }
 0x973   :  { %3921 = vtanh.f32 %v861_v11  ;;  %v3455_v23 = vmul.f32 -1.442695, %v861_v11 }
 0x974   :  { %3923 = vpow2.f32 %v3456_v17 }
 0x97d   :  { %v3922_v14 = vpop.eup %3921 }
 0x97e   :  { %921 = vrot.lane.b32.xlu0 %v3922_v14, %s4130_s13  ;;  %v3924_v18 = vpop.eup %3923 }
 0x97f   :  { %v966_v20 = vadd.f32 1.0, %v3924_v18 }
 0x981   :  { %3925 = vrcp.f32 %v966_v20 }
 0x982   :  { %3927 = vpow2.f32 %v3455_v23 }
 0x98b   :  { %v3926_v24 = vpop.eup %3925 }
 0x98c   :  { %v3928_v31 = vpop.eup %3927  ;;  %v974_v47 = vmul.f32 %v3926_v24, %v972_v44 }
 0x98d   :  { %v910_v34 = vadd.f32 1.0, %v3928_v31 }
 0x98f   :  { %3929 = vrcp.f32 %v910_v34 }
 0x999   :  { %v3930_v35 = vpop.eup %3929 }
 0x99a   :  { %v919_v56 = vmul.f32 %v3930_v35, %v917_v52 }
 0x9dd   :  { %v977_v27 = vpop.permute.xlu0 %976 }
 0x9de   :  { %v979_v28 = vmul.f32 %v3926_v24, %v977_v27 }
 0x9e0   :  { %981 = vrot.lane.b32.xlu0 %v979_v28, %s4131_s1 }
 0x9e4   :  { %1000 = vperm.xlu0 %3869, %v997_v6  }
 0x9e8   :  { %993 = vperm.xlu0 %3869, %v3452_v43  }
 0x9f0   :  { %v922_v41 = vpop.permute.xlu0 %921 }
 0x9f1   :  { %v924_v42 = vmul.f32 %v3930_v35, %v922_v41 }
 0x9f3   :  { %926 = vrot.lane.b32.xlu1 %v924_v42, %s4131_s1 }
 0xa52   :  { %v982_v50 = vpop.permute.xlu0 %981 }
 0xa53   :  { %v4593_v51 = vadd.f32 %v982_v50, %v974_v47  ;;  %v1023_v47 = vld [vmem:[#allocation2 + $0x8] sm:$0xc0] }
 0xa55   :  { %3931 = vtanh.f32 %v4593_v51 }
 0xa5f   :  { %v3932_v22 = vpop.eup %3931 }
 0xa60   :  { %987 = vrot.lane.b32.xlu1 %v3932_v22, %s4130_s13 }
 0xa63   :  { %v4597_v55 = vpop.permute.xlu0 %1000 }
 0xa64   :  { %v1003_v48 = vmul.f32 %v4597_v55, %v4540_v30  ;;  %v1010_v20 = vmul.f32 %v4597_v55, %v4569_v49 }
 0xa65   :  { %v927_v57 = vpop.permute.xlu1 %926 }
 0xa66   :  { %v929_v58 = vadd.f32 %v927_v57, %v919_v56  ;;  %1005 = vrot.lane.b32.xlu0 %v1003_v48, %s4132_s14  ;;  %v1022_v48 = vld [vmem:[#allocation2 + $0x10] sm:$0x3] }
 0xa67   :  { %v4605_v5 = vpop.permute.xlu0 %993 }
 0xa68   :  { %3933 = vtanh.f32 %v929_v58  ;;  %v956_v18 = vrot.slane %v929_v58, 6 }
 0xa6a   :  { %938 = vperm.xlu0 %3869, %v3451_v59  }
 0xa72   :  { %v3934_v60 = vpop.eup %3933 }
 0xa73   :  { %932 = vrot.lane.b32.xlu1 %v3934_v60, %s4130_s13 }
 0xa77   :  { %950 = vperm.xlu1 %3870, %v947_v61  }
 0xad2   :  { %v988_v0 = vpop.permute.xlu1 %987 }
 0xad3   :  { %v990_v1 = vmul.f32 %v3926_v24, %v988_v0 }
 0xad5   :  { %v996_v30 = vmul.f32 %v4605_v5, %v990_v1 }
 0xad8   :  { %v1006_v33 = vpop.permute.xlu0 %1005 }
 0xad9   :  { %v4608_v10 = vadd.f32 %v1006_v33, %v996_v30 }
 0xadb   :  { %v1069_v11 = vpack.c.bf16 %v4608_v10, %v4608_v10 }
 0xadd   :  { %1071 = vrot.lane.b32.xlu0 %v1069_v11, %s4131_s1 }
 0xae5   :  { %v933_v13 = vpop.permute.xlu1 %932 }
 0xae6   :  { %v935_v14 = vmul.f32 %v3930_v35, %v933_v13 }
 0xae8   :  { %v942_v17 = vrot.slane %v935_v14, 6 }
 0xae9   :  { %v4618_v23 = vpop.permute.xlu0 %938 }
 0xaea   :  { %943 = vrot.lane.b32.xlu1 %v942_v17, %s4131_s1 }
 0xaee   :  { %957 = vrot.lane.b32.xlu1 %v956_v18, %s4132_s14 }
 0xaf2   :  { %1012 = vrot.lane.b32.xlu1 %v1010_v20, %s4131_s1 }
 0xaf6   :  { %v4627_v27 = vpop.permute.xlu1 %950 }
 0xaf7   :  { %v953_v43 = vmul.f32 %v4627_v27, %v4560_v36  ;;  %v961_v35 = vmul.f32 %v4627_v27, %v4581_v21 }
 0xb4f   :  { %v1072_v24 = vpop.permute.xlu0 %1071 }
 0xb50   :  { %3680 = vmatmul.mubr.msk.bf16.vlgmr.msra.gmra.mrb[24].mxu1 %vm173_vm3, %v1072_v24 }
 0xb51   :  { %3692 = vmatpush3.bf16.msra.mxu1 %v4304_v46  ;;  %3695 = vmatprep.mubr.msk.bf16.mxu1 %vm4129_vm0, %v4127_v3 }
 0xb52   :  { %3693 = vmatprep.subr.bf16.mxu1 %v4127_v3 }
 0xb55   :  { %3694 = vmatpush3.bf16.msra.mxu1 %v4324_v54 }
 0xb56   :  { %3707 = vmatprep.subr.bf16.mxu1 %v4127_v3 }
 0xb5c   :  { %v944_v49 = vpop.permute.xlu1 %943 }
 0xb5d   :  { %v946_v28 = vmul.f32 %v944_v49, %v4618_v23 }
 0xb5f   :  { %v4632_v31 = vadd.f32 %v953_v43, %v946_v28 }
 0xb60   :  { %v958_v6 = vpop.permute.xlu1 %957 }
 0xb61   :  { %1016 = vst.msk [vmem:[#allocation3 + $0x6] sm:$0x3] %vm358_vm4, %v4632_v31  ;;  %v1024_v34 = vpack.c.bf16 %v4632_v31, %v4632_v31  ;;  %v960_v41 = vmul.f32 %v958_v6, %v4618_v23  ;;  %v1009_v6 = vmul.f32 %v4605_v5, %v4593_v51  ;;  %v1195_v51 = vmul.f32 %v4608_v10, %v4627_v27 }
 0xb63   :  { %v4641_v42 = vadd.f32 %v961_v35, %v960_v41  ;;  %3672 = vmatmul.mubr.msk.bf16.vlgmr.msra.gmra.mrb[12].mxu0 %vm173_vm3, %v1024_v34 }
 0xb64   :  { %3684 = vmatpush3.bf16.msra.mxu0 %v4264_v29  ;;  %3687 = vmatprep.mubr.msk.bf16.mxu0 %vm4129_vm0, %v4127_v3  ;;  %v1013_v28 = vpop.permute.xlu1 %1012 }
 0xb65   :  { %1128 = vrot.lane.b32.xlu1 %v4641_v42, %s4131_s1  ;;  %3685 = vmatprep.subr.bf16.mxu0 %v4127_v3  ;;  %v1015_v34 = vadd.f32 %v1013_v28, %v1009_v6  ;;  %v1220_v6 = vld [vmem:[#allocation2 + $0x8] sm:$0x30] }
 0xb67   :  { %v1170_v35 = vrot.slane %v1015_v34, 2 }
 0xb68   :  { %3686 = vmatpush3.bf16.msra.mxu0 %v4282_v37 }
 0xb69   :  { %3699 = vmatprep.subr.bf16.mxu0 %v4127_v3 }
 0xc23   :  { %v1110_v36 = vpop.f32.mrb[24].mxu1 }
 0xc24   :  { %v1117_v21 = vrot.slane %v1110_v36, 2  ;;  %v3681_v44 = vpop.f32.mrb[25].mxu1 }
 0xc25   :  { %v1113_v50 = vpop.f32.mrb[26].mxu1 }
 0xc26   :  { %v1119_v22 = vadd.f32 %v1117_v21, %v1023_v47  ;;  %v3682_v52 = vpop.f32.mrb[27].mxu1  ;;  %v1129_v47 = vpop.permute.xlu1 %1128 }
 0xc28   :  { %3935 = vtanh.f32 %v1119_v22  ;;  %v3460_v1 = vmul.f32 -1.442695, %v1119_v22  ;;  %v1149_v22 = vmul.f32 %v4597_v55, %v4632_v31 }
 0xc32   :  { %v3936_v56 = vpop.eup %3935 }
 0xc33   :  { %1174 = vrot.lane.b32.xlu0 %v3936_v56, %s4130_s13 }
 0xc36   :  { %v1062_v57 = vpop.f32.mrb[12].mxu0 }
 0xc37   :  { %v1068_v58 = vadd.f32 %v1062_v57, %v1022_v48  ;;  %v3673_v59 = vpop.f32.mrb[13].mxu0 }
 0xc38   :  { %v1065_v60 = vpop.f32.mrb[14].mxu0 }
 0xc39   :  { %3937 = vtanh.f32 %v1068_v58  ;;  %v3674_v61 = vpop.f32.mrb[15].mxu0  ;;  %v3459_v11 = vmul.f32 -1.442695, %v1068_v58 }
 0xc3a   :  { %3939 = vpow2.f32 %v3460_v1 }
 0xc43   :  { %v3938_v0 = vpop.eup %3937 }
 0xc44   :  { %1133 = vrot.lane.b32.xlu0 %v3938_v0, %s4130_s13  ;;  %v3940_v30 = vpop.eup %3939 }
 0xc45   :  { %v1165_v33 = vadd.f32 1.0, %v3940_v30 }
 0xc47   :  { %3941 = vrcp.f32 %v1165_v33 }
 0xc48   :  { %3943 = vpow2.f32 %v3459_v11  ;;  %v1207_v11 = vmul.f32 %v1015_v34, %v4627_v27 }
 0xc51   :  { %v3942_v13 = vpop.eup %3941 }
 0xc52   :  { %v3944_v14 = vpop.eup %3943  ;;  %v1172_v41 = vmul.f32 %v3942_v13, %v1170_v35 }
 0xc53   :  { %v1123_v20 = vadd.f32 1.0, %v3944_v14 }
 0xc55   :  { %3945 = vrcp.f32 %v1123_v20 }
 0xc5f   :  { %v3946_v24 = vpop.eup %3945 }
 0xc60   :  { %v1131_v50 = vmul.f32 %v3946_v24, %v1129_v47 }
 0xca5   :  { %v1175_v17 = vpop.permute.xlu0 %1174 }
 0xca6   :  { %v1177_v18 = vmul.f32 %v3942_v13, %v1175_v17 }
 0xca8   :  { %1179 = vrot.lane.b32.xlu0 %v1177_v18, %s4131_s1 }
 0xcb6   :  { %v1134_v49 = vpop.permute.xlu0 %1133 }
 0xcb7   :  { %v1136_v43 = vmul.f32 %v3946_v24, %v1134_v49 }
 0xcb9   :  { %1138 = vrot.lane.b32.xlu0 %v1136_v43, %s4131_s1 }
 0xd1a   :  { %v1180_v36 = vpop.permute.xlu0 %1179 }
 0xd1b   :  { %v1182_v21 = vadd.f32 %v1180_v36, %v1172_v41 }
 0xd1d   :  { %3947 = vtanh.f32 %v1182_v21  ;;  %v1202_v48 = vrot.slane %v1182_v21, 6 }
 0xd27   :  { %v3948_v44 = vpop.eup %3947 }
 0xd28   :  { %1185 = vrot.lane.b32.xlu1 %v3948_v44, %s4130_s13 }
 0xd2b   :  { %v1139_v52 = vpop.permute.xlu0 %1138 }
 0xd2c   :  { %v4661_v56 = vadd.f32 %v1139_v52, %v1131_v50  ;;  %1151 = vrot.lane.b32.xlu1 %v1149_v22, %s4132_s14 }
 0xd2e   :  { %3949 = vtanh.f32 %v4661_v56 }
 0xd30   :  { %1197 = vrot.lane.b32.xlu1 %v1195_v51, %s4131_s1 }
 0xd34   :  { %1203 = vrot.lane.b32.xlu1 %v1202_v48, %s4132_s14  ;;  %v1219_v48 = vld [vmem:[#allocation2 + $0x10] sm:$0xc] }
 0xd38   :  { %v3950_v57 = vpop.eup %3949 }
 0xd39   :  { %1144 = vrot.lane.b32.xlu0 %v3950_v57, %s4130_s13 }
 0xd9a   :  { %v1186_v58 = vpop.permute.xlu1 %1185 }
 0xd9b   :  { %v1188_v31 = vmul.f32 %v3942_v13, %v1186_v58 }
 0xd9d   :  { %v1190_v59 = vrot.slane %v1188_v31, 6 }
 0xd9e   :  { %v1152_v1 = vpop.permute.xlu1 %1151 }
 0xd9f   :  { %1191 = vrot.lane.b32.xlu0 %v1190_v59, %s4131_s1 }
 0xda2   :  { %v1198_v17 = vpop.permute.xlu1 %1197 }
 0xda6   :  { %v1204_v36 = vpop.permute.xlu1 %1203 }
 0xda7   :  { %v1206_v44 = vmul.f32 %v1204_v36, %v4618_v23  ;;  %v1155_v36 = vmul.f32 %v4661_v56, %v4605_v5 }
 0xdab   :  { %v1145_v60 = vpop.permute.xlu0 %1144 }
 0xdac   :  { %v1147_v61 = vmul.f32 %v3946_v24, %v1145_v60  ;;  %v1156_v60 = vmul.f32 %v4597_v55, %v4641_v42 }
 0xdae   :  { %v1148_v0 = vmul.f32 %v1147_v61, %v4605_v5 }
 0xdb0   :  { %v4672_v30 = vadd.f32 %v1152_v1, %v1148_v0 }
 0xdb2   :  { %v1221_v33 = vpack.c.bf16 %v4672_v30, %v4672_v30  ;;  %v1353_v56 = vmul.f32 %v4672_v30, %v4535_v26 }
 0xdb4   :  { %1223 = vrot.lane.b32.xlu0 %v1221_v33, %s4131_s1 }
 0xdb8   :  { %1209 = vrot.lane.b32.xlu0 %v1207_v11, %s4132_s14 }
 0xe11   :  { %v1192_v13 = vpop.permute.xlu0 %1191 }
 0xe12   :  { %v1194_v14 = vmul.f32 %v1192_v13, %v4618_v23 }
 0xe14   :  { %v4680_v18 = vadd.f32 %v1198_v17, %v1194_v14 }
 0xe16   :  { %1218 = vst.msk [vmem:[#allocation4 + $0x6] sm:$0x3] %vm358_vm4, %v4680_v18  ;;  %v1272_v20 = vpack.c.bf16 %v4680_v18, %v4680_v18 }
 0xe18   :  { %3696 = vmatmul.mubr.msk.bf16.vlgmr.msra.gmra.mrb[28].mxu1 %vm173_vm3, %v1272_v20 }
 0xe19   :  { %3708 = vmatpush3.bf16.msra.mxu1 %v4304_v46  ;;  %3711 = vmatprep.mubr.msk.bf16.mxu1 %vm4129_vm0, %v4127_v3 }
 0xe1a   :  { %3709 = vmatprep.subr.bf16.mxu1 %v4127_v3 }
 0xe1d   :  { %3710 = vmatpush3.bf16.msra.mxu1 %v4324_v54 }
 0xe1e   :  { %3723 = vmatprep.subr.bf16.mxu1 %v4127_v3 }
 0xe26   :  { %v1224_v24 = vpop.permute.xlu0 %1223 }
 0xe27   :  { %3688 = vmatmul.mubr.msk.bf16.vlgmr.msra.gmra.mrb[16].mxu0 %vm173_vm3, %v1224_v24 }
 0xe28   :  { %3700 = vmatpush3.bf16.msra.mxu0 %v4264_v29  ;;  %3703 = vmatprep.mubr.msk.bf16.mxu0 %vm4129_vm0, %v4127_v3 }
 0xe29   :  { %3701 = vmatprep.subr.bf16.mxu0 %v4127_v3 }
 0xe2a   :  { %v1210_v21 = vpop.permute.xlu0 %1209 }
 0xe2b   :  { %v4701_v47 = vadd.f32 %v1210_v21, %v1206_v44 }
 0xe2c   :  { %3702 = vmatpush3.bf16.msra.mxu0 %v4282_v37 }
 0xe2d   :  { %3715 = vmatprep.subr.bf16.mxu0 %v4127_v3  ;;  %v1379_v58 = vrot.slane %v4701_v47, 4 }
 0xeeb   :  { %v1310_v49 = vpop.f32.mrb[28].mxu1 }
 0xeec   :  { %v1317_v43 = vrot.slane %v1310_v49, 4  ;;  %v3697_v28 = vpop.f32.mrb[29].mxu1 }
 0xeed   :  { %v1313_v34 = vpop.f32.mrb[30].mxu1 }
 0xeee   :  { %v1319_v35 = vadd.f32 %v1317_v43, %v1220_v6  ;;  %v3698_v41 = vpop.f32.mrb[31].mxu1 }
 0xef0   :  { %3951 = vtanh.f32 %v1319_v35  ;;  %v3464_v0 = vmul.f32 -1.442695, %v1319_v35 }
 0xefa   :  { %v3952_v50 = vpop.eup %3951  ;;  %v1262_v22 = vpop.f32.mrb[16].mxu0 }
 0xefb   :  { %v1269_v52 = vrot.slane %v1262_v22, 6  ;;  %v3689_v51 = vpop.f32.mrb[17].mxu0  ;;  %1385 = vrot.lane.b32.xlu1 %v3952_v50, %s4130_s13 }
 0xefc   :  { %v1265_v57 = vpop.f32.mrb[18].mxu0 }
 0xefd   :  { %v1271_v31 = vadd.f32 %v1269_v52, %v1219_v48  ;;  %v3690_v59 = vpop.f32.mrb[19].mxu0 }
 0xeff   :  { %1380 = vrot.lane.b32.xlu1 %v1379_v58, %s4131_s1  ;;  %3953 = vtanh.f32 %v1271_v31  ;;  %v3463_v33 = vmul.f32 -1.442695, %v1271_v31 }
 0xf00   :  { %3955 = vpow2.f32 %v3464_v0 }
 0xf01   :  { %3957 = vpow2.f32 %v3463_v33 }
 0xf03   :  { %1158 = vrot.lane.b32.xlu1 %v1156_v60, %s4131_s1 }
 0xf09   :  { %v3954_v61 = vpop.eup %3953 }
 0xf0a   :  { %1332 = vrot.lane.b32.xlu0 %v3954_v61, %s4130_s13  ;;  %v3956_v1 = vpop.eup %3955 }
 0xf0b   :  { %v1374_v11 = vadd.f32 1.0, %v3956_v1  ;;  %v3958_v13 = vpop.eup %3957 }
 0xf0c   :  { %v1323_v24 = vadd.f32 1.0, %v3958_v13 }
 0xf0d   :  { %3959 = vrcp.f32 %v1374_v11  ;;  %v1406_v11 = vmul.f32 %v4680_v18, %v4555_v32 }
 0xf0e   :  { %3961 = vrcp.f32 %v1323_v24 }
 0xf17   :  { %v3960_v14 = vpop.eup %3959 }
 0xf18   :  { %v3962_v42 = vpop.eup %3961 }
 0xf6d   :  { %v1386_v17 = vpop.permute.xlu1 %1385 }
 0xf6e   :  { %v1388_v20 = vmul.f32 %v3960_v14, %v1386_v17 }
 0xf70   :  { %1390 = vrot.lane.b32.xlu0 %v1388_v20, %s4131_s1 }
 0xf71   :  { %v1381_v28 = vpop.permute.xlu1 %1380 }
 0xf72   :  { %v1383_v6 = vmul.f32 %v3960_v14, %v1381_v28  ;;  %v1419_v28 = vld [vmem:[#allocation2 + $0x8] sm:$0xc] }
 0xf75   :  { %v1159_v41 = vpop.permute.xlu1 %1158 }
 0xf76   :  { %v4714_v21 = vadd.f32 %v1159_v41, %v1155_v36 }
 0xf78   :  { %v1328_v44 = vrot.slane %v4714_v21, 6 }
 0xf7a   :  { %v1330_v22 = vmul.f32 %v3962_v42, %v1328_v44 }
 0xf7c   :  { %v1333_v49 = vpop.permute.xlu0 %1332 }
 0xf7d   :  { %v1335_v43 = vmul.f32 %v3962_v42, %v1333_v49 }
 0xf7f   :  { %1337 = vrot.lane.b32.xlu0 %v1335_v43, %s4131_s1 }
 0xfe2   :  { %v1391_v34 = vpop.permute.xlu0 %1390 }
 0xfe3   :  { %v1393_v35 = vadd.f32 %v1391_v34, %v1383_v6 }
 0xfe5   :  { %3963 = vtanh.f32 %v1393_v35  ;;  %v1409_v0 = vrot.slane %v1393_v35, 4 }
 0xfef   :  { %v3964_v50 = vpop.eup %3963 }
 0xff0   :  { %1396 = vrot.lane.b32.xlu1 %v3964_v50, %s4130_s13 }
 0xff1   :  { %v1338_v52 = vpop.permute.xlu0 %1337 }
 0xff2   :  { %v1340_v51 = vadd.f32 %v1338_v52, %v1330_v22  ;;  %v1365_v52 = vmul.f32 %v4714_v21, %v4535_v26 }
 0xff4   :  { %3965 = vtanh.f32 %v1340_v51  ;;  %v1360_v1 = vrot.slane %v1340_v51, 2 }
 0xffe   :  { %v3966_v48 = vpop.eup %3965 }
 0xfff   :  { %1343 = vrot.lane.b32.xlu0 %v3966_v48, %s4130_s13  ;;  %v1418_v48 = vld [vmem:[#allocation2 + $0x10] sm:$0x30] }
0x1062   :  { %v1397_v57 = vpop.permute.xlu1 %1396 }
0x1063   :  { %v1399_v58 = vmul.f32 %v3960_v14, %v1397_v57 }
0x1065   :  { %v1401_v31 = vrot.slane %v1399_v58, 4 }
0x1067   :  { %1402 = vrot.lane.b32.xlu1 %v1401_v31, %s4131_s1 }
0x106b   :  { %1355 = vrot.lane.b32.xlu1 %v1353_v56, %s4131_s1 }
0x1071   :  { %v1344_v59 = vpop.permute.xlu0 %1343 }
0x1072   :  { %v1346_v60 = vmul.f32 %v3962_v42, %v1344_v59 }
0x1074   :  { %v1348_v61 = vrot.slane %v1346_v60, 2 }
0x1076   :  { %1349 = vrot.lane.b32.xlu0 %v1348_v61, %s4131_s1 }
0x107a   :  { %1410 = vrot.lane.b32.xlu0 %v1409_v0, %s4132_s14 }
0x107e   :  { %1361 = vrot.lane.b32.xlu0 %v1360_v1, %s4132_s14 }
0x10d9   :  { %v1403_v33 = vpop.permute.xlu1 %1402 }
0x10da   :  { %v1405_v13 = vmul.f32 %v1403_v33, %v4551_v45 }
0x10dc   :  { %v4729_v14 = vadd.f32 %v1406_v11, %v1405_v13 }
0x10dd   :  { %v1356_v24 = vpop.permute.xlu1 %1355 }
0x10de   :  { %1417 = vst.msk [vmem:[#allocation4 + $0x4] sm:$0x3] %vm358_vm4, %v4729_v14  ;;  %v1468_v17 = vpack.c.bf16 %v4729_v14, %v4729_v14 }
0x10e0   :  { %3712 = vmatmul.mubr.msk.bf16.vlgmr.msra.gmra.mrb[32].mxu1 %vm173_vm3, %v1468_v17 }
0x10e1   :  { %3724 = vmatpush3.bf16.msra.mxu1 %v4304_v46  ;;  %3727 = vmatprep.mubr.msk.bf16.mxu1 %vm4129_vm0, %v4127_v3 }
0x10e2   :  { %3725 = vmatprep.subr.bf16.mxu1 %v4127_v3 }
0x10e5   :  { %3726 = vmatpush3.bf16.msra.mxu1 %v4324_v54 }
0x10e6   :  { %3731 = vmatprep.subr.bf16.mxu1 %v4127_v3 }
0x10e8   :  { %v1350_v18 = vpop.permute.xlu0 %1349 }
0x10e9   :  { %v1352_v20 = vmul.f32 %v1350_v18, %v4533_v25 }
0x10eb   :  { %v4743_v42 = vadd.f32 %v1356_v24, %v1352_v20 }
0x10ec   :  { %v1411_v41 = vpop.permute.xlu0 %1410 }
0x10ed   :  { %1416 = vst.msk [vmem:[#allocation3 + $0xa] sm:$0x3] %vm358_vm4, %v4743_v42  ;;  %v1420_v46 = vpack.c.bf16 %v4743_v42, %v4743_v42  ;;  %v1413_v36 = vmul.f32 %v1411_v41, %v4551_v45 }
0x10ef   :  { %3704 = vmatmul.mubr.msk.bf16.vlgmr.msra.gmra.mrb[20].mxu0 %vm173_vm3, %v1420_v46 }
0x10f0   :  { %3716 = vmatpush3.bf16.msra.mxu0 %v4264_v29  ;;  %3719 = vmatprep.mubr.msk.bf16.mxu0 %vm4129_vm0, %v4127_v3  ;;  %v1414_v29 = vmul.f32 %v4701_v47, %v4555_v32  ;;  %v1362_v33 = vpop.permute.xlu0 %1361 }
0x10f1   :  { %3717 = vmatprep.subr.bf16.mxu0 %v4127_v3  ;;  %v1364_v18 = vmul.f32 %v1362_v33, %v4533_v25 }
0x10f2   :  { %v4761_v51 = vadd.f32 %v1414_v29, %v1413_v36 }
0x10f4   :  { %3718 = vmatpush3.bf16.msra.mxu0 %v4282_v37  ;;  %v1569_v56 = vrot.slane %v4761_v51, 6  ;;  %v1604_v33 = vmul.f32 %v4761_v51, %v4459_v53 }
0x11b3   :  { %v1506_v54 = vpop.f32.mrb[32].mxu1 }
0x11b4   :  { %v1513_v49 = vrot.slane %v1506_v54, 6  ;;  %v3713_v43 = vpop.f32.mrb[33].mxu1 }
0x11b5   :  { %v1509_v6 = vpop.f32.mrb[34].mxu1 }
0x11b6   :  { %v1515_v34 = vadd.f32 %v1513_v49, %v1419_v28  ;;  %v3714_v35 = vpop.f32.mrb[35].mxu1 }
0x11b8   :  { %3967 = vtanh.f32 %v1515_v34  ;;  %v3468_v59 = vmul.f32 -1.442695, %v1515_v34 }
0x11c2   :  { %v3968_v44 = vpop.eup %3967  ;;  %v1458_v50 = vpop.f32.mrb[20].mxu0 }
0x11c3   :  { %1575 = vrot.lane.b32.xlu1 %v3968_v44, %s4130_s13  ;;  %v1465_v22 = vrot.slane %v1458_v50, 4  ;;  %v3705_v37 = vpop.f32.mrb[21].mxu0 }
0x11c4   :  { %v1461_v57 = vpop.f32.mrb[22].mxu0 }
0x11c5   :  { %v1467_v58 = vadd.f32 %v1465_v22, %v1418_v48  ;;  %v3706_v31 = vpop.f32.mrb[23].mxu0 }
0x11c7   :  { %1367 = vrot.lane.b32.xlu1 %v1365_v52, %s4132_s14  ;;  %3969 = vtanh.f32 %v1467_v58  ;;  %v3467_v21 = vmul.f32 -1.442695, %v1467_v58 }
0x11c8   :  { %3971 = vpow2.f32 %v3468_v59 }
0x11c9   :  { %3973 = vpow2.f32 %v3467_v21 }
0x11cb   :  { %1570 = vrot.lane.b32.xlu1 %v1569_v56, %s4131_s1 }
0x11d1   :  { %v3970_v47 = vpop.eup %3969 }
0x11d2   :  { %1530 = vrot.lane.b32.xlu0 %v3970_v47, %s4130_s13  ;;  %v3972_v60 = vpop.eup %3971 }
0x11d3   :  { %v1564_v61 = vadd.f32 1.0, %v3972_v60  ;;  %v3974_v0 = vpop.eup %3973  ;;  %v1596_v60 = vmul.f32 %v4729_v14, %v4459_v53 }
0x11d4   :  { %v1519_v17 = vadd.f32 1.0, %v3974_v0 }
0x11d5   :  { %3975 = vrcp.f32 %v1564_v61 }
0x11d6   :  { %3977 = vrcp.f32 %v1519_v17 }
0x11df   :  { %v3976_v1 = vpop.eup %3975 }
0x11e0   :  { %v3978_v54 = vpop.eup %3977 }
0x1235   :  { %v1576_v11 = vpop.permute.xlu1 %1575 }
0x1236   :  { %v1578_v13 = vmul.f32 %v3976_v1, %v1576_v11 }
0x1238   :  { %1580 = vrot.lane.b32.xlu0 %v1578_v13, %s4131_s1 }
0x1239   :  { %v1368_v20 = vpop.permute.xlu1 %1367 }
0x123a   :  { %v1370_v24 = vadd.f32 %v1368_v20, %v1364_v18 }
0x123c   :  { %v1524_v46 = vrot.slane %v1370_v24, 4  ;;  %v1559_v14 = vmul.f32 %v1370_v24, %v4468_v38 }
0x123d   :  { %v1571_v28 = vpop.permute.xlu1 %1570 }
0x123e   :  { %1525 = vrot.lane.b32.xlu1 %v1524_v46, %s4131_s1  ;;  %v1573_v6 = vmul.f32 %v3976_v1, %v1571_v28  ;;  %v1609_v28 = vld [vmem:[#allocation2 + $0x8] sm:$0x3] }
0x1244   :  { %v1531_v49 = vpop.permute.xlu0 %1530 }
0x1245   :  { %v1533_v43 = vmul.f32 %v3978_v54, %v1531_v49 }
0x1247   :  { %1535 = vrot.lane.b32.xlu0 %v1533_v43, %s4131_s1 }
0x12aa   :  { %v1581_v34 = vpop.permute.xlu0 %1580 }
0x12ab   :  { %v1583_v35 = vadd.f32 %v1581_v34, %v1573_v6 }
0x12ad   :  { %3979 = vtanh.f32 %v1583_v35  ;;  %v1599_v57 = vrot.slane %v1583_v35, 2 }
0x12b0   :  { %v1526_v41 = vpop.permute.xlu1 %1525 }
0x12b1   :  { %v1528_v44 = vmul.f32 %v3978_v54, %v1526_v41 }
0x12b7   :  { %v3980_v36 = vpop.eup %3979 }
0x12b8   :  { %1586 = vrot.lane.b32.xlu1 %v3980_v36, %s4130_s13 }
0x12b9   :  { %v1536_v29 = vpop.permute.xlu0 %1535 }
0x12ba   :  { %v1538_v50 = vadd.f32 %v1536_v29, %v1528_v44 }
0x12bc   :  { %3981 = vtanh.f32 %v1538_v50  ;;  %v1554_v58 = vrot.slane %v1538_v50, 4 }
0x12c6   :  { %v3982_v22 = vpop.eup %3981 }
0x12c7   :  { %1541 = vrot.lane.b32.xlu0 %v3982_v22, %s4130_s13  ;;  %v1608_v22 = vld [vmem:[#allocation2 + $0x10] sm:$0xc0] }
0x132a   :  { %v1587_v37 = vpop.permute.xlu1 %1586 }
0x132b   :  { %v1589_v52 = vmul.f32 %v3976_v1, %v1587_v37 }
0x132d   :  { %v1591_v48 = vrot.slane %v1589_v52, 2 }
0x132f   :  { %1592 = vrot.lane.b32.xlu1 %v1591_v48, %s4131_s1 }
0x1333   :  { %1600 = vrot.lane.b32.xlu1 %v1599_v57, %s4132_s14 }
0x1337   :  { %1555 = vrot.lane.b32.xlu1 %v1554_v58, %s4132_s14 }
0x1339   :  { %v1542_v31 = vpop.permute.xlu0 %1541 }
0x133a   :  { %v1544_v56 = vmul.f32 %v3978_v54, %v1542_v31  ;;  %v1551_v54 = vmul.f32 %v4743_v42, %v4468_v38 }
0x133c   :  { %v1546_v47 = vrot.slane %v1544_v56, 4 }
0x133e   :  { %1547 = vrot.lane.b32.xlu0 %v1546_v47, %s4131_s1 }
0x13a1   :  { %v1593_v59 = vpop.permute.xlu1 %1592 }
0x13a2   :  { %v1595_v21 = vmul.f32 %v1593_v59, %v4472_v40 }
0x13a4   :  { %v1597_v61 = vadd.f32 %v1596_v60, %v1595_v21 }
0x13a5   :  { %v1601_v0 = vpop.permute.xlu1 %1600 }
0x13a6   :  { %1607 = vst.msk [vmem:[#allocation4 + $0x2] sm:$0x3] %vm358_vm4, %v1597_v61  ;;  %v1658_v1 = vpack.c.bf16 %v1597_v61, %v1597_v61  ;;  %v1603_v11 = vmul.f32 %v1601_v0, %v4472_v40 }
0x13a8   :  { %v1605_v13 = vadd.f32 %v1604_v33, %v1603_v11  ;;  %3728 = vmatmul.mubr.msk.bf16.vlgmr.msra.gmra.mrb[36].mxu1 %vm173_vm3, %v1658_v1 }
0x13a9   :  { %v1556_v17 = vpop.permute.xlu1 %1555  ;;  %3735 = vmatprep.mubr.msk.bf16.mxu1 %vm4129_vm0, %v4127_v3 }
0x13aa   :  { %v1558_v18 = vmul.f32 %v1556_v17, %v4470_v39  ;;  %1748 = vrot.lane.b32.xlu1 %v1605_v13, %s4131_s1  ;;  %v1769_v17 = vmul.f32 %v1597_v61, %v4392_v62 }
0x13ac   :  { %v1560_v20 = vadd.f32 %v1559_v14, %v1558_v18 }
0x13ae   :  { %v1711_v46 = vrot.slane %v1560_v20, 2 }
0x13b0   :  { %1712 = vrot.lane.b32.xlu1 %v1711_v46, %s4131_s1  ;;  %v1548_v51 = vpop.permute.xlu0 %1547 }
0x13b1   :  { %v1550_v49 = vmul.f32 %v1548_v51, %v4470_v39 }
0x13b3   :  { %v4794_v43 = vadd.f32 %v1551_v54, %v1550_v49 }
0x13b5   :  { %1606 = vst.msk [vmem:[#allocation3 + $0xc] sm:$0x3] %vm358_vm4, %v4794_v43  ;;  %v1610_v24 = vpack.c.bf16 %v4794_v43, %v4794_v43 }
0x13b7   :  { %3720 = vmatmul.mubr.msk.bf16.vlgmr.msra.gmra.mrb[24].mxu0 %vm173_vm3, %v1610_v24 }
0x13b8   :  { %1846 = vmatprep.mubr.bf16.mxu0 %v4128_v4 }
0x141c   :  { %v1749_v14 = vpop.permute.xlu1 %1748 }
0x1422   :  { %v1713_v54 = vpop.permute.xlu1 %1712 }
0x147b   :  { %v1696_v6 = vpop.f32.mrb[36].mxu1 }
0x147c   :  { %v1702_v34 = vadd.f32 %v1696_v6, %v1609_v28  ;;  %v3729_v35 = vpop.f32.mrb[37].mxu1 }
0x147d   :  { %v1699_v41 = vpop.f32.mrb[38].mxu1  ;;  %v1801_v35 = vld [vmem:[%s5319_s6 + $0x58] sm:$0xff] }
0x147e   :  { %3983 = vtanh.f32 %v1702_v34  ;;  %v3730_v42 = vpop.f32.mrb[39].mxu1  ;;  %v3472_v58 = vmul.f32 -1.442695, %v1702_v34  ;;  %v1798_v41 = vld [vmem:[%s5319_s6 + $0x40] sm:$0xff] }
0x1488   :  { %v3984_v36 = vpop.eup %3983 }
0x1489   :  { %1753 = vrot.lane.b32.xlu0 %v3984_v36, %s4130_s13  ;;  %v1800_v36 = vld [vmem:[%s5319_s6 + $0x50] sm:$0xff] }
0x148a   :  { %v1648_v44 = vpop.f32.mrb[24].mxu0 }
0x148b   :  { %v1655_v29 = vrot.slane %v1648_v44, 2  ;;  %v3721_v50 = vpop.f32.mrb[25].mxu0  ;;  %v1807_v44 = vpack.c.bf16 %v1800_v36, %v1798_v41 }
0x148c   :  { %v1651_v37 = vpop.f32.mrb[26].mxu0  ;;  %v1805_v50 = vld [vmem:[%s5319_s6 + $0x78] sm:$0xff] }
0x148d   :  { %v1657_v52 = vadd.f32 %v1655_v29, %v1608_v22  ;;  %v3722_v48 = vpop.f32.mrb[27].mxu0  ;;  %v1803_v29 = vld [vmem:[%s5319_s6 + $0x68] sm:$0xff]  ;;  %v1802_v22 = vld [vmem:[%s5319_s6 + $0x60] sm:$0xff] }
0x148e   :  { %v1810_v37 = vpack.c.bf16 %v1805_v50, %v1803_v29  ;;  %v1789_v29 = vld [vmem:[%s5319_s6 + $0x30] sm:$0xff] }
0x148f   :  { %3985 = vtanh.f32 %v1657_v52  ;;  %v3471_v47 = vmul.f32 -1.442695, %v1657_v52  ;;  %v1804_v52 = vld [vmem:[%s5319_s6 + $0x70] sm:$0xff] }
0x1490   :  { %3987 = vpow2.f32 %v3472_v58 }
0x1499   :  { %v3986_v57 = vpop.eup %3985 }
0x149a   :  { %1717 = vrot.lane.b32.xlu0 %v3986_v57, %s4130_s13  ;;  %v3988_v31 = vpop.eup %3987  ;;  %v1809_v57 = vpack.c.bf16 %v1804_v52, %v1802_v22 }
0x149b   :  { %v1743_v56 = vadd.f32 1.0, %v3988_v31 }
0x149d   :  { %3989 = vrcp.f32 %v1743_v56 }
0x149e   :  { %3991 = vpow2.f32 %v3471_v47  ;;  %v1784_v47 = vld [vmem:[%s5319_s6 + $0x8] sm:$0xff] }
0x14a7   :  { %v3990_v59 = vpop.eup %3989 }
0x14a8   :  { %v3992_v21 = vpop.eup %3991  ;;  %v1751_v18 = vmul.f32 %v3990_v59, %v1749_v14 }
0x14a9   :  { %v1706_v1 = vadd.f32 1.0, %v3992_v21 }
0x14ab   :  { %3993 = vrcp.f32 %v1706_v1  ;;  %v1926_v1 = vld [vmem:[%s5320_s8 + $0x18] sm:$0xff] }
0x14b5   :  { %v3994_v33 = vpop.eup %3993 }
0x14b6   :  { %v1715_v49 = vmul.f32 %v3994_v33, %v1713_v54  ;;  %v1930_v54 = vld [vmem:[%s5321_s9 + $0x18] sm:$0xff] }
0x14fb   :  { %v1754_v60 = vpop.permute.xlu0 %1753 }
0x14fc   :  { %v1756_v0 = vmul.f32 %v3990_v59, %v1754_v60  ;;  %v1786_v60 = vld [vmem:[%s5319_s6 + $0x18] sm:$0xff] }
0x14fd   :  { %v1793_v21 = vpack.c.bf16 %v1786_v60, %v1784_v47 }
0x14fe   :  { %1758 = vrot.lane.b32.xlu0 %v1756_v0, %s4131_s1  ;;  %v1924_v0 = vld [vmem:[%s5320_s8 + $0x8] sm:$0xff] }
0x150c   :  { %v1718_v11 = vpop.permute.xlu0 %1717 }
0x150d   :  { %v1720_v13 = vmul.f32 %v3994_v33, %v1718_v11 }
0x150f   :  { %1722 = vrot.lane.b32.xlu0 %v1720_v13, %s4131_s1 }
0x1513   :  { %1771 = vrot.lane.b32.xlu0 %v1769_v17, %s4132_s14 }
0x1517   :  { %1018 = vrot.lane.b32.xlu0 %v4608_v10, %s4131_s1  ;;  %v1799_v10 = vld [vmem:[%s5319_s6 + $0x48] sm:$0xff] }
0x1518   :  { %v1808_v42 = vpack.c.bf16 %v1801_v35, %v1799_v10 }
0x151a   :  { %1814 = vmatprep.subr.bf16.mxu0 %v1808_v42 }
0x151b   :  { %1815 = vmatpush1.bf16.msra.mxu0 %v1807_v44  ;;  %v1787_v44 = vld [vmem:[%s5319_s6 + $0x20] sm:$0xff] }
0x151c   :  { %1816 = vmatprep.subr.bf16.mxu0 %v1810_v37  ;;  %v1794_v50 = vpack.c.bf16 %v1789_v29, %v1787_v44  ;;  %v1738_v37 = vmul.f32 %v4794_v43, %v4410_v16 }
0x151f   :  { %1817 = vmatpush1.bf16.msra.mxu0 %v1809_v57 }
0x1520   :  { %1860 = vmatprep.subr.bf16.mxu0 %v1793_v21 }
0x1570   :  { %v1759_v20 = vpop.permute.xlu0 %1758 }
0x1571   :  { %v1761_v46 = vadd.f32 %v1759_v20, %v1751_v18  ;;  %v1927_v20 = vld [vmem:[%s5321_s9] sm:$0xff] }
0x1573   :  { %3995 = vtanh.f32 %v1761_v46  ;;  %v1929_v46 = vld [vmem:[%s5321_s9 + $0x10] sm:$0xff] }
0x157d   :  { %v3996_v51 = vpop.eup %3995 }
0x157e   :  { %1764 = vrot.lane.b32.xlu1 %v3996_v51, %s4130_s13 }
0x1581   :  { %v1723_v24 = vpop.permute.xlu0 %1722 }
0x1582   :  { %v1725_v28 = vadd.f32 %v1723_v24, %v1715_v49  ;;  %v4886_v49 = vpack.c.bf16 %v1930_v54, %v1929_v46 }
0x1584   :  { %3997 = vtanh.f32 %v1725_v28  ;;  %v1783_v28 = vld [vmem:[%s5319_s6] sm:$0xff] }
0x1585   :  { %v1772_v6 = vpop.permute.xlu0 %1771 }
0x1589   :  { %v1019_v61 = vpop.permute.xlu0 %1018 }
0x158a   :  { %1021 = vst.msk [vmem:[#allocation4 + $0x8] sm:$0x3] %vm358_vm4, %v1019_v61  ;;  %v1788_v61 = vld [vmem:[%s5319_s6 + $0x28] sm:$0xff] }
0x158e   :  { %v3998_v34 = vpop.eup %3997 }
0x158f   :  { %1728 = vrot.lane.b32.xlu1 %v3998_v34, %s4130_s13  ;;  %v1790_v34 = vld [vmem:[%s5319_s6 + $0x38] sm:$0xff] }
0x1590   :  { %v1795_v36 = vpack.c.bf16 %v1790_v34, %v1788_v61 }
0x1591   :  { %v1797_v35 = vld [vmem:[#allocation4 + $0x8] sm:$0xff] }
0x15f0   :  { %v1765_v48 = vpop.permute.xlu1 %1764 }
0x15f1   :  { %v1767_v58 = vmul.f32 %v3990_v59, %v1765_v48  ;;  %v1923_v59 = vld [vmem:[%s5320_s8] sm:$0xff] }
0x15f2   :  { %v4859_v13 = vpack.c.bf16 %v1924_v0, %v1923_v59 }
0x15f3   :  { %v1768_v31 = vmul.f32 %v1767_v58, %v4394_v63 }
0x15f4   :  { %3732 = vmatpush3.bf16.msra.mxu1 %v4859_v13 }
0x15f5   :  { %v1774_v56 = vadd.f32 %v1772_v6, %v1768_v31  ;;  %3733 = vmatprep.subr.bf16.mxu1 %v4127_v3  ;;  %v1785_v6 = vld [vmem:[%s5319_s6 + $0x10] sm:$0xff] }
0x15f6   :  { %v1792_v41 = vpack.c.bf16 %v1785_v6, %v1783_v28 }
0x15f7   :  { %1777 = vrot.lane.b32.xlu1 %v1774_v56, %s4131_s1 }
0x15fb   :  { %355 = vrot.lane.b32.xlu1 %v4401_v7, %s4131_s1  ;;  %v1925_v7 = vld [vmem:[%s5320_s8 + $0x10] sm:$0xff] }
0x15fc   :  { %v4862_v14 = vpack.c.bf16 %v1926_v1, %v1925_v7  ;;  %v1903_v1 = vld [vmem:[%s5322_s7] sm:$0x3] }
0x15fe   :  { %3734 = vmatpush3.bf16.msra.mxu1 %v4862_v14 }
0x15ff   :  { %3739 = vmatprep.subr.bf16.mxu1 %v4127_v3 }
0x1601   :  { %v1729_v11 = vpop.permute.xlu1 %1728  ;;  %3736 = vmatmul.mubr.bf16.vlgmr.msra.gmra.mrb[40].mxu1 %v4128_v4 }
0x1602   :  { %v1731_v17 = vmul.f32 %v3994_v33, %v1729_v11  ;;  %v1928_v33 = vld [vmem:[%s5321_s9 + $0x8] sm:$0xff]  ;;  %3743 = vmatprep.mubr.msk.bf16.mxu1 %vm4129_vm0, %v4127_v3  ;;  %v1908_v11 = vrot.slane %v1903_v1, %v100_v9 }
0x1603   :  { %v4877_v51 = vpack.c.bf16 %v1928_v33, %v1927_v20 }
0x1604   :  { %v1733_v18 = vrot.slane %v1731_v17, 6  ;;  %v1912_v17 = vrot.slane %v1903_v1, %v104_v12 }
0x1605   :  { %3740 = vmatpush3.bf16.msra.mxu1 %v4877_v51 }
0x1606   :  { %1734 = vrot.lane.b32.xlu0 %v1733_v18, %s4131_s1  ;;  %3741 = vmatprep.subr.bf16.mxu1 %v4127_v3 }
0x1609   :  { %3742 = vmatpush3.bf16.msra.mxu1 %v4886_v49 }
0x160a   :  { %1214 = vrot.lane.b32.xlu0 %v4672_v30, %s4131_s1  ;;  %3755 = vmatprep.subr.bf16.mxu1 %v4127_v3 }
0x160c   :  { %3744 = vmatmul.mubr.bf16.vlgmr.msra.gmra.mrb[44].mxu1 %v4128_v4 }
0x160d   :  { %3756 = vmatpush3.bf16.msra.mxu1 %v4877_v51  ;;  %3759 = vmatprep.mubr.msk.bf16.mxu1 %vm4129_vm0, %v4127_v3 }
0x160e   :  { %3757 = vmatprep.subr.bf16.mxu1 %v4127_v3 }
0x1611   :  { %3758 = vmatpush3.bf16.msra.mxu1 %v4886_v49 }
0x1612   :  { %3771 = vmatprep.subr.bf16.mxu1 %v4127_v3 }
0x1669   :  { %v1778_v30 = vpop.permute.xlu1 %1777 }
0x166a   :  { %1780 = vst.msk [vmem:[#allocation4] sm:$0x3] %vm358_vm4, %v1778_v30 }
0x166d   :  { %v356_v24 = vpop.permute.xlu1 %355 }
0x166e   :  { %359 = vst.msk [vmem:[#allocation3] sm:$0x3] %vm358_vm4, %v356_v24 }
0x1671   :  { %v1796_v10 = vld [vmem:[#allocation4] sm:$0xff] }
0x1672   :  { %v1806_v42 = vpack.c.bf16 %v1797_v35, %v1796_v10 }
0x1674   :  { %3473 = vmatmul.mubr.msk.bf16.vlgmr.msra.gmra.mrb[28].mxu0 %vm173_vm3, %v1806_v42 }
0x1675   :  { %1861 = vmatpush1.bf16.msra.mxu0 %v1792_v41  ;;  %1892 = vmatprep.mubr.bf16.mxu0 %v4128_v4  ;;  %v1781_v58 = vld [vmem:[#allocation3] sm:$0xff] }
0x1676   :  { %1862 = vmatprep.subr.bf16.mxu0 %v1795_v36 }
0x1678   :  { %v1735_v22 = vpop.permute.xlu0 %1734 }
0x1679   :  { %1863 = vmatpush1.bf16.msra.mxu0 %v1794_v50  ;;  %v1737_v52 = vmul.f32 %v1735_v22, %v4408_v15 }
0x167a   :  { %3747 = vmatprep.subr.bf16.mxu0 %v4127_v3 }
0x167b   :  { %v1739_v48 = vadd.f32 %v1738_v37, %v1737_v52 }
0x167c   :  { %v1215_v57 = vpop.permute.xlu0 %1214 }
0x167d   :  { %1775 = vst.msk [vmem:[#allocation3 + $0xe] sm:$0x3] %vm358_vm4, %v1739_v48  ;;  %1217 = vst.msk [vmem:[#allocation3 + $0x8] sm:$0x3] %vm358_vm4, %v1215_v57 }
0x1684   :  { %v1782_v31 = vld [vmem:[#allocation3 + $0x8] sm:$0xff] }
0x1685   :  { %v1791_v56 = vpack.c.bf16 %v1782_v31, %v1781_v58 }
0x1687   :  { %3474 = vmatmul.mubr.msk.bf16.vlgmr.msra.gmra.mrb[28].mxu0 %vm173_vm3, %v1791_v56 }
0x1688   :  { %3748 = vmatpush3.bf16.msra.mxu0 %v4859_v13  ;;  %3751 = vmatprep.mubr.msk.bf16.mxu0 %vm4129_vm0, %v4127_v3 }
0x1689   :  { %3749 = vmatprep.subr.bf16.mxu0 %v4127_v3 }
0x168c   :  { %3750 = vmatpush3.bf16.msra.mxu0 %v4862_v14 }
0x168d   :  { %3763 = vmatprep.subr.bf16.mxu0 %v4127_v3 }
0x16d4   :  { %v1971_v4 = vpop.f32.mrb[40].mxu1 }
0x16d5   :  { %v3737_v43 = vpop.f32.mrb[41].mxu1 }
0x16d6   :  { %v1974_v47 = vpop.f32.mrb[42].mxu1 }
0x16d7   :  { %v3738_v60 = vpop.f32.mrb[43].mxu1 }
0x16df   :  { %v2014_v21 = vpop.f32.mrb[44].mxu1 }
0x16e0   :  { %v3745_v59 = vpop.f32.mrb[45].mxu1  ;;  %v2021_v61 = vrot.slane %v2014_v21, 2 }
0x16e1   :  { %v2017_v0 = vpop.f32.mrb[46].mxu1 }
0x16e2   :  { %v3746_v7 = vpop.f32.mrb[47].mxu1 }
0x175a   :  { %v1894_v18 = vpop.f32.mrb[28].mxu0 }
0x175b   :  { %v1915_v20 = vadd.f32 %v1908_v11, %v1894_v18  ;;  %v1896_v33 = vpop.f32.mrb[29].mxu0 }
0x175c   :  { %v1916_v46 = vadd.f32 %v1912_v17, %v1896_v33  ;;  %v1898_v54 = vpop.f32.mrb[30].mxu0 }
0x175d   :  { %1919 = vst [vmem:[#allocation2] sm:$0xff] %v1915_v20  ;;  %v1917_v30 = vadd.f32 %v1908_v11, %v1898_v54  ;;  %v1900_v24 = vpop.f32.mrb[31].mxu0 }
0x175e   :  { %1920 = vst [vmem:[#allocation2 + $0x8] sm:$0xff] %v1916_v46  ;;  %v1918_v28 = vadd.f32 %v1912_v17, %v1900_v24 }
0x175f   :  { %1921 = vst [vmem:[#allocation2 + $0x10] sm:$0xff] %v1917_v30 }
0x1760   :  { %1922 = vst [vmem:[#allocation2 + $0x18] sm:$0xff] %v1918_v28 }
0x1764   :  { %v1931_v6 = vld [vmem:[#allocation2] sm:$0x3] }
0x1765   :  { %v1977_v34 = vadd.f32 %v1971_v4, %v1931_v6 }
0x1767   :  { %3999 = vtanh.f32 %v1977_v34  ;;  %v1934_v9 = vld [vmem:[#allocation2 + $0x18] sm:$0xc0]  ;;  %v3475_v35 = vmul.f32 -1.442695, %v1977_v34 }
0x1768   :  { %v2023_v10 = vadd.f32 %v2021_v61, %v1934_v9  ;;  %v2090_v9 = vld [vmem:[#allocation2] sm:$0xc] }
0x176a   :  { %4001 = vtanh.f32 %v2023_v10  ;;  %v3476_v41 = vmul.f32 -1.442695, %v2023_v10 }
0x176b   :  { %4003 = vpow2.f32 %v3475_v35 }
0x176c   :  { %4005 = vpow2.f32 %v3476_v41 }
0x1771   :  { %v4000_v8 = vpop.eup %3999 }
0x1772   :  { %2033 = vrot.lane.b32.xlu1 %v4000_v8, %s4130_s13 }
0x1774   :  { %v4002_v12 = vpop.eup %4001 }
0x1775   :  { %2061 = vrot.lane.b32.xlu0 %v4002_v12, %s4130_s13  ;;  %v4004_v42 = vpop.eup %4003 }
0x1776   :  { %v4006_v36 = vpop.eup %4005  ;;  %v2027_v44 = vadd.f32 1.0, %v4004_v42 }
0x1777   :  { %v2055_v29 = vadd.f32 1.0, %v4006_v36  ;;  %v2093_v36 = vld [vmem:[#allocation2 + $0x18] sm:$0x30] }
0x1778   :  { %4007 = vrcp.f32 %v2027_v44 }
0x1779   :  { %4009 = vrcp.f32 %v2055_v29 }
0x1782   :  { %v4008_v50 = vpop.eup %4007 }
0x1783   :  { %v4010_v52 = vpop.eup %4009  ;;  %v2031_v58 = vmul.f32 0.0, %v4008_v50 }
0x1784   :  { %v2059_v4 = vmul.f32 0.0, %v4010_v52 }
0x17e4   :  { %v2034_v22 = vpop.permute.xlu1 %2033 }
0x17e5   :  { %v2036_v37 = vmul.f32 %v4008_v50, %v2034_v22 }
0x17e7   :  { %2038 = vrot.lane.b32.xlu1 %v2036_v37, %s4131_s1  ;;  %v2062_v48 = vpop.permute.xlu0 %2061 }
0x17e8   :  { %v2064_v57 = vmul.f32 %v4010_v52, %v2062_v48 }
0x17ea   :  { %2066 = vrot.lane.b32.xlu0 %v2064_v57, %s4131_s1 }
0x1859   :  { %v2039_v31 = vpop.permute.xlu1 %2038 }
0x185a   :  { %v4946_v56 = vadd.f32 %v2039_v31, %v2031_v58 }
0x185c   :  { %4011 = vtanh.f32 %v4946_v56  ;;  %v2067_v43 = vpop.permute.xlu0 %2066 }
0x185d   :  { %v2069_v47 = vadd.f32 %v2067_v43, %v2059_v4 }
0x185f   :  { %4013 = vtanh.f32 %v2069_v47  ;;  %v2084_v33 = vrot.slane %v2069_v47, 6 }
0x1866   :  { %v4012_v60 = vpop.eup %4011 }
0x1867   :  { %2044 = vrot.lane.b32.xlu1 %v4012_v60, %s4130_s13 }
0x1869   :  { %v4014_v21 = vpop.eup %4013 }
0x186a   :  { %2072 = vrot.lane.b32.xlu0 %v4014_v21, %s4130_s13 }
0x18d9   :  { %v2045_v59 = vpop.permute.xlu1 %2044 }
0x18da   :  { %v2047_v0 = vmul.f32 %v4008_v50, %v2045_v59 }
0x18dc   :  { %v2048_v7 = vmul.f32 %v2047_v0, %v4394_v63  ;;  %v2073_v1 = vpop.permute.xlu0 %2072 }
0x18dd   :  { %v2075_v11 = vmul.f32 %v4010_v52, %v2073_v1 }
0x18de   :  { %v4953_v17 = vadd.f32 %v2048_v7, %v4397_v2 }
0x18df   :  { %v2077_v18 = vrot.slane %v2075_v11, 6 }
0x18e0   :  { %v2094_v20 = vpack.c.bf16 %v4953_v17, %v4953_v17 }
0x18e1   :  { %2078 = vrot.lane.b32.xlu1 %v2077_v18, %s4131_s1  ;;  %v2050_v18 = vmul.f32 %v4946_v56, %v4394_v63  ;;  %v2226_v56 = vmul.f32 %v4953_v17, %v4459_v53 }
0x18e2   :  { %2096 = vrot.lane.b32.xlu0 %v2094_v20, %s4131_s1 }
0x18e3   :  { %v2051_v20 = vadd.f32 %v2050_v18, %v4397_v2 }
0x18e5   :  { %2085 = vrot.lane.b32.xlu1 %v2084_v33, %s4132_s14  ;;  %v2201_v33 = vrot.slane %v2051_v20, 6  ;;  %v2238_v17 = vmul.f32 %v2051_v20, %v4459_v53  ;;  %v2292_v20 = vld [vmem:[#allocation2 + $0x18] sm:$0xc] }
0x1953   :  { %v2079_v46 = vpop.permute.xlu1 %2078 }
0x1954   :  { %v2081_v54 = vmul.f32 %v2079_v46, %v4408_v15  ;;  %v2097_v30 = vpop.permute.xlu0 %2096 }
0x1955   :  { %3752 = vmatmul.mubr.msk.bf16.vlgmr.msra.gmra.mrb[32].mxu0 %vm173_vm3, %v2097_v30 }
0x1956   :  { %v4963_v24 = vadd.f32 %v2081_v54, %v4413_v19  ;;  %3764 = vmatpush3.bf16.msra.mxu0 %v4859_v13  ;;  %3767 = vmatprep.mubr.msk.bf16.mxu0 %vm4129_vm0, %v4127_v3 }
0x1957   :  { %3765 = vmatprep.subr.bf16.mxu0 %v4127_v3  ;;  %v2086_v22 = vpop.permute.xlu1 %2085 }
0x1958   :  { %v2145_v28 = vpack.c.bf16 %v4963_v24, %v4963_v24  ;;  %v2088_v52 = vmul.f32 %v2086_v22, %v4408_v15 }
0x195a   :  { %3760 = vmatmul.mubr.msk.bf16.vlgmr.msra.gmra.mrb[48].mxu1 %vm173_vm3, %v2145_v28  ;;  %3766 = vmatpush3.bf16.msra.mxu0 %v4862_v14  ;;  %v4983_v48 = vadd.f32 %v2088_v52, %v4413_v19 }
0x195b   :  { %3772 = vmatpush3.bf16.msra.mxu1 %v4877_v51  ;;  %3775 = vmatprep.mubr.msk.bf16.mxu1 %vm4129_vm0, %v4127_v3 }
0x195c   :  { %3773 = vmatprep.subr.bf16.mxu1 %v4127_v3  ;;  %3779 = vmatprep.subr.bf16.mxu0 %v4127_v3  ;;  %v2252_v58 = vrot.slane %v4983_v48, 4 }
0x195f   :  { %3774 = vmatpush3.bf16.msra.mxu1 %v4886_v49 }
0x1960   :  { %3787 = vmatprep.subr.bf16.mxu1 %v4127_v3 }
0x1a28   :  { %v2135_v6 = vpop.f32.mrb[32].mxu0 }
0x1a29   :  { %v2142_v61 = vrot.slane %v2135_v6, 6  ;;  %v3753_v34 = vpop.f32.mrb[33].mxu0 }
0x1a2a   :  { %v2138_v10 = vpop.f32.mrb[34].mxu0 }
0x1a2b   :  { %v2144_v8 = vadd.f32 %v2142_v61, %v2090_v9  ;;  %v3754_v12 = vpop.f32.mrb[35].mxu0 }
0x1a2d   :  { %4015 = vtanh.f32 %v2144_v8  ;;  %v2183_v35 = vpop.f32.mrb[48].mxu1  ;;  %v3479_v31 = vmul.f32 -1.442695, %v2144_v8 }
0x1a2e   :  { %v2190_v41 = vrot.slane %v2183_v35, 4  ;;  %v3761_v42 = vpop.f32.mrb[49].mxu1 }
0x1a2f   :  { %v2186_v44 = vpop.f32.mrb[50].mxu1 }
0x1a30   :  { %v2192_v29 = vadd.f32 %v2190_v41, %v2093_v36  ;;  %v3762_v50 = vpop.f32.mrb[51].mxu1 }
0x1a32   :  { %4017 = vtanh.f32 %v2192_v29  ;;  %v3480_v4 = vmul.f32 -1.442695, %v2192_v29 }
0x1a33   :  { %4019 = vpow2.f32 %v3479_v31 }
0x1a34   :  { %4021 = vpow2.f32 %v3480_v4 }
0x1a37   :  { %v4016_v37 = vpop.eup %4015 }
0x1a38   :  { %2205 = vrot.lane.b32.xlu0 %v4016_v37, %s4130_s13 }
0x1a3c   :  { %v4018_v57 = vpop.eup %4017 }
0x1a3d   :  { %2258 = vrot.lane.b32.xlu1 %v4018_v57, %s4130_s13  ;;  %v4020_v43 = vpop.eup %4019 }
0x1a3e   :  { %v2196_v47 = vadd.f32 1.0, %v4020_v43  ;;  %v4022_v60 = vpop.eup %4021 }
0x1a3f   :  { %v2247_v21 = vadd.f32 1.0, %v4022_v60 }
0x1a40   :  { %4023 = vrcp.f32 %v2196_v47 }
0x1a41   :  { %2253 = vrot.lane.b32.xlu1 %v2252_v58, %s4131_s1  ;;  %4025 = vrcp.f32 %v2247_v21  ;;  %v2279_v58 = vmul.f32 %v4963_v24, %v4468_v38  ;;  %v2289_v21 = vld [vmem:[#allocation2] sm:$0x30] }
0x1a4a   :  { %v4024_v59 = vpop.eup %4023 }
0x1a4b   :  { %v4026_v7 = vpop.eup %4025  ;;  %v2203_v46 = vmul.f32 %v4024_v59, %v2201_v33 }
0x1aaa   :  { %v2206_v19 = vpop.permute.xlu0 %2205 }
0x1aab   :  { %v2208_v0 = vmul.f32 %v4024_v59, %v2206_v19 }
0x1aad   :  { %2210 = vrot.lane.b32.xlu0 %v2208_v0, %s4131_s1 }
0x1aaf   :  { %v2259_v1 = vpop.permute.xlu1 %2258 }
0x1ab0   :  { %v2261_v11 = vmul.f32 %v4026_v7, %v2259_v1 }
0x1ab2   :  { %2263 = vrot.lane.b32.xlu0 %v2261_v11, %s4131_s1 }
0x1ab3   :  { %v2254_v30 = vpop.permute.xlu1 %2253 }
0x1ab4   :  { %v2256_v6 = vmul.f32 %v4026_v7, %v2254_v30 }
0x1b1f   :  { %v2211_v54 = vpop.permute.xlu0 %2210 }
0x1b20   :  { %v2213_v28 = vadd.f32 %v2211_v54, %v2203_v46 }
0x1b22   :  { %4027 = vtanh.f32 %v2213_v28  ;;  %v2233_v2 = vrot.slane %v2213_v28, 2 }
0x1b24   :  { %v2264_v61 = vpop.permute.xlu0 %2263 }
0x1b25   :  { %v2266_v34 = vadd.f32 %v2264_v61, %v2256_v6 }
0x1b27   :  { %4029 = vtanh.f32 %v2266_v34  ;;  %v2282_v8 = vrot.slane %v2266_v34, 4 }
0x1b2c   :  { %v4028_v9 = vpop.eup %4027 }
0x1b2d   :  { %2216 = vrot.lane.b32.xlu1 %v4028_v9, %s4130_s13 }
0x1b31   :  { %v4030_v10 = vpop.eup %4029 }
0x1b32   :  { %2269 = vrot.lane.b32.xlu0 %v4030_v10, %s4130_s13  ;;  %v2287_v10 = vmul.f32 %v4983_v48, %v4468_v38 }
0x1b36   :  { %2228 = vrot.lane.b32.xlu0 %v2226_v56, %s4131_s1 }
0x1b3a   :  { %2234 = vrot.lane.b32.xlu0 %v2233_v2, %s4132_s14 }
0x1b3e   :  { %2283 = vrot.lane.b32.xlu0 %v2282_v8, %s4132_s14 }
0x1b9f   :  { %v2217_v12 = vpop.permute.xlu1 %2216 }
0x1ba0   :  { %v2219_v35 = vmul.f32 %v4024_v59, %v2217_v12 }
0x1ba2   :  { %v2221_v41 = vrot.slane %v2219_v35, 2 }
0x1ba4   :  { %v2270_v42 = vpop.permute.xlu0 %2269  ;;  %2222 = vrot.lane.b32.xlu1 %v2221_v41, %s4131_s1 }
0x1ba5   :  { %v2272_v36 = vmul.f32 %v4026_v7, %v2270_v42 }
0x1ba7   :  { %v2274_v44 = vrot.slane %v2272_v36, 4 }
0x1ba8   :  { %v2229_v22 = vpop.permute.xlu0 %2228 }
0x1ba9   :  { %2275 = vrot.lane.b32.xlu1 %v2274_v44, %s4131_s1 }
0x1bac   :  { %v2235_v7 = vpop.permute.xlu0 %2234 }
0x1bad   :  { %2240 = vrot.lane.b32.xlu1 %v2238_v17, %s4132_s14  ;;  %v2237_v6 = vmul.f32 %v2235_v7, %v4472_v40 }
0x1bb0   :  { %v2284_v30 = vpop.permute.xlu0 %2283 }
0x1bb1   :  { %v2286_v61 = vmul.f32 %v2284_v30, %v4470_v39 }
0x1bb3   :  { %v5037_v56 = vadd.f32 %v2287_v10, %v2286_v61 }
0x1bb5   :  { %v2442_v12 = vrot.slane %v5037_v56, 6 }
0x1c16   :  { %v2223_v29 = vpop.permute.xlu1 %2222 }
0x1c17   :  { %v2225_v50 = vmul.f32 %v2223_v29, %v4472_v40 }
0x1c19   :  { %v5005_v37 = vadd.f32 %v2229_v22, %v2225_v50 }
0x1c1b   :  { %v2293_v52 = vpack.c.bf16 %v5005_v37, %v5005_v37  ;;  %v2276_v57 = vpop.permute.xlu1 %2275 }
0x1c1c   :  { %v2278_v31 = vmul.f32 %v2276_v57, %v4470_v39 }
0x1c1d   :  { %3768 = vmatmul.mubr.msk.bf16.vlgmr.msra.gmra.mrb[36].mxu0 %vm173_vm3, %v2293_v52 }
0x1c1e   :  { %v5013_v4 = vadd.f32 %v2279_v58, %v2278_v31  ;;  %3780 = vmatpush3.bf16.msra.mxu0 %v4859_v13  ;;  %3783 = vmatprep.mubr.msk.bf16.mxu0 %vm4129_vm0, %v4127_v3 }
0x1c1f   :  { %3781 = vmatprep.subr.bf16.mxu0 %v4127_v3  ;;  %v2241_v28 = vpop.permute.xlu1 %2240 }
0x1c20   :  { %v2341_v43 = vpack.c.bf16 %v5013_v4, %v5013_v4  ;;  %v5032_v34 = vadd.f32 %v2241_v28, %v2237_v6  ;;  %v2424_v28 = vmul.f32 %v5005_v37, %v4555_v32 }
0x1c22   :  { %3776 = vmatmul.mubr.msk.bf16.vlgmr.msra.gmra.mrb[52].mxu1 %vm173_vm3, %v2341_v43  ;;  %3782 = vmatpush3.bf16.msra.mxu0 %v4862_v14  ;;  %v2397_v2 = vrot.slane %v5032_v34, 4 }
0x1c23   :  { %3788 = vmatpush3.bf16.msra.mxu1 %v4877_v51  ;;  %3791 = vmatprep.mubr.msk.bf16.mxu1 %vm4129_vm0, %v4127_v3 }
0x1c24   :  { %3789 = vmatprep.subr.bf16.mxu1 %v4127_v3  ;;  %3795 = vmatprep.subr.bf16.mxu0 %v4127_v3 }
0x1c27   :  { %3790 = vmatpush3.bf16.msra.mxu1 %v4886_v49 }
0x1c28   :  { %3803 = vmatprep.subr.bf16.mxu1 %v4127_v3 }
0x1cf0   :  { %v2331_v24 = vpop.f32.mrb[36].mxu0 }
0x1cf1   :  { %v2338_v47 = vrot.slane %v2331_v24, 4  ;;  %v3769_v60 = vpop.f32.mrb[37].mxu0 }
0x1cf2   :  { %v2334_v59 = vpop.f32.mrb[38].mxu0 }
0x1cf3   :  { %v2340_v19 = vadd.f32 %v2338_v47, %v2289_v21  ;;  %v3770_v0 = vpop.f32.mrb[39].mxu0 }
0x1cf5   :  { %4031 = vtanh.f32 %v2340_v19  ;;  %v2379_v1 = vpop.f32.mrb[52].mxu1  ;;  %v3483_v35 = vmul.f32 -1.442695, %v2340_v19 }
0x1cf6   :  { %v2386_v11 = vrot.slane %v2379_v1, 6  ;;  %v3777_v18 = vpop.f32.mrb[53].mxu1 }
0x1cf7   :  { %v2382_v33 = vpop.f32.mrb[54].mxu1 }
0x1cf8   :  { %v2388_v46 = vadd.f32 %v2386_v11, %v2292_v20  ;;  %v3778_v54 = vpop.f32.mrb[55].mxu1 }
0x1cfa   :  { %4033 = vtanh.f32 %v2388_v46  ;;  %v3484_v41 = vmul.f32 -1.442695, %v2388_v46 }
0x1cfb   :  { %4035 = vpow2.f32 %v3483_v35 }
0x1cfc   :  { %4037 = vpow2.f32 %v3484_v41 }
0x1cff   :  { %v4032_v9 = vpop.eup %4031 }
0x1d00   :  { %2403 = vrot.lane.b32.xlu1 %v4032_v9, %s4130_s13 }
0x1d04   :  { %v4034_v8 = vpop.eup %4033  ;;  %2398 = vrot.lane.b32.xlu1 %v2397_v2, %s4131_s1  ;;  %v2469_v2 = vmul.f32 %v5013_v4, %v4535_v26 }
0x1d05   :  { %2448 = vrot.lane.b32.xlu0 %v4034_v8, %s4130_s13  ;;  %v4036_v48 = vpop.eup %4035 }
0x1d06   :  { %v2392_v42 = vadd.f32 1.0, %v4036_v48  ;;  %v4038_v36 = vpop.eup %4037  ;;  %v2479_v48 = vld [vmem:[#allocation2] sm:$0xc0] }
0x1d07   :  { %v2437_v44 = vadd.f32 1.0, %v4038_v36 }
0x1d08   :  { %2443 = vrot.lane.b32.xlu1 %v2442_v12, %s4131_s1  ;;  %4039 = vrcp.f32 %v2392_v42 }
0x1d09   :  { %4041 = vrcp.f32 %v2437_v44 }
0x1d12   :  { %v4040_v17 = vpop.eup %4039 }
0x1d13   :  { %v4042_v22 = vpop.eup %4041 }
0x1d72   :  { %v2404_v29 = vpop.permute.xlu1 %2403 }
0x1d73   :  { %v2406_v50 = vmul.f32 %v4040_v17, %v2404_v29 }
0x1d75   :  { %2408 = vrot.lane.b32.xlu0 %v2406_v50, %s4131_s1 }
0x1d76   :  { %v2399_v58 = vpop.permute.xlu1 %2398 }
0x1d77   :  { %v2449_v52 = vpop.permute.xlu0 %2448  ;;  %v2401_v31 = vmul.f32 %v4040_v17, %v2399_v58 }
0x1d78   :  { %v2451_v57 = vmul.f32 %v4042_v22, %v2449_v52 }
0x1d7a   :  { %2453 = vrot.lane.b32.xlu0 %v2451_v57, %s4131_s1  ;;  %v2444_v24 = vpop.permute.xlu1 %2443 }
0x1d7b   :  { %v2446_v60 = vmul.f32 %v4042_v22, %v2444_v24 }
0x1de7   :  { %v2409_v43 = vpop.permute.xlu0 %2408 }
0x1de8   :  { %v2411_v47 = vadd.f32 %v2409_v43, %v2401_v31  ;;  %v2432_v43 = vmul.f32 %v5032_v34, %v4555_v32 }
0x1dea   :  { %4043 = vtanh.f32 %v2411_v47  ;;  %v2427_v33 = vrot.slane %v2411_v47, 4 }
0x1dec   :  { %v2454_v21 = vpop.permute.xlu0 %2453 }
0x1ded   :  { %v2456_v59 = vadd.f32 %v2454_v21, %v2446_v60 }
0x1def   :  { %4045 = vtanh.f32 %v2456_v59  ;;  %v2472_v54 = vrot.slane %v2456_v59, 2 }
0x1df4   :  { %v4044_v19 = vpop.eup %4043 }
0x1df5   :  { %2414 = vrot.lane.b32.xlu1 %v4044_v19, %s4130_s13 }
0x1df9   :  { %v4046_v0 = vpop.eup %4045 }
0x1dfa   :  { %2459 = vrot.lane.b32.xlu0 %v4046_v0, %s4130_s13  ;;  %v2477_v0 = vmul.f32 %v5037_v56, %v4535_v26 }
0x1e67   :  { %v2415_v7 = vpop.permute.xlu1 %2414 }
0x1e68   :  { %v2417_v1 = vmul.f32 %v4040_v17, %v2415_v7  ;;  %v2482_v17 = vld [vmem:[#allocation2 + $0x18] sm:$0x3] }
0x1e6a   :  { %v2419_v11 = vrot.slane %v2417_v1, 4 }
0x1e6c   :  { %v2460_v18 = vpop.permute.xlu0 %2459  ;;  %2420 = vrot.lane.b32.xlu1 %v2419_v11, %s4131_s1 }
0x1e6d   :  { %v2462_v20 = vmul.f32 %v4042_v22, %v2460_v18 }
0x1e6f   :  { %v2464_v46 = vrot.slane %v2462_v20, 2 }
0x1e70   :  { %2428 = vrot.lane.b32.xlu1 %v2427_v33, %s4132_s14 }
0x1e71   :  { %2465 = vrot.lane.b32.xlu0 %v2464_v46, %s4131_s1 }
0x1e75   :  { %2473 = vrot.lane.b32.xlu0 %v2472_v54, %s4132_s14 }
0x1ede   :  { %v2421_v30 = vpop.permute.xlu1 %2420 }
0x1edf   :  { %v2423_v6 = vmul.f32 %v2421_v30, %v4551_v45 }
0x1ee1   :  { %v5055_v61 = vadd.f32 %v2424_v28, %v2423_v6 }
0x1ee2   :  { %v2429_v52 = vpop.permute.xlu1 %2428 }
0x1ee3   :  { %v2483_v9 = vpack.c.bf16 %v5055_v61, %v5055_v61  ;;  %v2466_v10 = vpop.permute.xlu0 %2465  ;;  %v2431_v31 = vmul.f32 %v2429_v52, %v4551_v45 }
0x1ee4   :  { %v2468_v8 = vmul.f32 %v2466_v10, %v4533_v25 }
0x1ee5   :  { %3784 = vmatmul.mubr.msk.bf16.vlgmr.msra.gmra.mrb[40].mxu0 %vm173_vm3, %v2483_v9  ;;  %v5083_v24 = vadd.f32 %v2432_v43, %v2431_v31 }
0x1ee6   :  { %v5063_v12 = vadd.f32 %v2469_v2, %v2468_v8  ;;  %3796 = vmatpush3.bf16.msra.mxu0 %v4859_v13  ;;  %3799 = vmatprep.mubr.msk.bf16.mxu0 %vm4129_vm0, %v4127_v3 }
0x1ee7   :  { %3797 = vmatprep.subr.bf16.mxu0 %v4127_v3  ;;  %v2474_v60 = vpop.permute.xlu0 %2473  ;;  %v2584_v59 = vrot.slane %v5083_v24, 2 }
0x1ee8   :  { %v2531_v37 = vpack.c.bf16 %v5063_v12, %v5063_v12  ;;  %v2476_v19 = vmul.f32 %v2474_v60, %v4533_v25 }
0x1eea   :  { %3792 = vmatmul.mubr.msk.bf16.vlgmr.msra.gmra.mrb[56].mxu1 %vm173_vm3, %v2531_v37  ;;  %3798 = vmatpush3.bf16.msra.mxu0 %v4862_v14  ;;  %v5092_v7 = vadd.f32 %v2477_v0, %v2476_v19 }
0x1eeb   :  { %3804 = vmatpush3.bf16.msra.mxu1 %v4877_v51  ;;  %3807 = vmatprep.mubr.msk.bf16.mxu1 %vm4129_vm0, %v4127_v3 }
0x1eec   :  { %3805 = vmatprep.subr.bf16.mxu1 %v4127_v3  ;;  %3811 = vmatprep.subr.bf16.mxu0 %v4127_v3 }
0x1eef   :  { %3806 = vmatpush3.bf16.msra.mxu1 %v4886_v49 }
0x1ef0   :  { %3819 = vmatprep.subr.bf16.mxu1 %v4127_v3 }
0x1fb8   :  { %v2521_v4 = vpop.f32.mrb[40].mxu0 }
0x1fb9   :  { %v2528_v35 = vrot.slane %v2521_v4, 2  ;;  %v3785_v41 = vpop.f32.mrb[41].mxu0 }
0x1fba   :  { %v2524_v42 = vpop.f32.mrb[42].mxu0 }
0x1fbb   :  { %v2530_v36 = vadd.f32 %v2528_v35, %v2479_v48  ;;  %v3786_v44 = vpop.f32.mrb[43].mxu0  ;;  %v2650_v42 = vmul.f32 %v5063_v12, %v4597_v55 }
0x1fbd   :  { %4047 = vtanh.f32 %v2530_v36  ;;  %v2569_v29 = vpop.f32.mrb[56].mxu1  ;;  %v3487_v34 = vmul.f32 -1.442695, %v2530_v36 }
0x1fbe   :  { %v2575_v50 = vadd.f32 %v2569_v29, %v2482_v17  ;;  %v3793_v22 = vpop.f32.mrb[57].mxu1 }
0x1fbf   :  { %v2572_v57 = vpop.f32.mrb[58].mxu1 }
0x1fc0   :  { %4049 = vtanh.f32 %v2575_v50  ;;  %v3794_v58 = vpop.f32.mrb[59].mxu1  ;;  %v3488_v1 = vmul.f32 -1.442695, %v2575_v50 }
0x1fc1   :  { %4051 = vpow2.f32 %v3487_v34 }
0x1fc2   :  { %4053 = vpow2.f32 %v3488_v1 }
0x1fc7   :  { %v4048_v47 = vpop.eup %4047 }
0x1fc8   :  { %2590 = vrot.lane.b32.xlu1 %v4048_v47, %s4130_s13  ;;  %v2611_v47 = vmul.f32 %v5055_v61, %v4627_v27  ;;  %v2481_v61 = vld [vmem:[#allocation2 + $0x10] sm:$0x3] }
0x1fca   :  { %v4050_v21 = vpop.eup %4049 }
0x1fcb   :  { %2634 = vrot.lane.b32.xlu0 %v4050_v21, %s4130_s13  ;;  %v4052_v11 = vpop.eup %4051 }
0x1fcc   :  { %2585 = vrot.lane.b32.xlu1 %v2584_v59, %s4131_s1  ;;  %v4054_v18 = vpop.eup %4053  ;;  %v2579_v20 = vadd.f32 1.0, %v4052_v11 }
0x1fcd   :  { %v2624_v33 = vadd.f32 1.0, %v4054_v18 }
0x1fce   :  { %4055 = vrcp.f32 %v2579_v20 }
0x1fcf   :  { %4057 = vrcp.f32 %v2624_v33 }
0x1fd0   :  { %2629 = vrot.lane.b32.xlu1 %v5092_v7, %s4131_s1 }
0x1fd8   :  { %v4056_v46 = vpop.eup %4055 }
0x1fd9   :  { %v4058_v30 = vpop.eup %4057 }
0x203a   :  { %v2591_v54 = vpop.permute.xlu1 %2590 }
0x203b   :  { %v2593_v56 = vmul.f32 %v4056_v46, %v2591_v54  ;;  %v2480_v54 = vld [vmem:[#allocation2 + $0x8] sm:$0xc0] }
0x203d   :  { %v2635_v28 = vpop.permute.xlu0 %2634  ;;  %2595 = vrot.lane.b32.xlu0 %v2593_v56, %s4131_s1 }
0x203e   :  { %v2637_v6 = vmul.f32 %v4058_v30, %v2635_v28  ;;  %v2586_v9 = vpop.permute.xlu1 %2585 }
0x203f   :  { %v2588_v10 = vmul.f32 %v4056_v46, %v2586_v9 }
0x2041   :  { %2639 = vrot.lane.b32.xlu0 %v2637_v6, %s4131_s1 }
0x2042   :  { %v2630_v2 = vpop.permute.xlu1 %2629 }
0x2043   :  { %v2632_v4 = vmul.f32 %v4058_v30, %v2630_v2 }
0x20af   :  { %v2596_v8 = vpop.permute.xlu0 %2595 }
0x20b0   :  { %v2598_v37 = vadd.f32 %v2596_v8, %v2588_v10  ;;  %v2657_v10 = vmul.f32 %v5092_v7, %v4597_v55 }
0x20b2   :  { %4059 = vtanh.f32 %v2598_v37  ;;  %v2614_v52 = vrot.slane %v2598_v37, 6  ;;  %v2619_v37 = vmul.f32 %v5083_v24, %v4627_v27 }
0x20b3   :  { %v2640_v35 = vpop.permute.xlu0 %2639 }
0x20b4   :  { %v5098_v41 = vadd.f32 %v2640_v35, %v2632_v4 }
0x20b6   :  { %4061 = vtanh.f32 %v5098_v41 }
0x20bc   :  { %v4060_v48 = vpop.eup %4059 }
0x20bd   :  { %2601 = vrot.lane.b32.xlu1 %v4060_v48, %s4130_s13 }
0x20c0   :  { %v4062_v36 = vpop.eup %4061 }
0x20c1   :  { %2645 = vrot.lane.b32.xlu0 %v4062_v36, %s4130_s13  ;;  %2652 = vrot.lane.b32.xlu1 %v2650_v42, %s4132_s14 }
0x212f   :  { %v2602_v44 = vpop.permute.xlu1 %2601 }
0x2130   :  { %v2604_v17 = vmul.f32 %v4056_v46, %v2602_v44 }
0x2132   :  { %v2606_v29 = vrot.slane %v2604_v17, 6 }
0x2133   :  { %v2646_v50 = vpop.permute.xlu0 %2645  ;;  %v2653_v58 = vpop.permute.xlu1 %2652 }
0x2134   :  { %v2648_v22 = vmul.f32 %v4058_v30, %v2646_v50  ;;  %2607 = vrot.lane.b32.xlu0 %v2606_v29, %s4131_s1 }
0x2136   :  { %v2649_v57 = vmul.f32 %v2648_v22, %v4605_v5 }
0x2138   :  { %v5108_v31 = vadd.f32 %v2653_v58, %v2649_v57  ;;  %2615 = vrot.lane.b32.xlu0 %v2614_v52, %s4132_s14  ;;  %v2656_v58 = vmul.f32 %v5098_v41, %v4605_v5 }
0x213a   :  { %v2708_v12 = vpack.c.bf16 %v5108_v31, %v5108_v31 }
0x213c   :  { %2710 = vrot.lane.b32.xlu1 %v2708_v12, %s4131_s1 }
0x21a6   :  { %v2608_v43 = vpop.permute.xlu0 %2607 }
0x21a7   :  { %v2610_v60 = vmul.f32 %v2608_v43, %v4618_v23 }
0x21a9   :  { %v5117_v21 = vadd.f32 %v2611_v47, %v2610_v60 }
0x21aa   :  { %v2616_v9 = vpop.permute.xlu0 %2615 }
0x21ab   :  { %v2663_v59 = vpack.c.bf16 %v5117_v21, %v5117_v21  ;;  %v2618_v2 = vmul.f32 %v2616_v9, %v4618_v23 }
0x21ad   :  { %3800 = vmatmul.mubr.msk.bf16.vlgmr.msra.gmra.mrb[44].mxu0 %vm173_vm3, %v2663_v59  ;;  %v5143_v4 = vadd.f32 %v2619_v37, %v2618_v2 }
0x21ae   :  { %v2711_v19 = vpop.permute.xlu1 %2710  ;;  %3812 = vmatpush3.bf16.msra.mxu0 %v4859_v13  ;;  %3815 = vmatprep.mubr.msk.bf16.mxu0 %vm4129_vm0, %v4127_v3 }
0x21af   :  { %3808 = vmatmul.mubr.msk.bf16.vlgmr.msra.gmra.mrb[60].mxu1 %vm173_vm3, %v2711_v19  ;;  %3813 = vmatprep.subr.bf16.mxu0 %v4127_v3 }
0x21b0   :  { %3820 = vmatpush3.bf16.msra.mxu1 %v4877_v51  ;;  %3823 = vmatprep.mubr.msk.bf16.mxu1 %vm4129_vm0, %v4127_v3 }
0x21b1   :  { %3821 = vmatprep.subr.bf16.mxu1 %v4127_v3 }
0x21b2   :  { %3814 = vmatpush3.bf16.msra.mxu0 %v4862_v14 }
0x21b3   :  { %3827 = vmatprep.subr.bf16.mxu0 %v4127_v3 }
0x21b4   :  { %3822 = vmatpush3.bf16.msra.mxu1 %v4886_v49 }
0x21b5   :  { %3835 = vmatprep.subr.bf16.mxu1 %v4127_v3 }
0x2280   :  { %v2701_v0 = vpop.f32.mrb[44].mxu0 }
0x2281   :  { %v2707_v34 = vadd.f32 %v2701_v0, %v2481_v61  ;;  %v3801_v1 = vpop.f32.mrb[45].mxu0 }
0x2282   :  { %v2704_v11 = vpop.f32.mrb[46].mxu0  ;;  %v2749_v18 = vpop.f32.mrb[60].mxu1 }
0x2283   :  { %4063 = vtanh.f32 %v2707_v34  ;;  %v2756_v20 = vrot.slane %v2749_v18, 2  ;;  %v3802_v33 = vpop.f32.mrb[47].mxu0  ;;  %v3809_v46 = vpop.f32.mrb[61].mxu1  ;;  %v3491_v35 = vmul.f32 -1.442695, %v2707_v34  ;;  %v2788_v11 = vmul.f32 %v5117_v21, %v4597_v55 }
0x2284   :  { %v2752_v56 = vpop.f32.mrb[62].mxu1  ;;  %v2834_v18 = vmul.f32 %v5108_v31, %v4627_v27 }
0x2285   :  { %v2758_v30 = vadd.f32 %v2756_v20, %v2480_v54  ;;  %v3810_v28 = vpop.f32.mrb[63].mxu1 }
0x2287   :  { %4065 = vtanh.f32 %v2758_v30  ;;  %v3492_v48 = vmul.f32 -1.442695, %v2758_v30 }
0x2288   :  { %4067 = vpow2.f32 %v3491_v35 }
0x2289   :  { %4069 = vpow2.f32 %v3492_v48 }
0x228d   :  { %v4064_v6 = vpop.eup %4063 }
0x228e   :  { %2772 = vrot.lane.b32.xlu1 %v4064_v6, %s4130_s13 }
0x2291   :  { %v4066_v8 = vpop.eup %4065 }
0x2292   :  { %2813 = vrot.lane.b32.xlu0 %v4066_v8, %s4130_s13  ;;  %2659 = vrot.lane.b32.xlu1 %v2657_v10, %s4131_s1  ;;  %v4068_v7 = vpop.eup %4067 }
0x2293   :  { %v2762_v42 = vadd.f32 1.0, %v4068_v7  ;;  %v4070_v36 = vpop.eup %4069 }
0x2294   :  { %v2804_v44 = vadd.f32 1.0, %v4070_v36  ;;  %v2291_v36 = vld [vmem:[#allocation2 + $0x10] sm:$0xc] }
0x2295   :  { %4071 = vrcp.f32 %v2762_v42 }
0x2296   :  { %2767 = vrot.lane.b32.xlu0 %v5143_v4, %s4131_s1  ;;  %4073 = vrcp.f32 %v2804_v44 }
0x229f   :  { %v4072_v24 = vpop.eup %4071 }
0x22a0   :  { %v4074_v50 = vpop.eup %4073 }
0x2300   :  { %v2773_v17 = vpop.permute.xlu1 %2772 }
0x2301   :  { %v2775_v29 = vmul.f32 %v4072_v24, %v2773_v17 }
0x2303   :  { %2777 = vrot.lane.b32.xlu1 %v2775_v29, %s4131_s1 }
0x2304   :  { %v2814_v22 = vpop.permute.xlu0 %2813  ;;  %v2660_v57 = vpop.permute.xlu1 %2659 }
0x2305   :  { %v2816_v52 = vmul.f32 %v4074_v50, %v2814_v22  ;;  %v2662_v12 = vadd.f32 %v2660_v57, %v2656_v58 }
0x2307   :  { %2818 = vrot.lane.b32.xlu0 %v2816_v52, %s4131_s1  ;;  %v2809_v47 = vrot.slane %v2662_v12, 2  ;;  %v2846_v9 = vmul.f32 %v2662_v12, %v4627_v27  ;;  %v2290_v52 = vld [vmem:[#allocation2 + $0x8] sm:$0x30] }
0x2308   :  { %v2768_v43 = vpop.permute.xlu0 %2767 }
0x2309   :  { %v2770_v60 = vmul.f32 %v4072_v24, %v2768_v43  ;;  %v2811_v61 = vmul.f32 %v4074_v50, %v2809_v47 }
0x2375   :  { %v2778_v59 = vpop.permute.xlu1 %2777 }
0x2376   :  { %v5151_v19 = vadd.f32 %v2778_v59, %v2770_v60 }
0x2378   :  { %4075 = vtanh.f32 %v5151_v19 }
0x2379   :  { %v2819_v0 = vpop.permute.xlu0 %2818 }
0x237a   :  { %v2821_v34 = vadd.f32 %v2819_v0, %v2811_v61  ;;  %v2795_v0 = vmul.f32 %v5143_v4, %v4597_v55 }
0x237c   :  { %4077 = vtanh.f32 %v2821_v34  ;;  %v2841_v20 = vrot.slane %v2821_v34, 6 }
0x2382   :  { %v4076_v1 = vpop.eup %4075 }
0x2383   :  { %2783 = vrot.lane.b32.xlu1 %v4076_v1, %s4130_s13 }
0x2386   :  { %v4078_v41 = vpop.eup %4077 }
0x2387   :  { %2824 = vrot.lane.b32.xlu0 %v4078_v41, %s4130_s13  ;;  %2790 = vrot.lane.b32.xlu1 %v2788_v11, %s4132_s14 }
0x238b   :  { %2836 = vrot.lane.b32.xlu1 %v2834_v18, %s4131_s1 }
0x238f   :  { %2842 = vrot.lane.b32.xlu1 %v2841_v20, %s4132_s14 }
0x23f5   :  { %v2784_v33 = vpop.permute.xlu1 %2783 }
0x23f6   :  { %v2786_v46 = vmul.f32 %v4072_v24, %v2784_v33 }
0x23f8   :  { %v2787_v54 = vmul.f32 %v2786_v46, %v4605_v5 }
0x23f9   :  { %v2825_v56 = vpop.permute.xlu0 %2824  ;;  %v2791_v30 = vpop.permute.xlu1 %2790 }
0x23fa   :  { %v2827_v21 = vmul.f32 %v4074_v50, %v2825_v56  ;;  %v5164_v6 = vadd.f32 %v2791_v30, %v2787_v54 }
0x23fc   :  { %v2829_v28 = vrot.slane %v2827_v21, 6  ;;  %v2852_v31 = vpack.c.bf16 %v5164_v6, %v5164_v6 }
0x23fd   :  { %v2837_v8 = vpop.permute.xlu1 %2836 }
0x23fe   :  { %2830 = vrot.lane.b32.xlu0 %v2829_v28, %s4131_s1  ;;  %v2794_v28 = vmul.f32 %v5151_v19, %v4605_v5  ;;  %v2984_v5 = vmul.f32 %v5164_v6, %v4535_v26 }
0x2401   :  { %v2843_v43 = vpop.permute.xlu1 %2842 }
0x2402   :  { %2854 = vrot.lane.b32.xlu0 %v2852_v31, %s4131_s1  ;;  %v2845_v59 = vmul.f32 %v2843_v43, %v4618_v23 }
0x2406   :  { %2848 = vrot.lane.b32.xlu0 %v2846_v9, %s4132_s14 }
0x2470   :  { %v2831_v10 = vpop.permute.xlu0 %2830 }
0x2471   :  { %v2833_v2 = vmul.f32 %v2831_v10, %v4618_v23 }
0x2473   :  { %v5173_v37 = vadd.f32 %v2837_v8, %v2833_v2 }
0x2474   :  { %v2855_v35 = vpop.permute.xlu0 %2854 }
0x2475   :  { %v2903_v48 = vpack.c.bf16 %v5173_v37, %v5173_v37  ;;  %3816 = vmatmul.mubr.msk.bf16.vlgmr.msra.gmra.mrb[48].mxu0 %vm173_vm3, %v2855_v35 }
0x2476   :  { %3828 = vmatpush3.bf16.msra.mxu0 %v4859_v13  ;;  %3831 = vmatprep.mubr.msk.bf16.mxu0 %vm4129_vm0, %v4127_v3 }
0x2477   :  { %3824 = vmatmul.mubr.msk.bf16.vlgmr.msra.gmra.mrb[64].mxu1 %vm173_vm3, %v2903_v48  ;;  %3829 = vmatprep.subr.bf16.mxu0 %v4127_v3 }
0x2478   :  { %3836 = vmatpush3.bf16.msra.mxu1 %v4877_v51  ;;  %3839 = vmatprep.mubr.msk.bf16.mxu1 %vm4129_vm0, %v4127_v3  ;;  %v2849_v60 = vpop.permute.xlu0 %2848 }
0x2479   :  { %3837 = vmatprep.subr.bf16.mxu1 %v4127_v3  ;;  %v5195_v34 = vadd.f32 %v2849_v60, %v2845_v59  ;;  %v3037_v59 = vmul.f32 %v5173_v37, %v4555_v32 }
0x247a   :  { %3830 = vmatpush3.bf16.msra.mxu0 %v4862_v14 }
0x247b   :  { %3843 = vmatprep.subr.bf16.mxu0 %v4127_v3  ;;  %v3010_v1 = vrot.slane %v5195_v34, 4 }
0x247c   :  { %3838 = vmatpush3.bf16.msra.mxu1 %v4886_v49 }
0x247d   :  { %3851 = vmatprep.subr.bf16.mxu1 %v4127_v3 }
0x2548   :  { %v2893_v27 = vpop.f32.mrb[48].mxu0 }
0x2549   :  { %v2900_v7 = vrot.slane %v2893_v27, 6  ;;  %v3817_v42 = vpop.f32.mrb[49].mxu0 }
0x254a   :  { %v2896_v44 = vpop.f32.mrb[50].mxu0  ;;  %v2941_v24 = vpop.f32.mrb[64].mxu1 }
0x254b   :  { %v2902_v17 = vadd.f32 %v2900_v7, %v2291_v36  ;;  %v2948_v29 = vrot.slane %v2941_v24, 4  ;;  %v3818_v50 = vpop.f32.mrb[51].mxu0  ;;  %v3825_v22 = vpop.f32.mrb[65].mxu1 }
0x254c   :  { %v2944_v57 = vpop.f32.mrb[66].mxu1 }
0x254d   :  { %4079 = vtanh.f32 %v2902_v17  ;;  %v2950_v58 = vadd.f32 %v2948_v29, %v2290_v52  ;;  %v3826_v12 = vpop.f32.mrb[67].mxu1  ;;  %v3495_v11 = vmul.f32 -1.442695, %v2902_v17 }
0x254f   :  { %4081 = vtanh.f32 %v2950_v58  ;;  %v3496_v41 = vmul.f32 -1.442695, %v2950_v58 }
0x2550   :  { %4083 = vpow2.f32 %v3495_v11  ;;  %v2092_v11 = vld [vmem:[#allocation2 + $0x10] sm:$0x30] }
0x2551   :  { %4085 = vpow2.f32 %v3496_v41 }
0x2557   :  { %v4080_v47 = vpop.eup %4079 }
0x2558   :  { %2963 = vrot.lane.b32.xlu1 %v4080_v47, %s4130_s13 }
0x2559   :  { %v4082_v61 = vpop.eup %4081 }
0x255a   :  { %3016 = vrot.lane.b32.xlu0 %v4082_v61, %s4130_s13  ;;  %v4084_v23 = vpop.eup %4083 }
0x255b   :  { %v2954_v18 = vadd.f32 1.0, %v4084_v23  ;;  %v4086_v20 = vpop.eup %4085 }
0x255c   :  { %2797 = vrot.lane.b32.xlu1 %v2795_v0, %s4131_s1  ;;  %v3005_v33 = vadd.f32 1.0, %v4086_v20 }
0x255d   :  { %4087 = vrcp.f32 %v2954_v18 }
0x255e   :  { %4089 = vrcp.f32 %v3005_v33 }
0x2560   :  { %3011 = vrot.lane.b32.xlu1 %v3010_v1, %s4131_s1 }
0x2567   :  { %v4088_v55 = vpop.eup %4087 }
0x2568   :  { %v4090_v56 = vpop.eup %4089 }
0x25ca   :  { %v2964_v4 = vpop.permute.xlu1 %2963 }
0x25cb   :  { %v2966_v46 = vmul.f32 %v4088_v55, %v2964_v4 }
0x25cc   :  { %v3017_v54 = vpop.permute.xlu0 %3016 }
0x25cd   :  { %2968 = vrot.lane.b32.xlu0 %v2966_v46, %s4131_s1  ;;  %v3019_v30 = vmul.f32 %v4090_v56, %v3017_v54 }
0x25ce   :  { %v2798_v21 = vpop.permute.xlu1 %2797 }
0x25cf   :  { %v2800_v31 = vadd.f32 %v2798_v21, %v2794_v28 }
0x25d1   :  { %3021 = vrot.lane.b32.xlu0 %v3019_v30, %s4131_s1  ;;  %v2959_v9 = vrot.slane %v2800_v31, 6  ;;  %v2996_v6 = vmul.f32 %v2800_v31, %v4535_v26  ;;  %v3045_v31 = vmul.f32 %v5195_v34, %v4555_v32 }
0x25d2   :  { %v3012_v2 = vpop.permute.xlu1 %3011 }
0x25d3   :  { %v2961_v10 = vmul.f32 %v4088_v55, %v2959_v9  ;;  %v3014_v48 = vmul.f32 %v4090_v56, %v3012_v2 }
0x263f   :  { %v2969_v8 = vpop.permute.xlu0 %2968 }
0x2640   :  { %v2971_v35 = vadd.f32 %v2969_v8, %v2961_v10 }
0x2642   :  { %4091 = vtanh.f32 %v2971_v35  ;;  %v2991_v19 = vrot.slane %v2971_v35, 2 }
0x2643   :  { %v3022_v27 = vpop.permute.xlu0 %3021 }
0x2644   :  { %v3024_v7 = vadd.f32 %v3022_v27, %v3014_v48 }
0x2646   :  { %4093 = vtanh.f32 %v3024_v7  ;;  %v3040_v44 = vrot.slane %v3024_v7, 4 }
0x264c   :  { %v4092_v42 = vpop.eup %4091 }
0x264d   :  { %2974 = vrot.lane.b32.xlu1 %v4092_v42, %s4130_s13 }
0x2650   :  { %v4094_v36 = vpop.eup %4093 }
0x2651   :  { %3027 = vrot.lane.b32.xlu0 %v4094_v36, %s4130_s13 }
0x2655   :  { %2986 = vrot.lane.b32.xlu0 %v2984_v5, %s4131_s1 }
0x2659   :  { %2992 = vrot.lane.b32.xlu0 %v2991_v19, %s4132_s14 }
0x265d   :  { %3041 = vrot.lane.b32.xlu0 %v3040_v44, %s4132_s14 }
0x26bf   :  { %v2975_v24 = vpop.permute.xlu1 %2974 }
0x26c0   :  { %v2977_v17 = vmul.f32 %v4088_v55, %v2975_v24 }
0x26c2   :  { %v2979_v29 = vrot.slane %v2977_v17, 2 }
0x26c3   :  { %v3028_v50 = vpop.permute.xlu0 %3027 }
0x26c4   :  { %v3030_v22 = vmul.f32 %v4090_v56, %v3028_v50  ;;  %2980 = vrot.lane.b32.xlu1 %v2979_v29, %s4131_s1 }
0x26c6   :  { %v3032_v52 = vrot.slane %v3030_v22, 4 }
0x26c7   :  { %v2987_v12 = vpop.permute.xlu0 %2986 }
0x26c8   :  { %3033 = vrot.lane.b32.xlu1 %v3032_v52, %s4131_s1 }
0x26cb   :  { %v2993_v33 = vpop.permute.xlu0 %2992 }
0x26cc   :  { %2998 = vrot.lane.b32.xlu1 %v2996_v6, %s4132_s14 }
0x2736   :  { %v2981_v57 = vpop.permute.xlu1 %2980 }
0x2737   :  { %v2983_v58 = vmul.f32 %v2981_v57, %v4533_v25 }
0x2739   :  { %v5217_v43 = vadd.f32 %v2987_v12, %v2983_v58 }
0x273a   :  { %v3034_v47 = vpop.permute.xlu1 %3033 }
0x273b   :  { %v3047_v60 = vpack.c.bf16 %v5217_v43, %v5217_v43  ;;  %v3036_v61 = vmul.f32 %v3034_v47, %v4551_v45 }
0x273d   :  { %v5224_v0 = vadd.f32 %v3037_v59, %v3036_v61  ;;  %3832 = vmatmul.mubr.msk.bf16.vlgmr.msra.gmra.mrb[52].mxu0 %vm173_vm3, %v3047_v60 }
0x273e   :  { %3844 = vmatpush3.bf16.msra.mxu0 %v4859_v13  ;;  %3847 = vmatprep.mubr.msk.bf16.mxu0 %vm4129_vm0, %v4127_v3  ;;  %v2999_v56 = vpop.permute.xlu1 %2998 }
0x273f   :  { %v3095_v26 = vpack.c.bf16 %v5224_v0, %v5224_v0  ;;  %3845 = vmatprep.subr.bf16.mxu0 %v4127_v3 }
0x2741   :  { %3840 = vmatmul.mubr.msk.bf16.vlgmr.msra.gmra.mrb[68].mxu1 %vm173_vm3, %v3095_v26 }
0x2742   :  { %3846 = vmatpush3.bf16.msra.mxu0 %v4862_v14  ;;  %3852 = vmatpush3.bf16.msra.mxu1 %v4877_v51  ;;  %v2091_v51 = vld [vmem:[#allocation2 + $0x8] sm:$0xc] }
0x2743   :  { %3853 = vmatprep.subr.bf16.mxu1 %v4127_v3  ;;  %3855 = vmatprep.mubr.msk.bf16.mxu1 %vm4129_vm0, %v4127_v3  ;;  %v3042_v3 = vpop.permute.xlu0 %3041 }
0x2744   :  { %v3044_v30 = vmul.f32 %v3042_v3, %v4551_v45 }
0x2746   :  { %3854 = vmatpush3.bf16.msra.mxu1 %v4886_v49  ;;  %v2995_v49 = vmul.f32 %v2993_v33, %v4533_v25  ;;  %v5247_v9 = vadd.f32 %v3045_v31, %v3044_v30  ;;  %v3223_v33 = vmul.f32 %v5224_v0, %v4459_v53  ;;  %v1932_v30 = vld [vmem:[#allocation2 + $0x8] sm:$0x3] }
0x2748   :  { %v5242_v21 = vadd.f32 %v2999_v56, %v2995_v49  ;;  %v3196_v25 = vrot.slane %v5247_v9, 6 }
0x274a   :  { %v3151_v10 = vrot.slane %v5242_v21, 4 }
0x2810   :  { %v3085_v13 = vpop.f32.mrb[52].mxu0 }
0x2811   :  { %v3092_v37 = vrot.slane %v3085_v13, 4  ;;  %v3833_v1 = vpop.f32.mrb[53].mxu0 }
0x2812   :  { %v3088_v41 = vpop.f32.mrb[54].mxu0 }
0x2813   :  { %v3094_v23 = vadd.f32 %v3092_v37, %v2092_v11  ;;  %v3834_v18 = vpop.f32.mrb[55].mxu0  ;;  %v3178_v11 = vmul.f32 %v5217_v43, %v4468_v38 }
0x2814   :  { %v3133_v20 = vpop.f32.mrb[68].mxu1 }
0x2815   :  { %4095 = vtanh.f32 %v3094_v23  ;;  %v3140_v14 = vrot.slane %v3133_v20, 6  ;;  %v3841_v55 = vpop.f32.mrb[69].mxu1  ;;  %v3499_v45 = vmul.f32 -1.442695, %v3094_v23 }
0x2816   :  { %v3136_v4 = vpop.f32.mrb[70].mxu1 }
0x2817   :  { %v3142_v46 = vadd.f32 %v3140_v14, %v2091_v51  ;;  %v3842_v54 = vpop.f32.mrb[71].mxu1 }
0x2818   :  { %v1933_v54 = vld [vmem:[#allocation2 + $0x10] sm:$0xc0] }
0x2819   :  { %4097 = vtanh.f32 %v3142_v46  ;;  %v3500_v8 = vmul.f32 -1.442695, %v3142_v46 }
0x281a   :  { %4099 = vpow2.f32 %v3499_v45 }
0x281b   :  { %4101 = vpow2.f32 %v3500_v8  ;;  %v3186_v8 = vmul.f32 %v5242_v21, %v4468_v38 }
0x281f   :  { %v4096_v28 = vpop.eup %4095 }
0x2820   :  { %3157 = vrot.lane.b32.xlu1 %v4096_v28, %s4130_s13 }
0x2823   :  { %v4098_v2 = vpop.eup %4097 }
0x2824   :  { %3202 = vrot.lane.b32.xlu0 %v4098_v2, %s4130_s13  ;;  %3152 = vrot.lane.b32.xlu1 %v3151_v10, %s4131_s1  ;;  %v4100_v32 = vpop.eup %4099 }
0x2825   :  { %v3146_v34 = vadd.f32 1.0, %v4100_v32  ;;  %v4102_v35 = vpop.eup %4101 }
0x2826   :  { %v3191_v48 = vadd.f32 1.0, %v4102_v35 }
0x2827   :  { %4103 = vrcp.f32 %v3146_v34 }
0x2828   :  { %3197 = vrot.lane.b32.xlu1 %v3196_v25, %s4131_s1  ;;  %4105 = vrcp.f32 %v3191_v48 }
0x2831   :  { %v4104_v27 = vpop.eup %4103 }
0x2832   :  { %v4106_v36 = vpop.eup %4105 }
0x2892   :  { %v3158_v7 = vpop.permute.xlu1 %3157 }
0x2893   :  { %v3160_v42 = vmul.f32 %v4104_v27, %v3158_v7 }
0x2895   :  { %3162 = vrot.lane.b32.xlu0 %v3160_v42, %s4131_s1  ;;  %v3231_v42 = vmul.f32 %v5247_v9, %v4459_v53 }
0x2896   :  { %v3203_v5 = vpop.permute.xlu0 %3202  ;;  %v3153_v44 = vpop.permute.xlu1 %3152 }
0x2897   :  { %v3205_v19 = vmul.f32 %v4106_v36, %v3203_v5  ;;  %v3155_v24 = vmul.f32 %v4104_v27, %v3153_v44 }
0x2899   :  { %3207 = vrot.lane.b32.xlu0 %v3205_v19, %s4131_s1 }
0x289a   :  { %v3198_v17 = vpop.permute.xlu1 %3197 }
0x289b   :  { %v3200_v22 = vmul.f32 %v4106_v36, %v3198_v17 }
0x2907   :  { %v3163_v29 = vpop.permute.xlu0 %3162 }
0x2908   :  { %v3165_v50 = vadd.f32 %v3163_v29, %v3155_v24 }
0x290a   :  { %4107 = vtanh.f32 %v3165_v50  ;;  %v3181_v26 = vrot.slane %v3165_v50, 4 }
0x290b   :  { %v3208_v52 = vpop.permute.xlu0 %3207 }
0x290c   :  { %v3210_v6 = vadd.f32 %v3208_v52, %v3200_v22 }
0x290e   :  { %4109 = vtanh.f32 %v3210_v6  ;;  %v3226_v37 = vrot.slane %v3210_v6, 2 }
0x2914   :  { %v4108_v57 = vpop.eup %4107 }
0x2915   :  { %3168 = vrot.lane.b32.xlu1 %v4108_v57, %s4130_s13 }
0x2918   :  { %v4110_v58 = vpop.eup %4109 }
0x2919   :  { %3213 = vrot.lane.b32.xlu0 %v4110_v58, %s4130_s13 }
0x2987   :  { %v3169_v12 = vpop.permute.xlu1 %3168 }
0x2988   :  { %v3171_v47 = vmul.f32 %v4104_v27, %v3169_v12 }
0x298a   :  { %v3173_v60 = vrot.slane %v3171_v47, 4 }
0x298b   :  { %v3214_v59 = vpop.permute.xlu0 %3213 }
0x298c   :  { %v3216_v61 = vmul.f32 %v4106_v36, %v3214_v59  ;;  %3174 = vrot.lane.b32.xlu1 %v3173_v60, %s4131_s1 }
0x298e   :  { %v3218_v13 = vrot.slane %v3216_v61, 2 }
0x2990   :  { %3219 = vrot.lane.b32.xlu0 %v3218_v13, %s4131_s1  ;;  %3182 = vrot.lane.b32.xlu1 %v3181_v26, %s4132_s14  ;;  %v3505_v26 = vld [vmem:[%s5323_s10] ss:$0 sm:$0xff] }
0x2994   :  { %3227 = vrot.lane.b32.xlu0 %v3226_v37, %s4132_s14 }
0x29fe   :  { %v3175_v1 = vpop.permute.xlu1 %3174 }
0x29ff   :  { %v3177_v41 = vmul.f32 %v3175_v1, %v4470_v39 }
0x2a01   :  { %v5265_v23 = vadd.f32 %v3178_v11, %v3177_v41 }
0x2a02   :  { %v3220_v18 = vpop.permute.xlu0 %3219  ;;  %v3183_v2 = vpop.permute.xlu1 %3182 }
0x2a03   :  { %v3233_v20 = vpack.c.bf16 %v5265_v23, %v5265_v23  ;;  %v3222_v14 = vmul.f32 %v3220_v18, %v4472_v40  ;;  %v3185_v45 = vmul.f32 %v3183_v2, %v4470_v39 }
0x2a05   :  { %v5272_v55 = vadd.f32 %v3223_v33, %v3222_v14  ;;  %3848 = vmatmul.mubr.msk.bf16.vlgmr.msra.gmra.mrb[56].mxu0 %vm173_vm3, %v3233_v20  ;;  %v3187_v32 = vadd.f32 %v3186_v8, %v3185_v45 }
0x2a06   :  { %v3228_v35 = vpop.permute.xlu0 %3227 }
0x2a07   :  { %v3281_v43 = vpack.c.bf16 %v5272_v55, %v5272_v55  ;;  %v3334_v27 = vrot.slane %v3187_v32, 2  ;;  %v3230_v7 = vmul.f32 %v3228_v35, %v4472_v40  ;;  %v3392_v59 = vmul.f32 %v5272_v55, %v4392_v62 }
0x2a09   :  { %3856 = vmatmul.mubr.msk.bf16.vlgmr.msra.gmra.mrb[72].mxu1 %vm173_vm3, %v3281_v43  ;;  %v3232_v39 = vadd.f32 %v3231_v42, %v3230_v7  ;;  %v3361_v43 = vmul.f32 %v5265_v23, %v4410_v16 }
0x2ad8   :  { %v3271_v51 = vpop.f32.mrb[56].mxu0 }
0x2ad9   :  { %v3278_v4 = vrot.slane %v3271_v51, 2  ;;  %v3849_v46 = vpop.f32.mrb[57].mxu0 }
0x2ada   :  { %v3274_v3 = vpop.f32.mrb[58].mxu0 }
0x2adb   :  { %v3280_v56 = vadd.f32 %v3278_v4, %v1933_v54  ;;  %v3850_v49 = vpop.f32.mrb[59].mxu0 }
0x2adc   :  { %v3319_v0 = vpop.f32.mrb[72].mxu1 }
0x2add   :  { %4111 = vtanh.f32 %v3280_v56  ;;  %v3325_v28 = vadd.f32 %v3319_v0, %v1932_v30  ;;  %v3857_v31 = vpop.f32.mrb[73].mxu1  ;;  %v3503_v38 = vmul.f32 -1.442695, %v3280_v56  ;;  %v17_v56 = vstv %s5324_s11 }
0x2ade   :  { %v3322_v10 = vpop.f32.mrb[74].mxu1  ;;  %18 = vst [vmem:[#allocation5] sm:$0x1] %v17_v56 }
0x2adf   :  { %v3858_v25 = vpop.f32.mrb[75].mxu1  ;;  %4113 = vtanh.f32 %v3325_v28  ;;  %v3504_v21 = vmul.f32 -1.442695, %v3325_v28 }
0x2ae0   :  { %4115 = vpow2.f32 %v3503_v38 }
0x2ae1   :  { %4117 = vpow2.f32 %v3504_v21 }
0x2ae5   :  { %v3506_v30 = vld [vmem:[#allocation5] ss:$0 sm:$0xff] }
0x2ae7   :  { %v4112_v34 = vpop.eup %4111 }
0x2ae8   :  { %3340 = vrot.lane.b32.xlu1 %v4112_v34, %s4130_s13 }
0x2ae9   :  { %v4114_v48 = vpop.eup %4113 }
0x2aea   :  { %3376 = vrot.lane.b32.xlu0 %v4114_v48, %s4130_s13  ;;  %v4116_v36 = vpop.eup %4115 }
0x2aeb   :  { %v3329_v5 = vadd.f32 1.0, %v4116_v36  ;;  %v4118_v19 = vpop.eup %4117 }
0x2aec   :  { %3335 = vrot.lane.b32.xlu1 %v3334_v27, %s4131_s1  ;;  %v3366_v44 = vadd.f32 1.0, %v4118_v19 }
0x2aed   :  { %4119 = vrcp.f32 %v3329_v5 }
0x2aee   :  { %4121 = vrcp.f32 %v3366_v44 }
0x2af0   :  { %3371 = vrot.lane.b32.xlu1 %v3232_v39, %s4131_s1 }
0x2af7   :  { %v4120_v40 = vpop.eup %4119 }
0x2af8   :  { %v4122_v53 = vpop.eup %4121 }
0x2b5a   :  { %v3341_v24 = vpop.permute.xlu1 %3340 }
0x2b5b   :  { %v3343_v17 = vmul.f32 %v4120_v40, %v3341_v24 }
0x2b5c   :  { %v3377_v29 = vpop.permute.xlu0 %3376 }
0x2b5d   :  { %3345 = vrot.lane.b32.xlu0 %v3343_v17, %s4131_s1  ;;  %v3379_v9 = vmul.f32 %v4122_v53, %v3377_v29 }
0x2b5e   :  { %v3336_v50 = vpop.permute.xlu1 %3335 }
0x2b5f   :  { %v3338_v22 = vmul.f32 %v4120_v40, %v3336_v50 }
0x2b61   :  { %3381 = vrot.lane.b32.xlu0 %v3379_v9, %s4131_s1 }
0x2b62   :  { %v3372_v52 = vpop.permute.xlu1 %3371 }
0x2b63   :  { %v3374_v58 = vmul.f32 %v4122_v53, %v3372_v52 }
0x2bcf   :  { %v3346_v6 = vpop.permute.xlu0 %3345 }
0x2bd0   :  { %v3348_v57 = vadd.f32 %v3346_v6, %v3338_v22 }
0x2bd2   :  { %4123 = vtanh.f32 %v3348_v57 }
0x2bd3   :  { %v3382_v12 = vpop.permute.xlu0 %3381 }
0x2bd4   :  { %v3384_v47 = vadd.f32 %v3382_v12, %v3374_v58 }
0x2bd6   :  { %4125 = vtanh.f32 %v3384_v47 }
0x2bdc   :  { %v4124_v60 = vpop.eup %4123 }
0x2bdd   :  { %3351 = vrot.lane.b32.xlu1 %v4124_v60, %s4130_s13 }
0x2be0   :  { %v4126_v61 = vpop.eup %4125 }
0x2be1   :  { %3387 = vrot.lane.b32.xlu0 %v4126_v61, %s4130_s13  ;;  %3394 = vrot.lane.b32.xlu1 %v3392_v59, %s4132_s14 }
0x2be5   :  { %3409 = vrot.lane.b32.xlu0 %v3505_v26, %s4130_s13 }
0x2c4f   :  { %v3352_v13 = vpop.permute.xlu1 %3351 }
0x2c50   :  { %v3354_v37 = vmul.f32 %v4120_v40, %v3352_v13 }
0x2c52   :  { %v3356_v1 = vrot.slane %v3354_v37, 6 }
0x2c53   :  { %v3388_v11 = vpop.permute.xlu0 %3387  ;;  %v3395_v18 = vpop.permute.xlu1 %3394 }
0x2c54   :  { %v3390_v41 = vmul.f32 %v4122_v53, %v3388_v11  ;;  %3357 = vrot.lane.b32.xlu1 %v3356_v1, %s4131_s1 }
0x2c56   :  { %v3391_v62 = vmul.f32 %v3390_v41, %v4394_v63 }
0x2c57   :  { %v3410_v20 = vpop.permute.xlu0 %3409 }
0x2c58   :  { %v3397_v33 = vadd.f32 %v3395_v18, %v3391_v62 }
0x2c5a   :  { %v3412_v14 = vmul.f32 %v3410_v20, %v3397_v33 }
0x2c5c   :  { %3414 = vrot.lane.b32.xlu0 %v3412_v14, %s4131_s1 }
0x2cc6   :  { %v3358_v55 = vpop.permute.xlu1 %3357 }
0x2cc7   :  { %v3360_v51 = vmul.f32 %v3358_v55, %v4408_v15 }
0x2cc9   :  { %v3362_v4 = vadd.f32 %v3361_v43, %v3360_v51 }
0x2ccb   :  { %v3405_v46 = vmul.f32 %v3505_v26, %v3362_v4 }
0x2ccd   :  { %v3406_v54 = vsel %vm358_vm4, %v3405_v46, 0.0 }
0x2cce   :  { %v3415_v3 = vpop.permute.xlu0 %3414  ;;  %3407 = vadd.xlane.f32.xlu1 %v3406_v54 }
0x2ccf   :  { %v3417_v63 = vsel %vm358_vm4, %v3415_v3, 0.0 }
0x2cd0   :  { %3418 = vadd.xlane.f32.xlu0 %v3417_v63 }
0x2d5b   :  { %v3408_v49 = vpop.xlane.xlu1 %3407 }
0x2d5d   :  { %v3419_v0 = vpop.xlane.xlu0 %3418 }
0x2d5e   :  { %v3420_v16 = vadd.f32 %v3419_v0, %v3408_v49 }
0x2d60   :  { %v3428_v15 = vadd.f32 %v3506_v30, %v3420_v16 }
0x2d62   :  { %3430 = vst.msk [vmem:[%s5325_s12] sm:$0x3] %vm3429_vm11, %v3428_v15 }

</bundles_post_ra>
